<compile_context>
chip_gen: v7x
topology: tpu7x:2x2x1
jax: 0.10.0
libtpu: 0.0.40
codegen_flags: <defaults>
</compile_context>

<pallas_src>
import functools

import jax
import jax.numpy as jnp
from jax.experimental import pallas as pl
from jax.experimental.pallas import tpu as pltpu

C = 16  # channel count of both conv layers


def subnet_kernel(x_ref, w1_ref, b1_ref, w2s_ref, b2_ref, masks_ref, avg_ref,
                  o_ref, *, seq_len, batch_block):
    # x_ref:     (1, 1, N)   N = batch_block * seq_len; batch j owns lanes [j*L, (j+1)*L)
    # w1_ref:    (3, C, 1)   conv1 weights, tap-major: w1_ref[k, c, 0] = torch_w1[c, 0, k]
    # b1_ref:    (C, 1)
    # w2s_ref:   (3C, C)     conv2 tap matrices stacked on rows (bf16)
    # b2_ref:    (C, 1)
    # masks_ref: (4, N)      precomputed boundary masks (f32 0/1), grid-invariant
    # avg_ref:   (N, bb)     precomputed block-diagonal GAP averaging matrix (bf16)
    # o_ref:     (C, bb)     GAP output slab for this batch block (lane-dense)
    L = seq_len
    N = batch_block * L

    x = x_ref[0]                                 # (1, N)
    m_prev1 = masks_ref[0:1]                     # pos >= 1
    m_next1 = masks_ref[1:2]                     # pos <= L-2
    m_prev2 = masks_ref[2:3]                     # pos >= 2
    m_next2 = masks_ref[3:4]                     # pos <  L-2

    # ---- Conv1d(1 -> 16, k=3, pad=1): taps via lane rolls, zero-masked at segment edges.
    x_prev = pltpu.roll(x, 1, axis=1) * m_prev1          # x[l-1]
    x_next = pltpu.roll(x, N - 1, axis=1) * m_next1      # x[l+1]
    h = (w1_ref[0] * x_prev + w1_ref[1] * x + w1_ref[2] * x_next + b1_ref[...])
    h = jnp.maximum(h, 0.0)                              # ReLU, (C, N)

    # ---- MaxPool1d(2, 2), kept dilated: result valid at lanes with pos % 2 == 0.
    p1 = jnp.maximum(h, pltpu.roll(h, N - 1, axis=1))

    # ---- Conv1d(16 -> 16, k=3, pad=1) on the pooled sequence.
    # Single (3C, C) x (C, N) bf16 matmul (no activation concat); the tap shifts are
    # applied to the matmul *outputs* (roll commutes with the channel contraction).
    y = jnp.dot(w2s_ref[...], p1.astype(jnp.bfloat16),
                preferred_element_type=jnp.float32)      # (3C, N) f32
    h2 = (m_prev2 * pltpu.roll(y[0:C], 2, axis=1)        # tap k=0 (prev pooled elem)
          + y[C:2 * C]                                   # tap k=1 (center)
          + m_next2 * pltpu.roll(y[2 * C:3 * C], N - 2, axis=1)  # tap k=2 (next)
          + b2_ref[...])
    h2 = jnp.maximum(h2, 0.0)                            # ReLU, valid at pos % 2 == 0

    # ---- Second MaxPool1d(2, 2): result valid at lanes with pos % 4 == 0.
    p2 = jnp.maximum(h2, pltpu.roll(h2, N - 2, axis=1))

    # ---- AdaptiveAvgPool1d(1): precomputed block-diagonal averaging matmul
    #      (also masks out invalid/garbage lanes).  bf16 operands, f32 accumulation.
    o_ref[...] = jnp.dot(p2.astype(jnp.bfloat16), avg_ref[...],
                         preferred_element_type=jnp.float32)     # (C, bb)


def subnet_forward(x, w1, b1, w2, b2, *, batch_block=None):
    """x: (B, 1, L) float32 (NCL, like PyTorch Conv1d). Returns (B, 16)."""
    B, cin, L = x.shape
    assert cin == 1, "SubNet expects a single input channel"
    assert L % 4 == 0, "sequence length must be divisible by 4 (two MaxPool(2) stages)"

    # ---- Lane-dense batch block: target ~4-8K lanes/step, cap bb at 128 (GAP matmul
    #      scales as bb^2*L), keep bb a multiple of 128 whenever the batch tiles.
    if batch_block is None:
        batch_block = max(1, min(128, 8192 // L))
    bb = int(min(batch_block, B))
    if bb < B and bb % 128 != 0:
        # Either grow to a lane-dense multiple of 128 or collapse to one full block.
        bb = int(min(B, ((bb + 127) // 128) * 128))
    G = pl.cdiv(B, bb)
    Bpad = G * bb
    N = bb * L

    # ---- Pack `bb` consecutive batch elements along the lane axis (contiguous reshape).
    xp = jnp.pad(x.astype(jnp.float32), ((0, Bpad - B), (0, 0), (0, 0)))
    xp = xp.reshape(G, 1, N)

    # ---- Weights (conv2 taps stacked on the host -> no in-kernel concat), bf16 for MXU.
    w1p = jnp.transpose(w1[:, 0, :], (1, 0)).reshape(3, C, 1).astype(jnp.float32)
    w2s = jnp.concatenate([w2[:, :, 0], w2[:, :, 1], w2[:, :, 2]],
                          axis=0).astype(jnp.bfloat16)            # (3C, C)
    b1c = b1.reshape(C, 1).astype(jnp.float32)
    b2c = b2.reshape(C, 1).astype(jnp.float32)

    # ---- Grid-invariant constants, hoisted out of the kernel (DMA'd once).
    pos = jnp.arange(N, dtype=jnp.int32) % L
    masks = jnp.stack([pos >= 1, pos <= L - 2, pos >= 2, pos < L - 2],
                      axis=0).astype(jnp.float32)                 # (4, N)
    rows = jnp.arange(N, dtype=jnp.int32)[:, None]
    cols = jnp.arange(bb, dtype=jnp.int32)[None, :]
    pick = jnp.logical_and(rows // L == cols, rows % 4 == 0)
    avg = jnp.where(pick, 4.0 / L, 0.0).astype(jnp.bfloat16)      # (N, bb)

    kernel = functools.partial(subnet_kernel, seq_len=L, batch_block=bb)

    flops = int(2 * Bpad * L * C * 3              # conv1 taps (VPU)
                + 2 * Bpad * L * (3 * C) * C      # conv2 stacked matmul
                + 2 * Bpad * L * C * bb)          # GAP block-diagonal matmul (dense form)
    bytes_accessed = int(4 * Bpad * L             # x
                         + 4 * (3 * C + 2 * C)    # w1, b1, b2
                         + 2 * (3 * C * C)        # w2 stacked (bf16)
                         + 4 * 4 * N              # boundary masks
                         + 2 * N * bb             # avg matrix (bf16)
                         + 4 * C * Bpad)          # output

    out = pl.pallas_call(
        kernel,
        out_shape=jax.ShapeDtypeStruct((C, Bpad), jnp.float32),
        grid_spec=pltpu.PrefetchScalarGridSpec(
            num_scalar_prefetch=0,
            grid=(G,),
            in_specs=[
                pl.BlockSpec((1, 1, N), lambda g: (g, 0, 0)),      # x (per-step)
                pl.BlockSpec((3, C, 1), lambda g: (0, 0, 0)),      # w1
                pl.BlockSpec((C, 1), lambda g: (0, 0)),            # b1
                pl.BlockSpec((3 * C, C), lambda g: (0, 0)),        # w2 stacked (bf16)
                pl.BlockSpec((C, 1), lambda g: (0, 0)),            # b2
                pl.BlockSpec((4, N), lambda g: (0, 0)),            # boundary masks
                pl.BlockSpec((N, bb), lambda g: (0, 0)),           # GAP avg matrix (bf16)
            ],
            out_specs=pl.BlockSpec((C, bb), lambda g: (0, g)),     # lane-dense store
        ),
        compiler_params=pltpu.CompilerParams(dimension_semantics=("parallel",)),
        cost_estimate=pl.CostEstimate(flops=flops, transcendentals=0,
                                      bytes_accessed=bytes_accessed),
    )(xp, w1p, b1c, w2s, b2c, masks, avg)

    out = jnp.transpose(out, (1, 0))        # (Bpad, C), Flatten
    return out[:B]


def reference_forward(x, w1, b1, w2, b2):
    """Pure-JAX reference matching the PyTorch module (full f32 precision)."""
    hp = jax.lax.Precision.HIGHEST

    def conv1d(h, w, b):
        y = jax.lax.conv_general_dilated(
            h, w, window_strides=(1,), padding=[(1, 1)],
            dimension_numbers=("NCH", "OIH", "NCH"), precision=hp)
        return y + b[None, :, None]

    h = jax.nn.relu(conv1d(x, w1, b1))
    h = jnp.max(h.reshape(h.shape[0], h.shape[1], -1, 2), axis=-1)   # MaxPool1d(2,2)
    h = jax.nn.relu(conv1d(h, w2, b2))
    h = jnp.max(h.reshape(h.shape[0], h.shape[1], -1, 2), axis=-1)   # MaxPool1d(2,2)
    return jnp.mean(h, axis=-1)                                      # GAP + Flatten


if __name__ == "__main__":
    key = jax.random.PRNGKey(0)
    k_x, k_w1, k_b1, k_w2, k_b2, k_x2 = jax.random.split(key, 6)

    L = 32
    w1 = 0.2 * jax.random.normal(k_w1, (C, 1, 3), dtype=jnp.float32)   # Conv1d(1,16,3)
    b1 = 0.1 * jax.random.normal(k_b1, (C,), dtype=jnp.float32)
    w2 = 0.2 * jax.random.normal(k_w2, (C, C, 3), dtype=jnp.float32)   # Conv1d(16,16,3)
    b2 = 0.1 * jax.random.normal(k_b2, (C,), dtype=jnp.float32)

    # Tolerance is relaxed vs. the f32 reference because both MXU dots use bf16
    # operands (f32 accumulation), as recommended by the perf review.
    TOL = dict(atol=1e-2, rtol=1e-2)

    # Lane-dense path: bb = 128 (full 128-lane output stores), N = 4096 lanes/step,
    # grid = 2 steps so v7x can shard one step per TensorCore.
    B = 256
    x = jax.random.normal(k_x, (B, 1, L), dtype=jnp.float32)
    out = jax.block_until_ready(subnet_forward(x, w1, b1, w2, b2))
    ref = jax.block_until_ready(reference_forward(x, w1, b1, w2, b2))
    assert out.shape == (B, C), out.shape
    assert jnp.allclose(out, ref, **TOL), float(jnp.max(jnp.abs(out - ref)))

    # Small-batch fallback path (bb = B, single grid step, full-extent blocks).
    B2 = 6
    x2 = jax.random.normal(k_x2, (B2, 1, L), dtype=jnp.float32)
    out2 = jax.block_until_ready(subnet_forward(x2, w1, b1, w2, b2))
    ref2 = jax.block_until_ready(reference_forward(x2, w1, b1, w2, b2))
    assert out2.shape == (B2, C), out2.shape
    assert jnp.allclose(out2, ref2, **TOL), float(jnp.max(jnp.abs(out2 - ref2)))

    print("KERNEL_OK")
</pallas_src>

<mosaic_0001>
module attributes {stable_mosaic.version = 11 : i64} {
  func.func @subnet_kernel(%arg0: i32, %arg1: memref<1x1x4096xf32, #tpu.memory_space<vmem>>, %arg2: memref<3x16x1xf32, #tpu.memory_space<vmem>>, %arg3: memref<16x1xf32, #tpu.memory_space<vmem>>, %arg4: memref<48x16xbf16, #tpu.memory_space<vmem>>, %arg5: memref<16x1xf32, #tpu.memory_space<vmem>>, %arg6: memref<4x4096xf32, #tpu.memory_space<vmem>>, %arg7: memref<4096x128xbf16, #tpu.memory_space<vmem>>, %arg8: memref<16x128xf32, #tpu.memory_space<vmem>>) attributes {dimension_semantics = [#tpu.dimension_semantics<parallel>], iteration_bounds = array<i64: 2>, scalar_prefetch = 0 : i64, scratch_operands = 0 : i64, tpu.core_type = #tpu.core_type<tc>, window_params = [{transform_indices = @transform_0, window_bounds = array<i64: 1, 1, 4096>}, {pipeline_mode = #tpu.pipeline_mode<synchronous>, transform_indices = @transform_1, window_bounds = array<i64: 3, 16, 1>}, {pipeline_mode = #tpu.pipeline_mode<synchronous>, transform_indices = @transform_2, window_bounds = array<i64: 16, 1>}, {pipeline_mode = #tpu.pipeline_mode<synchronous>, transform_indices = @transform_3, window_bounds = array<i64: 48, 16>}, {pipeline_mode = #tpu.pipeline_mode<synchronous>, transform_indices = @transform_4, window_bounds = array<i64: 16, 1>}, {pipeline_mode = #tpu.pipeline_mode<synchronous>, transform_indices = @transform_5, window_bounds = array<i64: 4, 4096>}, {pipeline_mode = #tpu.pipeline_mode<synchronous>, transform_indices = @transform_6, window_bounds = array<i64: 4096, 128>}, {transform_indices = @transform_7, window_bounds = array<i64: 16, 128>}]} {
    %c0 = arith.constant 0 : index
    %c0_0 = arith.constant 0 : index
    %c0_1 = arith.constant 0 : index
    %0 = vector.load %arg1[%c0, %c0_0, %c0_1] : memref<1x1x4096xf32, #tpu.memory_space<vmem>>, vector<1x1x4096xf32>
    %1 = vector.shape_cast %0 : vector<1x1x4096xf32> to vector<1x4096xf32>
    %c0_2 = arith.constant 0 : index
    %c0_3 = arith.constant 0 : index
    %2 = vector.load %arg6[%c0_2, %c0_3] : memref<4x4096xf32, #tpu.memory_space<vmem>>, vector<1x4096xf32>
    %c1 = arith.constant 1 : index
    %c0_4 = arith.constant 0 : index
    %3 = vector.load %arg6[%c1, %c0_4] : memref<4x4096xf32, #tpu.memory_space<vmem>>, vector<1x4096xf32>
    %c2 = arith.constant 2 : index
    %c0_5 = arith.constant 0 : index
    %4 = vector.load %arg6[%c2, %c0_5] : memref<4x4096xf32, #tpu.memory_space<vmem>>, vector<1x4096xf32>
    %c3 = arith.constant 3 : index
    %c0_6 = arith.constant 0 : index
    %5 = vector.load %arg6[%c3, %c0_6] : memref<4x4096xf32, #tpu.memory_space<vmem>>, vector<1x4096xf32>
    %c1_i32 = arith.constant 1 : i32
    %6 = tpu.dynamic_rotate %1 by %c1_i32 dim 1 : vector<1x4096xf32>, i32 -> vector<1x4096xf32>
    %7 = arith.mulf %6, %2 : vector<1x4096xf32>
    %c4095_i32 = arith.constant 4095 : i32
    %8 = tpu.dynamic_rotate %1 by %c4095_i32 dim 1 : vector<1x4096xf32>, i32 -> vector<1x4096xf32>
    %9 = arith.mulf %8, %3 : vector<1x4096xf32>
    %c0_7 = arith.constant 0 : index
    %c0_8 = arith.constant 0 : index
    %c0_9 = arith.constant 0 : index
    %10 = vector.load %arg2[%c0_7, %c0_8, %c0_9] : memref<3x16x1xf32, #tpu.memory_space<vmem>>, vector<1x16x1xf32>
    %11 = vector.shape_cast %10 : vector<1x16x1xf32> to vector<16x1xf32>
    %12 = vector.broadcast %11 : vector<16x1xf32> to vector<16x4096xf32>
    %13 = vector.broadcast %7 : vector<1x4096xf32> to vector<16x4096xf32>
    %14 = arith.mulf %12, %13 : vector<16x4096xf32>
    %c1_10 = arith.constant 1 : index
    %c0_11 = arith.constant 0 : index
    %c0_12 = arith.constant 0 : index
    %15 = vector.load %arg2[%c1_10, %c0_11, %c0_12] : memref<3x16x1xf32, #tpu.memory_space<vmem>>, vector<1x16x1xf32>
    %16 = vector.shape_cast %15 : vector<1x16x1xf32> to vector<16x1xf32>
    %17 = vector.broadcast %16 : vector<16x1xf32> to vector<16x4096xf32>
    %18 = vector.broadcast %1 : vector<1x4096xf32> to vector<16x4096xf32>
    %19 = arith.mulf %17, %18 : vector<16x4096xf32>
    %20 = arith.addf %14, %19 : vector<16x4096xf32>
    %c2_13 = arith.constant 2 : index
    %c0_14 = arith.constant 0 : index
    %c0_15 = arith.constant 0 : index
    %21 = vector.load %arg2[%c2_13, %c0_14, %c0_15] : memref<3x16x1xf32, #tpu.memory_space<vmem>>, vector<1x16x1xf32>
    %22 = vector.shape_cast %21 : vector<1x16x1xf32> to vector<16x1xf32>
    %23 = vector.broadcast %22 : vector<16x1xf32> to vector<16x4096xf32>
    %24 = vector.broadcast %9 : vector<1x4096xf32> to vector<16x4096xf32>
    %25 = arith.mulf %23, %24 : vector<16x4096xf32>
    %26 = arith.addf %20, %25 : vector<16x4096xf32>
    %c0_16 = arith.constant 0 : index
    %c0_17 = arith.constant 0 : index
    %27 = vector.load %arg3[%c0_16, %c0_17] : memref<16x1xf32, #tpu.memory_space<vmem>>, vector<16x1xf32>
    %28 = vector.broadcast %27 : vector<16x1xf32> to vector<16x4096xf32>
    %29 = arith.addf %26, %28 : vector<16x4096xf32>
    %cst = arith.constant 0.000000e+00 : f32
    %30 = vector.broadcast %cst : f32 to vector<16x4096xf32>
    %31 = arith.maximumf %29, %30 : vector<16x4096xf32>
    %c4095_i32_18 = arith.constant 4095 : i32
    %32 = tpu.dynamic_rotate %31 by %c4095_i32_18 dim 1 : vector<16x4096xf32>, i32 -> vector<16x4096xf32>
    %33 = arith.maximumf %31, %32 : vector<16x4096xf32>
    %c0_19 = arith.constant 0 : index
    %c0_20 = arith.constant 0 : index
    %34 = vector.load %arg4[%c0_19, %c0_20] : memref<48x16xbf16, #tpu.memory_space<vmem>>, vector<48x16xbf16>
    %35 = arith.truncf %33 : vector<16x4096xf32> to vector<16x4096xbf16>
    %cst_21 = arith.constant dense<0.000000e+00> : vector<48x4096xf32>
    %36 = tpu.matmul %34, %35, %cst_21 {dimension_numbers = #tpu.dot_dimension_numbers<[1], [0], [0], [1], [0, 0, 1, 1], [], []>} : vector<48x16xbf16>, vector<16x4096xbf16>, vector<48x4096xf32> -> vector<48x4096xf32>
    %37 = vector.extract_strided_slice %36 {offsets = [0, 0], sizes = [16, 4096], strides = [1, 1]} : vector<48x4096xf32> to vector<16x4096xf32>
    %c2_i32 = arith.constant 2 : i32
    %38 = tpu.dynamic_rotate %37 by %c2_i32 dim 1 : vector<16x4096xf32>, i32 -> vector<16x4096xf32>
    %39 = vector.broadcast %4 : vector<1x4096xf32> to vector<16x4096xf32>
    %40 = arith.mulf %39, %38 : vector<16x4096xf32>
    %41 = vector.extract_strided_slice %36 {offsets = [16, 0], sizes = [16, 4096], strides = [1, 1]} : vector<48x4096xf32> to vector<16x4096xf32>
    %42 = arith.addf %40, %41 : vector<16x4096xf32>
    %43 = vector.extract_strided_slice %36 {offsets = [32, 0], sizes = [16, 4096], strides = [1, 1]} : vector<48x4096xf32> to vector<16x4096xf32>
    %c4094_i32 = arith.constant 4094 : i32
    %44 = tpu.dynamic_rotate %43 by %c4094_i32 dim 1 : vector<16x4096xf32>, i32 -> vector<16x4096xf32>
    %45 = vector.broadcast %5 : vector<1x4096xf32> to vector<16x4096xf32>
    %46 = arith.mulf %45, %44 : vector<16x4096xf32>
    %47 = arith.addf %42, %46 : vector<16x4096xf32>
    %c0_22 = arith.constant 0 : index
    %c0_23 = arith.constant 0 : index
    %48 = vector.load %arg5[%c0_22, %c0_23] : memref<16x1xf32, #tpu.memory_space<vmem>>, vector<16x1xf32>
    %49 = vector.broadcast %48 : vector<16x1xf32> to vector<16x4096xf32>
    %50 = arith.addf %47, %49 : vector<16x4096xf32>
    %cst_24 = arith.constant 0.000000e+00 : f32
    %51 = vector.broadcast %cst_24 : f32 to vector<16x4096xf32>
    %52 = arith.maximumf %50, %51 : vector<16x4096xf32>
    %c4094_i32_25 = arith.constant 4094 : i32
    %53 = tpu.dynamic_rotate %52 by %c4094_i32_25 dim 1 : vector<16x4096xf32>, i32 -> vector<16x4096xf32>
    %54 = arith.maximumf %52, %53 : vector<16x4096xf32>
    %55 = arith.truncf %54 : vector<16x4096xf32> to vector<16x4096xbf16>
    %c0_26 = arith.constant 0 : index
    %c0_27 = arith.constant 0 : index
    %56 = vector.load %arg7[%c0_26, %c0_27] : memref<4096x128xbf16, #tpu.memory_space<vmem>>, vector<4096x128xbf16>
    %cst_28 = arith.constant dense<0.000000e+00> : vector<16x128xf32>
    %57 = tpu.matmul %55, %56, %cst_28 {dimension_numbers = #tpu.dot_dimension_numbers<[1], [0], [0], [1], [0, 0, 1, 1], [], []>} : vector<16x4096xbf16>, vector<4096x128xbf16>, vector<16x128xf32> -> vector<16x128xf32>
    %c0_29 = arith.constant 0 : index
    %c0_30 = arith.constant 0 : index
    %58 = vector.load %arg8[%c0_29, %c0_30] : memref<16x128xf32, #tpu.memory_space<vmem>>, vector<16x128xf32>
    tpu.vector_store %arg8[%c0_29, %c0_30], %57 {strides = array<i32>} : memref<16x128xf32, #tpu.memory_space<vmem>>, vector<16x128xf32>,
    return
  }
  func.func @transform_0(%arg0: i32) -> (i32, i32, i32) {
    %c0_i32 = arith.constant 0 : i32
    %c0_i32_0 = arith.constant 0 : i32
    %c0_i32_1 = arith.constant 0 : i32
    return %arg0, %c0_i32, %c0_i32_0 : i32, i32, i32
  }
  func.func @transform_1(%arg0: i32) -> (i32, i32, i32) {
    %c0_i32 = arith.constant 0 : i32
    %c0_i32_0 = arith.constant 0 : i32
    %c0_i32_1 = arith.constant 0 : i32
    %c0_i32_2 = arith.constant 0 : i32
    return %c0_i32, %c0_i32_0, %c0_i32_1 : i32, i32, i32
  }
  func.func @transform_2(%arg0: i32) -> (i32, i32) {
    %c0_i32 = arith.constant 0 : i32
    %c0_i32_0 = arith.constant 0 : i32
    %c0_i32_1 = arith.constant 0 : i32
    return %c0_i32, %c0_i32_0 : i32, i32
  }
  func.func @transform_3(%arg0: i32) -> (i32, i32) {
    %c0_i32 = arith.constant 0 : i32
    %c0_i32_0 = arith.constant 0 : i32
    %c0_i32_1 = arith.constant 0 : i32
    return %c0_i32, %c0_i32_0 : i32, i32
  }
  func.func @transform_4(%arg0: i32) -> (i32, i32) {
    %c0_i32 = arith.constant 0 : i32
    %c0_i32_0 = arith.constant 0 : i32
    %c0_i32_1 = arith.constant 0 : i32
    return %c0_i32, %c0_i32_0 : i32, i32
  }
  func.func @transform_5(%arg0: i32) -> (i32, i32) {
    %c0_i32 = arith.constant 0 : i32
    %c0_i32_0 = arith.constant 0 : i32
    %c0_i32_1 = arith.constant 0 : i32
    return %c0_i32, %c0_i32_0 : i32, i32
  }
  func.func @transform_6(%arg0: i32) -> (i32, i32) {
    %c0_i32 = arith.constant 0 : i32
    %c0_i32_0 = arith.constant 0 : i32
    %c0_i32_1 = arith.constant 0 : i32
    return %c0_i32, %c0_i32_0 : i32, i32
  }
  func.func @transform_7(%arg0: i32) -> (i32, i32) {
    %c0_i32 = arith.constant 0 : i32
    %c0_i32_0 = arith.constant 0 : i32
    return %c0_i32, %arg0 : i32, i32
  }
}

</mosaic_0001>

<bundles_post_ra>
// kernel: tpu_custom_call.1
= control target key start
LH: loop header
LB: loop body
LE: loop exit
PB: predicated region body
PF: predicated region fallthrough
CT: control target
= control target key end

     0   :  { %12 = vsyncpa [#allocation3], 0  ;;  %s13697_s0 = inlined_call_operand.hbm [shape: f32[2,1,4096], index: 0, kind: input, shape index: {}]   ;;  %s13698_s1 = inlined_call_operand.vmem [shape: f32[3,16,1], index: 1, kind: input, shape index: {}]   ;;  %s13699_s2 = inlined_call_operand.vmem [shape: f32[16,1], index: 2, kind: input, shape index: {}]   ;;  %s13700_s3 = inlined_call_operand.vmem [shape: bf16[48,16], index: 3, kind: input, shape index: {}]   ;;  %s13701_s4 = inlined_call_operand.vmem [shape: f32[16,1], index: 4, kind: input, shape index: {}]   ;;  %s13702_s5 = inlined_call_operand.vmem [shape: f32[4,4096], index: 5, kind: input, shape index: {}]   ;;  %s13703_s6 = inlined_call_operand.hbm [shape: bf16[4096,128], index: 6, kind: input, shape index: {}]   ;;  %s13704_s7 = inlined_call_operand.hbm [shape: f32[16,256], index: 7, kind: output, shape index: {}]  }
   0x1   :  { %14 = vsyncpa [#allocation3 + $0x1], 0 }
   0x2   :  { %15 = vsyncpa [#allocation6], 0 }
   0x3   :  { %16 = vsyncpa [#allocation4], 0 }
   0x4   :  { %18 = vsyncpa [#allocation4 + $0x1], 0  ;;  %s8915_s24 = smov 0   ;;  %s8917_s25 = smov 0  }
   0x5   :  { %s8919_s26 = smov 0   ;;  %s8921_s27 = smov 0  }
   0x6 LB: > { %s8936_s28 = sadd.s32 4294967295, %s8860_s27   ;;  %s7379_s29 = sadd.s32 4294967294, %s8860_s27   ;;  %s8860_s27 = sphi %s8921_s27, %s14691_s27   ;;  %s8856_s26 = sphi %s8919_s26, %s14690_s26   ;;  %s8852_s25 = sphi %s8917_s25, %s14689_s25   ;;  %s8848_s24 = sphi %s8915_s24, %s14688_s24  }
   0x7   : > { %p44_p0 = scmp.ne.s32.totalorder %s8852_s25, %s8848_s24  ;;  %p13705_p1 = scmp.eq.s32.totalorder %s8936_s28, 0 }
   0x8   : > { %p200_p3 = scmp.eq.s32.totalorder %s7379_s29, 1  ;;  %p7380_p5 = scmp.ge.s32.totalorder %s8860_s27, 1 }
   0x9   : > { %p8945_p4 = por %p13705_p1, %p44_p0  ;;  %p207_p7 = scmp.lt.s32.totalorder %s8860_s27, 3 }
   0xa   : > { %p8950_p6 = por %p200_p3, %p44_p0  ;;  %s8862_s10 = smov [#allocation5]  }
   0xb   : > { %s14014_s30 = scalar_select %p8945_p4, 1, 0 }
   0xc   : > { %s14015_s8 = scalar_select %p8950_p6, 1, 0 }
   0xd   : > { %p8955_p8 = pnand %p7380_p5, %p207_p7  ;;  %s234_s11 = sshll.u32 %s8862_s10, 4  ;;  %s8959_s11 = int_to_ptr.vmem [resolvable:$true] %s234_s11 }
   0xe   : > { %s8971_s13 = sadd.s32 1, %s8860_s27   ;;  %s31_s14 = sadd.s32 1, %s8856_s26 }
   0xf   : > { %s14016_s9 = scalar_select %p8955_p8, 1, 0 }
  0x10   : > { %p8081_p9 = pneg %p8955_p8  ;;  %s28_s15 = ssub.s32 %s8860_s27, %s8971_s13 }
  0x11   : > { %s8732_s18 = scalar_lea.hbm %s13703_s6, 32768 }
  0x12   : > { %p8966_p11 = pnand %p8081_p9, %p13705_p1  ;;  %p8733_p12 = scmp.ne.s32.totalorder %s13703_s6, %s8732_s18 }
  0x13   : > { %p8739_p5 = scmp.lt.u32.totalorder %s8732_s18, %s13703_s6 }
  0x14   : > { %p8734_p13 = pneg %p8966_p11 }
  0x16   : > { %p8735_p0 = pnand %p8734_p13, %p8733_p12 }
  0x18   : > { %p8736_p3 = pneg %p8735_p0 }
  0x1a   : > { %p8741_p7 = pnand %p8739_p5, %p8736_p3 }
  0x1c   : > { %8744 = shalt.err (!%p8741_p7)
}
  0x1d   : > { %s8745_s23 = scalar_lea.vmem %s8959_s11, 32768  ;;  %p8753_p2 = scmp.lt.s32.totalorder %s8959_s11, %s8959_s11 }
  0x1e   : > { %p8746_p9 = scmp.ne.s32.totalorder %s8959_s11, %s8745_s23  ;;  %p8754_p6 = scmp.lt.s32.totalorder %s8745_s23, %s8745_s23 }
  0x20   : > { %p8748_p10 = pnand %p8746_p9, %p8734_p13  ;;  %p8755_p4 = por %p8754_p6, %p8753_p2 }
  0x22   : > { %p8749_p1 = pneg %p8748_p10 }
  0x24   : > { %p8756_p8 = pnand %p8755_p4, %p8749_p1 }
  0x26   : > { %8759 = shalt.err (!%p8756_p8)
}
  0x27   : > { %s8863_s29 = smov 64   ;;  %s8864_s10 = smov 4  }
  0x28   : > { %8084 = dma.hbm_to_vmem [thread:$0]  (!%p8966_p11), %s13703_s6, 32768, %s8959_s11, [#allocation6], %s8863_s29, %s8863_s29, %s8864_s10  }
  0x29   : > { %p29_p2 = scmp.eq.s32.totalorder %s28_s15, 0  ;;  %p38_p1 = scmp.ne.s32.totalorder %s8856_s26, %s8852_s25 }
  0x2a   : > { %p39_p4 = scmp.eq.s32.totalorder %s8860_s27, 0  ;;  %p8094_p6 = scmp.lt.s32.totalorder %s8860_s27, 2 }
  0x2b   : > { %s9002_s18 = scalar_select %p29_p2, %s8856_s26, %s31_s14  }
  0x2c   : > { %p40_p8 = por %p39_p4, %p38_p1  ;;  %p14018_p10 = scmp.eq.s32.totalorder %s8936_s28, 1 }
  0x2d   : > { %s248_s20 = sand.u32 1, %s8856_s26   ;;  %s7720_s21 = sshll.u32 %s8860_s27, 9 }
  0x2e   : > { %p9006_p12 = por %p14018_p10, %p38_p1  ;;  %s7383_s22 = sshll.u32 %s248_s20, 5 }
  0x2f   : > { %s9015_s16 = scalar_lea.hbm %s13697_s0, %s7720_s21  ;;  %s252_s11 = scalar_lea.vmem [#allocation2], %s7383_s22 }
  0x30   : > { %s260_s14 = sshll.u32 %s252_s11, 4  ;;  %p9017_p11 = pnand %p8094_p6, %p40_p8  ;;  %s9021_s14 = int_to_ptr.vmem [resolvable:$true] %s260_s14 }
  0x31   : > { %s249_s29 = scalar_lea.sflag [#allocation3], %s248_s20  ;;  %s8760_s10 = scalar_lea.hbm %s9015_s16, 512 }
  0x32   : > { %p8761_p13 = scmp.ne.s32.totalorder %s9015_s16, %s8760_s10  ;;  %p8762_p0 = pneg %p9017_p11 }
  0x33   : > { %s8765_s22 = scalar_lea.hbm %s13697_s0, 1024  ;;  %p8766_p7 = scmp.lt.u32.totalorder %s9015_s16, %s13697_s0 }
  0x34   : > { %p8763_p3 = pnand %p8762_p0, %p8761_p13  ;;  %p8767_p9 = scmp.lt.u32.totalorder %s8765_s22, %s8760_s10 }
  0x35   : > { %p8769_p1 = scmp.lt.u32.totalorder %s8760_s10, %s9015_s16 }
  0x36   : > { %p8764_p5 = pneg %p8763_p3  ;;  %p8768_p2 = por %p8767_p9, %p8766_p7 }
  0x38   : > { %p8770_p4 = por %p8769_p1, %p8768_p2 }
  0x3a   : > { %p8771_p6 = pnand %p8770_p4, %p8764_p5 }
  0x3c   : > { %8774 = shalt.err (!%p8771_p6)
}
  0x3d   : > { %s8775_s20 = scalar_lea.vmem %s9021_s14, 512  ;;  %s8865_s11 = smov [#allocation2]  }
  0x3e   : > { %p8776_p8 = scmp.ne.s32.totalorder %s9021_s14, %s8775_s20  ;;  %s8780_s17 = sshll.u32 %s8865_s11, 4  ;;  %s8781_s17 = int_to_ptr.vmem [resolvable:$false] %s8780_s17 }
  0x3f   : > { %s8782_s21 = scalar_lea.vmem %s8781_s17, 1024  ;;  %p8783_p3 = scmp.lt.s32.totalorder %s9021_s14, %s8781_s17 }
  0x40   : > { %p8778_p10 = pnand %p8776_p8, %p8762_p0  ;;  %p8784_p7 = scmp.lt.s32.totalorder %s8782_s21, %s8775_s20 }
  0x42   : > { %p8779_p13 = pneg %p8778_p10  ;;  %p8785_p9 = por %p8784_p7, %p8783_p3 }
  0x44   : > { %p8786_p2 = pnand %p8785_p9, %p8779_p13 }
  0x46   : > { %8789 = shalt.err (!%p8786_p2)
}
  0x47   : > { %8088 = dma.hbm_to_vmem [thread:$0]  (!%p9017_p11), %s9015_s16, 512, %s9021_s14, %s249_s29  }
  0x48   : > { %p14021_p5 = scmp.ne.s32.totalorder %s14016_s9, 0 }
  0x4a   : > { %269 = sbr.rel (%p14021_p5) target bundleno = 1721 (0x6b9), region = 48 }
  0x51   : > { %s9051_s10 = sand.u32 1, %s8852_s25   ;;  %p14022_p0 = scmp.ne.s32.totalorder %s14014_s30, 0 }
  0x52   : > { %s7387_s22 = sshll.u32 %s9051_s10, 5  ;;  %s272_s12 = scalar_lea.sflag [#allocation3], %s9051_s10 }
  0x53   : > { %s9055_s23 = scalar_lea.vmem [#allocation2], %s7387_s22 }
  0x54   : > { %8835 = dma.done.wait (%p14022_p0), %s272_s12, 512  }
  0x55   : > { %8837 = vsyncadd (%p14022_p0), %s272_s12, 4294966784  ;;  %p14023_p11 = scmp.eq.s32.totalorder %s8936_s28, 0 }
  0x57   : > { %8839 = dma.done.wait (%p14023_p11), [#allocation6], 32768   ;;  %p14024_p1 = pmov %p14023_p11 }
  0x58   : > { %v350_v0 = vlaneseq  ;;  %v13708_v1 = vmov 0   ;;  %v7405_v3 = vld [vmem:[%s13698_s1 + $0x10] sm:$0xff]  ;;  %v1098_v4 = vld [vmem:[%s13698_s1] sm:$0xff]  ;;  %v7406_v7 = vld [vmem:[%s13698_s1 + $0x18] sm:$0xff]  ;;  %s8867_s22 = smov 1   ;;  %s8868_s9 = smov 127  }
  0x59   : > { %8841 = vsyncadd (%p14024_p1), [#allocation6], 4294934528  ;;  %8141 = vset.pattern.permute.xlu1 %v13708_v1  ;;  %8140 = vset.pattern.permute.xlu0 %v13708_v1  ;;  %v1099_v8 = vld [vmem:[%s13698_s1 + $0x8] sm:$0xff]  ;;  %v311_v9 = vld [vmem:[%s9055_s23] sm:$0xff]  ;;  %vm2161_vm2 = vcmask 130048   ;;  %s8869_s15 = smov 2  }
  0x5a   : > { %2266 = vmatprep.mubr.bf16.mxu1 %v13708_v1  ;;  %2203 = vmatprep.mubr.bf16.mxu0 %v13708_v1  ;;  %v351_v2 = vshrl.u32 %v350_v0, 7  ;;  %v7407_v15 = vld [vmem:[%s13698_s1 + $0x20] sm:$0xff]  ;;  %v7408_v18 = vld [vmem:[%s13698_s1 + $0x28] sm:$0xff]  ;;  %v9196_v34 = vld [vmem:[%s9055_s23 + $0x10] sm:$0xff]  ;;  %v9231_v39 = vand.u32 127, %v350_v0  ;;  %s7717_s12 = sshll.u32 %s8936_s28, 7 }
  0x5b   : > { %1307 = vperm.xlu1 %8141, %v7405_v3   ;;  %1102 = vperm.xlu0 %8140, %v1098_v4   ;;  %v1712_v23 = vld [vmem:[%s13699_s2] sm:$0xff]  ;;  %v1713_v24 = vld [vmem:[%s13699_s2 + $0x8] sm:$0xff]  ;;  %s7284_s14 = scalar_lea.sflag [#allocation4], %s9051_s10  ;;  %s8871_s28 = smov [#allocation7]  }
  0x5c   : > { %v9076_v5 = vsub.s32 3, %v351_v2  ;;  %v9078_v6 = vsub.s32 2, %v351_v2  ;;  %v9087_v10 = vsub.s32 4, %v351_v2  ;;  %v9095_v13 = vsub.s32 0, %v351_v2  ;;  %v312_v25 = vld [vmem:[%s9055_s23 + $0x8] sm:$0xff] }
  0x5d   : > { %v9097_v14 = vsub.s32 1, %v351_v2  ;;  %v9117_v19 = vsub.s32 5, %v351_v2  ;;  %v9121_v20 = vsub.s32 6, %v351_v2  ;;  %v9123_v21 = vsub.s32 7, %v351_v2  ;;  %v9241_v42 = vld [vmem:[%s13702_s5] ss:$4 sm:$0xff] }
  0x5e   : > { %14025 = vst [vmem:[#allocation11_spill] sm:$0xff] %v9076_v5  ;;  %14026 = vst [vmem:[#allocation12_spill] sm:$0xff] %v9078_v6  ;;  %v9090_v11 = vrot.slane %v311_v9, %v9076_v5  ;;  %v9093_v12 = vrot.slane %v311_v9, %v9078_v6  ;;  %v9107_v16 = vrot.slane %v311_v9, %v9087_v10  ;;  %vm576_vm0 = vcmp.lt.s32.totalorder %v9231_v39, 1  ;;  %v9264_v54 = vld [vmem:[%s13702_s5 + $0x1] ss:$4 sm:$0xff] }
  0x5f   : > { %14027 = vst [vmem:[#allocation13_spill] sm:$0xff] %v9087_v10  ;;  %1312 = vperm.xlu1 %8141, %v7406_v7   ;;  %1107 = vperm.xlu0 %8140, %v1099_v8   ;;  %14028 = vst [vmem:[#allocation14_spill] sm:$0xff] %v9095_v13  ;;  %v9112_v17 = vrot.slane %v311_v9, %v9097_v14  ;;  %v9130_v22 = vrot.slane %v311_v9, %v9117_v19  ;;  %vm869_vm1 = vcmp.lt.s32.totalorder %v9231_v39, 127 }
  0x60   : > { %14029 = vst [vmem:[#allocation15_spill] sm:$0xff] %v9097_v14  ;;  %14030 = vst [vmem:[#allocation16_spill] sm:$0xff] %v9117_v19  ;;  %v9144_v26 = vrot.slane %v311_v9, %v9121_v20  ;;  %v9147_v27 = vrot.slane %v311_v9, %v9123_v21  ;;  %v9154_v28 = vrot.slane %v312_v25, %v9095_v13  ;;  %vm3307_vm3 = vcmp.lt.s32.totalorder %v9231_v39, 2 }
  0x61   : > { %14031 = vst [vmem:[#allocation17_spill] sm:$0xff] %v9121_v20  ;;  %14032 = vst [vmem:[#allocation18_spill] sm:$0xff] %v9123_v21  ;;  %v9165_v29 = vrot.slane %v312_v25, %v9097_v14  ;;  %v9172_v30 = vrot.slane %v312_v25, %v9078_v6  ;;  %v9175_v31 = vrot.slane %v312_v25, %v9076_v5  ;;  %vm3792_vm4 = vcmp.lt.s32.totalorder %v9231_v39, 126 }
  0x62   : > { %14033 = vst [vmem:[#allocation19_spill] sm:$0xff] %v9130_v22  ;;  %v9182_v32 = vrot.slane %v312_v25, %v9087_v10  ;;  %v9193_v33 = vrot.slane %v312_v25, %v9117_v19  ;;  %v9203_v35 = vrot.slane %v312_v25, %v9121_v20  ;;  %v9206_v36 = vrot.slane %v312_v25, %v9123_v21 }
  0x63   : > { %516 = vrot.lane.b32.xlu1 %v9090_v11, %s8867_s22  ;;  %514 = vrot.lane.b32.xlu0 %v9093_v12, %s8867_s22  ;;  %14034 = vst [vmem:[#allocation20_spill] sm:$0xff] %v9165_v29  ;;  %v9214_v37 = vrot.slane %v9196_v34, %v9095_v13  ;;  %v9226_v38 = vrot.slane %v9196_v34, %v9097_v14 }
  0x64   : > { %14035 = vst [vmem:[#allocation21_spill] sm:$0xff] %v9193_v33  ;;  %v628_v45 = vrot.slane %v9241_v42, %v9076_v5  ;;  %v632_v51 = vrot.slane %v9241_v42, %v9087_v10  ;;  %v624_v55 = vrot.slane %v9241_v42, %v9078_v6  ;;  %v921_v62 = vrot.slane %v9264_v54, %v9076_v5 }
  0x65   : > { %14036 = vst [vmem:[#allocation22_spill] sm:$0xff] %v9226_v38 }
  0x67   : > { %1448 = vperm.xlu1 %8141, %v7407_v15   ;;  %518 = vrot.lane.b32.xlu0 %v9107_v16, %s8867_s22 }
  0x6b   : > { %1453 = vperm.xlu0 %8140, %v7408_v18   ;;  %512 = vrot.lane.b32.xlu1 %v9112_v17, %s8867_s22  ;;  %v925_v18 = vrot.slane %v9264_v54, %v9087_v10 }
  0x6f   : > { %811 = vrot.lane.b32.xlu0 %v9090_v11, %s8868_s9  ;;  %813 = vrot.lane.b32.xlu1 %v9107_v16, %s8868_s9 }
  0x73   : > { %815 = vrot.lane.b32.xlu0 %v9130_v22, %s8868_s9  ;;  %809 = vrot.lane.b32.xlu1 %v9093_v12, %s8868_s9 }
  0x77   : > { %1716 = vperm.xlu0 %8140, %v1712_v23   ;;  %1721 = vperm.xlu1 %8141, %v1713_v24   ;;  %v917_v23 = vrot.slane %v9264_v54, %v9078_v6 }
  0x7b   : > { %522 = vrot.lane.b32.xlu0 %v9144_v26, %s8867_s22  ;;  %524 = vrot.lane.b32.xlu1 %v9147_v27, %s8867_s22 }
  0x7f   : > { %526 = vrot.lane.b32.xlu0 %v9154_v28, %s8867_s22  ;;  %520 = vrot.lane.b32.xlu1 %v9130_v22, %s8867_s22 }
  0x83   : > { %819 = vrot.lane.b32.xlu0 %v9147_v27, %s8868_s9  ;;  %821 = vrot.lane.b32.xlu1 %v9154_v28, %s8868_s9 }
  0x87   : > { %823 = vrot.lane.b32.xlu0 %v9165_v29, %s8868_s9  ;;  %817 = vrot.lane.b32.xlu1 %v9144_v26, %s8868_s9 }
  0x8b   : > { %530 = vrot.lane.b32.xlu0 %v9172_v30, %s8867_s22  ;;  %532 = vrot.lane.b32.xlu1 %v9175_v31, %s8867_s22 }
  0x8f   : > { %534 = vrot.lane.b32.xlu0 %v9182_v32, %s8867_s22  ;;  %528 = vrot.lane.b32.xlu1 %v9165_v29, %s8867_s22 }
  0x93   : > { %827 = vrot.lane.b32.xlu0 %v9175_v31, %s8868_s9  ;;  %829 = vrot.lane.b32.xlu1 %v9182_v32, %s8868_s9 }
  0x97   : > { %831 = vrot.lane.b32.xlu0 %v9193_v33, %s8868_s9  ;;  %825 = vrot.lane.b32.xlu1 %v9172_v30, %s8868_s9 }
  0x9b   : > { %538 = vrot.lane.b32.xlu0 %v9203_v35, %s8867_s22  ;;  %540 = vrot.lane.b32.xlu1 %v9206_v36, %s8867_s22 }
  0x9f   : > { %542 = vrot.lane.b32.xlu0 %v9214_v37, %s8867_s22  ;;  %536 = vrot.lane.b32.xlu1 %v9193_v33, %s8867_s22 }
  0xa3   : > { %835 = vrot.lane.b32.xlu0 %v9206_v36, %s8868_s9  ;;  %837 = vrot.lane.b32.xlu1 %v9214_v37, %s8868_s9 }
  0xa7   : > { %839 = vrot.lane.b32.xlu0 %v9226_v38, %s8868_s9 }
  0xda   : > { %v9234_v40 = vpop.permute.xlu1 %1307  ;;  %v9236_v41 = vpop.permute.xlu0 %1102 }
  0xdb   : > { %14037 = vst [vmem:[#allocation23_spill] sm:$0xff] %v9234_v40  ;;  %v1318_v9 = vmul.f32 %v9234_v40, %v9090_v11 }
  0xde   : > { %v9243_v43 = vpop.permute.xlu1 %1312  ;;  %v9245_v44 = vpop.permute.xlu0 %1107 }
  0xdf   : > { %14038 = vst [vmem:[#allocation24_spill] sm:$0xff] %v9243_v43  ;;  %v1350_v24 = vmul.f32 %v9243_v43, %v9090_v11 }
  0xe2   : > { %v517_v46 = vpop.permute.xlu1 %516  ;;  %v515_v47 = vpop.permute.xlu0 %514 }
  0xe3   : > { %v605_v48 = vsel %vm576_vm0, %v515_v47, %v517_v46 }
  0xe4   : > { %v776_v49 = vmul.f32 %v628_v45, %v605_v48 }
  0xe6   : > { %v9252_v50 = vpop.permute.xlu1 %1448  ;;  %v9256_v52 = vpop.permute.xlu0 %518  ;;  %v1125_v56 = vrot.slane %v776_v49, %v9095_v13 }
  0xe7   : > { %14039 = vst [vmem:[#allocation25_spill] sm:$0xff] %v9256_v52  ;;  %v604_v53 = vsel %vm576_vm0, %v517_v46, %v9256_v52 }
  0xe8   : > { %v777_v57 = vmul.f32 %v632_v51, %v604_v53  ;;  %v1241_v63 = vmul.f32 %v1125_v56, %v9236_v41  ;;  %v1273_v0 = vmul.f32 %v1125_v56, %v9245_v44 }
  0xea   : > { %v9269_v58 = vpop.permute.xlu0 %1453  ;;  %v9271_v59 = vpop.permute.xlu1 %512  ;;  %v1129_v2 = vrot.slane %v777_v57, %v9095_v13  ;;  %v1382_v25 = vadd.f32 %v1318_v9, %v1241_v63  ;;  %v1414_v51 = vadd.f32 %v1350_v24, %v1273_v0  ;;  %v1319_v63 = vmul.f32 %v9234_v40, %v9107_v16 }
  0xeb   : > { %14040 = vst [vmem:[#allocation26_spill] sm:$0xff] %v9271_v59  ;;  %v606_v60 = vsel %vm576_vm0, %v9271_v59, %v515_v47  ;;  %v1351_v0 = vmul.f32 %v9243_v43, %v9107_v16  ;;  %v9326_v16 = vld [vmem:[%s13702_s5 + $0x20] ss:$4 sm:$0xff] }
  0xec   : > { %v775_v61 = vmul.f32 %v624_v55, %v606_v60  ;;  %v1242_v45 = vmul.f32 %v1129_v2, %v9236_v41  ;;  %v1274_v46 = vmul.f32 %v1129_v2, %v9245_v44  ;;  %v1317_v2 = vmul.f32 %v9234_v40, %v9093_v12 }
  0xee   : > { %v812_v3 = vpop.permute.xlu0 %811  ;;  %v814_v4 = vpop.permute.xlu1 %813  ;;  %v1121_v7 = vrot.slane %v775_v61, %v9095_v13  ;;  %v1415_v24 = vadd.f32 %v1351_v0, %v1274_v46 }
  0xef   : > { %v897_v8 = vsel %vm869_vm1, %v812_v3, %v814_v4 }
  0xf0   : > { %v1069_v15 = vmul.f32 %v921_v62, %v897_v8  ;;  %v1240_v53 = vmul.f32 %v1121_v7, %v9236_v41  ;;  %v1272_v55 = vmul.f32 %v1121_v7, %v9245_v44 }
  0xf2   : > { %v1471_v47 = vrot.slane %v1069_v15, %v9095_v13  ;;  %v9295_v48 = vpop.permute.xlu0 %815  ;;  %v9297_v49 = vpop.permute.xlu1 %809 }
  0xf3   : > { %14041 = vst [vmem:[#allocation27_spill] sm:$0xff] %v9295_v48  ;;  %14042 = vst [vmem:[#allocation28_spill] sm:$0xff] %v9297_v49  ;;  %v896_v11 = vsel %vm869_vm1, %v814_v4, %v9295_v48  ;;  %v898_v56 = vsel %vm869_vm1, %v9297_v49, %v812_v3  ;;  %v1349_v4 = vmul.f32 %v9243_v43, %v9093_v12 }
  0xf4   : > { %v1587_v57 = vmul.f32 %v1471_v47, %v9252_v50  ;;  %v1619_v60 = vmul.f32 %v1471_v47, %v9269_v58  ;;  %v1070_v61 = vmul.f32 %v925_v18, %v896_v11  ;;  %v1068_v62 = vmul.f32 %v917_v23, %v898_v56 }
  0xf5   : > { %v1383_v23 = vadd.f32 %v1319_v63, %v1242_v45  ;;  %v1381_v47 = vadd.f32 %v1317_v2, %v1240_v53  ;;  %v1413_v11 = vadd.f32 %v1349_v4, %v1272_v55  ;;  %v648_v2 = vrot.slane %v9326_v16, %v9095_v13 }
  0xf6   : > { %v1475_v3 = vrot.slane %v1070_v61, %v9095_v13  ;;  %v1467_v7 = vrot.slane %v1068_v62, %v9095_v13  ;;  %v9319_v8 = vpop.permute.xlu0 %1716  ;;  %v9321_v9 = vpop.permute.xlu1 %1721  ;;  %v1651_v15 = vadd.f32 %v1587_v57, %v1382_v25  ;;  %v1683_v18 = vadd.f32 %v1619_v60, %v1414_v51 }
  0xf8   : > { %v1588_v12 = vmul.f32 %v1475_v3, %v9252_v50  ;;  %v1620_v56 = vmul.f32 %v1475_v3, %v9269_v58  ;;  %v1586_v61 = vmul.f32 %v1467_v7, %v9252_v50  ;;  %v1618_v62 = vmul.f32 %v1467_v7, %v9269_v58 }
  0xf9   : > { %v9333_v25 = vadd.f32 %v9319_v8, %v1651_v15  ;;  %v9336_v51 = vadd.f32 %v9321_v9, %v1683_v18  ;;  %v640_v18 = vrot.slane %v9241_v42, %v9121_v20 }
  0xfa   : > { %v523_v57 = vpop.permute.xlu0 %522  ;;  %v525_v60 = vpop.permute.xlu1 %524  ;;  %v1652_v45 = vadd.f32 %v1588_v12, %v1383_v23  ;;  %v1684_v46 = vadd.f32 %v1620_v56, %v1415_v24  ;;  %v1650_v53 = vadd.f32 %v1586_v61, %v1381_v47  ;;  %v1682_v55 = vadd.f32 %v1618_v62, %v1413_v11 }
  0xfb   : > { %v13711_v63 = vmax.f32 %v9333_v25, 0.0  ;;  %v13710_v0 = vmax.f32 %v9336_v51, 0.0  ;;  %v644_v24 = vrot.slane %v9241_v42, %v9123_v21  ;;  %v601_v47 = vsel %vm576_vm0, %v523_v57, %v525_v60 }
  0xfc   : > { %v9343_v4 = vadd.f32 %v9319_v8, %v1652_v45  ;;  %v9346_v3 = vadd.f32 %v9321_v9, %v1684_v46  ;;  %v9349_v7 = vadd.f32 %v9319_v8, %v1650_v53  ;;  %v9358_v23 = vadd.f32 %v9321_v9, %v1682_v55  ;;  %v9380_v45 = vld [vmem:[%s13702_s5 + $0x21] ss:$4 sm:$0xff] }
  0xfd   : > { %v8142_v15 = vpack.i.bf16 %v13710_v0, %v13711_v63 }
  0xfe   : > { %14043 = vst [vmem:[#allocation29_spill] sm:$0xff] %v9343_v4  ;;  %14044 = vst [vmem:[#allocation30_spill] sm:$0xff] %v9346_v3  ;;  %v9364_v11 = vpop.permute.xlu0 %526  ;;  %v9366_v12 = vpop.permute.xlu1 %520  ;;  %v13716_v56 = vmax.f32 %v9343_v4, 0.0  ;;  %v13717_v61 = vmax.f32 %v9346_v3, 0.0  ;;  %v13719_v46 = vmax.f32 %v9349_v7, 0.0  ;;  %v13718_v53 = vmax.f32 %v9358_v23, 0.0 }
  0xff   : > { %14045 = vst [vmem:[#allocation31_spill] sm:$0xff] %v9364_v11  ;;  %14046 = vst [vmem:[#allocation32_spill] sm:$0xff] %v9366_v12  ;;  %v600_v62 = vsel %vm576_vm0, %v525_v60, %v9364_v11  ;;  %8143 = vrot.lane.b32.xlu0 %v8142_v15, %s8868_s9  ;;  %v602_v42 = vsel %vm576_vm0, %v9366_v12, %v523_v57  ;;  %v937_v15 = vrot.slane %v9264_v54, %v9123_v21 }
 0x100   : > { %v781_v55 = vmul.f32 %v648_v2, %v600_v62  ;;  %v779_v1 = vmul.f32 %v640_v18, %v602_v42  ;;  %v8147_v60 = vpack.i.bf16 %v13717_v61, %v13716_v56  ;;  %v780_v57 = vmul.f32 %v644_v24, %v601_v47 }
 0x101   : > { %v941_v18 = vrot.slane %v9380_v45, %v9095_v13  ;;  %v933_v24 = vrot.slane %v9264_v54, %v9121_v20  ;;  %v9403_v62 = vrot.slane %v9196_v34, %v9076_v5  ;;  %v9411_v42 = vrot.slane %v9196_v34, %v9078_v6 }
 0x102   : > { %v1145_v0 = vrot.slane %v781_v55, %v9095_v13  ;;  %v820_v63 = vpop.permute.xlu0 %819  ;;  %v822_v33 = vpop.permute.xlu1 %821  ;;  %v1137_v29 = vrot.slane %v779_v1, %v9095_v13  ;;  %8148 = vrot.lane.b32.xlu1 %v8147_v60, %s8868_s9  ;;  %v8152_v1 = vpack.i.bf16 %v13718_v53, %v13719_v46  ;;  %v1141_v55 = vrot.slane %v780_v57, %v9095_v13 }
 0x103   : > { %833 = vrot.lane.b32.xlu0 %v9203_v35, %s8868_s9  ;;  %v893_v2 = vsel %vm869_vm1, %v820_v63, %v822_v33  ;;  %v9422_v61 = vrot.slane %v9196_v34, %v9087_v10  ;;  %v1323_v34 = vmul.f32 %v9234_v40, %v9154_v28  ;;  %v1321_v3 = vmul.f32 %v9234_v40, %v9144_v26 }
 0x104   : > { %v1073_v47 = vmul.f32 %v937_v15, %v893_v2  ;;  %v1246_v60 = vmul.f32 %v1145_v0, %v9236_v41  ;;  %v1278_v56 = vmul.f32 %v1145_v0, %v9245_v44  ;;  %v1244_v53 = vmul.f32 %v1137_v29, %v9236_v41 }
 0x105   : > { %v1276_v11 = vmul.f32 %v1137_v29, %v9245_v44 }
 0x106   : > { %v9416_v15 = vpop.permute.xlu0 %823  ;;  %v9418_v2 = vpop.permute.xlu1 %817  ;;  %8153 = vrot.lane.b32.xlu1 %v8152_v1, %s8868_s9  ;;  %v1353_v1 = vmul.f32 %v9243_v43, %v9144_v26  ;;  %v1385_v26 = vadd.f32 %v1321_v3, %v1244_v53 }
 0x107   : > { %14047 = vst [vmem:[#allocation33_spill] sm:$0xff] %v9416_v15  ;;  %14048 = vst [vmem:[#allocation34_spill] sm:$0xff] %v9418_v2  ;;  %v892_v46 = vsel %vm869_vm1, %v822_v33, %v9416_v15  ;;  %548 = vrot.lane.b32.xlu0 %v9403_v62, %s8867_s22  ;;  %v894_v0 = vsel %vm869_vm1, %v9418_v2, %v820_v63  ;;  %v1487_v33 = vrot.slane %v1073_v47, %v9095_v13 }
 0x108   : > { %v1074_v57 = vmul.f32 %v941_v18, %v892_v46  ;;  %v1072_v4 = vmul.f32 %v933_v24, %v894_v0  ;;  %v1355_v15 = vmul.f32 %v9243_v43, %v9154_v28  ;;  %v1245_v63 = vmul.f32 %v1141_v55, %v9236_v41 }
 0x109   : > { %v1277_v46 = vmul.f32 %v1141_v55, %v9245_v44  ;;  %v1387_v28 = vadd.f32 %v1323_v34, %v1246_v60  ;;  %v1591_v59 = vmul.f32 %v1487_v33, %v9252_v50  ;;  %v1417_v48 = vadd.f32 %v1353_v1, %v1276_v11 }
 0x10a   : > { %v1491_v18 = vrot.slane %v1074_v57, %v9095_v13  ;;  %v1483_v24 = vrot.slane %v1072_v4, %v9095_v13  ;;  %v9448_v0 = vpop.permute.xlu0 %530  ;;  %v533_v49 = vpop.permute.xlu1 %532  ;;  %546 = vrot.lane.b32.xlu1 %v9411_v42, %s8867_s22  ;;  %v1419_v29 = vadd.f32 %v1355_v15, %v1278_v56  ;;  %v1354_v60 = vmul.f32 %v9243_v43, %v9147_v27 }
 0x10b   : > { %544 = vrot.lane.b32.xlu0 %v9226_v38, %s8867_s22  ;;  %v1322_v38 = vmul.f32 %v9234_v40, %v9147_v27  ;;  %v1623_v3 = vmul.f32 %v1487_v33, %v9269_v58  ;;  %v660_v1 = vrot.slane %v9326_v16, %v9076_v5 }
 0x10c   : > { %v1592_v47 = vmul.f32 %v1491_v18, %v9252_v50  ;;  %v1624_v55 = vmul.f32 %v1491_v18, %v9269_v58  ;;  %v1590_v57 = vmul.f32 %v1483_v24, %v9252_v50  ;;  %v1622_v4 = vmul.f32 %v1483_v24, %v9269_v58 }
 0x10d   : > { %v1386_v33 = vadd.f32 %v1322_v38, %v1245_v63  ;;  %v1418_v24 = vadd.f32 %v1354_v60, %v1277_v46  ;;  %v664_v60 = vrot.slane %v9326_v16, %v9087_v10 }
 0x10e   : > { %v9464_v56 = vpop.permute.xlu0 %534  ;;  %v9466_v53 = vpop.permute.xlu1 %528  ;;  %v1656_v15 = vadd.f32 %v1592_v47, %v1387_v28  ;;  %v1688_v34 = vadd.f32 %v1624_v55, %v1419_v29  ;;  %v1654_v18 = vadd.f32 %v1590_v57, %v1385_v26  ;;  %550 = vrot.lane.b32.xlu1 %v9422_v61, %s8867_s22  ;;  %v1686_v11 = vadd.f32 %v1622_v4, %v1417_v48  ;;  %v9481_v29 = vld [vmem:[%s9055_s23 + $0x10] sm:$0xff] }
 0x10f   : > { %14049 = vst [vmem:[#allocation35_spill] sm:$0xff] %v9464_v56  ;;  %14050 = vst [vmem:[#allocation36_spill] sm:$0xff] %v9466_v53  ;;  %845 = vrot.lane.b32.xlu0 %v9422_v61, %s8868_s9  ;;  %v597_v28 = vsel %vm576_vm0, %v9448_v0, %v533_v49  ;;  %v9485_v26 = vrot.slane %v9481_v29, %v9121_v20  ;;  %v953_v48 = vrot.slane %v9380_v45, %v9076_v5 }
 0x110   : > { %v9475_v27 = vadd.f32 %v9319_v8, %v1656_v15  ;;  %v9490_v47 = vadd.f32 %v9321_v9, %v1688_v34  ;;  %v9494_v63 = vadd.f32 %v9319_v8, %v1654_v18  ;;  %v1655_v46 = vadd.f32 %v1591_v59, %v1386_v33 }
 0x111   : > { %v1687_v4 = vadd.f32 %v1623_v3, %v1418_v24  ;;  %v9506_v38 = vadd.f32 %v9321_v9, %v1686_v11  ;;  %v784_v18 = vmul.f32 %v660_v1, %v597_v28  ;;  %v596_v59 = vsel %vm576_vm0, %v533_v49, %v9464_v56 }
 0x112   : > { %14051 = vst [vmem:[#allocation37_spill] sm:$0xff] %v9475_v27  ;;  %14052 = vst [vmem:[#allocation38_spill] sm:$0xff] %v9490_v47  ;;  %v828_v55 = vpop.permute.xlu0 %827  ;;  %v830_v57 = vpop.permute.xlu1 %829  ;;  %843 = vrot.lane.b32.xlu1 %v9403_v62, %s8868_s9  ;;  %v13734_v34 = vmax.f32 %v9490_v47, 0.0  ;;  %v957_v33 = vrot.slane %v9380_v45, %v9087_v10  ;;  %v9515_v24 = vrot.slane %v9481_v29, %v9117_v19  ;;  %v14056_v2 = vmax.f32 %v9475_v27, 0.0 }
 0x113   : > { %14053 = vst [vmem:[#allocation39_spill] sm:$0xff] %v9494_v63  ;;  %554 = vrot.lane.b32.xlu0 %v9485_v26, %s8867_s22  ;;  %v889_v15 = vsel %vm869_vm1, %v828_v55, %v830_v57  ;;  %14054 = vst [vmem:[#allocation40_spill] sm:$0xff] %v9506_v38  ;;  %v13738_v28 = vmax.f32 %v9494_v63, 0.0  ;;  %v785_v56 = vmul.f32 %v664_v60, %v596_v59 }
 0x114   : > { %v1077_v3 = vmul.f32 %v953_v48, %v889_v15  ;;  %14055 = vst [vmem:[#allocation41_spill] sm:$0xff] %v9515_v24  ;;  %v8162_v22 = vpack.i.bf16 %v13734_v34, %v14056_v2  ;;  %v9528_v48 = vadd.f32 %v9319_v8, %v1655_v46  ;;  %v9531_v15 = vadd.f32 %v9321_v9, %v1687_v4 }
 0x115   : > { %v656_v27 = vrot.slane %v9326_v16, %v9078_v6  ;;  %v1157_v34 = vrot.slane %v784_v18, %v9095_v13  ;;  %v598_v46 = vsel %vm576_vm0, %v9466_v53, %v9448_v0  ;;  %v949_v59 = vrot.slane %v9380_v45, %v9078_v6 }
 0x116   : > { %v9521_v11 = vpop.permute.xlu0 %831  ;;  %v9523_v1 = vpop.permute.xlu1 %825  ;;  %14059 = vst [vmem:[#allocation44_spill] sm:$0xff] %v9528_v48  ;;  %14060 = vst [vmem:[#allocation45_spill] sm:$0xff] %v9531_v15  ;;  %847 = vrot.lane.b32.xlu1 %v9515_v24, %s8868_s9  ;;  %v1503_v4 = vrot.slane %v1077_v3, %v9095_v13  ;;  %v14061_v18 = vmax.f32 %v9506_v38, 0.0  ;;  %v13741_v3 = vmax.f32 %v9531_v15, 0.0 }
 0x117   : > { %14057 = vst [vmem:[#allocation42_spill] sm:$0xff] %v9521_v11  ;;  %14058 = vst [vmem:[#allocation43_spill] sm:$0xff] %v9523_v1  ;;  %v888_v2 = vsel %vm869_vm1, %v830_v57, %v9521_v11  ;;  %8163 = vrot.lane.b32.xlu0 %v8162_v22, %s8868_s9  ;;  %v890_v57 = vsel %vm869_vm1, %v9523_v1, %v828_v55  ;;  %v13742_v22 = vmax.f32 %v9528_v48, 0.0 }
 0x118   : > { %v1078_v60 = vmul.f32 %v957_v33, %v888_v2  ;;  %v8167_v47 = vpack.i.bf16 %v14061_v18, %v13738_v28  ;;  %v9563_v33 = vld [vmem:[%s9055_s23 + $0x18] sm:$0xff]  ;;  %v1161_v2 = vrot.slane %v785_v56, %v9095_v13  ;;  %v783_v11 = vmul.f32 %v656_v27, %v598_v46 }
 0x119   : > { %v1249_v55 = vmul.f32 %v1157_v34, %v9236_v41  ;;  %v1281_v1 = vmul.f32 %v1157_v34, %v9245_v44  ;;  %v1076_v28 = vmul.f32 %v949_v59, %v890_v57  ;;  %v8157_v53 = vpack.i.bf16 %v13741_v3, %v13742_v22 }
 0x11a   : > { %v9552_v49 = vpop.permute.xlu0 %538  ;;  %v9558_v0 = vpop.permute.xlu1 %540  ;;  %841 = vrot.lane.b32.xlu1 %v9411_v42, %s8868_s9  ;;  %v1507_v18 = vrot.slane %v1078_v60, %v9095_v13  ;;  %v9578_v56 = vrot.slane %v9563_v33, %v9095_v13  ;;  %v1595_v27 = vmul.f32 %v1503_v4, %v9252_v50  ;;  %v1627_v46 = vmul.f32 %v1503_v4, %v9269_v58 }
 0x11b   : > { %8168 = vrot.lane.b32.xlu0 %v8167_v47, %s8868_s9  ;;  %v1326_v47 = vmul.f32 %v9234_v40, %v9175_v31  ;;  %v1358_v34 = vmul.f32 %v9243_v43, %v9175_v31  ;;  %v1250_v60 = vmul.f32 %v1161_v2, %v9236_v41  ;;  %v1153_v59 = vrot.slane %v783_v11, %v9095_v13  ;;  %v9601_v31 = vld [vmem:[%s13702_s5 + $0x40] ss:$4 sm:$0xff] }
 0x11c   : > { %v1282_v3 = vmul.f32 %v1161_v2, %v9245_v44  ;;  %v1596_v15 = vmul.f32 %v1507_v18, %v9252_v50  ;;  %v1499_v48 = vrot.slane %v1076_v28, %v9095_v13  ;;  %v1327_v11 = vmul.f32 %v9234_v40, %v9182_v32 }
 0x11d   : > { %v1390_v4 = vadd.f32 %v1326_v47, %v1249_v55  ;;  %v1422_v22 = vadd.f32 %v1358_v34, %v1281_v1  ;;  %v1628_v2 = vmul.f32 %v1507_v18, %v9269_v58  ;;  %v1359_v28 = vmul.f32 %v9243_v43, %v9182_v32 }
 0x11e   : > { %v9582_v63 = vpop.permute.xlu0 %542  ;;  %8158 = vrot.lane.b32.xlu1 %v8157_v53, %s8868_s9  ;;  %v9591_v57 = vpop.permute.xlu1 %536  ;;  %v9605_v53 = vrot.slane %v9481_v29, %v9123_v21  ;;  %v1248_v34 = vmul.f32 %v1153_v59, %v9236_v41  ;;  %v1280_v38 = vmul.f32 %v1153_v59, %v9245_v44  ;;  %v9621_v29 = vld [vmem:[%s13702_s5 + $0x41] ss:$4 sm:$0xff]  ;;  %v9625_v18 = vrot.slane %v9563_v33, %v9097_v14 }
 0x11f   : > { %14062 = vst [vmem:[#allocation46_spill] sm:$0xff] %v9582_v63  ;;  %14063 = vst [vmem:[#allocation47_spill] sm:$0xff] %v9591_v57  ;;  %558 = vrot.lane.b32.xlu0 %v9578_v56, %s8867_s22  ;;  %v1659_v1 = vadd.f32 %v1595_v27, %v1390_v4  ;;  %v1691_v47 = vadd.f32 %v1627_v46, %v1422_v22  ;;  %v1391_v22 = vadd.f32 %v1327_v11, %v1250_v60 }
 0x120   : > { %14064 = vst [vmem:[#allocation48_spill] sm:$0xff] %v9605_v53  ;;  %14065 = vst [vmem:[#allocation49_spill] sm:$0xff] %v9625_v18  ;;  %v680_v32 = vrot.slane %v9601_v31, %v9095_v13  ;;  %v1423_v27 = vadd.f32 %v1359_v28, %v1282_v3  ;;  %v1325_v46 = vmul.f32 %v9234_v40, %v9172_v30 }
 0x121   : > { %v1357_v59 = vmul.f32 %v9243_v43, %v9172_v30  ;;  %v1594_v4 = vmul.f32 %v1499_v48, %v9252_v50  ;;  %v1626_v52 = vmul.f32 %v1499_v48, %v9269_v58  ;;  %v592_v60 = vsel %vm576_vm0, %v9558_v0, %v9582_v63 }
 0x122   : > { %v9610_v55 = vpop.permute.xlu0 %835  ;;  %556 = vrot.lane.b32.xlu1 %v9605_v53, %s8867_s22  ;;  %v838_v11 = vpop.permute.xlu1 %837  ;;  %v1660_v14 = vadd.f32 %v1596_v15, %v1391_v22  ;;  %v973_v3 = vrot.slane %v9621_v29, %v9095_v13  ;;  %v9646_v12 = vadd.f32 %v9319_v8, %v1659_v1  ;;  %v9649_v30 = vadd.f32 %v9321_v9, %v1691_v47 }
 0x123   : > { %851 = vrot.lane.b32.xlu0 %v9605_v53, %s8868_s9  ;;  %v1692_v53 = vadd.f32 %v1628_v2, %v1423_v27  ;;  %v676_v48 = vrot.slane %v9326_v16, %v9123_v21  ;;  %v1389_v15 = vadd.f32 %v1325_v46, %v1248_v34  ;;  %v1421_v22 = vadd.f32 %v1357_v59, %v1280_v38 }
 0x124   : > { %14067 = vst [vmem:[#allocation51_spill] sm:$0xff] %v9646_v12  ;;  %14068 = vst [vmem:[#allocation52_spill] sm:$0xff] %v9649_v30  ;;  %v593_v1 = vsel %vm576_vm0, %v9552_v49, %v9558_v0  ;;  %v789_v47 = vmul.f32 %v680_v32, %v592_v60  ;;  %v969_v2 = vrot.slane %v9380_v45, %v9123_v21  ;;  %v13759_v59 = vmax.f32 %v9646_v12, 0.0 }
 0x125   : > { %v885_v27 = vsel %vm869_vm1, %v9610_v55, %v838_v11  ;;  %v9670_v34 = vadd.f32 %v9319_v8, %v1660_v14  ;;  %v9673_v38 = vadd.f32 %v9321_v9, %v1692_v53  ;;  %v1658_v46 = vadd.f32 %v1594_v4, %v1389_v15  ;;  %v8722_v14 = vld [vmem:[%s9055_s23] sm:$0xff] }
 0x126   : > { %v9643_v28 = vpop.permute.xlu0 %839  ;;  %552 = vrot.lane.b32.xlu1 %v9515_v24, %s8867_s22  ;;  %v1690_v0 = vadd.f32 %v1626_v52, %v1421_v22  ;;  %v13756_v60 = vmax.f32 %v9649_v30, 0.0  ;;  %v1081_v24 = vmul.f32 %v969_v2, %v885_v27  ;;  %v9684_v53 = vrot.slane %v8722_v14, %v9095_v13  ;;  %v14123_v30 = vld [vmem:[#allocation40_spill] sm:$0xff] }
 0x127   : > { %14066 = vst [vmem:[#allocation50_spill] sm:$0xff] %v9643_v28  ;;  %v884_v63 = vsel %vm869_vm1, %v838_v11, %v9643_v28  ;;  %855 = vrot.lane.b32.xlu0 %v9625_v18, %s8868_s9  ;;  %14069 = vst [vmem:[#allocation53_spill] sm:$0xff] %v9670_v34  ;;  %v788_v28 = vmul.f32 %v676_v48, %v593_v1  ;;  %v1177_v11 = vrot.slane %v789_v47, %v9095_v13 }
 0x128   : > { %14070 = vst [vmem:[#allocation54_spill] sm:$0xff] %v9673_v38  ;;  %v1082_v32 = vmul.f32 %v973_v3, %v884_v63  ;;  %v13757_v52 = vmax.f32 %v9670_v34, 0.0  ;;  %v13758_v63 = vmax.f32 %v9673_v38, 0.0  ;;  %v9689_v4 = vadd.f32 %v9319_v8, %v1658_v46 }
 0x129   : > { %v9692_v3 = vadd.f32 %v9321_v9, %v1690_v0  ;;  %v8172_v15 = vpack.i.bf16 %v13756_v60, %v13759_v59  ;;  %v1173_v22 = vrot.slane %v788_v28, %v9095_v13  ;;  %v1254_v1 = vmul.f32 %v1177_v11, %v9236_v41 }
 0x12a   : > { %853 = vrot.lane.b32.xlu1 %v9578_v56, %s8868_s9  ;;  %14071 = vst [vmem:[#allocation55_spill] sm:$0xff] %v9689_v4  ;;  %v1523_v48 = vrot.slane %v1082_v32, %v9095_v13  ;;  %v1286_v47 = vmul.f32 %v1177_v11, %v9245_v44  ;;  %v9707_v2 = vrot.slane %v9563_v33, %v9123_v21  ;;  %v13766_v46 = vmax.f32 %v9689_v4, 0.0 }
 0x12b   : > { %849 = vrot.lane.b32.xlu0 %v9485_v26, %s8868_s9  ;;  %14072 = vst [vmem:[#allocation56_spill] sm:$0xff] %v9692_v3  ;;  %v1519_v27 = vrot.slane %v1081_v24, %v9095_v13  ;;  %v8177_v28 = vpack.i.bf16 %v13758_v63, %v13757_v52  ;;  %v1331_v14 = vmul.f32 %v9234_v40, %v9214_v37 }
 0x12c   : > { %v1600_v32 = vmul.f32 %v1523_v48, %v9252_v50  ;;  %v1632_v11 = vmul.f32 %v1523_v48, %v9269_v58  ;;  %v1253_v24 = vmul.f32 %v1173_v22, %v9236_v41  ;;  %v1285_v60 = vmul.f32 %v1173_v22, %v9245_v44 }
 0x12d   : > { %v1395_v52 = vadd.f32 %v1331_v14, %v1254_v1  ;;  %v1330_v48 = vmul.f32 %v9234_v40, %v9206_v36  ;;  %v1599_v59 = vmul.f32 %v1519_v27, %v9252_v50  ;;  %v1631_v0 = vmul.f32 %v1519_v27, %v9269_v58 }
 0x12e   : > { %510 = vrot.lane.b32.xlu1 %v9684_v53, %s8867_s22  ;;  %v1362_v22 = vmul.f32 %v9243_v43, %v9206_v36  ;;  %v9742_v27 = vrot.slane %v9563_v33, %v9076_v5 }
 0x12f   : > { %8173 = vrot.lane.b32.xlu0 %v8172_v15, %s8868_s9  ;;  %v1363_v15 = vmul.f32 %v9243_v43, %v9214_v37  ;;  %v14073_v37 = vmax.f32 %v9692_v3, 0.0  ;;  %v1394_v1 = vadd.f32 %v1330_v48, %v1253_v24  ;;  %v9794_v48 = vrot.slane %v9563_v33, %v9117_v19 }
 0x131   : > { %v1427_v63 = vadd.f32 %v1363_v15, %v1286_v47  ;;  %v8182_v34 = vpack.i.bf16 %v14073_v37, %v13766_v46  ;;  %v1426_v47 = vadd.f32 %v1362_v22, %v1285_v60  ;;  %v1663_v14 = vadd.f32 %v1599_v59, %v1394_v1  ;;  %14079 = vst [vmem:[#allocation62_spill] sm:$0xff] %v9794_v48 }
 0x132   : > { %8178 = vrot.lane.b32.xlu1 %v8177_v28, %s8868_s9  ;;  %v1664_v28 = vadd.f32 %v1600_v32, %v1395_v52  ;;  %v672_v22 = vrot.slane %v9326_v16, %v9121_v20  ;;  %v14083_v46 = vmax.f32 %v9333_v25, 0.0  ;;  %v1361_v25 = vmul.f32 %v9243_v43, %v9203_v35 }
 0x133   : > { %572 = vrot.lane.b32.xlu0 %v9707_v2, %s8867_s22  ;;  %v1696_v38 = vadd.f32 %v1632_v11, %v1427_v63  ;;  %v1695_v15 = vadd.f32 %v1631_v0, %v1426_v47  ;;  %v9759_v59 = vadd.f32 %v9319_v8, %v1663_v14  ;;  %v9772_v63 = vrot.slane %v9563_v33, %v9087_v10 }
 0x134   : > { %v9745_v37 = vadd.f32 %v9319_v8, %v1664_v28  ;;  %v594_v28 = vsel %vm576_vm0, %v9591_v57, %v9552_v49 }
 0x135   : > { %v9748_v36 = vadd.f32 %v9321_v9, %v1696_v38  ;;  %14077 = vst [vmem:[#allocation60_spill] sm:$0xff] %v9759_v59  ;;  %v9762_v60 = vadd.f32 %v9321_v9, %v1695_v15  ;;  %v13765_v0 = vmax.f32 %v9759_v59, 0.0  ;;  %v787_v1 = vmul.f32 %v672_v22, %v594_v28 }
 0x136   : > { %8183 = vrot.lane.b32.xlu1 %v8182_v34, %s8868_s9  ;;  %14074 = vst [vmem:[#allocation57_spill] sm:$0xff] %v9745_v37  ;;  %v9756_v34 = vrot.slane %v9563_v33, %v9078_v6  ;;  %v13762_v52 = vmax.f32 %v9745_v37, 0.0  ;;  %v965_v15 = vrot.slane %v9380_v45, %v9121_v20 }
 0x137   : > { %805 = vrot.lane.b32.xlu0 %v9684_v53, %s8868_s9  ;;  %14075 = vst [vmem:[#allocation58_spill] sm:$0xff] %v9748_v36  ;;  %14078 = vst [vmem:[#allocation61_spill] sm:$0xff] %v9762_v60  ;;  %v13763_v38 = vmax.f32 %v9748_v36, 0.0  ;;  %v13764_v32 = vmax.f32 %v9762_v60, 0.0  ;;  %v1169_v14 = vrot.slane %v787_v1, %v9095_v13  ;;  %v1329_v36 = vmul.f32 %v9234_v40, %v9203_v35 }
 0x138   : > { %14076 = vst [vmem:[#allocation59_spill] sm:$0xff] %v9756_v34 }
 0x139   : > { %v8192_v11 = vpack.i.bf16 %v13763_v38, %v13762_v52  ;;  %v8187_v24 = vpack.i.bf16 %v13764_v32, %v13765_v0  ;;  %v1252_v28 = vmul.f32 %v1169_v14, %v9236_v41 }
 0x13a   : > { %807 = vrot.lane.b32.xlu1 %v9112_v17, %s8868_s9 }
 0x13b   : > { %564 = vrot.lane.b32.xlu0 %v9742_v27, %s8867_s22 }
 0x13e   : > { %562 = vrot.lane.b32.xlu1 %v9756_v34, %s8867_s22 }
 0x13f   : > { %560 = vrot.lane.b32.xlu0 %v9625_v18, %s8867_s22 }
 0x142   : > { %566 = vrot.lane.b32.xlu1 %v9772_v63, %s8867_s22 }
 0x143   : > { %8193 = vrot.lane.b32.xlu0 %v8192_v11, %s8868_s9 }
 0x146   : > { %8188 = vrot.lane.b32.xlu1 %v8187_v24, %s8868_s9 }
 0x147   : > { %861 = vrot.lane.b32.xlu0 %v9772_v63, %s8868_s9 }
 0x14a   : > { %859 = vrot.lane.b32.xlu1 %v9742_v27, %s8868_s9 }
 0x14e   : > { %863 = vrot.lane.b32.xlu1 %v9794_v48, %s8868_s9 }
 0x152   : > { %857 = vrot.lane.b32.xlu1 %v9756_v34, %s8868_s9 }
 0x156   : > { %568 = vrot.lane.b32.xlu1 %v9794_v48, %s8867_s22  ;;  %v692_v48 = vrot.slane %v9601_v31, %v9076_v5 }
 0x171   : > { %v8144_v47 = vpop.permute.xlu0 %8143 }
 0x172   : > { %v8146_v11 = vunpack.i.h.bf16 %v8144_v47  ;;  %v8145_v38 = vunpack.i.l.bf16 %v8144_v47 }
 0x174   : > { %v9813_v52 = vpop.permute.xlu1 %8148 }
 0x175   : > { %v9811_v24 = vpop.permute.xlu0 %833  ;;  %14081 = vst [vmem:[#allocation64_spill] sm:$0xff] %v9813_v52  ;;  %v13772_v49 = vunpack.i.h.bf16 %v9813_v52  ;;  %v13769_v22 = vunpack.i.l.bf16 %v9813_v52 }
 0x176   : > { %14080 = vst [vmem:[#allocation63_spill] sm:$0xff] %v9811_v24  ;;  %v886_v16 = vsel %vm869_vm1, %v9811_v24, %v9610_v55  ;;  %v14086_v24 = vmax.f32 %v9349_v7, 0.0  ;;  %v9873_v7 = vld [vmem:[%s13702_s5] ss:$4 sm:$0xff] }
 0x177   : > { %v1080_v1 = vmul.f32 %v965_v15, %v886_v16  ;;  %v2034_v45 = vsel %vm869_vm1, %v8145_v38, %v13769_v22  ;;  %v2035_v47 = vsel %vm869_vm1, %v8146_v11, %v13772_v49  ;;  %v14084_v15 = vmax.f32 %v9336_v51, 0.0 }
 0x178   : > { %v9831_v0 = vpop.permute.xlu1 %8153  ;;  %v2047_v37 = vmax.f32 %v14083_v46, %v2034_v45  ;;  %v1284_v22 = vmul.f32 %v1169_v14, %v9245_v44  ;;  %v1393_v46 = vadd.f32 %v1329_v36, %v1252_v28  ;;  %v14087_v36 = vmax.f32 %v9358_v23, 0.0 }
 0x179   : > { %v1515_v32 = vrot.slane %v1080_v1, %v9095_v13  ;;  %v549_v55 = vpop.permute.xlu0 %548  ;;  %14082 = vst [vmem:[#allocation65_spill] sm:$0xff] %v9831_v0  ;;  %v2079_v16 = vmax.f32 %v14084_v15, %v2035_v47  ;;  %v13778_v52 = vunpack.i.h.bf16 %v9831_v0  ;;  %v13779_v49 = vunpack.i.l.bf16 %v9831_v0 }
 0x17a   : > { %v14092_v23 = vmov 0  }
 0x17b   : > { %v1598_v1 = vmul.f32 %v1515_v32, %v9252_v50  ;;  %v1630_v51 = vmul.f32 %v1515_v32, %v9269_v58  ;;  %v2117_v45 = vpack.c.bf16 %v2079_v16, %v2047_v37  ;;  %v2036_v14 = vsel %vm869_vm1, %v13779_v49, %v8145_v38 }
 0x17c   : > { %v2037_v47 = vsel %vm869_vm1, %v13778_v52, %v8146_v11  ;;  %v547_v18 = vpop.permute.xlu1 %546  ;;  %v2046_v35 = vmax.f32 %v14086_v24, %v2036_v14  ;;  %v9864_v37 = vrot.slane %v9563_v33, %v9121_v20  ;;  %v688_v38 = vrot.slane %v9601_v31, %v9078_v6 }
 0x17d   : > { %v9856_v15 = vpop.permute.xlu0 %544  ;;  %v2078_v32 = vmax.f32 %v14087_v36, %v2037_v47  ;;  %v589_v28 = vsel %vm576_vm0, %v547_v18, %v549_v55  ;;  %2234 = vmatprep.subr.bf16.mxu1 %v2117_v45  ;;  %v1425_v11 = vadd.f32 %v1361_v25, %v1284_v22  ;;  %v1662_v16 = vadd.f32 %v1598_v1, %v1393_v46  ;;  %v9890_v25 = vld [vmem:[%s13700_s3] sm:$0xff]  }
 0x17e   : > { %14085 = vst [vmem:[#allocation66_spill] sm:$0xff] %v9856_v15  ;;  %v590_v33 = vsel %vm576_vm0, %v9856_v15, %v547_v18  ;;  %v792_v24 = vmul.f32 %v692_v48, %v589_v28  ;;  %v1334_v1 = vmul.f32 %v9234_v40, %v9403_v62  ;;  %v1366_v18 = vmul.f32 %v9243_v43, %v9403_v62 }
 0x17f   : > { %v2116_v14 = vpack.c.bf16 %v2078_v32, %v2046_v35  ;;  %v1694_v45 = vadd.f32 %v1630_v51, %v1425_v11  ;;  %v9883_v22 = vadd.f32 %v9319_v8, %v1662_v16  ;;  %v9898_v48 = vmul.f32 %v9234_v40, %v9422_v61 }
 0x180   : > { %v9892_v36 = vpop.permute.xlu1 %550  ;;  %v9902_v51 = vmul.f32 %v9243_v43, %v9422_v61  ;;  %v791_v35 = vmul.f32 %v688_v38, %v590_v33  ;;  %v9910_v11 = vmul.f32 %v9234_v40, %v9411_v42  ;;  %v1189_v62 = vrot.slane %v792_v24, %v9095_v13 }
 0x181   : > { %14088 = vst [vmem:[#allocation67_spill] sm:$0xff] %v9883_v22  ;;  %v846_v46 = vpop.permute.xlu0 %845  ;;  %14089 = vst [vmem:[#allocation68_spill] sm:$0xff] %v9892_v36  ;;  %2235 = vmatpush1.bf16.msra.mxu1 %v2116_v14  ;;  %v9905_v32 = vadd.f32 %v9321_v9, %v1694_v45  ;;  %v985_v16 = vrot.slane %v9621_v29, %v9076_v5  ;;  %v9917_v14 = vmul.f32 %v9243_v43, %v9411_v42  ;;  %v14091_v45 = vld [vmem:[#allocation48_spill] sm:$0xff] }
 0x182   : > { %v9921_v61 = vmul.f32 %v9234_v40, %v9578_v56  ;;  %v696_v38 = vrot.slane %v9601_v31, %v9087_v10  ;;  %v9930_v24 = vmul.f32 %v9243_v43, %v9578_v56  ;;  %v9934_v42 = vmul.f32 %v9234_v40, %v14091_v45 }
 0x183   : > { %14090 = vst [vmem:[#allocation69_spill] sm:$0xff] %v9905_v32  ;;  %v588_v52 = vsel %vm576_vm0, %v549_v55, %v9892_v36  ;;  %v9944_v33 = vmul.f32 %v9243_v43, %v14091_v45  ;;  %v9948_v56 = vmul.f32 %v9234_v40, %v9485_v26  ;;  %v9952_v28 = vmul.f32 %v9243_v43, %v9485_v26 }
 0x184   : > { %7415 = vmatmul.mubr.msk.bf16.vlgmr.msra.gmra.mrb[0].mxu1 %vm2161_vm2, %v9890_v25  ;;  %v844_v47 = vpop.permute.xlu1 %843  ;;  %v1185_v0 = vrot.slane %v791_v35, %v9095_v13  ;;  %v14095_v36 = vmax.f32 %v9883_v22, 0.0  ;;  %v14096_v15 = vmax.f32 %v9905_v32, 0.0  ;;  %v9963_v45 = vmul.f32 %v9234_v40, %v9112_v17  ;;  %v14106_v22 = vld [vmem:[#allocation25_spill] sm:$0xff] }
 0x185   : > { %v9939_v49 = vpop.permute.xlu0 %554  ;;  %2276 = vmatprep.mubr.bf16.mxu1 %v14092_v23  ;;  %14093 = vst [vmem:[#allocation48_spill] sm:$0xff] %v9948_v56  ;;  %14094 = vst [vmem:[#allocation70_spill] sm:$0xff] %v9952_v28  ;;  %v881_v55 = vsel %vm869_vm1, %v844_v47, %v846_v46  ;;  %v1257_v34 = vmul.f32 %v1189_v62, %v9236_v41  ;;  %v1289_v60 = vmul.f32 %v1189_v62, %v9245_v44 }
 0x186   : > { %v8197_v57 = vpack.i.bf16 %v14096_v15, %v14095_v36  ;;  %14097 = vst [vmem:[#allocation71_spill] sm:$0xff] %v9963_v45  ;;  %v1085_v26 = vmul.f32 %v985_v16, %v881_v55  ;;  %v9969_v35 = vmul.f32 %v9243_v43, %v9112_v17  ;;  %v793_v59 = vmul.f32 %v696_v38, %v588_v52  ;;  %v9977_v15 = vld [vmem:[%s13700_s3 + $0x8] sm:$0xff]  }
 0x187   : > { %v989_v32 = vrot.slane %v9621_v29, %v9087_v10  ;;  %v9981_v36 = vmul.f32 %v9234_v40, %v9684_v53  ;;  %v9985_v62 = vmul.f32 %v9243_v43, %v9684_v53  ;;  %v9996_v16 = vmul.f32 %v9243_v43, %v9742_v27  ;;  %v14105_v55 = vld [vmem:[#allocation32_spill] sm:$0xff] }
 0x188   : > { %14098 = vst [vmem:[#allocation72_spill] sm:$0xff] %v9969_v35  ;;  %8198 = vrot.lane.b32.xlu0 %v8197_v57, %s8868_s9  ;;  %v1535_v17 = vrot.slane %v1085_v26, %v9095_v13  ;;  %v9988_v52 = vpop.permute.xlu1 %847  ;;  %v9992_v57 = vmul.f32 %v9234_v40, %v9742_v27  ;;  %v10000_v38 = vmul.f32 %v9234_v40, %v9772_v63 }
 0x189   : > { %14099 = vst [vmem:[#allocation73_spill] sm:$0xff] %v9981_v36  ;;  %14100 = vst [vmem:[#allocation74_spill] sm:$0xff] %v9985_v62  ;;  %v603_v53 = vsel %vm576_vm0, %v14106_v22, %v14105_v55  ;;  %v1256_v26 = vmul.f32 %v1185_v0, %v9236_v41  ;;  %v10007_v62 = vpop.permute.xlu0 %8163  ;;  %v981_v27 = vrot.slane %v9621_v29, %v9078_v6  ;;  %v10019_v36 = vld [vmem:[%s13702_s5 + $0x60] ss:$4 sm:$0xff] }
 0x18a   : > { %14101 = vst [vmem:[#allocation75_spill] sm:$0xff] %v9988_v52  ;;  %14102 = vst [vmem:[#allocation76_spill] sm:$0xff] %v9992_v57  ;;  %v880_v57 = vsel %vm869_vm1, %v846_v46, %v9988_v52  ;;  %v1398_v22 = vadd.f32 %v1334_v1, %v1257_v34  ;;  %v1430_v55 = vadd.f32 %v1366_v18, %v1289_v60  ;;  %v14110_v34 = vld [vmem:[#allocation19_spill] sm:$0xff]  ;;  %v14122_v56 = vunpack.i.l.bf16 %v10007_v62 }
 0x18b   : > { %14103 = vst [vmem:[#allocation77_spill] sm:$0xff] %v9996_v16  ;;  %14104 = vst [vmem:[#allocation78_spill] sm:$0xff] %v10000_v38  ;;  %v1603_v16 = vmul.f32 %v1535_v17, %v9252_v50  ;;  %v1635_v38 = vmul.f32 %v1535_v17, %v9269_v58  ;;  %v1193_v35 = vrot.slane %v793_v59, %v9095_v13 }
 0x18c   : > { %14107 = vst [vmem:[#allocation32_spill] sm:$0xff] %v10007_v62  ;;  %v1086_v45 = vmul.f32 %v989_v32, %v880_v57  ;;  %570 = vrot.lane.b32.xlu0 %v9864_v37, %s8867_s22  ;;  %7416 = vmatmul.mubr.msk.bf16.gmra.mrb[4].mxu1 %vm2161_vm2, %v9977_v15  ;;  %v10028_v46 = vmul.f32 %v9243_v43, %v9772_v63  ;;  %v10030_v17 = vpop.permute.xlu1 %841  ;;  %v14113_v63 = vld [vmem:[#allocation34_spill] sm:$0xff]  ;;  %v14114_v32 = vld [vmem:[#allocation27_spill] sm:$0xff]  ;;  %s8870_s22 = smov 126  }
 0x18d   : > { %14109 = vst [vmem:[#allocation79_spill] sm:$0xff] %v10030_v17  ;;  %v1667_v52 = vadd.f32 %v1603_v16, %v1398_v22  ;;  %v1699_v28 = vadd.f32 %v1635_v38, %v1430_v55  ;;  %2286 = vmatprep.mubr.bf16.mxu1 %v14092_v23  ;;  %v10035_v59 = vmul.f32 %v9234_v40, %v14110_v34  ;;  %v10048_v16 = vpop.permute.xlu0 %8168 }
 0x18e   : > { %14108 = vst [vmem:[#allocation25_spill] sm:$0xff] %v10028_v46  ;;  %v10039_v60 = vmul.f32 %v9243_v43, %v14110_v34  ;;  %v14112_v1 = vrot.slane %v9873_v7, %v9117_v19  ;;  %v895_v57 = vsel %vm869_vm1, %v14114_v32, %v14113_v63  ;;  %14115 = vst [vmem:[#allocation34_spill] sm:$0xff] %v10048_v16  ;;  %v14121_v10 = vunpack.i.l.bf16 %v10048_v16 }
 0x18f   : > { %v882_v38 = vsel %vm869_vm1, %v10030_v17, %v844_v47  ;;  %v712_v22 = vrot.slane %v10019_v36, %v9095_v13  ;;  %v1288_v55 = vmul.f32 %v1185_v0, %v9245_v44  ;;  %v1539_v34 = vrot.slane %v1086_v45, %v9095_v13  ;;  %v10069_v47 = vld [vmem:[%s13700_s3 + $0x10] sm:$0xff]  }
 0x190   : > { %14111 = vst [vmem:[#allocation19_spill] sm:$0xff] %v10039_v60  ;;  %v778_v18 = vmul.f32 %v14112_v1, %v603_v53  ;;  %v1084_v43 = vmul.f32 %v981_v27, %v882_v38  ;;  %v1397_v53 = vadd.f32 %v9910_v11, %v1256_v26  ;;  %v1258_v1 = vmul.f32 %v1193_v35, %v9236_v41 }
 0x191   : > { %v1290_v63 = vmul.f32 %v1193_v35, %v9245_v44  ;;  %v10061_v32 = vadd.f32 %v9319_v8, %v1667_v52  ;;  %v10064_v40 = vadd.f32 %v9321_v9, %v1699_v28  ;;  %14118 = vst [vmem:[#allocation81_spill] sm:$0xff] %v10069_v47  ;;  %v8159_v35 = vpop.permute.xlu1 %8158  ;;  %v10075_v27 = vpop.permute.xlu0 %558  ;;  %v1604_v60 = vmul.f32 %v1539_v34, %v9252_v50 }
 0x192   : > { %v1531_v26 = vrot.slane %v1084_v43, %v9095_v13  ;;  %14119 = vst [vmem:[#allocation82_spill] sm:$0xff] %v10075_v27  ;;  %v8161_v52 = vunpack.i.h.bf16 %v8159_v35  ;;  %v8160_v38 = vunpack.i.l.bf16 %v8159_v35  ;;  %v1636_v0 = vmul.f32 %v1539_v34, %v9269_v58 }
 0x193   : > { %14116 = vst [vmem:[#allocation27_spill] sm:$0xff] %v10061_v32  ;;  %14117 = vst [vmem:[#allocation80_spill] sm:$0xff] %v10064_v40  ;;  %v13808_v28 = vmax.f32 %v10061_v32, 0.0  ;;  %v13807_v17 = vmax.f32 %v10064_v40, 0.0  ;;  %v14120_v11 = vunpack.i.h.bf16 %v10048_v16  ;;  %v14125_v16 = vld [vmem:[#allocation39_spill] sm:$0xff]  ;;  %v1399_v32 = vadd.f32 %v9898_v48, %v1258_v1 }
 0x194   : > { %v1602_v45 = vmul.f32 %v1531_v26, %v9252_v50  ;;  %v2028_v35 = vsel %vm869_vm1, %v14121_v10, %v8160_v38  ;;  %v2026_v34 = vsel %vm869_vm1, %v8160_v38, %v14122_v56  ;;  %7417 = vmatmul.mubr.msk.bf16.gmra.mrb[8].mxu1 %vm2161_vm2, %v10069_v47  ;;  %v14126_v4 = vmax.f32 %v14125_v16, 0.0  ;;  %v14128_v16 = vld [vmem:[#allocation44_spill] sm:$0xff]  ;;  %v14131_v38 = vld [vmem:[#allocation45_spill] sm:$0xff] }
 0x195   : > { %v2029_v43 = vsel %vm869_vm1, %v14120_v11, %v8161_v52  ;;  %v8202_v46 = vpack.i.bf16 %v13807_v17, %v13808_v28  ;;  %v14124_v11 = vmax.f32 %v14123_v30, 0.0  ;;  %v557_v10 = vpop.permute.xlu1 %556  ;;  %v1431_v40 = vadd.f32 %v9902_v51, %v1290_v63  ;;  %2392 = vmatprep.mubr.bf16.mxu1 %v14092_v23  ;;  %v852_v28 = vpop.permute.xlu0 %851 }
 0x196   : > { %v2050_v3 = vmax.f32 %v14126_v4, %v2028_v35  ;;  %v1634_v17 = vmul.f32 %v1531_v26, %v9269_v58  ;;  %v584_v56 = vsel %vm576_vm0, %v557_v10, %v10075_v27  ;;  %v14127_v30 = vunpack.i.h.bf16 %v10007_v62  ;;  %v10128_v62 = vld [vmem:[%s13702_s5 + $0x61] ss:$4 sm:$0xff] }
 0x197   : > { %v2082_v12 = vmax.f32 %v14124_v11, %v2029_v43  ;;  %8203 = vrot.lane.b32.xlu0 %v8202_v46, %s8868_s9  ;;  %v14129_v48 = vmax.f32 %v14128_v16, 0.0  ;;  %v1133_v51 = vrot.slane %v778_v18, %v9095_v13  ;;  %v14130_v63 = vrot.slane %v9264_v54, %v9117_v19 }
 0x198   : > { %v2027_v4 = vsel %vm869_vm1, %v8161_v52, %v14127_v30  ;;  %v14132_v43 = vmax.f32 %v14131_v38, 0.0  ;;  %v1668_v11 = vadd.f32 %v1604_v60, %v1399_v32  ;;  %v1700_v27 = vadd.f32 %v1636_v0, %v1431_v40 }
 0x199   : > { %v2051_v1 = vmax.f32 %v14129_v48, %v2026_v34  ;;  %v1071_v26 = vmul.f32 %v14130_v63, %v895_v57  ;;  %v2120_v46 = vpack.c.bf16 %v2082_v12, %v2050_v3  ;;  %v1429_v52 = vadd.f32 %v9917_v14, %v1288_v55  ;;  %v10133_v54 = vpop.permute.xlu1 %552  ;;  %v10141_v12 = vpop.permute.xlu0 %855 }
 0x19a   : > { %v2083_v35 = vmax.f32 %v14132_v43, %v2027_v4  ;;  %v1666_v34 = vadd.f32 %v1602_v45, %v1397_v53  ;;  %v708_v18 = vrot.slane %v9601_v31, %v9123_v21  ;;  %v797_v30 = vmul.f32 %v712_v22, %v584_v56 }
 0x19b   : > { %v10136_v4 = vadd.f32 %v9319_v8, %v1668_v11  ;;  %v585_v40 = vsel %vm576_vm0, %v9939_v49, %v557_v10  ;;  %v704_v3 = vrot.slane %v9601_v31, %v9121_v20  ;;  %867 = vrot.lane.b32.xlu0 %v9707_v2, %s8868_s9  ;;  %v10148_v14 = vadd.f32 %v9321_v9, %v1700_v27 }
 0x19c   : > { %v2121_v57 = vpack.c.bf16 %v2083_v35, %v2051_v1  ;;  %v1698_v60 = vadd.f32 %v1634_v17, %v1429_v52  ;;  %v1243_v22 = vmul.f32 %v1133_v51, %v9236_v41  ;;  %v10152_v55 = vmul.f32 %v1133_v51, %v9245_v44  ;;  %v14137_v52 = vld [vmem:[#allocation15_spill] sm:$0xff] }
 0x19d   : > { %14133 = vst [vmem:[#allocation40_spill] sm:$0xff] %v10136_v4  ;;  %14134 = vst [vmem:[#allocation39_spill] sm:$0xff] %v10148_v14  ;;  %v586_v53 = vsel %vm576_vm0, %v10133_v54, %v9939_v49  ;;  %v1005_v31 = vrot.slane %v10128_v62, %v9095_v13  ;;  %v10161_v32 = vrot.slane %v1071_v26, %v9095_v13  ;;  %v13812_v0 = vmax.f32 %v10136_v4, 0.0  ;;  %v854_v16 = vpop.permute.xlu1 %853  ;;  %v10177_v51 = vpop.permute.xlu0 %849 }
 0x19e   : > { %2360 = vmatprep.subr.bf16.mxu1 %v2121_v57  ;;  %v13813_v17 = vmax.f32 %v10148_v14, 0.0  ;;  %v10166_v45 = vadd.f32 %v9319_v8, %v1666_v34  ;;  %v796_v27 = vmul.f32 %v708_v18, %v585_v40  ;;  %v1209_v10 = vrot.slane %v797_v30, %v9095_v13 }
 0x19f   : > { %2361 = vmatpush1.bf16.msra.mxu1 %v2120_v46  ;;  %v997_v49 = vrot.slane %v9621_v29, %v9121_v20  ;;  %v1001_v56 = vrot.slane %v9621_v29, %v9123_v21  ;;  %v795_v48 = vmul.f32 %v704_v3, %v586_v53  ;;  %v876_v63 = vsel %vm869_vm1, %v854_v16, %v10141_v12 }
 0x1a0   : > { %14135 = vst [vmem:[#allocation44_spill] sm:$0xff] %v10166_v45  ;;  %v8207_v1 = vpack.i.bf16 %v13813_v17, %v13812_v0  ;;  %865 = vrot.lane.b32.xlu0 %v9864_v37, %s8868_s9  ;;  %v10185_v26 = vadd.f32 %v9321_v9, %v1698_v60  ;;  %v878_v29 = vsel %vm869_vm1, %v10177_v51, %v852_v28  ;;  %v13814_v46 = vmax.f32 %v10166_v45, 0.0 }
 0x1a1   : > { %v877_v38 = vsel %vm869_vm1, %v852_v28, %v854_v16  ;;  %v1090_v43 = vmul.f32 %v1005_v31, %v876_v63  ;;  %v10195_v35 = vadd.f32 %v10035_v59, %v1243_v22  ;;  %v10199_v11 = vmul.f32 %v10161_v32, %v9252_v50  ;;  %v511_v40 = vpop.permute.xlu1 %510  ;;  %v8174_v31 = vpop.permute.xlu0 %8173  ;;  %v14138_v16 = vld [vmem:[#allocation26_spill] sm:$0xff] }
 0x1a2   : > { %14136 = vst [vmem:[#allocation45_spill] sm:$0xff] %v10185_v26  ;;  %7421 = vmatmul.mubr.msk.bf16.vlgmr.msra.gmra.mrb[12].mxu1 %vm2161_vm2, %v9890_v25  ;;  %8208 = vrot.lane.b32.xlu1 %v8207_v1, %s8868_s9  ;;  %v620_v34 = vrot.slane %v9873_v7, %v14137_v52  ;;  %v616_v28 = vrot.slane %v9873_v7, %v9095_v13  ;;  %v13815_v53 = vmax.f32 %v10185_v26, 0.0 }
 0x1a3   : > { %v1205_v18 = vrot.slane %v796_v27, %v9095_v13  ;;  %v1088_v30 = vmul.f32 %v997_v49, %v878_v29  ;;  %v1089_v57 = vmul.f32 %v1001_v56, %v877_v38  ;;  %v1555_v59 = vrot.slane %v1090_v43, %v9095_v13  ;;  %2402 = vmatprep.mubr.bf16.mxu1 %v14092_v23  ;;  %v10221_v49 = vld [vmem:[%s13702_s5 + $0x1] ss:$4 sm:$0xff] }
 0x1a4   : > { %v1262_v3 = vmul.f32 %v1209_v10, %v9236_v41  ;;  %v1294_v60 = vmul.f32 %v1209_v10, %v9245_v44  ;;  %v1201_v22 = vrot.slane %v795_v48, %v9095_v13  ;;  %v607_v27 = vsel %vm576_vm0, %v511_v40, %v14138_v16 }
 0x1a5   : > { %v1551_v7 = vrot.slane %v1089_v57, %v9095_v13  ;;  %v909_v56 = vrot.slane %v10221_v49, %v9095_v13  ;;  %v913_v10 = vrot.slane %v10221_v49, %v14137_v52  ;;  %v1608_v48 = vmul.f32 %v1555_v59, %v9252_v50  ;;  %v10238_v16 = vpop.permute.xlu1 %8178  ;;  %v10244_v17 = vpop.permute.xlu0 %572 }
 0x1a6   : > { %v1640_v1 = vmul.f32 %v1555_v59, %v9269_v58  ;;  %v8212_v63 = vpack.i.bf16 %v13815_v53, %v13814_v46  ;;  %v1261_v38 = vmul.f32 %v1205_v18, %v9236_v41  ;;  %v1293_v43 = vmul.f32 %v1205_v18, %v9245_v44  ;;  %14139 = vst [vmem:[#allocation26_spill] sm:$0xff] %v10238_v16 }
 0x1a7   : > { %v1547_v57 = vrot.slane %v1088_v30, %v9095_v13  ;;  %v1260_v59 = vmul.f32 %v1201_v22, %v9236_v41  ;;  %v774_v0 = vmul.f32 %v620_v34, %v607_v27  ;;  %v1403_v46 = vadd.f32 %v9921_v61, %v1262_v3 }
 0x1a8   : > { %8213 = vrot.lane.b32.xlu1 %v8212_v63, %s8868_s9  ;;  %v1435_v53 = vadd.f32 %v9930_v24, %v1294_v60  ;;  %v1292_v18 = vmul.f32 %v1201_v22, %v9245_v44  ;;  %v1607_v30 = vmul.f32 %v1551_v7, %v9252_v50  ;;  %v1639_v29 = vmul.f32 %v1551_v7, %v9269_v58 }
 0x1a9   : > { %v608_v49 = vsel %vm576_vm0, %v10244_v17, %v511_v40  ;;  %v13818_v27 = vunpack.i.l.bf16 %v10238_v16  ;;  %v1672_v61 = vadd.f32 %v1608_v48, %v1403_v46  ;;  %v1606_v24 = vmul.f32 %v1547_v57, %v9252_v50  ;;  %v10260_v7 = vpop.permute.xlu1 %8183  ;;  %v10264_v14 = vpop.permute.xlu0 %805 }
 0x1aa   : > { %7422 = vmatmul.mubr.msk.bf16.gmra.mrb[16].mxu1 %vm2161_vm2, %v9977_v15  ;;  %v1704_v3 = vadd.f32 %v1640_v1, %v1435_v53  ;;  %v8176_v60 = vunpack.i.h.bf16 %v8174_v31  ;;  %v8175_v22 = vunpack.i.l.bf16 %v8174_v31  ;;  %14140 = vst [vmem:[#allocation83_spill] sm:$0xff] %v10260_v7  ;;  %v1402_v63 = vadd.f32 %v9934_v42, %v1261_v38  ;;  %14141 = vst [vmem:[#allocation84_spill] sm:$0xff] %v10264_v14 }
 0x1ab   : > { %2412 = vmatprep.mubr.bf16.mxu1 %v14092_v23  ;;  %v1117_v40 = vrot.slane %v774_v0, %v9095_v13  ;;  %v773_v4 = vmul.f32 %v616_v28, %v608_v49  ;;  %v13819_v34 = vunpack.i.h.bf16 %v10260_v7  ;;  %v1434_v46 = vadd.f32 %v9944_v33, %v1293_v43  ;;  %v14145_v43 = vld [vmem:[#allocation56_spill] sm:$0xff] }
 0x1ac   : > { %v13823_v53 = vunpack.i.l.bf16 %v10260_v7  ;;  %v10270_v48 = vadd.f32 %v9319_v8, %v1672_v61  ;;  %v10273_v31 = vadd.f32 %v9321_v9, %v1704_v3  ;;  %v1671_v1 = vadd.f32 %v1607_v30, %v1402_v63  ;;  %v14167_v7 = vld [vmem:[#allocation72_spill] sm:$0xff] }
 0x1ad   : > { %v2021_v42 = vsel %vm869_vm1, %v13819_v34, %v8176_v60  ;;  %v1703_v0 = vadd.f32 %v1639_v29, %v1434_v46  ;;  %v2018_v33 = vsel %vm869_vm1, %v8175_v22, %v13818_v27  ;;  %v14144_v28 = vunpack.i.h.bf16 %v10238_v16  ;;  %v808_v63 = vpop.permute.xlu1 %807  ;;  %v14147_v46 = vld [vmem:[#allocation55_spill] sm:$0xff]  ;;  %v565_v16 = vpop.permute.xlu0 %564 }
 0x1ae   : > { %14142 = vst [vmem:[#allocation85_spill] sm:$0xff] %v10270_v48  ;;  %14143 = vst [vmem:[#allocation86_spill] sm:$0xff] %v10273_v31  ;;  %v14146_v49 = vmax.f32 %v14145_v43, 0.0  ;;  %v2020_v30 = vsel %vm869_vm1, %v13823_v53, %v8175_v22  ;;  %v13826_v29 = vmax.f32 %v10270_v48, 0.0  ;;  %v13827_v3 = vmax.f32 %v10273_v31, 0.0  ;;  %v14154_v53 = vld [vmem:[#allocation52_spill] sm:$0xff] }
 0x1af   : > { %v2019_v38 = vsel %vm869_vm1, %v8176_v60, %v14144_v28  ;;  %v14148_v27 = vmax.f32 %v14147_v46, 0.0  ;;  %v10298_v45 = vadd.f32 %v9319_v8, %v1671_v1  ;;  %v10301_v60 = vadd.f32 %v9321_v9, %v1703_v0 }
 0x1b0   : > { %v2086_v61 = vmax.f32 %v14146_v49, %v2021_v42  ;;  %v14151_v42 = vld [vmem:[#allocation28_spill] sm:$0xff]  ;;  %v8222_v22 = vpack.i.bf16 %v13827_v3, %v13826_v29  ;;  %v14152_v49 = vld [vmem:[#allocation51_spill] sm:$0xff]  ;;  %v14155_v48 = vmax.f32 %v14154_v53, 0.0  ;;  %v1638_v29 = vmul.f32 %v1547_v57, %v9269_v58 }
 0x1b1   : > { %v2054_v34 = vmax.f32 %v14148_v27, %v2020_v30  ;;  %14149 = vst [vmem:[#allocation56_spill] sm:$0xff] %v10298_v45  ;;  %14150 = vst [vmem:[#allocation55_spill] sm:$0xff] %v10301_v60  ;;  %v899_v28 = vsel %vm869_vm1, %v808_v63, %v14151_v42  ;;  %v900_v27 = vsel %vm869_vm1, %v10264_v14, %v808_v63  ;;  %v14153_v1 = vmax.f32 %v14152_v49, 0.0  ;;  %v14157_v49 = vld [vmem:[#allocation13_spill] sm:$0xff] }
 0x1b2   : > { %v1067_v43 = vmul.f32 %v913_v10, %v899_v28  ;;  %7423 = vmatmul.mubr.msk.bf16.gmra.mrb[20].mxu1 %vm2161_vm2, %v10069_v47  ;;  %v13829_v0 = vmax.f32 %v10298_v45, 0.0  ;;  %v13828_v46 = vmax.f32 %v10301_v60, 0.0  ;;  %v1066_v42 = vmul.f32 %v909_v56, %v900_v27  ;;  %8223 = vrot.lane.b32.xlu0 %v8222_v22, %s8868_s9  ;;  %v14156_v10 = vld [vmem:[#allocation48_spill] sm:$0xff] }
 0x1b3   : > { %v2055_v30 = vmax.f32 %v14153_v1, %v2018_v33  ;;  %v2087_v31 = vmax.f32 %v14155_v48, %v2019_v38  ;;  %2518 = vmatprep.mubr.bf16.mxu1 %v14092_v23  ;;  %v1401_v63 = vadd.f32 %v14156_v10, %v1260_v59  ;;  %v563_v33 = vpop.permute.xlu1 %562  ;;  %v2124_v28 = vpack.c.bf16 %v2086_v61, %v2054_v34  ;;  %v10331_v48 = vpop.permute.xlu0 %560  ;;  %v14158_v34 = vld [vmem:[#allocation70_spill] sm:$0xff] }
 0x1b4   : > { %v728_v1 = vrot.slane %v10019_v36, %v14157_v49  ;;  %v8217_v56 = vpack.i.bf16 %v13828_v46, %v13829_v0  ;;  %v581_v57 = vsel %vm576_vm0, %v563_v33, %v565_v16  ;;  %v1017_v38 = vrot.slane %v10128_v62, %v9076_v5 }
 0x1b5   : > { %v2125_v53 = vpack.c.bf16 %v2087_v31, %v2055_v30  ;;  %v1113_v59 = vrot.slane %v773_v4, %v9095_v13  ;;  %v1433_v61 = vadd.f32 %v14158_v34, %v1292_v18  ;;  %v1670_v22 = vadd.f32 %v1606_v24, %v1401_v63 }
 0x1b6   : > { %v1239_v10 = vmul.f32 %v1117_v40, %v9236_v41  ;;  %8218 = vrot.lane.b32.xlu1 %v8217_v56, %s8868_s9  ;;  %v1459_v31 = vrot.slane %v1066_v42, %v9095_v13  ;;  %v1463_v30 = vrot.slane %v1067_v43, %v9095_v13  ;;  %v582_v4 = vsel %vm576_vm0, %v10331_v48, %v563_v33 }
 0x1b7   : > { %2486 = vmatprep.subr.bf16.mxu1 %v2125_v53  ;;  %v1702_v3 = vadd.f32 %v1638_v29, %v1433_v61  ;;  %v10346_v46 = vadd.f32 %v9319_v8, %v1670_v22  ;;  %v14160_v18 = vrot.slane %v10019_v36, %v9076_v5  ;;  %v10354_v63 = vpop.permute.xlu1 %566  ;;  %v1271_v42 = vmul.f32 %v1117_v40, %v9245_v44  ;;  %v10371_v34 = vpop.permute.xlu0 %8193 }
 0x1b8   : > { %2487 = vmatpush1.bf16.msra.mxu1 %v2124_v28  ;;  %14161 = vst [vmem:[#allocation51_spill] sm:$0xff] %v10354_v63  ;;  %v14162_v43 = vrot.slane %v10019_v36, %v9078_v6  ;;  %v580_v56 = vsel %vm576_vm0, %v565_v16, %v10354_v63  ;;  %v1238_v53 = vmul.f32 %v1113_v59, %v9236_v41  ;;  %14164 = vst [vmem:[#allocation48_spill] sm:$0xff] %v10371_v34 }
 0x1b9   : > { %14159 = vst [vmem:[#allocation28_spill] sm:$0xff] %v10346_v46  ;;  %v800_v24 = vmul.f32 %v14160_v18, %v581_v57  ;;  %v10367_v57 = vadd.f32 %v9321_v9, %v1702_v3  ;;  %v1270_v61 = vmul.f32 %v1113_v59, %v9245_v44  ;;  %v1584_v22 = vmul.f32 %v1459_v31, %v9252_v50 }
 0x1ba   : > { %v799_v29 = vmul.f32 %v14162_v43, %v582_v4  ;;  %v1585_v16 = vmul.f32 %v1463_v30, %v9252_v50  ;;  %v1617_v4 = vmul.f32 %v1463_v30, %v9269_v58  ;;  %v1616_v3 = vmul.f32 %v1459_v31, %v9269_v58  ;;  %v14168_v30 = vld [vmem:[#allocation73_spill] sm:$0xff] }
 0x1bb   : > { %14163 = vst [vmem:[#allocation52_spill] sm:$0xff] %v10367_v57  ;;  %v1221_v40 = vrot.slane %v800_v24, %v9095_v13  ;;  %7427 = vmatmul.mubr.msk.bf16.vlgmr.msra.gmra.mrb[24].mxu1 %vm2161_vm2, %v9890_v25  ;;  %v13838_v18 = vmax.f32 %v10367_v57, 0.0  ;;  %v801_v43 = vmul.f32 %v728_v1, %v580_v56  ;;  %v10381_v0 = vpop.permute.xlu1 %8188  ;;  %v14165_v24 = vld [vmem:[#allocation71_spill] sm:$0xff]  ;;  %v14166_v5 = vmax.f32 %v10346_v46, 0.0 }
 0x1bc   : > { %v1380_v33 = vadd.f32 %v14165_v24, %v1239_v10  ;;  %2528 = vmatprep.mubr.bf16.mxu1 %v14092_v23  ;;  %v1217_v59 = vrot.slane %v799_v29, %v9095_v13  ;;  %v13840_v10 = vunpack.i.l.bf16 %v10381_v0  ;;  %v862_v24 = vpop.permute.xlu0 %861  ;;  %v1412_v60 = vadd.f32 %v14167_v7, %v1271_v42 }
 0x1bd   : > { %v1265_v27 = vmul.f32 %v1221_v40, %v9236_v41  ;;  %v8227_v31 = vpack.i.bf16 %v13838_v18, %v14166_v5  ;;  %v1225_v1 = vrot.slane %v801_v43, %v9095_v13  ;;  %v1297_v29 = vmul.f32 %v1221_v40, %v9245_v44  ;;  %v14169_v5 = vld [vmem:[#allocation74_spill] sm:$0xff] }
 0x1be   : > { %v1649_v45 = vadd.f32 %v1585_v16, %v1380_v33  ;;  %v1379_v26 = vadd.f32 %v14168_v30, %v1238_v53  ;;  %v1411_v18 = vadd.f32 %v14169_v5, %v1270_v61  ;;  %v14170_v43 = vunpack.i.l.bf16 %v10371_v34  ;;  %v14174_v5 = vld [vmem:[#allocation60_spill] sm:$0xff] }
 0x1bf   : > { %8228 = vrot.lane.b32.xlu1 %v8227_v31, %s8868_s9  ;;  %v1266_v28 = vmul.f32 %v1225_v1, %v9236_v41  ;;  %v860_v57 = vpop.permute.xlu1 %859  ;;  %v14171_v40 = vunpack.i.h.bf16 %v10371_v34  ;;  %v14172_v7 = vunpack.i.h.bf16 %v10381_v0  ;;  %v1681_v33 = vadd.f32 %v1617_v4, %v1412_v60 }
 0x1c0   : > { %v2010_v56 = vsel %vm869_vm1, %v13840_v10, %v14170_v43  ;;  %v10415_v53 = vadd.f32 %v9319_v8, %v1649_v45  ;;  %v873_v61 = vsel %vm869_vm1, %v860_v57, %v862_v24  ;;  %v1648_v16 = vadd.f32 %v1584_v22, %v1379_v26  ;;  %v14176_v10 = vld [vmem:[#allocation61_spill] sm:$0xff]  ;;  %v14181_v22 = vld [vmem:[#allocation76_spill] sm:$0xff] }
 0x1c1   : > { %v2011_v42 = vsel %vm869_vm1, %v14172_v7, %v14171_v40  ;;  %v1093_v30 = vmul.f32 %v1017_v38, %v873_v61  ;;  %v1680_v31 = vadd.f32 %v1616_v3, %v1411_v18  ;;  %v14175_v46 = vmax.f32 %v14174_v5, 0.0 }
 0x1c2   : > { %14173 = vst [vmem:[#allocation70_spill] sm:$0xff] %v10415_v53  ;;  %v14177_v34 = vmax.f32 %v14176_v10, 0.0  ;;  %v1298_v63 = vmul.f32 %v1225_v1, %v9245_v44  ;;  %v10425_v40 = vadd.f32 %v9321_v9, %v1681_v33  ;;  %v13856_v45 = vmax.f32 %v10415_v53, 0.0 }
 0x1c3   : > { %v2059_v43 = vmax.f32 %v14175_v46, %v2010_v56  ;;  %v10429_v60 = vadd.f32 %v9319_v8, %v1648_v16  ;;  %7428 = vmatmul.mubr.msk.bf16.gmra.mrb[28].mxu1 %vm2161_vm2, %v9977_v15  ;;  %v1567_v26 = vrot.slane %v1093_v30, %v9095_v13  ;;  %v10435_v46 = vadd.f32 %v9321_v9, %v1680_v31  ;;  %v10437_v38 = vpop.permute.xlu1 %863  ;;  %v14182_v56 = vld [vmem:[#allocation77_spill] sm:$0xff] }
 0x1c4   : > { %v2091_v14 = vmax.f32 %v14177_v34, %v2011_v42  ;;  %14178 = vst [vmem:[#allocation71_spill] sm:$0xff] %v10425_v40  ;;  %v1406_v4 = vadd.f32 %v14181_v22, %v1265_v27  ;;  %2538 = vmatprep.mubr.bf16.mxu1 %v14092_v23  ;;  %v13855_v3 = vmax.f32 %v10425_v40, 0.0  ;;  %v872_v1 = vsel %vm869_vm1, %v862_v24, %v10437_v38  ;;  %v14221_v40 = vld [vmem:[#allocation75_spill] sm:$0xff] }
 0x1c5   : > { %14179 = vst [vmem:[#allocation72_spill] sm:$0xff] %v10429_v60  ;;  %14180 = vst [vmem:[#allocation73_spill] sm:$0xff] %v10435_v46  ;;  %v13854_v18 = vmax.f32 %v10429_v60, 0.0  ;;  %v1438_v10 = vadd.f32 %v14182_v56, %v1297_v29  ;;  %v1611_v7 = vmul.f32 %v1567_v26, %v9252_v50  ;;  %v1643_v42 = vmul.f32 %v1567_v26, %v9269_v58  ;;  %v14184_v29 = vld [vmem:[#allocation19_spill] sm:$0xff] }
 0x1c6   : > { %v2129_v34 = vpack.c.bf16 %v2091_v14, %v2059_v43  ;;  %v13853_v14 = vmax.f32 %v10435_v46, 0.0  ;;  %v14183_v27 = vrot.slane %v10128_v62, %v14157_v49  ;;  %v1621_v61 = vmul.f32 %v10161_v32, %v9269_v58  ;;  %v14220_v46 = vld [vmem:[#allocation50_spill] sm:$0xff] }
 0x1c7   : > { %v8232_v24 = vpack.i.bf16 %v13855_v3, %v13856_v45  ;;  %v1416_v16 = vadd.f32 %v14184_v29, %v10152_v55  ;;  %v1653_v30 = vadd.f32 %v10199_v11, %v10195_v35  ;;  %v10468_v43 = vpop.permute.xlu1 %857  ;;  %v1675_v32 = vadd.f32 %v1611_v7, %v1406_v4  ;;  %v14185_v35 = vld [vmem:[#allocation78_spill] sm:$0xff]  ;;  %v14187_v7 = vld [vmem:[#allocation25_spill] sm:$0xff] }
 0x1c8   : > { %v1094_v33 = vmul.f32 %v14183_v27, %v872_v1  ;;  %2612 = vmatprep.subr.bf16.mxu1 %v2129_v34  ;;  %v8237_v31 = vpack.i.bf16 %v13853_v14, %v13854_v18  ;;  %v1707_v26 = vadd.f32 %v1643_v42, %v1438_v10  ;;  %v1264_v34 = vmul.f32 %v1217_v59, %v9236_v41 }
 0x1c9   : > { %v1296_v22 = vmul.f32 %v1217_v59, %v9245_v44  ;;  %8233 = vrot.lane.b32.xlu0 %v8232_v24, %s8868_s9  ;;  %v874_v55 = vsel %vm869_vm1, %v10468_v43, %v860_v57  ;;  %v1407_v11 = vadd.f32 %v14185_v35, %v1266_v28  ;;  %v14186_v4 = vrot.slane %v10128_v62, %v9078_v6  ;;  %v14190_v57 = vld [vmem:[#allocation59_spill] sm:$0xff] }
 0x1ca   : > { %v1571_v5 = vrot.slane %v1094_v33, %v9095_v13  ;;  %8238 = vrot.lane.b32.xlu1 %v8237_v31, %s8868_s9  ;;  %v1439_v59 = vadd.f32 %v14187_v7, %v1298_v63  ;;  %v10485_v42 = vadd.f32 %v9319_v8, %v1675_v32  ;;  %v10488_v27 = vadd.f32 %v9321_v9, %v1707_v26  ;;  %v14191_v28 = vld [vmem:[#allocation23_spill] sm:$0xff] }
 0x1cb   : > { %v1092_v10 = vmul.f32 %v14186_v4, %v874_v55  ;;  %v1341_v33 = vmul.f32 %v14191_v28, %v14190_v57  ;;  %v1685_v24 = vadd.f32 %v1621_v61, %v1416_v16  ;;  %7429 = vmatmul.mubr.msk.bf16.gmra.mrb[32].mxu1 %vm2161_vm2, %v10069_v47  ;;  %v14192_v55 = vld [vmem:[#allocation24_spill] sm:$0xff]  ;;  %v10501_v35 = vadd.f32 %v9319_v8, %v1653_v30 }
 0x1cc   : > { %v1612_v1 = vmul.f32 %v1571_v5, %v9252_v50  ;;  %v1644_v56 = vmul.f32 %v1571_v5, %v9269_v58  ;;  %14188 = vst [vmem:[#allocation74_spill] sm:$0xff] %v10485_v42  ;;  %14189 = vst [vmem:[#allocation60_spill] sm:$0xff] %v10488_v27  ;;  %v1373_v63 = vmul.f32 %v14192_v55, %v14190_v57  ;;  %2644 = vmatprep.mubr.bf16.mxu1 %v14092_v23 }
 0x1cd   : > { %v1563_v29 = vrot.slane %v1092_v10, %v9095_v13  ;;  %v13852_v32 = vmax.f32 %v10485_v42, 0.0  ;;  %v13851_v26 = vmax.f32 %v10488_v27, 0.0  ;;  %14193 = vst [vmem:[#allocation61_spill] sm:$0xff] %v10501_v35  ;;  %v1405_v4 = vadd.f32 %v1341_v33, %v1264_v34  ;;  %v14219_v42 = vld [vmem:[#allocation79_spill] sm:$0xff] }
 0x1ce   : > { %v1676_v31 = vadd.f32 %v1612_v1, %v1407_v11  ;;  %v1708_v5 = vadd.f32 %v1644_v56, %v1439_v59  ;;  %v1437_v10 = vadd.f32 %v1373_v63, %v1296_v22  ;;  %v10516_v30 = vadd.f32 %v9321_v9, %v1685_v24 }
 0x1cf   : > { %v1610_v61 = vmul.f32 %v1563_v29, %v9252_v50  ;;  %v1642_v16 = vmul.f32 %v1563_v29, %v9269_v58  ;;  %v8242_v11 = vpack.i.bf16 %v13851_v26, %v13852_v32  ;;  %v13848_v29 = vmax.f32 %v10501_v35, 0.0  ;;  %v14203_v26 = vld [vmem:[#allocation47_spill] sm:$0xff] }
 0x1d0   : > { %v10510_v1 = vadd.f32 %v9319_v8, %v1676_v31  ;;  %v10513_v56 = vadd.f32 %v9321_v9, %v1708_v5  ;;  %14196 = vst [vmem:[#allocation19_spill] sm:$0xff] %v10516_v30  ;;  %v13847_v31 = vmax.f32 %v10516_v30, 0.0  ;;  %v14204_v32 = vld [vmem:[#allocation35_spill] sm:$0xff]  ;;  %v14212_v30 = vld [vmem:[#allocation62_spill] sm:$0xff]  ;;  %v10629_v35 = vmul.f32 %v14191_v28, %v9707_v2 }
 0x1d1   : > { %v1674_v7 = vadd.f32 %v1610_v61, %v1405_v4  ;;  %v1706_v59 = vadd.f32 %v1642_v16, %v1437_v10  ;;  %8243 = vrot.lane.b32.xlu0 %v8242_v11, %s8868_s9  ;;  %v8725_v4 = vld [vmem:[%s13702_s5 + $0x20] ss:$4 sm:$0xff]  ;;  %v883_v60 = vsel %vm869_vm1, %v14220_v46, %v14219_v42  ;;  %v14224_v42 = vunpack.i.h.bf16 %v10381_v0 }
 0x1d2   : > { %14194 = vst [vmem:[#allocation76_spill] sm:$0xff] %v10510_v1  ;;  %14195 = vst [vmem:[#allocation77_spill] sm:$0xff] %v10513_v56  ;;  %v13846_v34 = vmax.f32 %v10510_v1, 0.0  ;;  %v13845_v22 = vmax.f32 %v10513_v56, 0.0  ;;  %v8257_v16 = vpack.i.bf16 %v13847_v31, %v13848_v29  ;;  %v652_v10 = vrot.slane %v8725_v4, %v14137_v52  ;;  %v14199_v11 = vld [vmem:[#allocation36_spill] sm:$0xff]  ;;  %v14211_v56 = vld [vmem:[#allocation49_spill] sm:$0xff] }
 0x1d3   : > { %v10522_v57 = vadd.f32 %v9319_v8, %v1674_v7  ;;  %v10525_v33 = vadd.f32 %v9321_v9, %v1706_v59  ;;  %v14200_v7 = vld [vmem:[#allocation31_spill] sm:$0xff]  ;;  %v10613_v1 = vmul.f32 %v14192_v55, %v14211_v56  ;;  %14217 = vst [vmem:[#allocation24_spill] sm:$0xff] %v10629_v35 }
 0x1d4   : > { %v8247_v24 = vpack.i.bf16 %v13845_v22, %v13846_v34  ;;  %v599_v59 = vsel %vm576_vm0, %v14200_v7, %v14199_v11  ;;  %v14202_v34 = vld [vmem:[#allocation33_spill] sm:$0xff]  ;;  %v595_v11 = vsel %vm576_vm0, %v14204_v32, %v14203_v26  ;;  %v14209_v26 = vld [vmem:[#allocation22_spill] sm:$0xff] }
 0x1d5   : > { %14197 = vst [vmem:[#allocation78_spill] sm:$0xff] %v10522_v57  ;;  %14198 = vst [vmem:[#allocation25_spill] sm:$0xff] %v10525_v33  ;;  %v13849_v5 = vmax.f32 %v10522_v57, 0.0  ;;  %v13850_v63 = vmax.f32 %v10525_v33, 0.0  ;;  %v782_v31 = vmul.f32 %v652_v10, %v599_v59  ;;  %v14205_v10 = vld [vmem:[#allocation20_spill] sm:$0xff]  ;;  %v14207_v59 = vld [vmem:[#allocation63_spill] sm:$0xff]  ;;  %v10593_v45 = vmul.f32 %v14192_v55, %v14209_v26 }
 0x1d6   : > { %8248 = vrot.lane.b32.xlu1 %v8247_v24, %s8868_s9  ;;  %v8726_v24 = vld [vmem:[%s13702_s5 + $0x21] ss:$4 sm:$0xff] }
 0x1d7   : > { %v8252_v61 = vpack.i.bf16 %v13850_v63, %v13849_v5  ;;  %v945_v22 = vrot.slane %v8726_v24, %v14137_v52  ;;  %v668_v5 = vrot.slane %v8725_v4, %v9117_v19  ;;  %v1149_v63 = vrot.slane %v782_v31, %v9095_v13  ;;  %v14206_v4 = vld [vmem:[#allocation21_spill] sm:$0xff] }
 0x1d8   : > { %v1328_v31 = vmul.f32 %v14191_v28, %v14206_v4 }
 0x1d9   : > { %8253 = vrot.lane.b32.xlu0 %v8252_v61, %s8868_s9  ;;  %v14201_v61 = vld [vmem:[#allocation43_spill] sm:$0xff]  ;;  %v786_v14 = vmul.f32 %v668_v5, %v595_v11  ;;  %v1247_v18 = vmul.f32 %v1149_v63, %v9236_v41  ;;  %v1279_v3 = vmul.f32 %v1149_v63, %v9245_v44  ;;  %v1356_v5 = vmul.f32 %v14192_v55, %v14205_v10 }
 0x1da   : > { %8258 = vrot.lane.b32.xlu1 %v8257_v16, %s8868_s9  ;;  %v891_v16 = vsel %vm869_vm1, %v14202_v34, %v14201_v61  ;;  %v961_v34 = vrot.slane %v8726_v24, %v9117_v19  ;;  %v14208_v61 = vld [vmem:[#allocation42_spill] sm:$0xff] }
 0x1db   : > { %v1075_v29 = vmul.f32 %v945_v22, %v891_v16  ;;  %v1324_v22 = vmul.f32 %v14191_v28, %v14205_v10  ;;  %v887_v32 = vsel %vm869_vm1, %v14208_v61, %v14207_v59  ;;  %v1360_v16 = vmul.f32 %v14192_v55, %v14206_v4  ;;  %v14210_v59 = vld [vmem:[#allocation41_spill] sm:$0xff] }
 0x1dc   : > { %v1165_v11 = vrot.slane %v786_v14, %v9095_v13  ;;  %v10597_v61 = vmul.f32 %v14191_v28, %v14210_v59  ;;  %v10601_v10 = vmul.f32 %v14192_v55, %v14210_v59  ;;  %v1420_v6 = vadd.f32 %v1356_v5, %v1279_v3  ;;  %v8727_v14 = vld [vmem:[%s13702_s5 + $0x40] ss:$4 sm:$0xff] }
 0x1dd   : > { %v1495_v7 = vrot.slane %v1075_v29, %v9095_v13  ;;  %v10582_v29 = vmul.f32 %v14191_v28, %v14209_v26  ;;  %v1388_v49 = vadd.f32 %v1324_v22, %v1247_v18  ;;  %v10605_v4 = vmul.f32 %v14191_v28, %v14211_v56  ;;  %v14215_v22 = vld [vmem:[#allocation66_spill] sm:$0xff] }
 0x1de   : > { %v684_v26 = vrot.slane %v8727_v14, %v14137_v52  ;;  %v10617_v59 = vmul.f32 %v14191_v28, %v14212_v30  ;;  %v10621_v3 = vmul.f32 %v14192_v55, %v14212_v30  ;;  %v1251_v56 = vmul.f32 %v1165_v11, %v9236_v41  ;;  %v8728_v30 = vld [vmem:[%s13702_s5 + $0x41] ss:$4 sm:$0xff] }
 0x1df   : > { %v1593_v63 = vmul.f32 %v1495_v7, %v9252_v50  ;;  %v1625_v24 = vmul.f32 %v1495_v7, %v9269_v58  ;;  %v1079_v7 = vmul.f32 %v961_v34, %v887_v32  ;;  %v14216_v32 = vld [vmem:[#allocation46_spill] sm:$0xff]  ;;  %v1283_v57 = vmul.f32 %v1165_v11, %v9245_v44 }
 0x1e0   : > { %14213 = vst [vmem:[#allocation59_spill] sm:$0xff] %v10617_v59  ;;  %14214 = vst [vmem:[#allocation23_spill] sm:$0xff] %v10621_v3  ;;  %v591_v5 = vsel %vm576_vm0, %v14216_v32, %v14215_v22  ;;  %v14218_v22 = vld [vmem:[#allocation68_spill] sm:$0xff]  ;;  %v14227_v59 = vld [vmem:[#allocation69_spill] sm:$0xff] }
 0x1e1   : > { %v1657_v18 = vadd.f32 %v1593_v63, %v1388_v49  ;;  %v1689_v34 = vadd.f32 %v1625_v24, %v1420_v6  ;;  %v977_v49 = vrot.slane %v8728_v30, %v14137_v52  ;;  %v700_v6 = vrot.slane %v8727_v14, %v9117_v19 }
 0x1e2   : > { %v1511_v24 = vrot.slane %v1079_v7, %v9095_v13  ;;  %v587_v32 = vsel %vm576_vm0, %v14218_v22, %v10133_v54  ;;  %v790_v27 = vmul.f32 %v684_v26, %v591_v5  ;;  %v993_v14 = vrot.slane %v8728_v30, %v9117_v19  ;;  %v14222_v22 = vld [vmem:[#allocation82_spill] sm:$0xff] }
 0x1e3   : > { %v716_v7 = vrot.slane %v10019_v36, %v14137_v52  ;;  %v879_v54 = vsel %vm869_vm1, %v14221_v40, %v10177_v51  ;;  %v583_v26 = vsel %vm576_vm0, %v14222_v22, %v10331_v48  ;;  %v14223_v5 = vunpack.i.l.bf16 %v10381_v0  ;;  %v14225_v40 = vld [vmem:[#allocation67_spill] sm:$0xff] }
 0x1e4   : > { %v794_v51 = vmul.f32 %v700_v6, %v587_v32  ;;  %v14226_v53 = vmax.f32 %v14225_v40, 0.0  ;;  %v14228_v48 = vmax.f32 %v14227_v59, 0.0  ;;  %v10679_v47 = vadd.f32 %v9319_v8, %v1657_v18 }
 0x1e5   : > { %v1597_v35 = vmul.f32 %v1511_v24, %v9252_v50  ;;  %v10684_v0 = vmul.f32 %v14192_v55, %v9707_v2  ;;  %v10688_v6 = vmul.f32 %v14191_v28, %v9864_v37  ;;  %v1087_v32 = vmul.f32 %v993_v14, %v879_v54 }
 0x1e6   : > { %v10692_v59 = vmul.f32 %v14192_v55, %v9864_v37  ;;  %v1392_v18 = vadd.f32 %v1328_v31, %v1251_v56  ;;  %v1197_v2 = vrot.slane %v794_v51, %v9095_v13  ;;  %v13898_v37 = vmax.f32 %v10679_v47, 0.0 }
 0x1e7   : > { %v1629_v55 = vmul.f32 %v1511_v24, %v9269_v58  ;;  %v1009_v31 = vrot.slane %v10128_v62, %v14137_v52  ;;  %v736_v14 = vrot.slane %v10019_v36, %v9121_v20 }
 0x1fa   : > { %v10638_v63 = vpop.permute.xlu0 %8198 }
 0x1fb   : > { %v13896_v33 = vunpack.i.h.bf16 %v10638_v63  ;;  %v13873_v11 = vunpack.i.l.bf16 %v10638_v63 }
 0x1fd   : > { %v2012_v46 = vsel %vm869_vm1, %v13873_v11, %v14223_v5  ;;  %v2013_v30 = vsel %vm869_vm1, %v13896_v33, %v14224_v42  ;;  %v1083_v5 = vmul.f32 %v977_v49, %v883_v60  ;;  %v1424_v42 = vadd.f32 %v1360_v16, %v1283_v57 }
 0x1fe   : > { %v2058_v3 = vmax.f32 %v14226_v53, %v2012_v46  ;;  %v2090_v22 = vmax.f32 %v14228_v48, %v2013_v30  ;;  %v571_v11 = vpop.permute.xlu0 %570  ;;  %v798_v53 = vmul.f32 %v716_v7, %v583_v26  ;;  %v1181_v60 = vrot.slane %v790_v27, %v9095_v13 }
 0x1ff   : > { %v740_v49 = vrot.slane %v10019_v36, %v9123_v21  ;;  %v577_v28 = vsel %vm576_vm0, %v571_v11, %v10244_v17  ;;  %v1661_v57 = vadd.f32 %v1597_v35, %v1392_v18  ;;  %v1527_v27 = vrot.slane %v1083_v5, %v9095_v13 }
 0x200   : > { %v2128_v46 = vpack.c.bf16 %v2090_v22, %v2058_v3  ;;  %v10702_v3 = vadd.f32 %v9321_v9, %v1689_v34  ;;  %v1543_v16 = vrot.slane %v1087_v32, %v9095_v13  ;;  %v1213_v56 = vrot.slane %v798_v53, %v9095_v13  ;;  %v569_v34 = vpop.permute.xlu1 %568 }
 0x201   : > { %v875_v17 = vsel %vm869_vm1, %v10141_v12, %v10468_v43  ;;  %v1255_v35 = vmul.f32 %v1181_v60, %v9236_v41  ;;  %v1287_v24 = vmul.f32 %v1181_v60, %v9245_v44  ;;  %v578_v7 = vsel %vm576_vm0, %v569_v34, %v571_v11 }
 0x202   : > { %2613 = vmatpush1.bf16.msra.mxu1 %v2128_v46  ;;  %v804_v54 = vmul.f32 %v740_v49, %v577_v28  ;;  %v1259_v26 = vmul.f32 %v1197_v2, %v9236_v41  ;;  %v1291_v30 = vmul.f32 %v1197_v2, %v9245_v44  ;;  %v732_v12 = vrot.slane %v10019_v36, %v9117_v19 }
 0x203   : > { %v13897_v43 = vmax.f32 %v10702_v3, 0.0  ;;  %v1693_v51 = vadd.f32 %v1629_v55, %v1424_v42  ;;  %v1601_v40 = vmul.f32 %v1527_v27, %v9252_v50  ;;  %v1633_v11 = vmul.f32 %v1527_v27, %v9269_v58 }
 0x204   : > { %v1091_v48 = vmul.f32 %v1009_v31, %v875_v17  ;;  %v1605_v22 = vmul.f32 %v1543_v16, %v9252_v50  ;;  %v1263_v5 = vmul.f32 %v1213_v56, %v9236_v41  ;;  %v803_v32 = vmul.f32 %v736_v14, %v578_v7 }
 0x205   : > { %7433 = vmatmul.mubr.msk.bf16.vlgmr.msra.gmra.mrb[36].mxu1 %vm2161_vm2, %v9890_v25  ;;  %v1637_v25 = vmul.f32 %v1543_v16, %v9269_v58  ;;  %v1396_v36 = vadd.f32 %v10582_v29, %v1255_v35  ;;  %v1428_v46 = vadd.f32 %v10593_v45, %v1287_v24  ;;  %v1237_v18 = vrot.slane %v804_v54, %v9095_v13  ;;  %v14230_v24 = vld [vmem:[#allocation84_spill] sm:$0xff] }
 0x206   : > { %2654 = vmatprep.mubr.bf16.mxu1 %v14092_v23  ;;  %v10740_v42 = vadd.f32 %v9319_v8, %v1661_v57  ;;  %v1400_v60 = vadd.f32 %v10597_v61, %v1259_v26  ;;  %v1432_v49 = vadd.f32 %v10601_v10, %v1291_v30  ;;  %v1295_v2 = vmul.f32 %v1213_v56, %v9245_v44  ;;  %v14229_v56 = vld [vmem:[#allocation51_spill] sm:$0xff] }
 0x207   : > { %v1033_v28 = vrot.slane %v10128_v62, %v9123_v21  ;;  %v1665_v55 = vadd.f32 %v1601_v40, %v1396_v36  ;;  %v1697_v27 = vadd.f32 %v1633_v11, %v1428_v46  ;;  %v1559_v29 = vrot.slane %v1091_v48, %v9095_v13  ;;  %v14286_v21 = vld [vmem:[#allocation32_spill] sm:$0xff] }
 0x208   : > { %v10749_v45 = vadd.f32 %v9321_v9, %v1693_v51  ;;  %v10751_v31 = vadd.f32 %v1605_v22, %v1400_v60  ;;  %v10753_v57 = vadd.f32 %v1637_v25, %v1432_v49  ;;  %v1404_v61 = vadd.f32 %v10605_v4, %v1263_v5 }
 0x209   : > { %v10734_v53 = vpop.permute.xlu0 %8203  ;;  %v1233_v10 = vrot.slane %v803_v32, %v9095_v13  ;;  %v579_v17 = vsel %vm576_vm0, %v14229_v56, %v569_v34  ;;  %v1269_v14 = vmul.f32 %v1237_v18, %v9236_v41  ;;  %v1301_v35 = vmul.f32 %v1237_v18, %v9245_v44  ;;  %v14231_v32 = vld [vmem:[#allocation24_spill] sm:$0xff] }
 0x20a   : > { %v1436_v4 = vadd.f32 %v10613_v1, %v1295_v2  ;;  %v1025_v26 = vrot.slane %v10128_v62, %v9117_v19  ;;  %v1029_v34 = vrot.slane %v10128_v62, %v9121_v20  ;;  %v1609_v30 = vmul.f32 %v1559_v29, %v9252_v50 }
 0x20b   : > { %v1641_v51 = vmul.f32 %v1559_v29, %v9269_v58  ;;  %v10776_v40 = vadd.f32 %v9319_v8, %v1665_v55  ;;  %v802_v1 = vmul.f32 %v732_v12, %v579_v17  ;;  %v1268_v11 = vmul.f32 %v1233_v10, %v9236_v41 }
 0x20c   : > { %v1300_v48 = vmul.f32 %v1233_v10, %v9245_v44  ;;  %v1410_v36 = vadd.f32 %v14231_v32, %v1269_v14  ;;  %v1442_v46 = vadd.f32 %v10684_v0, %v1301_v35  ;;  %v8205_v55 = vunpack.i.l.bf16 %v10734_v53  ;;  %v14232_v35 = vld [vmem:[#allocation81_spill] sm:$0xff] }
 0x20d   : > { %v868_v16 = vpop.permute.xlu0 %867  ;;  %7434 = vmatmul.mubr.msk.bf16.gmra.mrb[40].mxu1 %vm2161_vm2, %v9977_v15  ;;  %v10779_v15 = vadd.f32 %v9321_v9, %v1697_v27  ;;  %v1229_v29 = vrot.slane %v802_v1, %v9095_v13  ;;  %v1673_v56 = vadd.f32 %v1609_v30, %v1404_v61  ;;  %v1409_v14 = vadd.f32 %v10688_v6, %v1268_v11  ;;  %v14235_v1 = vld [vmem:[#allocation80_spill] sm:$0xff] }
 0x20e   : > { %v901_v7 = vsel %vm869_vm1, %v868_v16, %v14230_v24  ;;  %2664 = vmatprep.mubr.bf16.mxu1 %v14092_v23  ;;  %v14287_v19 = vunpack.i.h.bf16 %v14286_v21 }
 0x20f   : > { %v1097_v54 = vmul.f32 %v1033_v28, %v901_v7  ;;  %v8206_v28 = vunpack.i.h.bf16 %v10734_v53 }
 0x211   : > { %v1583_v22 = vrot.slane %v1097_v54, %v9095_v13  ;;  %v1441_v54 = vadd.f32 %v10692_v59, %v1300_v48 }
 0x212   : > { %v866_v62 = vpop.permute.xlu0 %865 }
 0x213   : > { %v870_v25 = vsel %vm869_vm1, %v866_v62, %v868_v16  ;;  %v871_v5 = vsel %vm869_vm1, %v10437_v38, %v866_v62  ;;  %v1615_v12 = vmul.f32 %v1583_v22, %v9252_v50  ;;  %v1647_v18 = vmul.f32 %v1583_v22, %v9269_v58 }
 0x214   : > { %v10793_v60 = vpop.permute.xlu1 %8208  ;;  %v1095_v49 = vmul.f32 %v1025_v26, %v871_v5  ;;  %v1096_v2 = vmul.f32 %v1029_v34, %v870_v25  ;;  %v14233_v26 = vld [vmem:[#allocation27_spill] sm:$0xff]  ;;  %v14236_v22 = vmax.f32 %v14235_v1, 0.0  ;;  %v1267_v25 = vmul.f32 %v1229_v29, %v9236_v41 }
 0x215   : > { %v13879_v27 = vunpack.i.h.bf16 %v10793_v60  ;;  %v13878_v38 = vunpack.i.l.bf16 %v10793_v60  ;;  %v1679_v10 = vadd.f32 %v1615_v12, %v1410_v36  ;;  %v1711_v16 = vadd.f32 %v1647_v18, %v1442_v46  ;;  %7435 = vmatmul.mubr.msk.bf16.gmra.mrb[44].mxu1 %vm2161_vm2, %v14232_v35 }
 0x216   : > { %v1579_v0 = vrot.slane %v1096_v2, %v9095_v13  ;;  %v1575_v24 = vrot.slane %v1095_v49, %v9095_v13  ;;  %2770 = vmatprep.mubr.bf16.mxu1 %v14092_v23  ;;  %v14234_v34 = vmax.f32 %v14233_v26, 0.0  ;;  %v1299_v5 = vmul.f32 %v1229_v29, %v9245_v44 }
 0x217   : > { %v2002_v17 = vsel %vm869_vm1, %v8205_v55, %v13878_v38  ;;  %v2003_v53 = vsel %vm869_vm1, %v8206_v28, %v13879_v27  ;;  %v10822_v6 = vadd.f32 %v9319_v8, %v1679_v10  ;;  %v10825_v11 = vadd.f32 %v9321_v9, %v1711_v16  ;;  %v14256_v27 = vld [vmem:[#allocation71_spill] sm:$0xff] }
 0x218   : > { %v1614_v7 = vmul.f32 %v1579_v0, %v9252_v50  ;;  %v1646_v61 = vmul.f32 %v1579_v0, %v9269_v58  ;;  %v2063_v30 = vmax.f32 %v14234_v34, %v2002_v17  ;;  %v2095_v62 = vmax.f32 %v14236_v22, %v2003_v53  ;;  %v14239_v53 = vld [vmem:[#allocation44_spill] sm:$0xff] }
 0x219   : > { %v1819_v18 = vmax.f32 %v10822_v6, 0.0  ;;  %v1705_v49 = vadd.f32 %v1641_v51, %v1436_v4  ;;  %v1851_v2 = vmax.f32 %v10825_v11, 0.0  ;;  %v1613_v44 = vmul.f32 %v1575_v24, %v9252_v50  ;;  %v14237_v51 = vld [vmem:[#allocation45_spill] sm:$0xff] }
 0x21a   : > { %v10829_v32 = vpop.permute.xlu1 %8213  ;;  %v1678_v59 = vadd.f32 %v1614_v7, %v1409_v14  ;;  %v1710_v48 = vadd.f32 %v1646_v61, %v1441_v54  ;;  %v2133_v12 = vpack.c.bf16 %v2095_v62, %v2063_v30  ;;  %v1645_v29 = vmul.f32 %v1575_v24, %v9269_v58  ;;  %v14242_v7 = vld [vmem:[#allocation23_spill] sm:$0xff] }
 0x21b   : > { %v13890_v36 = vunpack.i.h.bf16 %v10829_v32  ;;  %v13892_v46 = vunpack.i.l.bf16 %v10829_v32  ;;  %v14238_v16 = vmax.f32 %v14237_v51, 0.0  ;;  %v14240_v14 = vmax.f32 %v14239_v53, 0.0 }
 0x21c   : > { %v10836_v0 = vadd.f32 %v9319_v8, %v1678_v59  ;;  %v10839_v41 = vadd.f32 %v9321_v9, %v1710_v48  ;;  %2738 = vmatprep.subr.bf16.mxu1 %v2133_v12  ;;  %v8262_v50 = vpack.i.bf16 %v1851_v2, %v1819_v18  ;;  %v1440_v61 = vadd.f32 %v14242_v7, %v1299_v5 }
 0x21d   : > { %v2005_v10 = vsel %vm869_vm1, %v13890_v36, %v8206_v28  ;;  %v2004_v4 = vsel %vm869_vm1, %v13892_v46, %v8205_v55  ;;  %v14241_v28 = vld [vmem:[#allocation59_spill] sm:$0xff]  ;;  %v8272_v55 = vpack.i.bf16 %v13897_v43, %v13898_v37  ;;  %v13893_v34 = vmax.f32 %v10740_v42, 0.0 }
 0x21e   : > { %v2094_v17 = vmax.f32 %v14238_v16, %v2005_v10  ;;  %v2062_v35 = vmax.f32 %v14240_v14, %v2004_v4  ;;  %v13899_v58 = vmax.f32 %v10836_v0, 0.0  ;;  %v1408_v24 = vadd.f32 %v14241_v28, %v1267_v25  ;;  %8263 = vrot.lane.b32.xlu0 %v8262_v50, %s8868_s9 }
 0x21f   : > { %v13900_v54 = vmax.f32 %v10839_v41, 0.0  ;;  %v10871_v30 = vadd.f32 %v9319_v8, %v10751_v31  ;;  %v10875_v1 = vadd.f32 %v9321_v9, %v10753_v57  ;;  %v1709_v62 = vadd.f32 %v1645_v29, %v1440_v61 }
 0x220   : > { %v2132_v26 = vpack.c.bf16 %v2094_v17, %v2062_v35  ;;  %v1677_v22 = vadd.f32 %v1613_v44, %v1408_v24  ;;  %v13891_v5 = vmax.f32 %v10749_v45, 0.0  ;;  %v13887_v59 = vmax.f32 %v10776_v40, 0.0 }
 0x221   : > { %v8267_v25 = vpack.i.bf16 %v13900_v54, %v13899_v58  ;;  %v13886_v48 = vmax.f32 %v10779_v15, 0.0  ;;  %v10885_v31 = vadd.f32 %v9319_v8, %v1673_v56  ;;  %v10888_v57 = vadd.f32 %v9321_v9, %v1705_v49  ;;  %v10903_v56 = vld [vmem:[%s13700_s3] sm:$0xff]  }
 0x222   : > { %2739 = vmatpush1.bf16.msra.mxu1 %v2132_v26  ;;  %8273 = vrot.lane.b32.xlu0 %v8272_v55, %s8868_s9  ;;  %v13881_v12 = vmax.f32 %v10871_v30, 0.0  ;;  %v13880_v44 = vmax.f32 %v10875_v1, 0.0  ;;  %v8277_v10 = vpack.i.bf16 %v13891_v5, %v13893_v34  ;;  %v10908_v49 = vadd.f32 %v9319_v8, %v1677_v22  ;;  %v14243_v26 = vld [vmem:[#allocation56_spill] sm:$0xff]  ;;  %v14266_v5 = vld [vmem:[#allocation25_spill] sm:$0xff] }
 0x223   : > { %8268 = vrot.lane.b32.xlu1 %v8267_v25, %s8868_s9  ;;  %v10911_v4 = vadd.f32 %v9321_v9, %v1709_v62  ;;  %v8282_v51 = vpack.i.bf16 %v13886_v48, %v13887_v59  ;;  %v13877_v16 = vmax.f32 %v10885_v31, 0.0  ;;  %v13876_v17 = vmax.f32 %v10888_v57, 0.0  ;;  %v14245_v25 = vld [vmem:[#allocation55_spill] sm:$0xff] }
 0x224   : > { %v10894_v29 = vpop.permute.xlu0 %8223  ;;  %v8287_v9 = vpack.i.bf16 %v13880_v44, %v13881_v12  ;;  %v13885_v28 = vmax.f32 %v10908_v49, 0.0  ;;  %v14244_v22 = vmax.f32 %v14243_v26, 0.0  ;;  %v14257_v44 = vmax.f32 %v14256_v27, 0.0 }
 0x225   : > { %7439 = vmatmul.mubr.msk.bf16.vlgmr.msra.gmra.mrb[48].mxu1 %vm2161_vm2, %v10903_v56  ;;  %v13875_v53 = vunpack.i.h.bf16 %v10894_v29  ;;  %v13874_v14 = vunpack.i.l.bf16 %v10894_v29  ;;  %v13884_v24 = vmax.f32 %v10911_v4, 0.0  ;;  %v8292_v7 = vpack.i.bf16 %v13876_v17, %v13877_v16 }
 0x226   : > { %2780 = vmatprep.mubr.bf16.mxu1 %v14092_v23  ;;  %8283 = vrot.lane.b32.xlu0 %v8282_v51, %s8868_s9  ;;  %v14267_v46 = vmax.f32 %v14266_v5, 0.0 }
 0x227   : > { %8278 = vrot.lane.b32.xlu1 %v8277_v10, %s8868_s9  ;;  %v14246_v10 = vmax.f32 %v14245_v25, 0.0  ;;  %v14247_v25 = vld [vmem:[#allocation28_spill] sm:$0xff] }
 0x228   : > { %v8219_v8 = vpop.permute.xlu1 %8218 }
 0x229   : > { %v8221_v35 = vunpack.i.h.bf16 %v8219_v8  ;;  %v8220_v50 = vunpack.i.l.bf16 %v8219_v8  ;;  %v4149_v8 = vld [vmem:[%s13701_s4] sm:$0xff] }
 0x22a   : > { %8293 = vrot.lane.b32.xlu0 %v8292_v7, %s8868_s9 }
 0x22b   : > { %v1994_v61 = vsel %vm869_vm1, %v8220_v50, %v13874_v14  ;;  %v1995_v55 = vsel %vm869_vm1, %v8221_v35, %v13875_v53  ;;  %8288 = vrot.lane.b32.xlu1 %v8287_v9, %s8868_s9  ;;  %v8297_v14 = vpack.i.bf16 %v13884_v24, %v13885_v28  ;;  %v10958_v9 = vld [vmem:[%s13700_s3 + $0x8] sm:$0xff]  }
 0x22c   : > { %v2067_v62 = vmax.f32 %v14244_v22, %v1994_v61  ;;  %v2099_v51 = vmax.f32 %v14246_v10, %v1995_v55  ;;  %v4150_v61 = vld [vmem:[%s13701_s4 + $0x8] sm:$0xff]  ;;  %v14248_v10 = vmax.f32 %v14247_v25, 0.0 }
 0x22d   : > { %7440 = vmatmul.mubr.msk.bf16.gmra.mrb[52].mxu1 %vm2161_vm2, %v10958_v9 }
 0x22e   : > { %v2137_v7 = vpack.c.bf16 %v2099_v51, %v2067_v62  ;;  %2790 = vmatprep.mubr.bf16.mxu1 %v14092_v23  ;;  %4153 = vperm.xlu0 %8140, %v4149_v8   ;;  %v14249_v8 = vld [vmem:[#allocation52_spill] sm:$0xff] }
 0x22f   : > { %8298 = vrot.lane.b32.xlu1 %v8297_v14, %s8868_s9  ;;  %s13653_s9 = scalar_lea.hbm %s13704_s7, %s7717_s12 }
 0x230   : > { %2864 = vmatprep.subr.bf16.mxu1 %v2137_v7  ;;  %v14250_v7 = vmax.f32 %v14249_v8, 0.0 }
 0x231   : > { %v10967_v55 = vpop.permute.xlu1 %8228 }
 0x232   : > { %v13882_v26 = vunpack.i.h.bf16 %v10967_v55  ;;  %v13883_v22 = vunpack.i.l.bf16 %v10967_v55 }
 0x233   : > { %4158 = vperm.xlu1 %8141, %v4150_v61   ;;  %v10986_v61 = vld [vmem:[%s13700_s3 + $0x10] sm:$0xff]  }
 0x234   : > { %v1996_v62 = vsel %vm869_vm1, %v13883_v22, %v8220_v50  ;;  %v1997_v14 = vsel %vm869_vm1, %v13882_v26, %v8221_v35 }
 0x235   : > { %v2066_v51 = vmax.f32 %v14248_v10, %v1996_v62  ;;  %v2098_v53 = vmax.f32 %v14250_v7, %v1997_v14  ;;  %7441 = vmatmul.mubr.msk.bf16.gmra.mrb[56].mxu1 %vm2161_vm2, %v10986_v61  ;;  %v14251_v10 = vld [vmem:[#allocation65_spill] sm:$0xff] }
 0x236   : > { %2896 = vmatprep.mubr.bf16.mxu1 %v14092_v23  ;;  %v14252_v8 = vunpack.i.l.bf16 %v14251_v10  ;;  %v14253_v38 = vunpack.i.h.bf16 %v14251_v10 }
 0x237   : > { %v2136_v50 = vpack.c.bf16 %v2098_v53, %v2066_v51 }
 0x239   : > { %2865 = vmatpush1.bf16.msra.mxu1 %v2136_v50 }
 0x23b   : > { %v8234_v17 = vpop.permute.xlu0 %8233 }
 0x23c   : > { %v8236_v35 = vunpack.i.h.bf16 %v8234_v17  ;;  %v8235_v16 = vunpack.i.l.bf16 %v8234_v17  ;;  %v10991_v25 = vpop.permute.xlu1 %8238  ;;  %v14254_v17 = vld [vmem:[#allocation70_spill] sm:$0xff] }
 0x23d   : > { %v8241_v62 = vunpack.i.h.bf16 %v10991_v25  ;;  %v8240_v14 = vunpack.i.l.bf16 %v10991_v25  ;;  %7445 = vmatmul.mubr.msk.bf16.vlgmr.msra.gmra.mrb[60].mxu1 %vm2161_vm2, %v10903_v56  ;;  %v14255_v51 = vmax.f32 %v14254_v17, 0.0  ;;  %v14260_v17 = vld [vmem:[#allocation73_spill] sm:$0xff] }
 0x23e   : > { %v2038_v7 = vsel %vm869_vm1, %v8235_v16, %v14252_v8  ;;  %v2039_v53 = vsel %vm869_vm1, %v8236_v35, %v14253_v38  ;;  %2906 = vmatprep.mubr.bf16.mxu1 %v14092_v23  ;;  %v14258_v38 = vld [vmem:[#allocation72_spill] sm:$0xff] }
 0x23f   : > { %v2045_v50 = vmax.f32 %v14255_v51, %v2038_v7  ;;  %v2077_v12 = vmax.f32 %v14257_v44, %v2039_v53  ;;  %v2040_v26 = vsel %vm869_vm1, %v8240_v14, %v8235_v16  ;;  %v2041_v10 = vsel %vm869_vm1, %v8241_v62, %v8236_v35 }
 0x240   : > { %v14259_v8 = vmax.f32 %v14258_v38, 0.0  ;;  %v14261_v7 = vmax.f32 %v14260_v17, 0.0 }
 0x241   : > { %v2115_v27 = vpack.c.bf16 %v2077_v12, %v2045_v50 }
 0x242   : > { %v2044_v22 = vmax.f32 %v14259_v8, %v2040_v26  ;;  %v2076_v51 = vmax.f32 %v14261_v7, %v2041_v10 }
 0x243   : > { %2171 = vmatprep.subr.bf16.mxu0 %v2115_v27  ;;  %v8244_v53 = vpop.permute.xlu0 %8243 }
 0x244   : > { %v2114_v44 = vpack.c.bf16 %v2076_v51, %v2044_v22  ;;  %v8246_v35 = vunpack.i.h.bf16 %v8244_v53  ;;  %v8245_v26 = vunpack.i.l.bf16 %v8244_v53  ;;  %v14262_v51 = vld [vmem:[#allocation74_spill] sm:$0xff]  ;;  %v14264_v53 = vld [vmem:[#allocation60_spill] sm:$0xff] }
 0x245   : > { %7446 = vmatmul.mubr.msk.bf16.gmra.mrb[64].mxu1 %vm2161_vm2, %v10958_v9  ;;  %v14263_v27 = vmax.f32 %v14262_v51, 0.0  ;;  %v14265_v24 = vmax.f32 %v14264_v53, 0.0 }
 0x246   : > { %2172 = vmatpush1.bf16.msra.mxu0 %v2114_v44  ;;  %2916 = vmatprep.mubr.bf16.mxu1 %v14092_v23 }
 0x248   : > { %v11026_v16 = vpop.permute.xlu1 %8248 }
 0x249   : > { %7412 = vmatmul.mubr.msk.bf16.vlgmr.msra.gmra.mrb[0].mxu0 %vm2161_vm2, %v10903_v56  ;;  %v13889_v38 = vunpack.i.h.bf16 %v11026_v16  ;;  %v13888_v12 = vunpack.i.l.bf16 %v11026_v16 }
 0x24a   : > { %2213 = vmatprep.mubr.bf16.mxu0 %v14092_v23 }
 0x24b   : > { %v11032_v22 = vpop.permute.xlu0 %8253  ;;  %v1986_v50 = vsel %vm869_vm1, %v8245_v26, %v13888_v12  ;;  %v1987_v10 = vsel %vm869_vm1, %v8246_v35, %v13889_v38 }
 0x24c   : > { %v13894_v8 = vunpack.i.h.bf16 %v11032_v22  ;;  %v13895_v17 = vunpack.i.l.bf16 %v11032_v22  ;;  %v8259_v7 = vpop.permute.xlu1 %8258  ;;  %v2071_v44 = vmax.f32 %v14263_v27, %v1986_v50  ;;  %v2103_v28 = vmax.f32 %v14265_v24, %v1987_v10  ;;  %v14268_v50 = vld [vmem:[#allocation78_spill] sm:$0xff]  ;;  %v14270_v24 = vld [vmem:[#allocation64_spill] sm:$0xff] }
 0x24d   : > { %v8261_v48 = vunpack.i.h.bf16 %v8259_v7  ;;  %v8260_v59 = vunpack.i.l.bf16 %v8259_v7  ;;  %v14269_v27 = vmax.f32 %v14268_v50, 0.0  ;;  %v14271_v10 = vunpack.i.h.bf16 %v14270_v24  ;;  %7447 = vmatmul.mubr.msk.bf16.gmra.mrb[68].mxu1 %vm2161_vm2, %v10986_v61 }
 0x24e   : > { %v1989_v12 = vsel %vm869_vm1, %v13894_v8, %v8246_v35  ;;  %v1988_v38 = vsel %vm869_vm1, %v13895_v17, %v8245_v26  ;;  %v2141_v36 = vpack.c.bf16 %v2103_v28, %v2071_v44  ;;  %v14272_v34 = vunpack.i.l.bf16 %v14270_v24  ;;  %v14273_v28 = vld [vmem:[#allocation30_spill] sm:$0xff]  ;;  %3022 = vmatprep.mubr.bf16.mxu1 %v14092_v23 }
 0x24f   : > { %v2102_v51 = vmax.f32 %v14267_v46, %v1989_v12  ;;  %v2070_v53 = vmax.f32 %v14269_v27, %v1988_v38  ;;  %v2033_v7 = vsel %vm869_vm1, %v14271_v10, %v8261_v48  ;;  %v14274_v26 = vmax.f32 %v14273_v28, 0.0  ;;  %v14275_v46 = vld [vmem:[#allocation29_spill] sm:$0xff]  ;;  %v14277_v38 = vld [vmem:[#allocation34_spill] sm:$0xff] }
 0x250   : > { %v2032_v35 = vsel %vm869_vm1, %v14272_v34, %v8260_v59  ;;  %v14276_v12 = vmax.f32 %v14275_v46, 0.0  ;;  %2990 = vmatprep.subr.bf16.mxu1 %v2141_v36  ;;  %v14278_v50 = vunpack.i.l.bf16 %v14277_v38  ;;  %v14279_v34 = vunpack.i.h.bf16 %v14277_v38  ;;  %v14280_v10 = vld [vmem:[#allocation61_spill] sm:$0xff] }
 0x251   : > { %v2080_v5 = vmax.f32 %v14274_v26, %v2033_v7  ;;  %7413 = vmatmul.mubr.msk.bf16.gmra.mrb[4].mxu0 %vm2161_vm2, %v10958_v9  ;;  %v14281_v7 = vmax.f32 %v14280_v10, 0.0  ;;  %v14282_v26 = vld [vmem:[#allocation19_spill] sm:$0xff] }
 0x252   : > { %v2048_v44 = vmax.f32 %v14276_v12, %v2032_v35  ;;  %v2030_v27 = vsel %vm869_vm1, %v8260_v59, %v14278_v50  ;;  %2223 = vmatprep.mubr.bf16.mxu0 %v14092_v23  ;;  %v2031_v24 = vsel %vm869_vm1, %v8261_v48, %v14279_v34  ;;  %v2140_v35 = vpack.c.bf16 %v2102_v51, %v2070_v53 }
 0x253   : > { %v2049_v28 = vmax.f32 %v14281_v7, %v2030_v27  ;;  %v14283_v36 = vmax.f32 %v14282_v26, 0.0 }
 0x254   : > { %2991 = vmatpush1.bf16.msra.mxu1 %v2140_v35  ;;  %v2118_v12 = vpack.c.bf16 %v2080_v5, %v2048_v44 }
 0x255   : > { %v2081_v46 = vmax.f32 %v14283_v36, %v2031_v24 }
 0x257   : > { %v2119_v8 = vpack.c.bf16 %v2081_v46, %v2049_v28  ;;  %7451 = vmatmul.mubr.msk.bf16.vlgmr.msra.gmra.mrb[72].mxu1 %vm2161_vm2, %v10903_v56  ;;  %v11111_v59 = vpop.f32.mrb[0].mxu1 }
 0x258   : > { %3032 = vmatprep.mubr.bf16.mxu1 %v14092_v23  ;;  %v11113_v48 = vpop.f32.mrb[1].mxu1 }
 0x259   : > { %2297 = vmatprep.subr.bf16.mxu0 %v2119_v8  ;;  %7414 = vmatmul.mubr.msk.bf16.gmra.mrb[8].mxu0 %vm2161_vm2, %v10986_v61  ;;  %v11115_v8 = vpop.f32.mrb[2].mxu1 }
 0x25a   : > { %2298 = vmatpush1.bf16.msra.mxu0 %v2118_v12  ;;  %2329 = vmatprep.mubr.bf16.mxu0 %v14092_v23  ;;  %v11117_v51 = vpop.f32.mrb[3].mxu1 }
 0x25f   : > { %7452 = vmatmul.mubr.msk.bf16.gmra.mrb[76].mxu1 %vm2161_vm2, %v10958_v9  ;;  %v11119_v53 = vpop.f32.mrb[4].mxu1 }
 0x260   : > { %3042 = vmatprep.mubr.bf16.mxu1 %v14092_v23  ;;  %v11121_v5 = vpop.f32.mrb[5].mxu1 }
 0x261   : > { %7418 = vmatmul.mubr.msk.bf16.vlgmr.msra.gmra.mrb[12].mxu0 %vm2161_vm2, %v10903_v56  ;;  %14284 = vst [vmem:[#allocation36_spill] sm:$0xff] %v11121_v5  ;;  %v11123_v44 = vpop.f32.mrb[6].mxu1 }
 0x262   : > { %2339 = vmatprep.mubr.bf16.mxu0 %v14092_v23  ;;  %v11125_v38 = vpop.f32.mrb[7].mxu1 }
 0x263   : > { %14285 = vst [vmem:[#allocation31_spill] sm:$0xff] %v11125_v38 }
 0x267   : > { %7453 = vmatmul.mubr.msk.bf16.gmra.mrb[80].mxu1 %vm2161_vm2, %v10986_v61  ;;  %v11127_v50 = vpop.f32.mrb[8].mxu1 }
 0x268   : > { %3148 = vmatprep.mubr.bf16.mxu1 %v14092_v23  ;;  %v11129_v27 = vpop.f32.mrb[9].mxu1 }
 0x269   : > { %7419 = vmatmul.mubr.msk.bf16.gmra.mrb[16].mxu0 %vm2161_vm2, %v10958_v9  ;;  %v11131_v34 = vpop.f32.mrb[10].mxu1 }
 0x26a   : > { %2349 = vmatprep.mubr.bf16.mxu0 %v14092_v23  ;;  %v11133_v24 = vpop.f32.mrb[11].mxu1 }
 0x271   : > { %7420 = vmatmul.mubr.msk.bf16.gmra.mrb[20].mxu0 %vm2161_vm2, %v10986_v61 }
 0x272   : > { %2455 = vmatprep.mubr.bf16.mxu0 %v14092_v23 }
 0x275   : > { %v11135_v10 = vpop.f32.mrb[12].mxu1 }
 0x276   : > { %v11137_v7 = vpop.f32.mrb[13].mxu1 }
 0x277   : > { %v11139_v28 = vpop.f32.mrb[14].mxu1 }
 0x278   : > { %v11141_v35 = vpop.f32.mrb[15].mxu1 }
 0x290   : > { %v8264_v26 = vpop.permute.xlu0 %8263 }
 0x291   : > { %v8266_v36 = vunpack.i.h.bf16 %v8264_v26  ;;  %v8265_v46 = vunpack.i.l.bf16 %v8264_v26 }
 0x293   : > { %v2042_v17 = vsel %vm869_vm1, %v8265_v46, %v8240_v14  ;;  %v2043_v33 = vsel %vm869_vm1, %v8266_v36, %v8241_v62 }
 0x294   : > { %v8274_v43 = vpop.permute.xlu0 %8273  ;;  %v2075_v26 = vmax.f32 %v1819_v18, %v2042_v17  ;;  %v2107_v54 = vmax.f32 %v1851_v2, %v2043_v33  ;;  %v14288_v33 = vunpack.i.l.bf16 %v14286_v21  ;;  %v14289_v17 = vmax.f32 %v10839_v41, 0.0  ;;  %v14297_v41 = vld [vmem:[#allocation37_spill] sm:$0xff] }
 0x295   : > { %v11143_v12 = vpop.permute.xlu1 %8268  ;;  %v8276_v20 = vunpack.i.h.bf16 %v8274_v43  ;;  %v8275_v13 = vunpack.i.l.bf16 %v8274_v43 }
 0x296   : > { %v13909_v37 = vunpack.i.h.bf16 %v11143_v12  ;;  %v13910_v58 = vunpack.i.l.bf16 %v11143_v12  ;;  %v2145_v14 = vpack.c.bf16 %v2107_v54, %v2075_v26  ;;  %v14291_v26 = vld [vmem:[#allocation83_spill] sm:$0xff] }
 0x297   : > { %v2025_v6 = vsel %vm869_vm1, %v14287_v19, %v8276_v20  ;;  %v2024_v43 = vsel %vm869_vm1, %v14288_v33, %v8275_v13  ;;  %v14293_v21 = vunpack.i.h.bf16 %v14291_v26 }
 0x298   : > { %v1981_v25 = vsel %vm869_vm1, %v13909_v37, %v8266_v36  ;;  %v1980_v62 = vsel %vm869_vm1, %v13910_v58, %v8265_v46  ;;  %3116 = vmatprep.subr.bf16.mxu1 %v2145_v14  ;;  %v14290_v46 = vmax.f32 %v10836_v0, 0.0  ;;  %v14292_v37 = vunpack.i.l.bf16 %v14291_v26  ;;  %v11187_v58 = vpop.f32.mrb[16].mxu1  ;;  %v11193_v0 = vpop.permute.xlu0 %8283 }
 0x299   : > { %v8279_v11 = vpop.permute.xlu1 %8278  ;;  %v2106_v36 = vmax.f32 %v14289_v17, %v1981_v25  ;;  %v2023_v33 = vsel %vm869_vm1, %v8276_v20, %v14293_v21  ;;  %14294 = vst [vmem:[#allocation43_spill] sm:$0xff] %v11187_v58  ;;  %v14298_v25 = vmax.f32 %v14297_v41, 0.0  ;;  %v11199_v26 = vpop.f32.mrb[17].mxu1  ;;  %v14303_v21 = vld [vmem:[#allocation26_spill] sm:$0xff]  ;;  %v8286_v41 = vunpack.i.h.bf16 %v11193_v0 }
 0x29a   : > { %v8281_v18 = vunpack.i.h.bf16 %v8279_v11  ;;  %v8280_v2 = vunpack.i.l.bf16 %v8279_v11  ;;  %v2074_v54 = vmax.f32 %v14290_v46, %v1980_v62  ;;  %v2022_v19 = vsel %vm869_vm1, %v8275_v13, %v14292_v37  ;;  %v14295_v11 = vld [vmem:[#allocation38_spill] sm:$0xff]  ;;  %14301 = vst [vmem:[#allocation33_spill] sm:$0xff] %v11199_v26  ;;  %v11203_v20 = vpop.f32.mrb[18].mxu1 }
 0x29b   : > { %v14296_v14 = vmax.f32 %v14295_v11, 0.0  ;;  %v2052_v17 = vmax.f32 %v14298_v25, %v2024_v43  ;;  %v14299_v62 = vmax.f32 %v10679_v47, 0.0  ;;  %v14300_v13 = vmax.f32 %v10702_v3, 0.0  ;;  %14302 = vst [vmem:[#allocation47_spill] sm:$0xff] %v11203_v20  ;;  %v14310_v20 = vld [vmem:[#allocation53_spill] sm:$0xff] }
 0x29c   : > { %v14304_v11 = vunpack.i.h.bf16 %v14303_v21  ;;  %v14305_v43 = vunpack.i.l.bf16 %v14303_v21  ;;  %v8285_v3 = vunpack.i.l.bf16 %v11193_v0  ;;  %v14311_v26 = vmax.f32 %v14310_v20, 0.0 }
 0x29d   : > { %v2084_v38 = vmax.f32 %v14296_v14, %v2025_v6  ;;  %v2053_v46 = vmax.f32 %v14299_v62, %v2022_v19  ;;  %v2085_v37 = vmax.f32 %v14300_v13, %v2023_v33  ;;  %v11201_v5 = vpop.permute.xlu1 %8288  ;;  %v11213_v19 = vpop.f32.mrb[19].mxu1  ;;  %v2144_v14 = vpack.c.bf16 %v2106_v36, %v2074_v54 }
 0x29e   : > { %v2017_v6 = vsel %vm869_vm1, %v14304_v11, %v8281_v18  ;;  %v2016_v47 = vsel %vm869_vm1, %v14305_v43, %v8280_v2  ;;  %14306 = vst [vmem:[#allocation35_spill] sm:$0xff] %v11213_v19  ;;  %v14307_v62 = vunpack.i.l.bf16 %v10638_v63  ;;  %v14308_v11 = vld [vmem:[#allocation54_spill] sm:$0xff]  ;;  %v11227_v36 = vpop.f32.mrb[20].mxu1  ;;  %v14316_v20 = vunpack.i.h.bf16 %v10829_v32 }
 0x29f   : > { %v2123_v33 = vpack.c.bf16 %v2085_v37, %v2053_v46  ;;  %v2122_v25 = vpack.c.bf16 %v2084_v38, %v2052_v17  ;;  %v14309_v58 = vmax.f32 %v14308_v11, 0.0  ;;  %v2056_v43 = vmax.f32 %v14311_v26, %v2016_v47  ;;  %3117 = vmatpush1.bf16.msra.mxu1 %v2144_v14 }
 0x2a0   : > { %v2014_v13 = vsel %vm869_vm1, %v8280_v2, %v14307_v62  ;;  %v14312_v38 = vunpack.i.h.bf16 %v10638_v63  ;;  %v14313_v2 = vmax.f32 %v10740_v42, 0.0  ;;  %v14315_v37 = vmax.f32 %v10749_v45, 0.0 }
 0x2a1   : > { %v2088_v21 = vmax.f32 %v14309_v58, %v2017_v6  ;;  %2423 = vmatprep.subr.bf16.mxu0 %v2123_v33  ;;  %v11225_v19 = vpop.permute.xlu1 %8298  ;;  %v14314_v58 = vunpack.i.l.bf16 %v10829_v32  ;;  %v2007_v63 = vsel %vm869_vm1, %v8286_v41, %v14316_v20  ;;  %v11246_v6 = vpop.f32.mrb[21].mxu1  ;;  %v14317_v47 = vmax.f32 %v10776_v40, 0.0 }
 0x2a2   : > { %2424 = vmatpush1.bf16.msra.mxu0 %v2122_v25  ;;  %v2015_v54 = vsel %vm869_vm1, %v8281_v18, %v14312_v38  ;;  %v2057_v17 = vmax.f32 %v14313_v2, %v2014_v13  ;;  %v13911_v46 = vunpack.i.h.bf16 %v11225_v19  ;;  %v13912_v42 = vunpack.i.l.bf16 %v11225_v19  ;;  %v11255_v25 = vpop.f32.mrb[22].mxu1  ;;  %7457 = vmatmul.mubr.msk.bf16.vlgmr.msra.gmra.mrb[84].mxu1 %vm2161_vm2, %v10903_v56 }
 0x2a3   : > { %v2006_v0 = vsel %vm869_vm1, %v8285_v3, %v14314_v58  ;;  %v2089_v26 = vmax.f32 %v14315_v37, %v2015_v54  ;;  %v2126_v18 = vpack.c.bf16 %v2088_v21, %v2056_v43  ;;  %v14318_v14 = vmax.f32 %v10779_v15, 0.0  ;;  %v11260_v62 = vpop.f32.mrb[23].mxu1  ;;  %3158 = vmatprep.mubr.bf16.mxu1 %v14092_v23 }
 0x2a4   : > { %v2061_v33 = vmax.f32 %v14317_v47, %v2006_v0  ;;  %v14319_v40 = vunpack.i.l.bf16 %v11143_v12  ;;  %v14320_v11 = vunpack.i.h.bf16 %v11143_v12  ;;  %v14321_v43 = vmax.f32 %v10908_v49, 0.0 }
 0x2a5   : > { %7424 = vmatmul.mubr.msk.bf16.vlgmr.msra.gmra.mrb[24].mxu0 %vm2161_vm2, %v10903_v56  ;;  %v2093_v45 = vmax.f32 %v14318_v14, %v2007_v63  ;;  %v2127_v32 = vpack.c.bf16 %v2089_v26, %v2057_v17  ;;  %v14322_v54 = vmax.f32 %v10911_v4, 0.0  ;;  %v11283_v17 = vpop.f32.mrb[24].mxu1  ;;  %v8291_v4 = vunpack.i.h.bf16 %v11201_v5  ;;  %v14325_v63 = vld [vmem:[#allocation48_spill] sm:$0xff] }
 0x2a6   : > { %2465 = vmatprep.mubr.bf16.mxu0 %v14092_v23  ;;  %v1982_v15 = vsel %vm869_vm1, %v13912_v42, %v14319_v40  ;;  %v1983_v21 = vsel %vm869_vm1, %v13911_v46, %v14320_v11  ;;  %v11287_v12 = vpop.f32.mrb[25].mxu1  ;;  %v8290_v37 = vunpack.i.l.bf16 %v11201_v5  ;;  %v14329_v5 = vunpack.i.l.bf16 %v10967_v55 }
 0x2a7   : > { %2549 = vmatprep.subr.bf16.mxu0 %v2127_v32  ;;  %v2131_v13 = vpack.c.bf16 %v2093_v45, %v2061_v33  ;;  %v11277_v38 = vmax.f32 %v14321_v43, %v1982_v15  ;;  %v11281_v2 = vmax.f32 %v14322_v54, %v1983_v21  ;;  %v11291_v0 = vpop.f32.mrb[26].mxu1  ;;  %v14327_v33 = vunpack.i.l.bf16 %v14325_v63  ;;  %v14334_v21 = vld [vmem:[#allocation57_spill] sm:$0xff] }
 0x2a8   : > { %2550 = vmatpush1.bf16.msra.mxu0 %v2126_v18  ;;  %v11294_v49 = vpop.f32.mrb[27].mxu1  ;;  %v14326_v18 = vunpack.i.h.bf16 %v14325_v63  ;;  %v1998_v32 = vsel %vm869_vm1, %v8290_v37, %v14329_v5  ;;  %v14335_v43 = vmax.f32 %v14334_v21, 0.0  ;;  %v14336_v63 = vmax.f32 %v10871_v30, 0.0  ;;  %v8294_v30 = vpop.permute.xlu0 %8293 }
 0x2a9   : > { %2675 = vmatprep.subr.bf16.mxu0 %v2131_v13  ;;  %v2143_v58 = vpack.c.bf16 %v11281_v2, %v11277_v38  ;;  %v11301_v26 = vpop.f32.mrb[28].mxu1  ;;  %v2008_v14 = vsel %vm869_vm1, %v14327_v33, %v8285_v3  ;;  %v14330_v13 = vunpack.i.h.bf16 %v10967_v55  ;;  %v14332_v3 = vld [vmem:[#allocation58_spill] sm:$0xff]  ;;  %v14337_v33 = vmax.f32 %v10875_v1, 0.0 }
 0x2aa   : > { %7458 = vmatmul.mubr.msk.bf16.gmra.mrb[88].mxu1 %vm2161_vm2, %v10958_v9  ;;  %14323 = vst [vmem:[#allocation20_spill] sm:$0xff] %v11301_v26  ;;  %v11303_v20 = vpop.f32.mrb[29].mxu1  ;;  %v2009_v47 = vsel %vm869_vm1, %v14326_v18, %v8286_v41  ;;  %v14333_v15 = vmax.f32 %v14332_v3, 0.0  ;;  %v2060_v54 = vmax.f32 %v14335_v43, %v2008_v14  ;;  %v2065_v18 = vmax.f32 %v14336_v63, %v1998_v32 }
 0x2ab   : > { %3168 = vmatprep.mubr.bf16.mxu1 %v14092_v23  ;;  %14324 = vst [vmem:[#allocation21_spill] sm:$0xff] %v11303_v20  ;;  %v11315_v45 = vpop.f32.mrb[30].mxu1  ;;  %v1999_v41 = vsel %vm869_vm1, %v8291_v4, %v14330_v13  ;;  %v8296_v1 = vunpack.i.h.bf16 %v8294_v30  ;;  %v8295_v14 = vunpack.i.l.bf16 %v8294_v30  ;;  %v14338_v32 = vunpack.i.h.bf16 %v10793_v60 }
 0x2ac   : > { %14328 = vst [vmem:[#allocation63_spill] sm:$0xff] %v11315_v45  ;;  %v11326_v40 = vpop.f32.mrb[31].mxu1  ;;  %v2092_v11 = vmax.f32 %v14333_v15, %v2009_v47  ;;  %v2097_v55 = vmax.f32 %v14337_v33, %v1999_v41  ;;  %v14339_v15 = vunpack.i.l.bf16 %v10793_v60  ;;  %v14341_v43 = vunpack.i.h.bf16 %v11032_v22 }
 0x2ad   : > { %7425 = vmatmul.mubr.msk.bf16.gmra.mrb[28].mxu0 %vm2161_vm2, %v10958_v9  ;;  %14331 = vst [vmem:[#allocation42_spill] sm:$0xff] %v11326_v40  ;;  %v11338_v5 = vpop.f32.mrb[32].mxu1  ;;  %v2001_v41 = vsel %vm869_vm1, %v14338_v32, %v8291_v4  ;;  %v14347_v30 = vmax.f32 %v10888_v57, 0.0  ;;  %v14364_v2 = vunpack.i.h.bf16 %v11225_v19 }
 0x2ae   : > { %2475 = vmatprep.mubr.bf16.mxu0 %v14092_v23  ;;  %v2130_v13 = vpack.c.bf16 %v2092_v11, %v2060_v54  ;;  %v11340_v46 = vpop.f32.mrb[33].mxu1  ;;  %v2135_v42 = vpack.c.bf16 %v2097_v55, %v2065_v18  ;;  %v2000_v11 = vsel %vm869_vm1, %v14339_v15, %v8290_v37  ;;  %v1991_v4 = vsel %vm869_vm1, %v8296_v1, %v14341_v43  ;;  %v14342_v54 = vld [vmem:[#allocation39_spill] sm:$0xff]  ;;  %v14344_v18 = vld [vmem:[#allocation40_spill] sm:$0xff] }
 0x2af   : > { %v11344_v3 = vpop.f32.mrb[34].mxu1  ;;  %v14343_v60 = vmax.f32 %v14342_v54, 0.0  ;;  %v14345_v37 = vmax.f32 %v14344_v18, 0.0  ;;  %v14346_v55 = vmax.f32 %v10885_v31, 0.0  ;;  %v2101_v32 = vmax.f32 %v14347_v30, %v1991_v4 }
 0x2b0   : > { %v11347_v47 = vpop.f32.mrb[35].mxu1  ;;  %v14351_v4 = vunpack.i.h.bf16 %v10894_v29 }
 0x2b1   : > { %v2096_v63 = vmax.f32 %v14343_v60, %v2001_v41  ;;  %v2064_v33 = vmax.f32 %v14345_v37, %v2000_v11  ;;  %v14352_v60 = vunpack.i.l.bf16 %v10894_v29  ;;  %v14354_v37 = vld [vmem:[#allocation86_spill] sm:$0xff] }
 0x2b2   : > { %7459 = vmatmul.mubr.msk.bf16.gmra.mrb[92].mxu1 %vm2161_vm2, %v10986_v61  ;;  %v1993_v54 = vsel %vm869_vm1, %v14351_v4, %v8296_v1 }
 0x2b3   : > { %v2134_v15 = vpack.c.bf16 %v2096_v63, %v2064_v33  ;;  %v1992_v63 = vsel %vm869_vm1, %v14352_v60, %v8295_v14  ;;  %v14355_v33 = vmax.f32 %v14354_v37, 0.0  ;;  %v14362_v37 = vunpack.i.l.bf16 %v11225_v19 }
 0x2b5   : > { %7426 = vmatmul.mubr.msk.bf16.gmra.mrb[32].mxu0 %vm2161_vm2, %v10986_v61 }
 0x2b6   : > { %2581 = vmatprep.mubr.bf16.mxu0 %v14092_v23 }
 0x2bd   : > { %7430 = vmatmul.mubr.msk.bf16.vlgmr.msra.gmra.mrb[36].mxu0 %vm2161_vm2, %v10903_v56 }
 0x2be   : > { %2676 = vmatpush1.bf16.msra.mxu0 %v2130_v13  ;;  %2591 = vmatprep.mubr.bf16.mxu0 %v14092_v23 }
 0x2bf   : > { %2801 = vmatprep.subr.bf16.mxu0 %v2135_v42  ;;  %v14340_v42 = vunpack.i.l.bf16 %v11032_v22 }
 0x2c1   : > { %v1990_v21 = vsel %vm869_vm1, %v8295_v14, %v14340_v42 }
 0x2c2   : > { %v2069_v13 = vmax.f32 %v14346_v55, %v1990_v21  ;;  %v2100_v55 = vmax.f32 %v14355_v33, %v1993_v54  ;;  %v14363_v33 = vunpack.i.l.bf16 %v11026_v16 }
 0x2c4   : > { %v2139_v22 = vpack.c.bf16 %v2101_v32, %v2069_v13  ;;  %v14356_v13 = vld [vmem:[#allocation85_spill] sm:$0xff]  ;;  %v1984_v38 = vsel %vm869_vm1, %v14363_v33, %v14362_v37 }
 0x2c5   : > { %7431 = vmatmul.mubr.msk.bf16.gmra.mrb[40].mxu0 %vm2161_vm2, %v10958_v9  ;;  %v14357_v30 = vmax.f32 %v14356_v13, 0.0  ;;  %v14366_v13 = vld [vmem:[#allocation76_spill] sm:$0xff] }
 0x2c6   : > { %2601 = vmatprep.mubr.bf16.mxu0 %v14092_v23 }
 0x2c7   : > { %v2068_v32 = vmax.f32 %v14357_v30, %v1992_v63  ;;  %v14367_v30 = vmax.f32 %v14366_v13, 0.0 }
 0x2c9   : > { %v2138_v29 = vpack.c.bf16 %v2100_v55, %v2068_v32  ;;  %v2072_v32 = vmax.f32 %v14367_v30, %v1984_v38 }
 0x2cd   : > { %7432 = vmatmul.mubr.msk.bf16.gmra.mrb[44].mxu0 %vm2161_vm2, %v10986_v61 }
 0x2ce   : > { %2707 = vmatprep.mubr.bf16.mxu0 %v14092_v23 }
 0x2d5   : > { %7436 = vmatmul.mubr.msk.bf16.vlgmr.msra.gmra.mrb[48].mxu0 %vm2161_vm2, %v10903_v56 }
 0x2d6   : > { %2802 = vmatpush1.bf16.msra.mxu0 %v2134_v15  ;;  %2717 = vmatprep.mubr.bf16.mxu0 %v14092_v23 }
 0x2d7   : > { %2927 = vmatprep.subr.bf16.mxu0 %v2139_v22 }
 0x2d8   : > { %v11382_v42 = vpop.f32.mrb[36].mxu1 }
 0x2d9   : > { %v11384_v41 = vpop.f32.mrb[37].mxu1 }
 0x2da   : > { %v11386_v11 = vpop.f32.mrb[38].mxu1 }
 0x2db   : > { %v11390_v31 = vpop.f32.mrb[39].mxu1 }
 0x2dd   : > { %7437 = vmatmul.mubr.msk.bf16.gmra.mrb[52].mxu0 %vm2161_vm2, %v10958_v9 }
 0x2de   : > { %2727 = vmatprep.mubr.bf16.mxu0 %v14092_v23 }
 0x2e0   : > { %v11393_v57 = vpop.f32.mrb[40].mxu1 }
 0x2e1   : > { %14348 = vst [vmem:[#allocation22_spill] sm:$0xff] %v11393_v57  ;;  %v11395_v21 = vpop.f32.mrb[41].mxu1 }
 0x2e2   : > { %14349 = vst [vmem:[#allocation41_spill] sm:$0xff] %v11395_v21  ;;  %v11397_v43 = vpop.f32.mrb[42].mxu1 }
 0x2e3   : > { %14350 = vst [vmem:[#allocation49_spill] sm:$0xff] %v11397_v43  ;;  %v11409_v18 = vpop.f32.mrb[43].mxu1 }
 0x2e4   : > { %14353 = vst [vmem:[#allocation62_spill] sm:$0xff] %v11409_v18 }
 0x2e5   : > { %7438 = vmatmul.mubr.msk.bf16.gmra.mrb[56].mxu0 %vm2161_vm2, %v10986_v61 }
 0x2e6   : > { %2833 = vmatprep.mubr.bf16.mxu0 %v14092_v23 }
 0x2e8   : > { %v11416_v15 = vpop.f32.mrb[44].mxu1 }
 0x2e9   : > { %v11418_v1 = vpop.f32.mrb[45].mxu1 }
 0x2ea   : > { %v11420_v22 = vpop.f32.mrb[46].mxu1 }
 0x2eb   : > { %v11424_v14 = vpop.f32.mrb[47].mxu1 }
 0x2ed   : > { %7442 = vmatmul.mubr.msk.bf16.vlgmr.msra.gmra.mrb[60].mxu0 %vm2161_vm2, %v10903_v56 }
 0x2ee   : > { %2928 = vmatpush1.bf16.msra.mxu0 %v2138_v29  ;;  %2843 = vmatprep.mubr.bf16.mxu0 %v14092_v23  ;;  %v14368_v29 = vld [vmem:[#allocation77_spill] sm:$0xff] }
 0x2ef   : > { %3053 = vmatprep.subr.bf16.mxu0 %v2143_v58  ;;  %v14365_v58 = vunpack.i.h.bf16 %v11026_v16  ;;  %v14369_v18 = vmax.f32 %v14368_v29, 0.0 }
 0x2f1   : > { %v1985_v55 = vsel %vm869_vm1, %v14365_v58, %v14364_v2 }
 0x2f2   : > { %v2104_v43 = vmax.f32 %v14369_v18, %v1985_v55 }
 0x2f4   : > { %v2142_v33 = vpack.c.bf16 %v2104_v43, %v2072_v32 }
 0x2f5   : > { %7443 = vmatmul.mubr.msk.bf16.gmra.mrb[64].mxu0 %vm2161_vm2, %v10958_v9 }
 0x2f6   : > { %2853 = vmatprep.mubr.bf16.mxu0 %v14092_v23 }
 0x2f8   : > { %v11433_v4 = vpop.f32.mrb[48].mxu1 }
 0x2f9   : > { %14358 = vst [vmem:[#allocation66_spill] sm:$0xff] %v11433_v4  ;;  %v11435_v54 = vpop.f32.mrb[49].mxu1 }
 0x2fa   : > { %14359 = vst [vmem:[#allocation46_spill] sm:$0xff] %v11435_v54  ;;  %v11437_v60 = vpop.f32.mrb[50].mxu1 }
 0x2fb   : > { %14360 = vst [vmem:[#allocation68_spill] sm:$0xff] %v11437_v60  ;;  %v11439_v63 = vpop.f32.mrb[51].mxu1 }
 0x2fc   : > { %14361 = vst [vmem:[#allocation79_spill] sm:$0xff] %v11439_v63 }
 0x2fd   : > { %7444 = vmatmul.mubr.msk.bf16.gmra.mrb[68].mxu0 %vm2161_vm2, %v10986_v61 }
 0x2fe   : > { %2959 = vmatprep.mubr.bf16.mxu0 %v14092_v23 }
 0x300   : > { %v11460_v21 = vpop.f32.mrb[52].mxu1 }
 0x301   : > { %14370 = vst [vmem:[#allocation50_spill] sm:$0xff] %v11460_v21  ;;  %v11462_v37 = vpop.f32.mrb[53].mxu1 }
 0x302   : > { %14371 = vst [vmem:[#allocation75_spill] sm:$0xff] %v11462_v37  ;;  %v11464_v19 = vpop.f32.mrb[54].mxu1 }
 0x303   : > { %14372 = vst [vmem:[#allocation82_spill] sm:$0xff] %v11464_v19  ;;  %v11466_v16 = vpop.f32.mrb[55].mxu1 }
 0x304   : > { %14373 = vst [vmem:[#allocation67_spill] sm:$0xff] %v11466_v16 }
 0x305   : > { %7448 = vmatmul.mubr.msk.bf16.vlgmr.msra.gmra.mrb[72].mxu0 %vm2161_vm2, %v10903_v56 }
 0x306   : > { %3054 = vmatpush1.bf16.msra.mxu0 %v2142_v33  ;;  %2969 = vmatprep.mubr.bf16.mxu0 %v14092_v23 }
 0x308   : > { %v11471_v2 = vpop.f32.mrb[56].mxu1 }
 0x309   : > { %14374 = vst [vmem:[#allocation69_spill] sm:$0xff] %v11471_v2  ;;  %v11473_v38 = vpop.f32.mrb[57].mxu1 }
 0x30a   : > { %14375 = vst [vmem:[#allocation51_spill] sm:$0xff] %v11473_v38  ;;  %v11475_v18 = vpop.f32.mrb[58].mxu1 }
 0x30b   : > { %14376 = vst [vmem:[#allocation84_spill] sm:$0xff] %v11475_v18  ;;  %v11477_v58 = vpop.f32.mrb[59].mxu1 }
 0x30c   : > { %14377 = vst [vmem:[#allocation24_spill] sm:$0xff] %v11477_v58 }
 0x30d   : > { %7449 = vmatmul.mubr.msk.bf16.gmra.mrb[76].mxu0 %vm2161_vm2, %v10958_v9 }
 0x30e   : > { %2979 = vmatprep.mubr.bf16.mxu0 %v14092_v23 }
 0x310   : > { %v11482_v43 = vpop.f32.mrb[60].mxu1 }
 0x311   : > { %14378 = vst [vmem:[#allocation81_spill] sm:$0xff] %v11482_v43  ;;  %v11484_v55 = vpop.f32.mrb[61].mxu1 }
 0x312   : > { %14379 = vst [vmem:[#allocation27_spill] sm:$0xff] %v11484_v55  ;;  %v11486_v13 = vpop.f32.mrb[62].mxu1 }
 0x313   : > { %14380 = vst [vmem:[#allocation80_spill] sm:$0xff] %v11486_v13  ;;  %v11488_v30 = vpop.f32.mrb[63].mxu1 }
 0x314   : > { %14381 = vst [vmem:[#allocation45_spill] sm:$0xff] %v11488_v30 }
 0x315   : > { %7450 = vmatmul.mubr.msk.bf16.gmra.mrb[80].mxu0 %vm2161_vm2, %v10986_v61 }
 0x316   : > { %3085 = vmatprep.mubr.bf16.mxu0 %v14092_v23 }
 0x318   : > { %v11493_v32 = vpop.f32.mrb[64].mxu1 }
 0x319   : > { %14382 = vst [vmem:[#allocation44_spill] sm:$0xff] %v11493_v32  ;;  %v11495_v33 = vpop.f32.mrb[65].mxu1 }
 0x31a   : > { %14383 = vst [vmem:[#allocation59_spill] sm:$0xff] %v11495_v33  ;;  %v11498_v19 = vpop.f32.mrb[66].mxu1 }
 0x31b   : > { %14384 = vst [vmem:[#allocation23_spill] sm:$0xff] %v11498_v19  ;;  %v11500_v21 = vpop.f32.mrb[67].mxu1 }
 0x31c   : > { %v2205_v29 = vpop.f32.mrb[0].mxu0  ;;  %14385 = vst [vmem:[#allocation56_spill] sm:$0xff] %v11500_v21 }
 0x31d   : > { %3179 = vrot.lane.b32.xlu0 %v2205_v29, %s8869_s15  ;;  %v2207_v16 = vpop.f32.mrb[1].mxu0  ;;  %7454 = vmatmul.mubr.msk.bf16.vlgmr.msra.gmra.mrb[84].mxu0 %vm2161_vm2, %v10903_v56 }
 0x31e   : > { %v2209_v37 = vpop.f32.mrb[2].mxu0  ;;  %3095 = vmatprep.mubr.bf16.mxu0 %v14092_v23 }
 0x31f   : > { %3181 = vrot.lane.b32.xlu1 %v2209_v37, %s8869_s15  ;;  %v2211_v57 = vpop.f32.mrb[3].mxu0 }
 0x320   : > { %v11510_v29 = vpop.f32.mrb[68].mxu1 }
 0x321   : > { %3187 = vrot.lane.b32.xlu0 %v11111_v59, %s8869_s15  ;;  %14386 = vst [vmem:[#allocation55_spill] sm:$0xff] %v11510_v29  ;;  %v11514_v33 = vpop.f32.mrb[69].mxu1 }
 0x322   : > { %14387 = vst [vmem:[#allocation28_spill] sm:$0xff] %v11514_v33  ;;  %v11519_v21 = vpop.f32.mrb[70].mxu1 }
 0x323   : > { %3189 = vrot.lane.b32.xlu1 %v11115_v8, %s8869_s15  ;;  %14388 = vst [vmem:[#allocation52_spill] sm:$0xff] %v11519_v21  ;;  %v11523_v59 = vpop.f32.mrb[71].mxu1 }
 0x324   : > { %v11512_v19 = vpop.f32.mrb[4].mxu0  ;;  %14389 = vst [vmem:[#allocation65_spill] sm:$0xff] %v11523_v59 }
 0x325   : > { %3183 = vrot.lane.b32.xlu0 %v2207_v16, %s8869_s15  ;;  %v11517_v37 = vpop.f32.mrb[5].mxu0  ;;  %7455 = vmatmul.mubr.msk.bf16.gmra.mrb[88].mxu0 %vm2161_vm2, %v10958_v9 }
 0x326   : > { %v11521_v56 = vpop.f32.mrb[6].mxu0  ;;  %3105 = vmatprep.mubr.bf16.mxu0 %v14092_v23 }
 0x327   : > { %3185 = vrot.lane.b32.xlu1 %v2211_v57, %s8869_s15  ;;  %v11526_v32 = vpop.f32.mrb[7].mxu0 }
 0x329   : > { %3191 = vrot.lane.b32.xlu0 %v11113_v48, %s8869_s15 }
 0x32a   : > { %v11535_v8 = vpop.f32.mrb[72].mxu1 }
 0x32b   : > { %3193 = vrot.lane.b32.xlu1 %v11117_v51, %s8869_s15  ;;  %14390 = vst [vmem:[#allocation70_spill] sm:$0xff] %v11535_v8  ;;  %v11537_v21 = vpop.f32.mrb[73].mxu1 }
 0x32c   : > { %v2225_v16 = vpop.f32.mrb[8].mxu0  ;;  %14391 = vst [vmem:[#allocation71_spill] sm:$0xff] %v11537_v21  ;;  %v11541_v59 = vpop.f32.mrb[74].mxu1 }
 0x32d   : > { %3672 = vrot.lane.b32.xlu0 %v11127_v50, %s8870_s22  ;;  %v2227_v57 = vpop.f32.mrb[9].mxu0  ;;  %14392 = vst [vmem:[#allocation72_spill] sm:$0xff] %v11541_v59  ;;  %v11543_v30 = vpop.f32.mrb[75].mxu1  ;;  %7456 = vmatmul.mubr.msk.bf16.gmra.mrb[92].mxu0 %vm2161_vm2, %v10986_v61 }
 0x32e   : > { %v2229_v9 = vpop.f32.mrb[10].mxu0  ;;  %14393 = vst [vmem:[#allocation73_spill] sm:$0xff] %v11543_v30 }
 0x32f   : > { %3674 = vrot.lane.b32.xlu1 %v11131_v34, %s8870_s22  ;;  %v2231_v23 = vpop.f32.mrb[11].mxu0 }
 0x331   : > { %3664 = vrot.lane.b32.xlu0 %v2225_v16, %s8870_s22 }
 0x332   : > { %v11551_v48 = vpop.f32.mrb[76].mxu1 }
 0x333   : > { %3666 = vrot.lane.b32.xlu1 %v2229_v9, %s8870_s22  ;;  %14394 = vst [vmem:[#allocation74_spill] sm:$0xff] %v11551_v48  ;;  %v11553_v50 = vpop.f32.mrb[77].mxu1 }
 0x334   : > { %v2331_v51 = vpop.f32.mrb[12].mxu0  ;;  %14395 = vst [vmem:[#allocation60_spill] sm:$0xff] %v11553_v50  ;;  %v11556_v30 = vpop.f32.mrb[78].mxu1 }
 0x335   : > { %3668 = vrot.lane.b32.xlu0 %v2227_v57, %s8870_s22  ;;  %v2333_v59 = vpop.f32.mrb[13].mxu0  ;;  %14396 = vst [vmem:[#allocation25_spill] sm:$0xff] %v11556_v30  ;;  %v11558_v34 = vpop.f32.mrb[79].mxu1 }
 0x336   : > { %v2335_v21 = vpop.f32.mrb[14].mxu0  ;;  %14397 = vst [vmem:[#allocation78_spill] sm:$0xff] %v11558_v34 }
 0x337   : > { %3670 = vrot.lane.b32.xlu1 %v2231_v23, %s8870_s22  ;;  %v2337_v61 = vpop.f32.mrb[15].mxu0 }
 0x339   : > { %3676 = vrot.lane.b32.xlu0 %v11129_v27, %s8870_s22 }
 0x33a   : > { %v11565_v16 = vpop.f32.mrb[80].mxu1 }
 0x33b   : > { %3678 = vrot.lane.b32.xlu1 %v11133_v24, %s8870_s22  ;;  %14398 = vst [vmem:[#allocation64_spill] sm:$0xff] %v11565_v16  ;;  %v11569_v57 = vpop.f32.mrb[81].mxu1 }
 0x33c   : > { %v11567_v9 = vpop.f32.mrb[16].mxu0  ;;  %14399 = vst [vmem:[#allocation30_spill] sm:$0xff] %v11569_v57  ;;  %v11574_v34 = vpop.f32.mrb[82].mxu1 }
 0x33d   : > { %3195 = vrot.lane.b32.xlu0 %v2331_v51, %s8869_s15  ;;  %v11572_v30 = vpop.f32.mrb[17].mxu0  ;;  %14400 = vst [vmem:[#allocation29_spill] sm:$0xff] %v11574_v34  ;;  %v11578_v50 = vpop.f32.mrb[83].mxu1 }
 0x33e   : > { %v11576_v23 = vpop.f32.mrb[18].mxu0  ;;  %14401 = vst [vmem:[#allocation34_spill] sm:$0xff] %v11578_v50 }
 0x33f   : > { %3197 = vrot.lane.b32.xlu1 %v2335_v21, %s8869_s15  ;;  %v11581_v27 = vpop.f32.mrb[19].mxu0 }
 0x341   : > { %3203 = vrot.lane.b32.xlu0 %v11135_v10, %s8869_s15 }
 0x343   : > { %3205 = vrot.lane.b32.xlu1 %v11139_v28, %s8869_s15 }
 0x344   : > { %v2351_v24 = vpop.f32.mrb[20].mxu0 }
 0x345   : > { %3199 = vrot.lane.b32.xlu0 %v2333_v59, %s8869_s15  ;;  %v2353_v51 = vpop.f32.mrb[21].mxu0 }
 0x346   : > { %v2355_v48 = vpop.f32.mrb[22].mxu0 }
 0x347   : > { %3201 = vrot.lane.b32.xlu1 %v2337_v61, %s8869_s15  ;;  %v2357_v34 = vpop.f32.mrb[23].mxu0  ;;  %v11620_v61 = vpop.permute.xlu0 %4153 }
 0x349   : > { %3207 = vrot.lane.b32.xlu0 %v11137_v7, %s8869_s15 }
 0x34b   : > { %3209 = vrot.lane.b32.xlu1 %v11141_v35, %s8869_s15 }
 0x34d   : > { %3680 = vrot.lane.b32.xlu0 %v2351_v24, %s8870_s22 }
 0x34f   : > { %3682 = vrot.lane.b32.xlu1 %v2355_v48, %s8870_s22 }
 0x351   : > { %3688 = vrot.lane.b32.xlu0 %v11227_v36, %s8870_s22 }
 0x353   : > { %3690 = vrot.lane.b32.xlu1 %v11255_v25, %s8870_s22 }
 0x355   : > { %3684 = vrot.lane.b32.xlu0 %v2353_v51, %s8870_s22 }
 0x357   : > { %3686 = vrot.lane.b32.xlu1 %v2357_v34, %s8870_s22 }
 0x359   : > { %3692 = vrot.lane.b32.xlu0 %v11246_v6, %s8870_s22 }
 0x35b   : > { %3694 = vrot.lane.b32.xlu1 %v11260_v62, %s8870_s22 }
 0x375   : > { %v11606_v28 = vpop.f32.mrb[84].mxu1 }
 0x376   : > { %14402 = vst [vmem:[#allocation61_spill] sm:$0xff] %v11606_v28  ;;  %v3152_v36 = vpop.f32.mrb[85].mxu1 }
 0x377   : > { %v11609_v21 = vpop.f32.mrb[86].mxu1 }
 0x378   : > { %v2457_v10 = vpop.f32.mrb[24].mxu0  ;;  %14403 = vst [vmem:[#allocation19_spill] sm:$0xff] %v11609_v21  ;;  %v3156_v59 = vpop.f32.mrb[87].mxu1 }
 0x379   : > { %3211 = vrot.lane.b32.xlu0 %v2457_v10, %s8869_s15  ;;  %v2459_v7 = vpop.f32.mrb[25].mxu0  ;;  %v11623_v10 = vpop.permute.xlu1 %4158 }
 0x37a   : > { %v2461_v35 = vpop.f32.mrb[26].mxu0 }
 0x37b   : > { %3213 = vrot.lane.b32.xlu1 %v2461_v35, %s8869_s15  ;;  %v2463_v25 = vpop.f32.mrb[27].mxu0 }
 0x37d   : > { %3215 = vrot.lane.b32.xlu0 %v2459_v7, %s8869_s15 }
 0x380   : > { %v11612_v6 = vpop.f32.mrb[28].mxu0 }
 0x381   : > { %14404 = vst [vmem:[#allocation32_spill] sm:$0xff] %v11612_v6  ;;  %v11614_v48 = vpop.f32.mrb[29].mxu0 }
 0x382   : > { %14405 = vst [vmem:[#allocation83_spill] sm:$0xff] %v11614_v48  ;;  %v11616_v62 = vpop.f32.mrb[30].mxu0 }
 0x383   : > { %14406 = vst [vmem:[#allocation38_spill] sm:$0xff] %v11616_v62  ;;  %v11618_v34 = vpop.f32.mrb[31].mxu0 }
 0x384   : > { %14407 = vst [vmem:[#allocation37_spill] sm:$0xff] %v11618_v34 }
 0x388   : > { %v2477_v24 = vpop.f32.mrb[32].mxu0 }
 0x389   : > { %3696 = vrot.lane.b32.xlu0 %v2477_v24, %s8870_s22  ;;  %v2479_v51 = vpop.f32.mrb[33].mxu0 }
 0x38a   : > { %v2481_v35 = vpop.f32.mrb[34].mxu0 }
 0x38b   : > { %3698 = vrot.lane.b32.xlu1 %v2481_v35, %s8870_s22  ;;  %v2483_v7 = vpop.f32.mrb[35].mxu0 }
 0x38d   : > { %3700 = vrot.lane.b32.xlu0 %v2479_v51, %s8870_s22 }
 0x38f   : > { %v11626_v21 = vpop.permute.xlu0 %3179  ;;  %3702 = vrot.lane.b32.xlu1 %v2483_v7, %s8870_s22 }
 0x390   : > { %v2583_v57 = vpop.f32.mrb[36].mxu0 }
 0x391   : > { %v11629_v28 = vpop.permute.xlu1 %3181  ;;  %3303 = vrot.lane.b32.xlu0 %v3152_v36, %s8869_s15  ;;  %v11635_v24 = vpop.f32.mrb[37].mxu0 }
 0x392   : > { %v2587_v8 = vpop.f32.mrb[38].mxu0 }
 0x393   : > { %v11632_v50 = vpop.permute.xlu0 %3187  ;;  %3305 = vrot.lane.b32.xlu1 %v3156_v59, %s8869_s15  ;;  %v11640_v35 = vpop.f32.mrb[39].mxu0 }
 0x395   : > { %v11637_v16 = vpop.permute.xlu1 %3189  ;;  %3219 = vrot.lane.b32.xlu0 %v11283_v17, %s8869_s15  ;;  %v11660_v17 = vld [vmem:[%s13702_s5 + $0x2] ss:$4 sm:$0xff] }
 0x397   : > { %v3184_v13 = vpop.permute.xlu0 %3183  ;;  %3217 = vrot.lane.b32.xlu1 %v2463_v25, %s8869_s15 }
 0x398   : > { %v11647_v33 = vpop.f32.mrb[40].mxu0  ;;  %v3368_v43 = vsel %vm3307_vm3, %v11626_v21, %v3184_v13  ;;  %v3366_v60 = vsel %vm3307_vm3, %v3184_v13, %v11632_v50 }
 0x399   : > { %v3186_v51 = vpop.permute.xlu1 %3185  ;;  %14408 = vst [vmem:[#allocation26_spill] sm:$0xff] %v11647_v33  ;;  %3223 = vrot.lane.b32.xlu0 %v11287_v12, %s8869_s15  ;;  %v11651_v36 = vpop.f32.mrb[41].mxu0  ;;  %v3383_v12 = vrot.slane %v11660_v17, %v14137_v52 }
 0x39a   : > { %14409 = vst [vmem:[#allocation54_spill] sm:$0xff] %v11651_v36  ;;  %v11655_v59 = vpop.f32.mrb[42].mxu0 }
 0x39b   : > { %v11645_v7 = vpop.permute.xlu0 %3191  ;;  %14410 = vst [vmem:[#allocation53_spill] sm:$0xff] %v11655_v59  ;;  %3221 = vrot.lane.b32.xlu1 %v11291_v0, %s8869_s15  ;;  %v11664_v25 = vpop.f32.mrb[43].mxu0  ;;  %v11678_v0 = vld [vmem:[%s13702_s5 + $0x3] ss:$4 sm:$0xff]  ;;  %v3537_v26 = vmul.f32 %v3383_v12, %v3368_v43  ;;  %v3367_v43 = vsel %vm3307_vm3, %v3186_v51, %v11637_v16 }
 0x39c   : > { %14411 = vst [vmem:[#allocation48_spill] sm:$0xff] %v11664_v25  ;;  %v14413_v59 = vld [vmem:[#allocation12_spill] sm:$0xff]  ;;  %v3868_v45 = vrot.slane %v11678_v0, %v14137_v52 }
 0x39d   : > { %v11653_v29 = vpop.permute.xlu1 %3193  ;;  %3227 = vrot.lane.b32.xlu0 %v2583_v57, %s8869_s15  ;;  %v3369_v57 = vsel %vm3307_vm3, %v11629_v28, %v3186_v51  ;;  %v3601_v13 = vadd.f32 %v3537_v26, %v11517_v37 }
 0x39e   : > { %v3569_v40 = vmul.f32 %v3383_v12, %v3369_v57  ;;  %v3872_v12 = vrot.slane %v11678_v0, %v14413_v59 }
 0x39f   : > { %v3673_v55 = vpop.permute.xlu0 %3672  ;;  %3225 = vrot.lane.b32.xlu1 %v11294_v49, %s8869_s15  ;;  %v3387_v49 = vrot.slane %v11660_v17, %v14413_v59 }
 0x3a0   : > { %v2603_v33 = vpop.f32.mrb[44].mxu0  ;;  %v3633_v34 = vadd.f32 %v3569_v40, %v11526_v32 }
 0x3a1   : > { %v3675_v36 = vpop.permute.xlu1 %3674  ;;  %3704 = vrot.lane.b32.xlu0 %v11338_v5, %s8870_s22  ;;  %v2605_v58 = vpop.f32.mrb[45].mxu0  ;;  %v3538_v48 = vmul.f32 %v3387_v49, %v3366_v60  ;;  %v3570_v57 = vmul.f32 %v3387_v49, %v3367_v43 }
 0x3a2   : > { %v2607_v63 = vpop.f32.mrb[46].mxu0 }
 0x3a3   : > { %v11680_v25 = vpop.permute.xlu0 %3664  ;;  %3229 = vrot.lane.b32.xlu1 %v2587_v8, %s8869_s15  ;;  %v2609_v5 = vpop.f32.mrb[47].mxu0  ;;  %v3602_v59 = vadd.f32 %v3538_v48, %v11119_v53  ;;  %v3634_v53 = vadd.f32 %v3570_v57, %v11123_v44  ;;  %v8468_v57 = vld [vmem:[#allocation5 + $0x88] sm:$0xff]  }
 0x3a4   : > { %14412 = vst [vmem:[#allocation58_spill] sm:$0xff] %v11680_v25 }
 0x3a5   : > { %v11690_v18 = vpop.permute.xlu1 %3666  ;;  %3708 = vrot.lane.b32.xlu0 %v11340_v46, %s8870_s22 }
 0x3a6   : > { %14414 = vst [vmem:[#allocation57_spill] sm:$0xff] %v11690_v18 }
 0x3a7   : > { %v11698_v20 = vpop.permute.xlu0 %3668  ;;  %3706 = vrot.lane.b32.xlu1 %v11344_v3, %s8870_s22 }
 0x3a8   : > { %v3851_v38 = vsel %vm3792_vm4, %v11698_v20, %v3673_v55  ;;  %v11721_v26 = vpop.f32.mrb[48].mxu0 }
 0x3a9   : > { %v4022_v2 = vmul.f32 %v3868_v45, %v3851_v38  ;;  %v11709_v8 = vpop.permute.xlu1 %3670  ;;  %3712 = vrot.lane.b32.xlu0 %v2603_v33, %s8870_s22  ;;  %v11727_v37 = vpop.f32.mrb[49].mxu0 }
 0x3aa   : > { %v3852_v51 = vsel %vm3792_vm4, %v11709_v8, %v3675_v36  ;;  %14415 = vst [vmem:[#allocation39_spill] sm:$0xff] %v11727_v37  ;;  %v11732_v40 = vpop.f32.mrb[50].mxu0 }
 0x3ab   : > { %v4086_v46 = vadd.f32 %v4022_v2, %v3601_v13  ;;  %v4054_v60 = vmul.f32 %v3868_v45, %v3852_v51  ;;  %v11719_v52 = vpop.permute.xlu0 %3676  ;;  %3710 = vrot.lane.b32.xlu1 %v11347_v47, %s8870_s22  ;;  %v8465_v13 = vld [vmem:[#allocation5 + $0xc0] sm:$0xff]   ;;  %v8467_v47 = vld [vmem:[#allocation5 + $0xc8] sm:$0xff]  }
 0x3ac   : > { %v3849_v38 = vsel %vm3792_vm4, %v3673_v55, %v11719_v52  ;;  %v11742_v55 = vpop.f32.mrb[51].mxu0  ;;  %v8466_v51 = vld [vmem:[#allocation5 + $0x80] sm:$0xff]   ;;  %7743 = vmatprep.subr.bf16.mxu1 %v8465_v13 }
 0x3ad   : > { %v4118_v3 = vadd.f32 %v4054_v60, %v3633_v34  ;;  %v4023_v49 = vmul.f32 %v3872_v12, %v3849_v38  ;;  %v11730_v43 = vpop.permute.xlu1 %3678  ;;  %v11735_v45 = vadd.f32 %v11620_v61, %v4086_v46  ;;  %14417 = vst [vmem:[#allocation86_spill] sm:$0xff] %v11742_v55  ;;  %3716 = vrot.lane.b32.xlu0 %v2605_v58, %s8870_s22 }
 0x3ae   : > { %v3850_v2 = vsel %vm3792_vm4, %v3675_v36, %v11730_v43  ;;  %7744 = vmatpush3.bf16.msra.mxu1 %v8466_v51 }
 0x3af   : > { %14416 = vst [vmem:[#allocation40_spill] sm:$0xff] %v11735_v45  ;;  %v11746_v32 = vadd.f32 %v11623_v10, %v4118_v3  ;;  %v4087_v33 = vadd.f32 %v4023_v49, %v3602_v59  ;;  %v4055_v48 = vmul.f32 %v3872_v12, %v3850_v2  ;;  %v11748_v34 = vpop.permute.xlu0 %3195  ;;  %v13916_v38 = vmax.f32 %v11735_v45, 0.0  ;;  %3714 = vrot.lane.b32.xlu1 %v2607_v63, %s8870_s22 }
 0x3b0   : > { %v11764_v12 = vpop.f32.mrb[52].mxu0  ;;  %7745 = vmatprep.subr.bf16.mxu1 %v8467_v47 }
 0x3b1   : > { %14418 = vst [vmem:[#allocation85_spill] sm:$0xff] %v11746_v32  ;;  %v13915_v36 = vmax.f32 %v11746_v32, 0.0  ;;  %v4119_v46 = vadd.f32 %v4055_v48, %v3634_v53  ;;  %v11752_v60 = vpop.permute.xlu1 %3197  ;;  %v11756_v44 = vadd.f32 %v11620_v61, %v4087_v33  ;;  %14421 = vst [vmem:[#allocation87_spill] sm:$0xff] %v11764_v12  ;;  %v11770_v49 = vpop.f32.mrb[53].mxu0  ;;  %v8469_v33 = vld [vmem:[#allocation5 + $0xd0] sm:$0xff]   ;;  %v14427_v32 = vld [vmem:[#allocation36_spill] sm:$0xff] }
 0x3b2   : > { %14422 = vst [vmem:[#allocation88_spill] sm:$0xff] %v11770_v49  ;;  %v11775_v53 = vpop.f32.mrb[54].mxu0  ;;  %7746 = vmatpush3.bf16.msra.mxu1 %v8468_v57 }
 0x3b3   : > { %14419 = vst [vmem:[#allocation76_spill] sm:$0xff] %v11756_v44  ;;  %v11760_v59 = vadd.f32 %v11623_v10, %v4119_v46  ;;  %v11762_v58 = vpop.permute.xlu0 %3203  ;;  %v8302_v3 = vpack.i.bf16 %v13915_v36, %v13916_v38  ;;  %14423 = vst [vmem:[#allocation89_spill] sm:$0xff] %v11775_v53  ;;  %v13918_v48 = vmax.f32 %v11756_v44, 0.0  ;;  %3718 = vrot.lane.b32.xlu1 %v2609_v5, %s8870_s22  ;;  %v11780_v13 = vpop.f32.mrb[55].mxu0  ;;  %v8470_v46 = vld [vmem:[#allocation5 + $0x90] sm:$0xff]   ;;  %7747 = vmatprep.subr.bf16.mxu1 %v8469_v33  ;;  %v14425_v36 = vld [vmem:[#allocation11_spill] sm:$0xff] }
 0x3b4   : > { %14424 = vst [vmem:[#allocation90_spill] sm:$0xff] %v11780_v13  ;;  %v3391_v38 = vrot.slane %v11660_v17, %v14425_v36  ;;  %v3364_v5 = vsel %vm3307_vm3, %v11632_v50, %v11645_v7  ;;  %v3365_v33 = vsel %vm3307_vm3, %v11637_v16, %v11653_v29  ;;  %v3876_v50 = vrot.slane %v11678_v0, %v14425_v36 }
 0x3b5   : > { %14420 = vst [vmem:[#allocation77_spill] sm:$0xff] %v11760_v59  ;;  %v13917_v63 = vmax.f32 %v11760_v59, 0.0  ;;  %v11773_v2 = vpop.permute.xlu1 %3205  ;;  %8303 = vrot.lane.b32.xlu0 %v8302_v3, %s8870_s22  ;;  %v8471_v3 = vld [vmem:[#allocation5 + $0xd8] sm:$0xff]   ;;  %v3362_v36 = vsel %vm3307_vm3, %v11645_v7, %v11748_v34 }
 0x3b6   : > { %7748 = vmatpush3.bf16.msra.mxu1 %v8470_v46  ;;  %v3539_v12 = vmul.f32 %v3391_v38, %v3364_v5  ;;  %v3571_v46 = vmul.f32 %v3391_v38, %v3365_v33 }
 0x3b7   : > { %v11782_v51 = vpop.permute.xlu0 %3199  ;;  %v8307_v47 = vpack.i.bf16 %v13917_v63, %v13918_v48  ;;  %v8472_v63 = vld [vmem:[#allocation5 + $0x98] sm:$0xff]   ;;  %7749 = vmatprep.subr.bf16.mxu1 %v8471_v3  ;;  %v14428_v3 = vld [vmem:[#allocation13_spill] sm:$0xff] }
 0x3b8   : > { %v11799_v13 = vpop.f32.mrb[56].mxu0  ;;  %v3603_v45 = vadd.f32 %v3539_v12, %v14427_v32  ;;  %v3395_v5 = vrot.slane %v11660_v17, %v14428_v3  ;;  %v3363_v12 = vsel %vm3307_vm3, %v11653_v29, %v11752_v60 }
 0x3b9   : > { %v11790_v53 = vpop.permute.xlu1 %3201  ;;  %8308 = vrot.lane.b32.xlu1 %v8307_v47, %s8870_s22  ;;  %v11805_v48 = vpop.f32.mrb[57].mxu0 }
 0x3ba   : > { %v11811_v47 = vpop.f32.mrb[58].mxu0  ;;  %7750 = vmatpush3.bf16.msra.mxu1 %v8472_v63  ;;  %v14429_v63 = vld [vmem:[#allocation31_spill] sm:$0xff]  ;;  %v3540_v7 = vmul.f32 %v3395_v5, %v3362_v36 }
 0x3bb   : > { %v11797_v57 = vpop.permute.xlu0 %3207  ;;  %v11813_v59 = vpop.f32.mrb[59].mxu0  ;;  %v3635_v33 = vadd.f32 %v3571_v46, %v14429_v63  ;;  %v8473_v46 = vld [vmem:[#allocation5 + $0xe0] sm:$0xff]   ;;  %v3572_v63 = vmul.f32 %v3395_v5, %v3363_v12 }
 0x3bc   : > { %14426 = vst [vmem:[#allocation91_spill] sm:$0xff] %v11813_v59  ;;  %7751 = vmatprep.subr.bf16.mxu1 %v8473_v46 }
 0x3bd   : > { %v11807_v49 = vpop.permute.xlu1 %3209  ;;  %v3636_v5 = vadd.f32 %v3572_v63, %v11576_v23  ;;  %v8478_v23 = vld [vmem:[#allocation5 + $0xb0] sm:$0xff]   ;;  %v8479_v63 = vld [vmem:[#allocation5 + $0xf8] sm:$0xff]  }
 0x3bf   : > { %v3681_v44 = vpop.permute.xlu0 %3680 }
 0x3c0   : > { %v3847_v16 = vsel %vm3792_vm4, %v11719_v52, %v3681_v44  ;;  %v11831_v32 = vpop.f32.mrb[60].mxu0 }
 0x3c1   : > { %v4024_v55 = vmul.f32 %v3876_v50, %v3847_v16  ;;  %v3683_v54 = vpop.permute.xlu1 %3682  ;;  %14430 = vst [vmem:[#allocation36_spill] sm:$0xff] %v11831_v32  ;;  %v11837_v16 = vpop.f32.mrb[61].mxu0 }
 0x3c2   : > { %v3848_v38 = vsel %vm3792_vm4, %v11730_v43, %v3683_v54  ;;  %14431 = vst [vmem:[#allocation31_spill] sm:$0xff] %v11837_v16  ;;  %v3880_v43 = vrot.slane %v11678_v0, %v14428_v3  ;;  %v3604_v16 = vadd.f32 %v3540_v7, %v11567_v9 }
 0x3c3   : > { %v4088_v59 = vadd.f32 %v4024_v55, %v3603_v45  ;;  %v4056_v52 = vmul.f32 %v3876_v50, %v3848_v38  ;;  %v11829_v4 = vpop.permute.xlu0 %3688  ;;  %v11843_v45 = vpop.f32.mrb[62].mxu0  ;;  %v8474_v38 = vld [vmem:[#allocation5 + $0xa0] sm:$0xff]  }
 0x3c4   : > { %14432 = vst [vmem:[#allocation92_spill] sm:$0xff] %v11843_v45  ;;  %v11848_v50 = vpop.f32.mrb[63].mxu0  ;;  %7752 = vmatpush3.bf16.msra.mxu1 %v8474_v38  ;;  %v8477_v38 = vld [vmem:[#allocation5 + $0xf0] sm:$0xff]  }
 0x3c5   : > { %v4120_v6 = vadd.f32 %v4056_v52, %v3635_v33  ;;  %v11839_v62 = vpop.permute.xlu1 %3690  ;;  %v11846_v55 = vadd.f32 %v11620_v61, %v4088_v59  ;;  %14433 = vst [vmem:[#allocation93_spill] sm:$0xff] %v11848_v50  ;;  %v8475_v52 = vld [vmem:[#allocation5 + $0xe8] sm:$0xff]  }
 0x3c6   : > { %v8476_v50 = vld [vmem:[#allocation5 + $0xa8] sm:$0xff]   ;;  %7753 = vmatprep.subr.bf16.mxu1 %v8475_v52 }
 0x3c7   : > { %v11851_v29 = vadd.f32 %v11623_v10, %v4120_v6  ;;  %v3685_v36 = vpop.permute.xlu0 %3684  ;;  %v13928_v32 = vmax.f32 %v11846_v55, 0.0 }
 0x3c8   : > { %v3845_v33 = vsel %vm3792_vm4, %v3681_v44, %v3685_v36  ;;  %v11861_v46 = vpop.f32.mrb[64].mxu0  ;;  %7754 = vmatpush3.bf16.msra.mxu1 %v8476_v50 }
 0x3c9   : > { %v13927_v3 = vmax.f32 %v11851_v29, 0.0  ;;  %v4025_v59 = vmul.f32 %v3880_v43, %v3845_v33  ;;  %v3687_v45 = vpop.permute.xlu1 %3686  ;;  %14434 = vst [vmem:[#allocation94_spill] sm:$0xff] %v11861_v46  ;;  %v11867_v7 = vpop.f32.mrb[65].mxu0  ;;  %7755 = vmatprep.subr.bf16.mxu1 %v8477_v38  ;;  %v14438_v38 = vld [vmem:[#allocation16_spill] sm:$0xff] }
 0x3ca   : > { %v3846_v6 = vsel %vm3792_vm4, %v3683_v54, %v3687_v45  ;;  %14435 = vst [vmem:[#allocation95_spill] sm:$0xff] %v11867_v7  ;;  %v11872_v54 = vpop.f32.mrb[66].mxu0  ;;  %v8491_v7 = vld [vmem:[#allocation5 + $0x60] sm:$0xff]  }
 0x3cb   : > { %v4089_v12 = vadd.f32 %v4025_v59, %v3604_v16  ;;  %v4057_v44 = vmul.f32 %v3880_v43, %v3846_v6  ;;  %v8312_v9 = vpack.i.bf16 %v13927_v3, %v13928_v32  ;;  %14436 = vst [vmem:[#allocation96_spill] sm:$0xff] %v11872_v54  ;;  %v11875_v16 = vpop.f32.mrb[67].mxu0  ;;  %v8480_v6 = vld [vmem:[#allocation5 + $0xb8] sm:$0xff]   ;;  %v8492_v54 = vld [vmem:[#allocation5 + $0x20] sm:$0xff]  }
 0x3cc   : > { %14437 = vst [vmem:[#allocation97_spill] sm:$0xff] %v11875_v16  ;;  %7756 = vmatpush3.bf16.msra.mxu1 %v8478_v23  ;;  %v3399_v23 = vrot.slane %v11660_v17, %v14438_v38 }
 0x3cd   : > { %v11870_v33 = vadd.f32 %v11620_v61, %v4089_v12  ;;  %v4121_v37 = vadd.f32 %v4057_v44, %v3636_v5  ;;  %8313 = vrot.lane.b32.xlu1 %v8312_v9, %s8870_s22  ;;  %7757 = vmatprep.subr.bf16.mxu1 %v8479_v63 }
 0x3cf   : > { %v11878_v43 = vadd.f32 %v11623_v10, %v4121_v37  ;;  %v13925_v52 = vmax.f32 %v11870_v33, 0.0 }
 0x3d0   : > { %v11888_v5 = vpop.f32.mrb[68].mxu0  ;;  %7758 = vmatpush3.bf16.msra.mxu1 %v8480_v6  ;;  %v3884_v6 = vrot.slane %v11678_v0, %v14438_v38 }
 0x3d1   : > { %v13926_v59 = vmax.f32 %v11878_v43, 0.0  ;;  %3231 = vrot.lane.b32.xlu1 %v11635_v24, %s8869_s15  ;;  %v11890_v37 = vpop.f32.mrb[69].mxu0  ;;  %v3361_v24 = vsel %vm3307_vm3, %v11752_v60, %v11790_v53 }
 0x3d2   : > { %v11893_v12 = vpop.f32.mrb[70].mxu0  ;;  %v3573_v60 = vmul.f32 %v3399_v23, %v3361_v24 }
 0x3d3   : > { %v8317_v50 = vpack.i.bf16 %v13926_v59, %v13925_v52  ;;  %v11897_v44 = vpop.f32.mrb[71].mxu0 }
 0x3d5   : > { %8318 = vrot.lane.b32.xlu0 %v8317_v50, %s8870_s22  ;;  %3235 = vrot.lane.b32.xlu1 %v11382_v42, %s8869_s15  ;;  %v3360_v42 = vsel %vm3307_vm3, %v11748_v34, %v11782_v51  ;;  %v3843_v34 = vsel %vm3792_vm4, %v3685_v36, %v11829_v4 }
 0x3d6   : > { %v3541_v52 = vmul.f32 %v3399_v23, %v3360_v42  ;;  %v4026_v24 = vmul.f32 %v3884_v6, %v3843_v34  ;;  %v8481_v42 = vld [vmem:[#allocation5 + $0x40] sm:$0xff]   ;;  %v8485_v34 = vld [vmem:[#allocation5 + $0x50] sm:$0xff]  }
 0x3d7   : > { %7721 = vmatprep.subr.bf16.mxu0 %v8481_v42  ;;  %v3357_v42 = vsel %vm3307_vm3, %v11773_v2, %v11807_v49 }
 0x3d8   : > { %v11907_v9 = vpop.f32.mrb[72].mxu0 }
 0x3d9   : > { %3233 = vrot.lane.b32.xlu0 %v11640_v35, %s8869_s15  ;;  %3239 = vrot.lane.b32.xlu1 %v11384_v41, %s8869_s15  ;;  %v11911_v63 = vpop.f32.mrb[73].mxu0  ;;  %v3844_v41 = vsel %vm3792_vm4, %v3687_v45, %v11839_v62 }
 0x3da   : > { %v11922_v35 = vpop.f32.mrb[74].mxu0  ;;  %v4058_v45 = vmul.f32 %v3884_v6, %v3844_v41  ;;  %v11975_v41 = vpop.permute.xlu0 %3692 }
 0x3db   : > { %v11928_v50 = vpop.f32.mrb[75].mxu0 }
 0x3dc   : > { %14439 = vst [vmem:[#allocation16_spill] sm:$0xff] %v11928_v50 }
 0x3dd   : > { %3237 = vrot.lane.b32.xlu0 %v11386_v11, %s8869_s15  ;;  %3243 = vrot.lane.b32.xlu1 %v11721_v26, %s8869_s15  ;;  %v3637_v11 = vadd.f32 %v3573_v60, %v11581_v27  ;;  %v3605_v26 = vadd.f32 %v3541_v52, %v11572_v30 }
 0x3df   : > { %v4122_v3 = vadd.f32 %v4058_v45, %v3637_v11  ;;  %v4090_v23 = vadd.f32 %v4026_v24, %v3605_v26  ;;  %v8486_v45 = vld [vmem:[#allocation5 + $0x10] sm:$0xff]   ;;  %v14446_v11 = vld [vmem:[#allocation18_spill] sm:$0xff]  ;;  %v3695_v26 = vpop.permute.xlu1 %3694 }
 0x3e0   : > { %v11938_v59 = vpop.f32.mrb[76].mxu0  ;;  %v3407_v24 = vrot.slane %v11660_v17, %v14446_v11 }
 0x3e1   : > { %3241 = vrot.lane.b32.xlu0 %v11390_v31, %s8869_s15  ;;  %3720 = vrot.lane.b32.xlu1 %v11416_v15, %s8870_s22  ;;  %14440 = vst [vmem:[#allocation98_spill] sm:$0xff] %v11938_v59  ;;  %v11941_v32 = vpop.f32.mrb[77].mxu0  ;;  %v11952_v15 = vadd.f32 %v11623_v10, %v4122_v3  ;;  %v11957_v30 = vadd.f32 %v11620_v61, %v4090_v23 }
 0x3e2   : > { %14441 = vst [vmem:[#allocation99_spill] sm:$0xff] %v11941_v32  ;;  %v11945_v36 = vpop.f32.mrb[78].mxu0  ;;  %v8489_v32 = vld [vmem:[#allocation5 + $0x1c0] sm:$0xff]  }
 0x3e3   : > { %14442 = vst [vmem:[#allocation100_spill] sm:$0xff] %v11945_v36  ;;  %v11949_v31 = vpop.f32.mrb[79].mxu0  ;;  %14444 = vst [vmem:[#allocation102_spill] sm:$0xff] %v11952_v15  ;;  %v13930_v3 = vmax.f32 %v11957_v30, 0.0  ;;  %v14448_v36 = vld [vmem:[#allocation33_spill] sm:$0xff]  ;;  %7787 = vmatprep.subr.bf16.mxu1 %v8489_v32 }
 0x3e4   : > { %14443 = vst [vmem:[#allocation101_spill] sm:$0xff] %v11949_v31  ;;  %14445 = vst [vmem:[#allocation103_spill] sm:$0xff] %v11957_v30 }
 0x3e5   : > { %3245 = vrot.lane.b32.xlu0 %v11732_v40, %s8869_s15  ;;  %3724 = vrot.lane.b32.xlu1 %v11418_v1, %s8870_s22  ;;  %v13929_v40 = vmax.f32 %v11952_v15, 0.0 }
 0x3e7   : > { %v8327_v60 = vpack.i.bf16 %v13929_v40, %v13930_v3  ;;  %v3892_v3 = vrot.slane %v11678_v0, %v14446_v11 }
 0x3e8   : > { %v11961_v27 = vpop.f32.mrb[80].mxu0 }
 0x3e9   : > { %3722 = vrot.lane.b32.xlu0 %v11420_v22, %s8870_s22  ;;  %3728 = vrot.lane.b32.xlu1 %v11799_v13, %s8870_s22  ;;  %v11964_v52 = vpop.f32.mrb[81].mxu0  ;;  %v8482_v13 = vld [vmem:[#allocation5] sm:$0xff]  }
 0x3ea   : > { %v11968_v1 = vpop.f32.mrb[82].mxu0  ;;  %7722 = vmatpush3.bf16.msra.mxu0 %v8482_v13 }
 0x3eb   : > { %v11973_v22 = vpop.f32.mrb[83].mxu0  ;;  %v11984_v6 = vpop.permute.xlu0 %3211 }
 0x3ed   : > { %3726 = vrot.lane.b32.xlu0 %v11424_v14, %s8870_s22  ;;  %3732 = vrot.lane.b32.xlu1 %v11805_v48, %s8870_s22  ;;  %v8483_v14 = vld [vmem:[#allocation5 + $0x48] sm:$0xff]   ;;  %v12000_v40 = vpop.permute.xlu1 %3213 }
 0x3ee   : > { %v8484_v48 = vld [vmem:[#allocation5 + $0x8] sm:$0xff]   ;;  %7723 = vmatprep.subr.bf16.mxu0 %v8483_v14  ;;  %v8488_v14 = vld [vmem:[#allocation5 + $0x18] sm:$0xff]  }
 0x3ef   : > { %7724 = vmatpush3.bf16.msra.mxu0 %v8484_v48  ;;  %v11992_v23 = vpop.permute.xlu0 %3215 }
 0x3f0   : > { %7725 = vmatprep.subr.bf16.mxu0 %v8485_v34  ;;  %v11998_v13 = vpop.f32.mrb[84].mxu0  ;;  %v3575_v34 = vmul.f32 %v3407_v24, %v3357_v42  ;;  %v14449_v42 = vld [vmem:[#allocation35_spill] sm:$0xff] }
 0x3f1   : > { %3730 = vrot.lane.b32.xlu0 %v11811_v47, %s8870_s22  ;;  %8328 = vrot.lane.b32.xlu1 %v8327_v60, %s8870_s22  ;;  %v3356_v47 = vsel %vm3307_vm3, %v11762_v58, %v11797_v57  ;;  %14447 = vst [vmem:[#allocation18_spill] sm:$0xff] %v11998_v13  ;;  %v8487_v60 = vld [vmem:[#allocation5 + $0x58] sm:$0xff]   ;;  %v12019_v15 = vpop.f32.mrb[85].mxu0 }
 0x3f2   : > { %v3543_v48 = vmul.f32 %v3407_v24, %v3356_v47  ;;  %14450 = vst [vmem:[#allocation33_spill] sm:$0xff] %v12019_v15 }
 0x3f3   : > { %7726 = vmatpush3.bf16.msra.mxu0 %v8486_v45 }
 0x3f4   : > { %7727 = vmatprep.subr.bf16.mxu0 %v8487_v60  ;;  %v3607_v59 = vadd.f32 %v3543_v48, %v14448_v36  ;;  %v3639_v60 = vadd.f32 %v3575_v34, %v14449_v42  ;;  %v14451_v36 = vld [vmem:[#allocation14_spill] sm:$0xff]  ;;  %v3359_v42 = vsel %vm3307_vm3, %v11790_v53, %v11773_v2  ;;  %v3358_v2 = vsel %vm3307_vm3, %v11782_v51, %v11762_v58 }
 0x3f5   : > { %v3864_v48 = vrot.slane %v11678_v0, %v14451_v36  ;;  %v12070_v53 = vld [vmem:[%s13702_s5 + $0x23] ss:$4 sm:$0xff]  ;;  %v3842_v58 = vsel %vm3792_vm4, %v11839_v62, %v3695_v26 }
 0x3f7   : > { %7728 = vmatpush3.bf16.msra.mxu0 %v8488_v14 }
 0x3f8   : > { %7729 = vmatprep.subr.bf16.mxu0 %v8491_v7  ;;  %v3853_v7 = vsel %vm3792_vm4, %v11680_v25, %v11698_v20  ;;  %v8496_v25 = vld [vmem:[#allocation5 + $0x28] sm:$0xff]  }
 0x3f9   : > { %v4021_v15 = vmul.f32 %v3864_v48, %v3853_v7  ;;  %v3854_v7 = vsel %vm3792_vm4, %v11690_v18, %v11709_v8  ;;  %v3841_v8 = vsel %vm3792_vm4, %v11829_v4, %v11975_v41 }
 0x3fb   : > { %v12004_v31 = vpop.permute.xlu0 %3696  ;;  %7730 = vmatpush3.bf16.msra.mxu0 %v8492_v54 }
 0x3fc   : > { %v3839_v45 = vsel %vm3792_vm4, %v11975_v41, %v12004_v31 }
 0x3fd   : > { %v4028_v16 = vmul.f32 %v3892_v3, %v3839_v45  ;;  %v12011_v47 = vpop.permute.xlu1 %3698  ;;  %v12026_v45 = vld [vmem:[%s13702_s5 + $0x22] ss:$4 sm:$0xff] }
 0x3fe   : > { %v3840_v24 = vsel %vm3792_vm4, %v3695_v26, %v12011_v47  ;;  %v3411_v20 = vrot.slane %v12026_v45, %v14451_v36 }
 0x3ff   : > { %v4092_v14 = vadd.f32 %v4028_v16, %v3607_v59  ;;  %v4060_v46 = vmul.f32 %v3892_v3, %v3840_v24  ;;  %v12017_v50 = vpop.permute.xlu0 %3700  ;;  %v3379_v16 = vrot.slane %v11660_v17, %v14451_v36  ;;  %v12032_v59 = vpop.f32.mrb[86].mxu0  ;;  %v14454_v3 = vld [vmem:[#allocation17_spill] sm:$0xff] }
 0x400   : > { %14452 = vst [vmem:[#allocation35_spill] sm:$0xff] %v12032_v59  ;;  %v3403_v34 = vrot.slane %v11660_v17, %v14454_v3 }
 0x401   : > { %v4124_v30 = vadd.f32 %v4060_v46, %v3639_v60  ;;  %v12028_v32 = vpop.permute.xlu1 %3702  ;;  %v12039_v54 = vadd.f32 %v11620_v61, %v4092_v14  ;;  %v3888_v60 = vrot.slane %v11678_v0, %v14454_v3  ;;  %v8495_v14 = vld [vmem:[#allocation5 + $0x68] sm:$0xff]  }
 0x402   : > { %7731 = vmatprep.subr.bf16.mxu0 %v8495_v14  ;;  %v3542_v51 = vmul.f32 %v3403_v34, %v3358_v2 }
 0x403   : > { %14453 = vst [vmem:[#allocation14_spill] sm:$0xff] %v12039_v54  ;;  %v12044_v46 = vadd.f32 %v11623_v10, %v4124_v30  ;;  %v12046_v24 = vpop.permute.xlu0 %3303  ;;  %v12060_v30 = vpop.f32.mrb[87].mxu0  ;;  %7732 = vmatpush3.bf16.msra.mxu0 %v8496_v25  ;;  %v14462_v14 = vmax.f32 %v12039_v54, 0.0  ;;  %v8500_v25 = vld [vmem:[#allocation5 + $0x30] sm:$0xff]  }
 0x404   : > { %14456 = vst [vmem:[#allocation104_spill] sm:$0xff] %v12046_v24  ;;  %v3370_v17 = vsel %vm3307_vm3, %v12046_v24, %v11626_v21  ;;  %14457 = vst [vmem:[#allocation105_spill] sm:$0xff] %v12060_v30  ;;  %v12074_v21 = vpop.f32.mrb[88].mxu0  ;;  %v3574_v24 = vmul.f32 %v3403_v34, %v3359_v42  ;;  %v3896_v42 = vrot.slane %v12070_v53, %v14451_v36  ;;  %v14483_v30 = vld [vmem:[#allocation37_spill] sm:$0xff] }
 0x405   : > { %14455 = vst [vmem:[#allocation17_spill] sm:$0xff] %v12044_v46  ;;  %v3536_v59 = vmul.f32 %v3379_v16, %v3370_v17  ;;  %v12072_v13 = vpop.permute.xlu1 %3305  ;;  %14459 = vst [vmem:[#allocation107_spill] sm:$0xff] %v12074_v21  ;;  %v12088_v0 = vpop.f32.mrb[89].mxu0  ;;  %v14463_v4 = vmax.f32 %v12044_v46, 0.0 }
 0x406   : > { %14458 = vst [vmem:[#allocation106_spill] sm:$0xff] %v12072_v13  ;;  %v3371_v17 = vsel %vm3307_vm3, %v12072_v13, %v11629_v28  ;;  %14460 = vst [vmem:[#allocation108_spill] sm:$0xff] %v12088_v0  ;;  %v12097_v26 = vpop.f32.mrb[90].mxu0  ;;  %v3355_v28 = vsel %vm3307_vm3, %v11807_v49, %v12000_v40  ;;  %v4027_v0 = vmul.f32 %v3888_v60, %v3841_v8  ;;  %v8503_v8 = vld [vmem:[#allocation5 + $0x78] sm:$0xff]  }
 0x407   : > { %v3600_v18 = vadd.f32 %v3536_v59, %v11512_v19  ;;  %v3568_v21 = vmul.f32 %v3379_v16, %v3371_v17  ;;  %v12095_v62 = vpop.permute.xlu0 %3219  ;;  %14461 = vst [vmem:[#allocation109_spill] sm:$0xff] %v12097_v26  ;;  %v8337_v19 = vpack.i.bf16 %v14463_v4, %v14462_v14  ;;  %v12109_v41 = vpop.f32.mrb[91].mxu0  ;;  %v8499_v16 = vld [vmem:[#allocation5 + $0x70] sm:$0xff]   ;;  %v4053_v59 = vmul.f32 %v3864_v48, %v3854_v7  ;;  %v14467_v7 = vld [vmem:[#allocation43_spill] sm:$0xff]  ;;  %v8504_v4 = vld [vmem:[#allocation5 + $0x38] sm:$0xff]  }
 0x408   : > { %14464 = vst [vmem:[#allocation110_spill] sm:$0xff] %v12109_v41  ;;  %v4059_v17 = vmul.f32 %v3888_v60, %v3842_v58  ;;  %v12114_v49 = vpop.f32.mrb[92].mxu0  ;;  %v3354_v26 = vsel %vm3307_vm3, %v11797_v57, %v11984_v6  ;;  %v3838_v14 = vsel %vm3792_vm4, %v12011_v47, %v12028_v32  ;;  %7733 = vmatprep.subr.bf16.mxu0 %v8499_v16 }
 0x409   : > { %v4085_v34 = vadd.f32 %v4021_v15, %v3600_v18  ;;  %v3632_v2 = vadd.f32 %v3568_v21, %v11521_v56  ;;  %v12112_v13 = vpop.permute.xlu1 %3217  ;;  %8338 = vrot.lane.b32.xlu1 %v8337_v19, %s8870_s22  ;;  %v14465_v18 = vld [vmem:[#allocation47_spill] sm:$0xff]  ;;  %v3576_v15 = vmul.f32 %v3411_v20, %v3355_v28  ;;  %7734 = vmatpush3.bf16.msra.mxu0 %v8500_v25  ;;  %v12136_v58 = vpop.f32.mrb[93].mxu0 }
 0x40a   : > { %v3638_v56 = vadd.f32 %v3574_v24, %v14465_v18  ;;  %v3606_v57 = vadd.f32 %v3542_v51, %v14467_v7  ;;  %v3837_v47 = vsel %vm3792_vm4, %v12004_v31, %v12017_v50  ;;  %14468 = vst [vmem:[#allocation43_spill] sm:$0xff] %v12136_v58  ;;  %v3544_v28 = vmul.f32 %v3411_v20, %v3354_v26  ;;  %v14469_v51 = vld [vmem:[#allocation39_spill] sm:$0xff]  ;;  %v14487_v58 = vld [vmem:[#allocation21_spill] sm:$0xff] }
 0x40b   : > { %v4117_v48 = vadd.f32 %v4053_v59, %v3632_v2  ;;  %v12126_v21 = vpop.permute.xlu0 %3223  ;;  %v12129_v60 = vadd.f32 %v11620_v61, %v4085_v34  ;;  %v4061_v19 = vmul.f32 %v3896_v42, %v3838_v14  ;;  %7735 = vmatprep.subr.bf16.mxu0 %v8503_v8  ;;  %v14470_v34 = vld [vmem:[#allocation38_spill] sm:$0xff]  ;;  %v4029_v31 = vmul.f32 %v3896_v42, %v3837_v47 }
 0x40c   : > { %v4123_v24 = vadd.f32 %v4059_v17, %v3638_v56  ;;  %v4091_v25 = vadd.f32 %v4027_v0, %v3606_v57  ;;  %v3640_v2 = vadd.f32 %v3576_v15, %v14470_v34  ;;  %v14472_v17 = vld [vmem:[#allocation32_spill] sm:$0xff]  ;;  %v8507_v15 = vld [vmem:[#allocation5 + $0x140] sm:$0xff]  }
 0x40d   : > { %14466 = vst [vmem:[#allocation47_spill] sm:$0xff] %v12129_v60  ;;  %v12138_v16 = vpop.permute.xlu1 %3221  ;;  %v12141_v59 = vadd.f32 %v11623_v10, %v4117_v48  ;;  %3247 = vrot.lane.b32.xlu1 %v14469_v51, %s8869_s15  ;;  %v13937_v7 = vmax.f32 %v12129_v60, 0.0  ;;  %7736 = vmatpush3.bf16.msra.mxu0 %v8504_v4  ;;  %v3608_v14 = vadd.f32 %v3544_v28, %v14472_v17  ;;  %v14473_v48 = vld [vmem:[#allocation66_spill] sm:$0xff] }
 0x40e   : > { %v12151_v26 = vadd.f32 %v11623_v10, %v4123_v24  ;;  %v4125_v0 = vadd.f32 %v4061_v19, %v3640_v2  ;;  %v12163_v57 = vadd.f32 %v11620_v61, %v4091_v25  ;;  %7765 = vmatprep.subr.bf16.mxu0 %v8507_v15  ;;  %v14476_v19 = vld [vmem:[#allocation46_spill] sm:$0xff]  ;;  %v14477_v25 = vld [vmem:[#allocation15_spill] sm:$0xff] }
 0x40f   : > { %v12146_v18 = vpop.permute.xlu0 %3227  ;;  %v13938_v20 = vmax.f32 %v12141_v59, 0.0  ;;  %v4093_v47 = vadd.f32 %v4029_v31, %v3608_v14  ;;  %v3415_v34 = vrot.slane %v12026_v45, %v14477_v25  ;;  %v3353_v31 = vsel %vm3307_vm3, %v12000_v40, %v12112_v13  ;;  %v14479_v14 = vld [vmem:[#allocation91_spill] sm:$0xff]  ;;  %v14488_v60 = vld [vmem:[#allocation42_spill] sm:$0xff] }
 0x410   : > { %14471 = vst [vmem:[#allocation39_spill] sm:$0xff] %v12151_v26  ;;  %14474 = vst [vmem:[#allocation38_spill] sm:$0xff] %v12163_v57  ;;  %v13940_v4 = vmax.f32 %v12151_v26, 0.0  ;;  %v12170_v24 = vadd.f32 %v11623_v10, %v4125_v0  ;;  %v13939_v51 = vmax.f32 %v12163_v57, 0.0  ;;  %v3352_v0 = vsel %vm3307_vm3, %v11984_v6, %v11992_v23  ;;  %v14484_v57 = vld [vmem:[#allocation69_spill] sm:$0xff] }
 0x411   : > { %v12154_v56 = vpop.permute.xlu1 %3225  ;;  %v8322_v42 = vpack.i.bf16 %v13938_v20, %v13937_v7  ;;  %3251 = vrot.lane.b32.xlu1 %v14473_v48, %s8869_s15  ;;  %v12180_v2 = vadd.f32 %v11620_v61, %v4093_v47  ;;  %v3900_v15 = vrot.slane %v12070_v53, %v14477_v25  ;;  %v3577_v47 = vmul.f32 %v3415_v34, %v3353_v31 }
 0x412   : > { %14475 = vst [vmem:[#allocation32_spill] sm:$0xff] %v12170_v24  ;;  %v8332_v40 = vpack.i.bf16 %v13940_v4, %v13939_v51  ;;  %v3545_v7 = vmul.f32 %v3415_v34, %v3352_v0 }
 0x413   : > { %v12165_v8 = vpop.permute.xlu0 %3704  ;;  %8323 = vrot.lane.b32.xlu0 %v8322_v42, %s8870_s22  ;;  %14478 = vst [vmem:[#allocation66_spill] sm:$0xff] %v12180_v2  ;;  %v13948_v20 = vmax.f32 %v12180_v2, 0.0  ;;  %v14481_v42 = vld [vmem:[#allocation11_spill] sm:$0xff]  ;;  %v3641_v46 = vadd.f32 %v3577_v47, %v14483_v30 }
 0x414   : > { %v3423_v51 = vrot.slane %v12026_v45, %v14481_v42 }
 0x415   : > { %v12172_v28 = vpop.permute.xlu1 %3229  ;;  %3255 = vrot.lane.b32.xlu1 %v14476_v19, %s8869_s15  ;;  %v3835_v19 = vsel %vm3792_vm4, %v12017_v50, %v12165_v8  ;;  %v3348_v50 = vsel %vm3307_vm3, %v12095_v62, %v12126_v21 }
 0x416   : > { %v4030_v0 = vmul.f32 %v3900_v15, %v3835_v19 }
 0x417   : > { %v12186_v17 = vpop.permute.xlu0 %3708  ;;  %3734 = vrot.lane.b32.xlu0 %v14479_v14, %s8870_s22  ;;  %v14480_v14 = vld [vmem:[#allocation36_spill] sm:$0xff] }
 0x419   : > { %v12197_v48 = vpop.permute.xlu1 %3706  ;;  %3259 = vrot.lane.b32.xlu1 %v14480_v14, %s8869_s15  ;;  %v3908_v14 = vrot.slane %v12070_v53, %v14481_v42 }
 0x41a   : > { %v3836_v6 = vsel %vm3792_vm4, %v12028_v32, %v12197_v48  ;;  %v3349_v32 = vsel %vm3307_vm3, %v12138_v16, %v12154_v56 }
 0x41b   : > { %v12216_v31 = vpop.permute.xlu0 %3712  ;;  %8333 = vrot.lane.b32.xlu0 %v8332_v40, %s8870_s22  ;;  %v4062_v34 = vmul.f32 %v3900_v15, %v3836_v6  ;;  %v14482_v40 = vmax.f32 %v12170_v24, 0.0  ;;  %v14485_v15 = vld [vmem:[#allocation83_spill] sm:$0xff]  ;;  %v3547_v6 = vmul.f32 %v3423_v51, %v3348_v50  ;;  %v3579_v42 = vmul.f32 %v3423_v51, %v3349_v32  ;;  %v14489_v51 = vld [vmem:[#allocation86_spill] sm:$0xff] }
 0x41c   : > { %v3831_v54 = vsel %vm3792_vm4, %v12186_v17, %v12216_v31  ;;  %v3609_v19 = vadd.f32 %v3545_v7, %v14485_v15 }
 0x41d   : > { %v3711_v4 = vpop.permute.xlu1 %3710  ;;  %v8342_v41 = vpack.i.bf16 %v14482_v40, %v13948_v20  ;;  %3736 = vrot.lane.b32.xlu1 %v14484_v57, %s8870_s22  ;;  %v4126_v2 = vadd.f32 %v4062_v34, %v3641_v46  ;;  %v4032_v24 = vmul.f32 %v3908_v14, %v3831_v54  ;;  %v14486_v20 = vld [vmem:[#allocation51_spill] sm:$0xff]  ;;  %v3611_v57 = vadd.f32 %v3547_v6, %v14487_v58 }
 0x41e   : > { %v4094_v26 = vadd.f32 %v4030_v0, %v3609_v19  ;;  %v3643_v7 = vadd.f32 %v3579_v42, %v14488_v60  ;;  %v14490_v60 = vld [vmem:[#allocation68_spill] sm:$0xff]  ;;  %v3351_v19 = vsel %vm3307_vm3, %v12112_v13, %v12138_v16  ;;  %v14491_v6 = vld [vmem:[#allocation79_spill] sm:$0xff] }
 0x41f   : > { %8343 = vrot.lane.b32.xlu0 %v8342_v41, %s8870_s22  ;;  %v12242_v40 = vpop.permute.xlu0 %3716  ;;  %v12253_v46 = vadd.f32 %v11623_v10, %v4126_v2  ;;  %v4096_v41 = vadd.f32 %v4032_v24, %v3611_v57  ;;  %v14492_v16 = vld [vmem:[#allocation12_spill] sm:$0xff] }
 0x420   : > { %v12256_v54 = vadd.f32 %v11620_v61, %v4094_v26 }
 0x421   : > { %v3715_v30 = vpop.permute.xlu1 %3714  ;;  %3740 = vrot.lane.b32.xlu1 %v14486_v20, %s8870_s22  ;;  %v13950_v20 = vmax.f32 %v12253_v46, 0.0  ;;  %v12272_v24 = vadd.f32 %v11620_v61, %v4096_v41 }
 0x422   : > { %v3832_v47 = vsel %vm3792_vm4, %v3711_v4, %v3715_v30  ;;  %v13951_v26 = vmax.f32 %v12256_v54, 0.0 }
 0x423   : > { %v4064_v50 = vmul.f32 %v3908_v14, %v3832_v47  ;;  %3249 = vrot.lane.b32.xlu0 %v14489_v51, %s8869_s15 }
 0x424   : > { %v8347_v57 = vpack.i.bf16 %v13950_v20, %v13951_v26  ;;  %v3350_v20 = vsel %vm3307_vm3, %v11992_v23, %v12095_v62  ;;  %v13955_v26 = vmax.f32 %v12272_v24, 0.0  ;;  %v3347_v23 = vsel %vm3307_vm3, %v12154_v56, %v12172_v28 }
 0x425   : > { %v4128_v32 = vadd.f32 %v4064_v50, %v3643_v7  ;;  %v12258_v34 = vpop.permute.xlu1 %3718  ;;  %3744 = vrot.lane.b32.xlu1 %v11888_v5, %s8870_s22  ;;  %v3419_v7 = vrot.slane %v12026_v45, %v14492_v16  ;;  %v14493_v50 = vld [vmem:[#allocation40_spill] sm:$0xff]  ;;  %v3833_v62 = vsel %vm3792_vm4, %v12165_v8, %v12186_v17  ;;  %v3346_v56 = vsel %vm3307_vm3, %v12126_v21, %v12146_v18  ;;  %v14499_v17 = vld [vmem:[#allocation63_spill] sm:$0xff] }
 0x426   : > { %v14494_v51 = vmax.f32 %v14493_v50, 0.0  ;;  %v14497_v50 = vld [vmem:[#allocation92_spill] sm:$0xff]  ;;  %v3830_v8 = vsel %vm3792_vm4, %v3715_v30, %v12258_v34  ;;  %v3829_v21 = vsel %vm3792_vm4, %v12216_v31, %v12242_v40 }
 0x427   : > { %v12262_v58 = vpop.permute.xlu0 %8303  ;;  %3253 = vrot.lane.b32.xlu0 %v14490_v60, %s8869_s15  ;;  %v12268_v2 = vadd.f32 %v11623_v10, %v4128_v32  ;;  %v14495_v32 = vld [vmem:[#allocation85_spill] sm:$0xff] }
 0x428   : > { %v13953_v0 = vunpack.i.h.bf16 %v12262_v58  ;;  %v13952_v5 = vunpack.i.l.bf16 %v12262_v58  ;;  %v14496_v60 = vmax.f32 %v14495_v32, 0.0 }
 0x429   : > { %3748 = vrot.lane.b32.xlu1 %v11890_v37, %s8870_s22  ;;  %v13954_v47 = vmax.f32 %v12268_v2, 0.0 }
 0x42b   : > { %v12274_v42 = vpop.permute.xlu1 %8308  ;;  %3257 = vrot.lane.b32.xlu0 %v14491_v6, %s8869_s15 }
 0x42c   : > { %v8311_v14 = vunpack.i.h.bf16 %v12274_v42  ;;  %v8310_v15 = vunpack.i.l.bf16 %v12274_v42 }
 0x42d   : > { %8348 = vrot.lane.b32.xlu1 %v8347_v57, %s8870_s22 }
 0x42e   : > { %v4475_v37 = vsel %vm3792_vm4, %v13952_v5, %v8310_v15  ;;  %v4476_v13 = vsel %vm3792_vm4, %v13953_v0, %v8311_v14  ;;  %v3834_v5 = vsel %vm3792_vm4, %v12197_v48, %v3711_v4  ;;  %v3578_v0 = vmul.f32 %v3419_v7, %v3351_v19  ;;  %v14498_v19 = vld [vmem:[#allocation13_spill] sm:$0xff] }
 0x42f   : > { %v4482_v41 = vmax.f32 %v14494_v51, %v4475_v37  ;;  %v4514_v6 = vmax.f32 %v14496_v60, %v4476_v13  ;;  %v3904_v37 = vrot.slane %v12070_v53, %v14492_v16  ;;  %3261 = vrot.lane.b32.xlu0 %v14497_v50, %s8869_s15  ;;  %v8357_v4 = vpack.i.bf16 %v13954_v47, %v13955_v26  ;;  %v14501_v60 = vld [vmem:[#allocation20_spill] sm:$0xff]  ;;  %v14505_v47 = vld [vmem:[#allocation26_spill] sm:$0xff] }
 0x430   : > { %v3546_v48 = vmul.f32 %v3419_v7, %v3350_v20  ;;  %v3427_v57 = vrot.slane %v12026_v45, %v14498_v19  ;;  %v3912_v7 = vrot.slane %v12070_v53, %v14498_v19 }
 0x431   : > { %v4546_v13 = vpack.c.bf16 %v4514_v6, %v4482_v41  ;;  %v4063_v51 = vmul.f32 %v3904_v37, %v3834_v5  ;;  %8358 = vrot.lane.b32.xlu1 %v8357_v4, %s8870_s22  ;;  %v3642_v41 = vadd.f32 %v3578_v0, %v14499_v17  ;;  %v4031_v20 = vmul.f32 %v3904_v37, %v3833_v62  ;;  %v14500_v5 = vld [vmem:[#allocation84_spill] sm:$0xff]  ;;  %v12356_v4 = vpop.f32.mrb[94].mxu0  ;;  %v14502_v0 = vld [vmem:[#allocation31_spill] sm:$0xff]  ;;  %v14503_v37 = vld [vmem:[#allocation53_spill] sm:$0xff] }
 0x432   : > { %v3580_v32 = vmul.f32 %v3427_v57, %v3347_v23  ;;  %v3610_v6 = vadd.f32 %v3546_v48, %v14501_v60  ;;  %v3548_v30 = vmul.f32 %v3427_v57, %v3346_v56  ;;  %v4033_v17 = vmul.f32 %v3912_v7, %v3829_v21  ;;  %v12367_v57 = vpop.f32.mrb[95].mxu0 }
 0x433   : > { %6657 = vmatprep.mubr.bf16.mxu0 %v4546_v13  ;;  %3738 = vrot.lane.b32.xlu0 %v14500_v5, %s8870_s22  ;;  %v4127_v50 = vadd.f32 %v4063_v51, %v3642_v41  ;;  %v4065_v13 = vmul.f32 %v3912_v7, %v3830_v8  ;;  %v14504_v5 = vld [vmem:[#allocation24_spill] sm:$0xff]  ;;  %v14506_v51 = vld [vmem:[#allocation81_spill] sm:$0xff] }
 0x434   : > { %v3644_v23 = vadd.f32 %v3580_v32, %v14503_v37  ;;  %v4095_v62 = vadd.f32 %v4031_v20, %v3610_v6  ;;  %v3612_v26 = vadd.f32 %v3548_v30, %v14505_v47  ;;  %v14508_v20 = vld [vmem:[#allocation27_spill] sm:$0xff] }
 0x435   : > { %3263 = vrot.lane.b32.xlu1 %v14502_v0, %s8869_s15  ;;  %v12365_v31 = vadd.f32 %v11623_v10, %v4127_v50 }
 0x436   : > { %v4129_v48 = vadd.f32 %v4065_v13, %v3644_v23  ;;  %v12372_v56 = vadd.f32 %v11620_v61, %v4095_v62  ;;  %v4097_v8 = vadd.f32 %v4033_v17, %v3612_v26  ;;  %v14510_v17 = vld [vmem:[#allocation55_spill] sm:$0xff] }
 0x437   : > { %3742 = vrot.lane.b32.xlu0 %v14504_v5, %s8870_s22  ;;  %v13959_v41 = vmax.f32 %v12365_v31, 0.0 }
 0x438   : > { %v12378_v47 = vadd.f32 %v11623_v10, %v4129_v48  ;;  %v13958_v7 = vmax.f32 %v12372_v56, 0.0  ;;  %v12384_v21 = vadd.f32 %v11620_v61, %v4097_v8  ;;  %v14513_v48 = vld [vmem:[#allocation77_spill] sm:$0xff] }
 0x439   : > { %3267 = vrot.lane.b32.xlu1 %v14506_v51, %s8869_s15 }
 0x43a   : > { %14507 = vst [vmem:[#allocation46_spill] sm:$0xff] %v12378_v47  ;;  %14509 = vst [vmem:[#allocation15_spill] sm:$0xff] %v12384_v21  ;;  %v8352_v30 = vpack.i.bf16 %v13959_v41, %v13958_v7  ;;  %v13956_v50 = vmax.f32 %v12384_v21, 0.0  ;;  %v14525_v41 = vld [vmem:[#allocation45_spill] sm:$0xff] }
 0x43b   : > { %3746 = vrot.lane.b32.xlu0 %v11893_v12, %s8870_s22  ;;  %v13957_v12 = vmax.f32 %v12378_v47, 0.0 }
 0x43d   : > { %3271 = vrot.lane.b32.xlu1 %v14508_v20, %s8869_s15  ;;  %v8362_v62 = vpack.i.bf16 %v13957_v12, %v13956_v50 }
 0x43f   : > { %v8314_v32 = vpop.permute.xlu1 %8313  ;;  %3750 = vrot.lane.b32.xlu0 %v11897_v44, %s8870_s22 }
 0x440   : > { %v8316_v26 = vunpack.i.h.bf16 %v8314_v32  ;;  %v8315_v60 = vunpack.i.l.bf16 %v8314_v32 }
 0x441   : > { %3275 = vrot.lane.b32.xlu1 %v11907_v9, %s8869_s15 }
 0x442   : > { %v4473_v44 = vsel %vm3792_vm4, %v8310_v15, %v8315_v60  ;;  %v4474_v13 = vsel %vm3792_vm4, %v8311_v14, %v8316_v26  ;;  %v14511_v15 = vld [vmem:[#allocation76_spill] sm:$0xff]  ;;  %v14514_v14 = vmax.f32 %v14513_v48, 0.0 }
 0x443   : > { %v12389_v6 = vpop.permute.xlu1 %3231  ;;  %8353 = vrot.lane.b32.xlu0 %v8352_v30, %s8870_s22  ;;  %v14512_v42 = vmax.f32 %v14511_v15, 0.0  ;;  %v14515_v30 = vmax.f32 %v11846_v55, 0.0  ;;  %v14521_v55 = vld [vmem:[#allocation93_spill] sm:$0xff] }
 0x444   : > { %v4515_v51 = vmax.f32 %v14514_v14, %v4474_v13  ;;  %v12434_v13 = vpop.f32.mrb[88].mxu1  ;;  %v8490_v14 = vld [vmem:[#allocation5 + $0x180] sm:$0xff]  }
 0x445   : > { %3752 = vrot.lane.b32.xlu1 %v14510_v17, %s8870_s22  ;;  %v4483_v5 = vmax.f32 %v14512_v42, %v4473_v44  ;;  %v14516_v44 = vmax.f32 %v11851_v29, 0.0  ;;  %14517 = vst [vmem:[#allocation91_spill] sm:$0xff] %v12434_v13  ;;  %v12438_v42 = vpop.f32.mrb[89].mxu1 }
 0x446   : > { %14518 = vst [vmem:[#allocation36_spill] sm:$0xff] %v12438_v42  ;;  %v12442_v50 = vpop.f32.mrb[90].mxu1 }
 0x447   : > { %v12407_v0 = vpop.permute.xlu0 %8318  ;;  %v3236_v23 = vpop.permute.xlu1 %3235  ;;  %8363 = vrot.lane.b32.xlu0 %v8362_v62, %s8870_s22  ;;  %14520 = vst [vmem:[#allocation37_spill] sm:$0xff] %v12442_v50  ;;  %v14526_v50 = vld [vmem:[#allocation54_spill] sm:$0xff] }
 0x448   : > { %v13961_v37 = vunpack.i.h.bf16 %v12407_v0  ;;  %v13960_v9 = vunpack.i.l.bf16 %v12407_v0  ;;  %v12446_v29 = vpop.f32.mrb[91].mxu1 }
 0x449   : > { %14522 = vst [vmem:[#allocation69_spill] sm:$0xff] %v12446_v29 }
 0x44a   : > { %v4471_v8 = vsel %vm3792_vm4, %v8315_v60, %v13960_v9  ;;  %v4472_v32 = vsel %vm3792_vm4, %v8316_v26, %v13961_v37  ;;  %v14519_v60 = vld [vmem:[#allocation28_spill] sm:$0xff]  ;;  %v4547_v26 = vpack.c.bf16 %v4515_v51, %v4483_v5  ;;  %v8501_v9 = vld [vmem:[#allocation5 + $0x1d8] sm:$0xff]   ;;  %v3435_v37 = vrot.slane %v12026_v45, %v14454_v3 }
 0x44b   : > { %v3234_v20 = vpop.permute.xlu0 %3233  ;;  %v4484_v17 = vmax.f32 %v14515_v30, %v4471_v8  ;;  %v4516_v15 = vmax.f32 %v14516_v44, %v4472_v32  ;;  %v12436_v62 = vpop.permute.xlu1 %3239  ;;  %3756 = vrot.lane.b32.xlu1 %v14519_v60, %s8870_s22  ;;  %3265 = vrot.lane.b32.xlu0 %v14521_v55, %s8869_s15  ;;  %v8493_v8 = vld [vmem:[#allocation5 + $0x1c8] sm:$0xff]  }
 0x44c   : > { %v12448_v30 = vpop.f32.mrb[92].mxu1  ;;  %v8494_v5 = vld [vmem:[#allocation5 + $0x188] sm:$0xff]   ;;  %v3345_v7 = vsel %vm3307_vm3, %v12172_v28, %v3234_v20  ;;  %v3342_v28 = vsel %vm3307_vm3, %v12389_v6, %v3236_v23 }
 0x44d   : > { %v4548_v48 = vpack.c.bf16 %v4516_v15, %v4484_v17  ;;  %v12452_v17 = vpop.f32.mrb[93].mxu1  ;;  %v3431_v15 = vrot.slane %v12026_v45, %v14438_v38  ;;  %v14523_v60 = vld [vmem:[#allocation80_spill] sm:$0xff] }
 0x44e   : > { %v12456_v51 = vpop.f32.mrb[94].mxu1 }
 0x44f   : > { %v3238_v32 = vpop.permute.xlu0 %3237  ;;  %6698 = vmatprep.mubr.bf16.mxu1 %v4548_v48  ;;  %v12450_v44 = vpop.permute.xlu1 %3243  ;;  %3760 = vrot.lane.b32.xlu1 %v11961_v27, %s8870_s22  ;;  %v8497_v48 = vld [vmem:[#allocation5 + $0x1d0] sm:$0xff]  }
 0x450   : > { %6699 = vmatmul.mubr.bf16.vlgmr.msra.gmra.mrb[96].mxu1 %v4547_v26  ;;  %3269 = vrot.lane.b32.xlu0 %v14523_v60, %s8869_s15  ;;  %v12462_v55 = vpop.f32.mrb[95].mxu1  ;;  %v3344_v26 = vsel %vm3307_vm3, %v12146_v18, %v12389_v6  ;;  %v8498_v60 = vld [vmem:[#allocation5 + $0x190] sm:$0xff]   ;;  %v3343_v13 = vsel %vm3307_vm3, %v3234_v20, %v3238_v32  ;;  %v3920_v6 = vrot.slane %v12070_v53, %v14454_v3 }
 0x451   : > { %7788 = vmatpush3.bf16.msra.mxu1 %v8490_v14  ;;  %14524 = vst [vmem:[#allocation83_spill] sm:$0xff] %v12462_v55  ;;  %v3916_v14 = vrot.slane %v12070_v53, %v14438_v38  ;;  %v3549_v18 = vmul.f32 %v3431_v15, %v3344_v26 }
 0x452   : > { %7789 = vmatprep.subr.bf16.mxu1 %v8493_v8 }
 0x453   : > { %v12468_v27 = vpop.permute.xlu0 %3241  ;;  %v3721_v12 = vpop.permute.xlu1 %3720  ;;  %3764 = vrot.lane.b32.xlu1 %v11964_v52, %s8870_s22  ;;  %v3439_v52 = vrot.slane %v12026_v45, %v14446_v11  ;;  %v3613_v42 = vadd.f32 %v3549_v18, %v14526_v50  ;;  %v8505_v45 = vld [vmem:[#allocation5 + $0x1e0] sm:$0xff]   ;;  %v14527_v50 = vld [vmem:[#allocation48_spill] sm:$0xff] }
 0x454   : > { %v3827_v8 = vsel %vm3792_vm4, %v12242_v40, %v3721_v12  ;;  %3273 = vrot.lane.b32.xlu0 %v14525_v41, %s8869_s15  ;;  %v3581_v40 = vmul.f32 %v3431_v15, %v3345_v7  ;;  %v3340_v41 = vsel %vm3307_vm3, %v3236_v23, %v12436_v62  ;;  %v3550_v7 = vmul.f32 %v3435_v37, %v3342_v28  ;;  %v8506_v28 = vld [vmem:[#allocation5 + $0x1a0] sm:$0xff]  }
 0x455   : > { %7790 = vmatpush3.bf16.msra.mxu1 %v8494_v5  ;;  %v4034_v5 = vmul.f32 %v3916_v14, %v3827_v8  ;;  %v3924_v8 = vrot.slane %v12070_v53, %v14446_v11  ;;  %v3551_v18 = vmul.f32 %v3439_v52, %v3340_v41 }
 0x456   : > { %7791 = vmatprep.subr.bf16.mxu1 %v8497_v48  ;;  %v8502_v48 = vld [vmem:[#allocation5 + $0x198] sm:$0xff]  }
 0x457   : > { %v12484_v29 = vpop.permute.xlu0 %3245  ;;  %v3725_v26 = vpop.permute.xlu1 %3724  ;;  %v4098_v20 = vadd.f32 %v4034_v5, %v3613_v42  ;;  %v14528_v42 = vld [vmem:[#allocation52_spill] sm:$0xff] }
 0x458   : > { %3277 = vrot.lane.b32.xlu0 %v11922_v35, %s8869_s15  ;;  %v3825_v15 = vsel %vm3792_vm4, %v3721_v12, %v3725_v26  ;;  %v3582_v35 = vmul.f32 %v3435_v37, %v3343_v13  ;;  %v14529_v13 = vld [vmem:[#allocation22_spill] sm:$0xff] }
 0x459   : > { %7792 = vmatpush3.bf16.msra.mxu1 %v8498_v60  ;;  %v3645_v60 = vadd.f32 %v3581_v40, %v14527_v50  ;;  %v4035_v40 = vmul.f32 %v3920_v6, %v3825_v15  ;;  %v3614_v50 = vadd.f32 %v3550_v7, %v14529_v13  ;;  %v14532_v15 = vld [vmem:[#allocation49_spill] sm:$0xff] }
 0x45a   : > { %7793 = vmatprep.subr.bf16.mxu1 %v8501_v9  ;;  %v3341_v9 = vsel %vm3307_vm3, %v3238_v32, %v12468_v27 }
 0x45b   : > { %v3723_v23 = vpop.permute.xlu0 %3722  ;;  %v12509_v47 = vpop.permute.xlu1 %3728  ;;  %v3583_v55 = vmul.f32 %v3439_v52, %v3341_v9  ;;  %v4099_v7 = vadd.f32 %v4035_v40, %v3614_v50  ;;  %v14534_v52 = vld [vmem:[#allocation65_spill] sm:$0xff] }
 0x45c   : > { %v3828_v21 = vsel %vm3792_vm4, %v12258_v34, %v3723_v23  ;;  %v3823_v53 = vsel %vm3792_vm4, %v3725_v26, %v12509_v47  ;;  %3754 = vrot.lane.b32.xlu0 %v14528_v42, %s8870_s22  ;;  %v8509_v34 = vld [vmem:[#allocation5 + $0x1e8] sm:$0xff]   ;;  %v14531_v26 = vld [vmem:[#allocation41_spill] sm:$0xff]  ;;  %v3646_v42 = vadd.f32 %v3582_v35, %v14532_v15 }
 0x45d   : > { %v4066_v12 = vmul.f32 %v3916_v14, %v3828_v21  ;;  %7794 = vmatpush3.bf16.msra.mxu1 %v8502_v48  ;;  %v4036_v41 = vmul.f32 %v3924_v8, %v3823_v53  ;;  %v12521_v21 = vadd.f32 %v11620_v61, %v4098_v20  ;;  %v3615_v48 = vadd.f32 %v3551_v18, %v14531_v26  ;;  %v8513_v20 = vld [vmem:[#allocation5 + $0x1f0] sm:$0xff]   ;;  %v14535_v18 = vld [vmem:[#allocation62_spill] sm:$0xff] }
 0x45e   : > { %7795 = vmatprep.subr.bf16.mxu1 %v8505_v45  ;;  %v3647_v35 = vadd.f32 %v3583_v55, %v14535_v18  ;;  %v8514_v50 = vld [vmem:[#allocation5 + $0x1b0] sm:$0xff]   ;;  %v12550_v55 = vadd.f32 %v11620_v61, %v4099_v7  ;;  %v14541_v7 = vmax.f32 %v11878_v43, 0.0  ;;  %v8525_v43 = vld [vmem:[#allocation5 + $0x2c0] sm:$0xff]  }
 0x45f   : > { %v4130_v5 = vadd.f32 %v4066_v12, %v3645_v60  ;;  %v3727_v37 = vpop.permute.xlu0 %3726  ;;  %14530 = vst [vmem:[#allocation51_spill] sm:$0xff] %v12521_v21  ;;  %v12525_v14 = vpop.permute.xlu1 %3732  ;;  %v8510_v12 = vld [vmem:[#allocation5 + $0x1a8] sm:$0xff]   ;;  %v4100_v9 = vadd.f32 %v4036_v41, %v3615_v48 }
 0x460   : > { %v3826_v32 = vsel %vm3792_vm4, %v3723_v23, %v3727_v37  ;;  %3758 = vrot.lane.b32.xlu0 %v14534_v52, %s8870_s22  ;;  %14537 = vst [vmem:[#allocation86_spill] sm:$0xff] %v12550_v55  ;;  %v13966_v18 = vmax.f32 %v12550_v55, 0.0  ;;  %v14574_v55 = vld [vmem:[#allocation17_spill] sm:$0xff] }
 0x461   : > { %v12530_v45 = vadd.f32 %v11623_v10, %v4130_v5  ;;  %v4067_v60 = vmul.f32 %v3920_v6, %v3826_v32  ;;  %7796 = vmatpush3.bf16.msra.mxu1 %v8506_v28  ;;  %v13969_v5 = vmax.f32 %v12521_v21, 0.0  ;;  %v12559_v48 = vadd.f32 %v11620_v61, %v4100_v9 }
 0x462   : > { %7797 = vmatprep.subr.bf16.mxu1 %v8509_v34 }
 0x463   : > { %14533 = vst [vmem:[#allocation21_spill] sm:$0xff] %v12530_v45  ;;  %v13968_v23 = vmax.f32 %v12530_v45, 0.0  ;;  %v4131_v53 = vadd.f32 %v4067_v60, %v3646_v42  ;;  %v12535_v13 = vpop.permute.xlu0 %3730  ;;  %v12539_v26 = vpop.permute.xlu1 %8328  ;;  %14538 = vst [vmem:[#allocation68_spill] sm:$0xff] %v12559_v48  ;;  %v14540_v42 = vunpack.i.l.bf16 %v12407_v0 }
 0x464   : > { %v3824_v6 = vsel %vm3792_vm4, %v3727_v37, %v12535_v13  ;;  %v8331_v40 = vunpack.i.h.bf16 %v12539_v26  ;;  %v13972_v34 = vunpack.i.l.bf16 %v12539_v26  ;;  %3762 = vrot.lane.b32.xlu0 %v11968_v1, %s8870_s22  ;;  %v8517_v37 = vld [vmem:[#allocation5 + $0x1f8] sm:$0xff]  }
 0x465   : > { %v12545_v28 = vadd.f32 %v11623_v10, %v4131_v53  ;;  %v4068_v41 = vmul.f32 %v3924_v8, %v3824_v6  ;;  %7798 = vmatpush3.bf16.msra.mxu1 %v8510_v12  ;;  %v8367_v32 = vpack.i.bf16 %v13968_v23, %v13969_v5  ;;  %v14539_v8 = vunpack.i.h.bf16 %v12407_v0  ;;  %v8518_v0 = vld [vmem:[#allocation5 + $0x1b8] sm:$0xff]  }
 0x466   : > { %7799 = vmatprep.subr.bf16.mxu1 %v8513_v20  ;;  %v4469_v60 = vsel %vm3792_vm4, %v14540_v42, %v13972_v34  ;;  %v14542_v20 = vmax.f32 %v11870_v33, 0.0  ;;  %v13965_v33 = vmax.f32 %v12559_v48, 0.0  ;;  %v8511_v34 = vld [vmem:[#allocation5 + $0x148] sm:$0xff]   ;;  %v8519_v48 = vld [vmem:[#allocation5 + $0x158] sm:$0xff]  }
 0x467   : > { %14536 = vst [vmem:[#allocation42_spill] sm:$0xff] %v12545_v28  ;;  %v4470_v15 = vsel %vm3792_vm4, %v14539_v8, %v8331_v40  ;;  %v4132_v1 = vadd.f32 %v4068_v41, %v3647_v35  ;;  %v13967_v12 = vmax.f32 %v12545_v28, 0.0  ;;  %8368 = vrot.lane.b32.xlu1 %v8367_v32, %s8870_s22  ;;  %v14545_v32 = vld [vmem:[#allocation71_spill] sm:$0xff]  ;;  %v14546_v8 = vld [vmem:[#allocation18_spill] sm:$0xff]  ;;  %v14575_v28 = vmax.f32 %v14574_v55, 0.0 }
 0x468   : > { %v12576_v52 = vmax.f32 %v14541_v7, %v4470_v15  ;;  %v12580_v9 = vmax.f32 %v14542_v20, %v4469_v60  ;;  %3766 = vrot.lane.b32.xlu0 %v11973_v22, %s8870_s22  ;;  %v14544_v22 = vld [vmem:[#allocation70_spill] sm:$0xff]  ;;  %v14547_v7 = vld [vmem:[#allocation64_spill] sm:$0xff] }
 0x469   : > { %v12584_v53 = vadd.f32 %v11623_v10, %v4132_v1  ;;  %7800 = vmatpush3.bf16.msra.mxu1 %v8514_v50  ;;  %v8372_v41 = vpack.i.bf16 %v13967_v12, %v13966_v18  ;;  %v3338_v1 = vsel %vm3307_vm3, %v12436_v62, %v12450_v44 }
 0x46a   : > { %7801 = vmatprep.subr.bf16.mxu1 %v8517_v37  ;;  %v12612_v37 = vld [vmem:[%s13702_s5 + $0x42] ss:$4 sm:$0xff] }
 0x46b   : > { %14543 = vst [vmem:[#allocation79_spill] sm:$0xff] %v12584_v53  ;;  %v13964_v6 = vmax.f32 %v12584_v53, 0.0  ;;  %v12625_v42 = vrot.slane %v12612_v37, %v14477_v25  ;;  %v3443_v60 = vrot.slane %v12612_v37, %v14451_v36 }
 0x46c   : > { %8373 = vrot.lane.b32.xlu0 %v8372_v41, %s8870_s22  ;;  %v3821_v41 = vsel %vm3792_vm4, %v12509_v47, %v12525_v14 }
 0x46d   : > { %v8377_v50 = vpack.i.bf16 %v13964_v6, %v13965_v33  ;;  %7802 = vmatpush3.bf16.msra.mxu1 %v8518_v0 }
 0x46e   : > { %7831 = vmatprep.subr.bf16.mxu1 %v8525_v43 }
 0x46f   : > { %8378 = vrot.lane.b32.xlu1 %v8377_v50, %s8870_s22  ;;  %v3552_v50 = vmul.f32 %v3443_v60, %v3338_v1 }
 0x473   : > { %3279 = vrot.lane.b32.xlu1 %v11911_v63, %s8869_s15  ;;  %v12621_v63 = vld [vmem:[%s13702_s5 + $0x43] ss:$4 sm:$0xff] }
 0x474   : > { %v3928_v0 = vrot.slane %v12621_v63, %v14451_v36  ;;  %v3932_v55 = vrot.slane %v12621_v63, %v14477_v25 }
 0x476   : > { %v4037_v6 = vmul.f32 %v3928_v0, %v3821_v41 }
 0x477   : > { %3283 = vrot.lane.b32.xlu1 %v14544_v22, %s8869_s15  ;;  %v3339_v22 = vsel %vm3307_vm3, %v12468_v27, %v12484_v29  ;;  %v14552_v27 = vunpack.i.h.bf16 %v12262_v58 }
 0x478   : > { %v3584_v12 = vmul.f32 %v3443_v60, %v3339_v22 }
 0x47b   : > { %3287 = vrot.lane.b32.xlu1 %v14545_v32, %s8869_s15  ;;  %v12616_v15 = vpop.permute.xlu1 %8338  ;;  %v14548_v32 = vld [vmem:[#allocation88_spill] sm:$0xff] }
 0x47f   : > { %3291 = vrot.lane.b32.xlu1 %v14546_v8, %s8869_s15  ;;  %v12635_v20 = vpop.permute.xlu1 %3247 }
 0x480   : > { %v3336_v43 = vsel %vm3307_vm3, %v12450_v44, %v12635_v20 }
 0x481   : > { %v3553_v62 = vmul.f32 %v12625_v42, %v3336_v43  ;;  %v14551_v43 = vld [vmem:[#allocation87_spill] sm:$0xff] }
 0x482   : > { %v3616_v18 = vadd.f32 %v3552_v50, %v14551_v43  ;;  %v14554_v50 = vmax.f32 %v12141_v59, 0.0  ;;  %v14555_v43 = vld [vmem:[#allocation47_spill] sm:$0xff] }
 0x483   : > { %3768 = vrot.lane.b32.xlu1 %v14547_v7, %s8870_s22  ;;  %v12653_v8 = vadd.f32 %v3553_v62, %v14548_v32  ;;  %v14549_v7 = vld [vmem:[#allocation30_spill] sm:$0xff]  ;;  %v12657_v44 = vpop.permute.xlu1 %3251  ;;  %v14553_v32 = vunpack.i.l.bf16 %v12262_v58  ;;  %v14556_v23 = vmax.f32 %v14555_v43, 0.0 }
 0x484   : > { %v4101_v60 = vadd.f32 %v4037_v6, %v3616_v18  ;;  %v14558_v18 = vld [vmem:[#allocation43_spill] sm:$0xff] }
 0x485   : > { %v12659_v33 = vpop.permute.xlu0 %8323 }
 0x486   : > { %14550 = vst [vmem:[#allocation40_spill] sm:$0xff] %v12659_v33  ;;  %v13971_v47 = vunpack.i.h.bf16 %v12659_v33  ;;  %v13970_v1 = vunpack.i.l.bf16 %v12659_v33 }
 0x487   : > { %3772 = vrot.lane.b32.xlu1 %v14549_v7, %s8870_s22  ;;  %v12678_v7 = vpop.permute.xlu1 %3255 }
 0x488   : > { %v4478_v62 = vsel %vm3792_vm4, %v13971_v47, %v14552_v27  ;;  %v4477_v41 = vsel %vm3792_vm4, %v13970_v1, %v14553_v32  ;;  %v8508_v32 = vld [vmem:[#allocation5 + $0x100] sm:$0xff]   ;;  %v14557_v1 = vld [vmem:[#allocation89_spill] sm:$0xff] }
 0x489   : > { %v4513_v22 = vmax.f32 %v14554_v50, %v4478_v62  ;;  %v4481_v5 = vmax.f32 %v14556_v23, %v4477_v41  ;;  %v12684_v27 = vpop.permute.xlu0 %3734  ;;  %v3648_v47 = vadd.f32 %v3584_v12, %v14557_v1  ;;  %v12696_v23 = vadd.f32 %v11620_v61, %v4101_v60  ;;  %v8512_v50 = vld [vmem:[#allocation5 + $0x108] sm:$0xff]  }
 0x48a   : > { %v3822_v58 = vsel %vm3792_vm4, %v12535_v13, %v12684_v27  ;;  %v8341_v12 = vunpack.i.h.bf16 %v12616_v15  ;;  %v8340_v1 = vunpack.i.l.bf16 %v12616_v15 }
 0x48b   : > { %3776 = vrot.lane.b32.xlu1 %v12114_v49, %s8870_s22  ;;  %v4545_v49 = vpack.c.bf16 %v4513_v22, %v4481_v5  ;;  %v4069_v35 = vmul.f32 %v3928_v0, %v3822_v58  ;;  %v12693_v59 = vpop.permute.xlu1 %3259  ;;  %14559 = vst [vmem:[#allocation85_spill] sm:$0xff] %v12696_v23  ;;  %v8515_v0 = vld [vmem:[#allocation5 + $0x150] sm:$0xff]   ;;  %v14561_v58 = vunpack.i.l.bf16 %v12539_v26 }
 0x48d   : > { %v4133_v6 = vadd.f32 %v4069_v35, %v3648_v47  ;;  %6658 = vmatmul.mubr.bf16.vlgmr.msra.gmra.mrb[96].mxu0 %v4545_v49  ;;  %v8334_v62 = vpop.permute.xlu0 %8333 }
 0x48e   : > { %7766 = vmatpush3.bf16.msra.mxu0 %v8508_v32  ;;  %v8336_v41 = vunpack.i.h.bf16 %v8334_v62  ;;  %v8335_v13 = vunpack.i.l.bf16 %v8334_v62 }
 0x48f   : > { %3780 = vrot.lane.b32.xlu1 %v14558_v18, %s8870_s22  ;;  %v12700_v5 = vadd.f32 %v11623_v10, %v4133_v6  ;;  %7767 = vmatprep.subr.bf16.mxu0 %v8511_v34  ;;  %v12707_v47 = vpop.permute.xlu1 %3736  ;;  %v8516_v18 = vld [vmem:[#allocation5 + $0x110] sm:$0xff]   ;;  %v14562_v6 = vld [vmem:[#allocation103_spill] sm:$0xff] }
 0x490   : > { %v4468_v35 = vsel %vm3792_vm4, %v8331_v40, %v8336_v41  ;;  %v4466_v43 = vsel %vm3792_vm4, %v8336_v41, %v8341_v12  ;;  %v4467_v34 = vsel %vm3792_vm4, %v14561_v58, %v8335_v13  ;;  %v4465_v32 = vsel %vm3792_vm4, %v8335_v13, %v8340_v1  ;;  %v14564_v41 = vld [vmem:[#allocation102_spill] sm:$0xff] }
 0x491   : > { %14560 = vst [vmem:[#allocation92_spill] sm:$0xff] %v12700_v5  ;;  %v12717_v15 = vpop.permute.xlu0 %8343  ;;  %v14563_v62 = vmax.f32 %v14562_v6, 0.0  ;;  %v14565_v26 = vmax.f32 %v14564_v41, 0.0  ;;  %v14566_v58 = vmax.f32 %v12696_v23, 0.0  ;;  %v14567_v33 = vmax.f32 %v12700_v5, 0.0  ;;  %v14572_v23 = vld [vmem:[#allocation14_spill] sm:$0xff] }
 0x492   : > { %7768 = vmatpush3.bf16.msra.mxu0 %v8512_v50  ;;  %v13979_v40 = vunpack.i.h.bf16 %v12717_v15  ;;  %v13982_v49 = vunpack.i.l.bf16 %v12717_v15  ;;  %v14573_v5 = vmax.f32 %v14572_v23, 0.0  ;;  %v8529_v23 = vld [vmem:[#allocation5 + $0x2c8] sm:$0xff]  }
 0x493   : > { %v4486_v22 = vmax.f32 %v14563_v62, %v4467_v34  ;;  %7769 = vmatprep.subr.bf16.mxu0 %v8515_v0  ;;  %v4518_v60 = vmax.f32 %v14565_v26, %v4468_v35  ;;  %v8382_v53 = vpack.i.bf16 %v14567_v33, %v14566_v58  ;;  %v12739_v0 = vpop.permute.xlu1 %3740  ;;  %v14568_v34 = vld [vmem:[#allocation39_spill] sm:$0xff]  ;;  %v14570_v62 = vld [vmem:[#allocation38_spill] sm:$0xff] }
 0x494   : > { %v4464_v13 = vsel %vm3792_vm4, %v8341_v12, %v13979_v40  ;;  %v4463_v50 = vsel %vm3792_vm4, %v8340_v1, %v13982_v49  ;;  %v14569_v35 = vmax.f32 %v14568_v34, 0.0  ;;  %v14571_v41 = vmax.f32 %v14570_v62, 0.0  ;;  %v8520_v40 = vld [vmem:[#allocation5 + $0x118] sm:$0xff]   ;;  %v8521_v49 = vld [vmem:[#allocation5 + $0x160] sm:$0xff]  }
 0x495   : > { %v3250_v33 = vpop.permute.xlu0 %3249  ;;  %v4550_v58 = vpack.c.bf16 %v4518_v60, %v4486_v22  ;;  %8383 = vrot.lane.b32.xlu0 %v8382_v53, %s8870_s22  ;;  %v4488_v12 = vmax.f32 %v14573_v5, %v4463_v50  ;;  %v4520_v1 = vmax.f32 %v14575_v28, %v4464_v13  ;;  %v14576_v60 = vld [vmem:[#allocation16_spill] sm:$0xff]  ;;  %v8522_v5 = vld [vmem:[#allocation5 + $0x120] sm:$0xff]  }
 0x496   : > { %v4519_v6 = vmax.f32 %v14569_v35, %v4466_v43  ;;  %v4487_v26 = vmax.f32 %v14571_v41, %v4465_v32  ;;  %7770 = vmatpush3.bf16.msra.mxu0 %v8516_v18  ;;  %v8526_v35 = vld [vmem:[#allocation5 + $0x280] sm:$0xff]   ;;  %v8523_v28 = vld [vmem:[#allocation5 + $0x168] sm:$0xff]   ;;  %v3819_v18 = vsel %vm3792_vm4, %v12525_v14, %v12707_v47  ;;  %v3337_v41 = vsel %vm3307_vm3, %v12484_v29, %v3250_v33  ;;  %v8534_v14 = vld [vmem:[#allocation5 + $0x290] sm:$0xff]  }
 0x497   : > { %6739 = vmatprep.mubr.bf16.mxu0 %v4550_v58  ;;  %7771 = vmatprep.subr.bf16.mxu0 %v8519_v48  ;;  %v12750_v34 = vpop.permute.xlu1 %3744  ;;  %v4552_v43 = vpack.c.bf16 %v4520_v1, %v4488_v12  ;;  %v8530_v22 = vld [vmem:[#allocation5 + $0x288] sm:$0xff]   ;;  %v4038_v62 = vmul.f32 %v3932_v55, %v3819_v18  ;;  %v3451_v58 = vrot.slane %v12612_v37, %v14492_v16  ;;  %v14578_v1 = vld [vmem:[#allocation73_spill] sm:$0xff]  ;;  %v14579_v29 = vld [vmem:[#allocation11_spill] sm:$0xff] }
 0x498   : > { %v4551_v53 = vpack.c.bf16 %v4519_v6, %v4487_v26  ;;  %v8524_v50 = vld [vmem:[#allocation5 + $0x128] sm:$0xff]   ;;  %v8527_v6 = vld [vmem:[#allocation5 + $0x170] sm:$0xff]   ;;  %v3936_v18 = vrot.slane %v12621_v63, %v14492_v16  ;;  %v8535_v16 = vld [vmem:[#allocation5 + $0x240] sm:$0xff]  }
 0x499   : > { %v12752_v32 = vpop.permute.xlu0 %3253  ;;  %3281 = vrot.lane.b32.xlu0 %v14576_v60, %s8869_s15  ;;  %6780 = vmatprep.mubr.bf16.mxu1 %v4552_v43  ;;  %v8537_v43 = vld [vmem:[#allocation5 + $0x2d8] sm:$0xff]   ;;  %v3455_v60 = vrot.slane %v12612_v37, %v14579_v29 }
 0x49a   : > { %7772 = vmatpush3.bf16.msra.mxu0 %v8520_v40  ;;  %6781 = vmatmul.mubr.bf16.vlgmr.msra.gmra.mrb[100].mxu1 %v4551_v53  ;;  %v14577_v40 = vld [vmem:[#allocation72_spill] sm:$0xff]  ;;  %v8528_v53 = vld [vmem:[#allocation5 + $0x130] sm:$0xff]  }
 0x49b   : > { %7773 = vmatprep.subr.bf16.mxu0 %v8521_v49  ;;  %v12758_v48 = vpop.permute.xlu1 %3748  ;;  %7832 = vmatpush3.bf16.msra.mxu1 %v8526_v35  ;;  %v8533_v49 = vld [vmem:[#allocation5 + $0x2d0] sm:$0xff]   ;;  %v3334_v35 = vsel %vm3307_vm3, %v12635_v20, %v12657_v44  ;;  %v4102_v20 = vadd.f32 %v4038_v62, %v12653_v8  ;;  %v12808_v8 = vrot.slane %v12621_v63, %v14579_v29  ;;  %v14580_v62 = vld [vmem:[#allocation35_spill] sm:$0xff] }
 0x49c   : > { %7833 = vmatprep.subr.bf16.mxu1 %v8529_v23  ;;  %v3332_v23 = vsel %vm3307_vm3, %v12657_v44, %v12678_v7  ;;  %v8538_v44 = vld [vmem:[#allocation5 + $0x298] sm:$0xff]  }
 0x49d   : > { %v12764_v13 = vpop.permute.xlu0 %3257  ;;  %3285 = vrot.lane.b32.xlu0 %v14577_v40, %s8869_s15  ;;  %v3335_v40 = vsel %vm3307_vm3, %v3250_v33, %v12752_v32  ;;  %v8541_v33 = vld [vmem:[#allocation5 + $0x2e0] sm:$0xff]   ;;  %v12829_v45 = vadd.f32 %v11620_v61, %v4102_v20 }
 0x49e   : > { %7774 = vmatpush3.bf16.msra.mxu0 %v8522_v5  ;;  %v3585_v5 = vmul.f32 %v12625_v42, %v3337_v41  ;;  %v3554_v42 = vmul.f32 %v3451_v58, %v3334_v35  ;;  %v3555_v41 = vmul.f32 %v3455_v60, %v3332_v23  ;;  %v8532_v35 = vld [vmem:[#allocation5 + $0x138] sm:$0xff]   ;;  %v3586_v29 = vmul.f32 %v3451_v58, %v3335_v40  ;;  %v8542_v58 = vld [vmem:[#allocation5 + $0x2a0] sm:$0xff]  }
 0x49f   : > { %7775 = vmatprep.subr.bf16.mxu0 %v8523_v28  ;;  %v12771_v26 = vpop.permute.xlu1 %8348  ;;  %7834 = vmatpush3.bf16.msra.mxu1 %v8530_v22  ;;  %v8531_v28 = vld [vmem:[#allocation5 + $0x178] sm:$0xff]   ;;  %v12792_v22 = vrot.slane %v12612_v37, %v14498_v19  ;;  %v3333_v23 = vsel %vm3307_vm3, %v12752_v32, %v12764_v13  ;;  %v14003_v21 = vmax.f32 %v12829_v45, 0.0 }
 0x4a0   : > { %7835 = vmatprep.subr.bf16.mxu1 %v8533_v49 }
 0x4a1   : > { %v12775_v12 = vpop.permute.xlu0 %3261  ;;  %3289 = vrot.lane.b32.xlu0 %v14578_v1, %s8869_s15 }
 0x4a2   : > { %7776 = vmatpush3.bf16.msra.mxu0 %v8524_v50  ;;  %v3817_v50 = vsel %vm3792_vm4, %v12707_v47, %v12739_v0  ;;  %v3815_v47 = vsel %vm3792_vm4, %v12739_v0, %v12750_v34 }
 0x4a3   : > { %7777 = vmatprep.subr.bf16.mxu0 %v8527_v6  ;;  %v12800_v49 = vpop.permute.xlu1 %8358  ;;  %7836 = vmatpush3.bf16.msra.mxu1 %v8534_v14  ;;  %v3330_v14 = vsel %vm3307_vm3, %v12678_v7, %v12693_v59  ;;  %v4039_v0 = vmul.f32 %v3936_v18, %v3817_v50  ;;  %v3813_v50 = vsel %vm3792_vm4, %v12750_v34, %v12758_v48 }
 0x4a4   : > { %7837 = vmatprep.subr.bf16.mxu1 %v8537_v43  ;;  %v3556_v20 = vmul.f32 %v12792_v22, %v3330_v14 }
 0x4a5   : > { %v3739_v6 = vpop.permute.xlu0 %3738  ;;  %3293 = vrot.lane.b32.xlu0 %v14580_v62, %s8869_s15  ;;  %v14581_v62 = vld [vmem:[#allocation90_spill] sm:$0xff] }
 0x4a6   : > { %7778 = vmatpush3.bf16.msra.mxu0 %v8528_v53  ;;  %v3820_v1 = vsel %vm3792_vm4, %v12684_v27, %v3739_v6  ;;  %v3649_v43 = vadd.f32 %v3585_v5, %v14581_v62  ;;  %v12833_v53 = vrot.slane %v12621_v63, %v14498_v19  ;;  %v14582_v5 = vld [vmem:[#allocation50_spill] sm:$0xff]  ;;  %v4040_v62 = vmul.f32 %v12808_v8, %v3815_v47  ;;  %v8545_v47 = vld [vmem:[#allocation5 + $0x2e8] sm:$0xff]  }
 0x4a7   : > { %v4070_v7 = vmul.f32 %v3932_v55, %v3820_v1  ;;  %7779 = vmatprep.subr.bf16.mxu0 %v8531_v28  ;;  %v12835_v27 = vpop.permute.xlu1 %3263  ;;  %7838 = vmatpush3.bf16.msra.mxu1 %v8538_v44  ;;  %v3618_v40 = vadd.f32 %v3554_v42, %v14582_v5  ;;  %v14583_v28 = vld [vmem:[#allocation29_spill] sm:$0xff]  ;;  %v3587_v1 = vmul.f32 %v3455_v60, %v3333_v23  ;;  %v8536_v42 = vld [vmem:[#allocation5 + $0x200] sm:$0xff]   ;;  %v14585_v5 = vld [vmem:[#allocation82_spill] sm:$0xff] }
 0x4a8   : > { %7839 = vmatprep.subr.bf16.mxu1 %v8541_v33  ;;  %v3650_v19 = vadd.f32 %v3586_v29, %v14585_v5  ;;  %v3331_v60 = vsel %vm3307_vm3, %v12764_v13, %v12775_v12  ;;  %v4041_v29 = vmul.f32 %v12833_v53, %v3813_v50  ;;  %v8549_v50 = vld [vmem:[#allocation5 + $0x2f0] sm:$0xff]  }
 0x4a9   : > { %v4134_v32 = vadd.f32 %v4070_v7, %v3649_v43  ;;  %v3743_v55 = vpop.permute.xlu0 %3742  ;;  %3770 = vrot.lane.b32.xlu0 %v14583_v28, %s8870_s22  ;;  %v14584_v43 = vld [vmem:[#allocation75_spill] sm:$0xff]  ;;  %v8539_v28 = vld [vmem:[#allocation5 + $0x248] sm:$0xff]   ;;  %v4103_v34 = vadd.f32 %v4039_v0, %v3618_v40  ;;  %v14587_v40 = vld [vmem:[#allocation34_spill] sm:$0xff] }
 0x4aa   : > { %7780 = vmatpush3.bf16.msra.mxu0 %v8532_v35  ;;  %v3818_v44 = vsel %vm3792_vm4, %v3739_v6, %v3743_v55  ;;  %v3619_v7 = vadd.f32 %v3555_v41, %v14584_v43  ;;  %v8546_v41 = vld [vmem:[#allocation5 + $0x2a8] sm:$0xff]  }
 0x4ab   : > { %v12851_v33 = vadd.f32 %v11623_v10, %v4134_v32  ;;  %v4071_v14 = vmul.f32 %v3936_v18, %v3818_v44  ;;  %7809 = vmatprep.subr.bf16.mxu0 %v8535_v16  ;;  %v12858_v6 = vpop.permute.xlu1 %3267  ;;  %7840 = vmatpush3.bf16.msra.mxu1 %v8542_v58  ;;  %v14586_v16 = vpack.c.bf16 %v12576_v52, %v12580_v9  ;;  %v14588_v32 = vld [vmem:[#allocation94_spill] sm:$0xff]  ;;  %v14589_v44 = vld [vmem:[#allocation67_spill] sm:$0xff] }
 0x4ac   : > { %v4104_v35 = vadd.f32 %v4040_v62, %v3619_v7  ;;  %v3620_v13 = vadd.f32 %v3556_v20, %v14588_v32  ;;  %v3651_v43 = vadd.f32 %v3587_v1, %v14589_v44  ;;  %v8540_v62 = vld [vmem:[#allocation5 + $0x208] sm:$0xff]   ;;  %7841 = vmatprep.subr.bf16.mxu1 %v8545_v47  ;;  %v8543_v1 = vld [vmem:[#allocation5 + $0x250] sm:$0xff]  }
 0x4ad   : > { %v14002_v23 = vmax.f32 %v12851_v33, 0.0  ;;  %v4135_v18 = vadd.f32 %v4071_v14, %v3650_v19  ;;  %6740 = vmatmul.mubr.bf16.vlgmr.msra.gmra.mrb[100].mxu0 %v14586_v16  ;;  %v3747_v0 = vpop.permute.xlu0 %3746  ;;  %3774 = vrot.lane.b32.xlu0 %v14587_v40, %s8870_s22  ;;  %v3588_v19 = vmul.f32 %v12792_v22, %v3331_v60  ;;  %v8553_v14 = vld [vmem:[#allocation5 + $0x2f8] sm:$0xff]   ;;  %v14590_v60 = vld [vmem:[#allocation96_spill] sm:$0xff] }
 0x4ae   : > { %7810 = vmatpush3.bf16.msra.mxu0 %v8536_v42  ;;  %v3816_v58 = vsel %vm3792_vm4, %v3743_v55, %v3747_v0  ;;  %v12881_v42 = vadd.f32 %v11620_v61, %v4103_v34  ;;  %v8550_v55 = vld [vmem:[#allocation5 + $0x2b0] sm:$0xff]   ;;  %v12884_v47 = vadd.f32 %v11620_v61, %v4104_v35  ;;  %v4105_v22 = vadd.f32 %v4041_v29, %v3620_v13  ;;  %v8547_v16 = vld [vmem:[#allocation5 + $0x258] sm:$0xff]  }
 0x4af   : > { %v12873_v52 = vadd.f32 %v11623_v10, %v4135_v18  ;;  %v4072_v9 = vmul.f32 %v12808_v8, %v3816_v58  ;;  %7811 = vmatprep.subr.bf16.mxu0 %v8539_v28  ;;  %v8387_v20 = vpack.i.bf16 %v14002_v23, %v14003_v21  ;;  %7842 = vmatpush3.bf16.msra.mxu1 %v8546_v41  ;;  %v12886_v5 = vpop.permute.xlu1 %3271  ;;  %v8544_v34 = vld [vmem:[#allocation5 + $0x210] sm:$0xff]   ;;  %v8554_v40 = vld [vmem:[#allocation5 + $0x2b8] sm:$0xff]   ;;  %v8350_v58 = vunpack.i.l.bf16 %v12771_v26 }
 0x4b0   : > { %7843 = vmatprep.subr.bf16.mxu1 %v8549_v50  ;;  %v3652_v41 = vadd.f32 %v3588_v19, %v14590_v60  ;;  %v13989_v32 = vmax.f32 %v12884_v47, 0.0  ;;  %v8548_v19 = vld [vmem:[#allocation5 + $0x218] sm:$0xff]  }
 0x4b1   : > { %v4136_v7 = vadd.f32 %v4072_v9, %v3651_v43  ;;  %v12888_v8 = vpop.permute.xlu0 %3750  ;;  %8388 = vrot.lane.b32.xlu1 %v8387_v20, %s8870_s22  ;;  %3778 = vrot.lane.b32.xlu0 %v12356_v4, %s8870_s22  ;;  %v14001_v35 = vmax.f32 %v12873_v52, 0.0  ;;  %v13990_v4 = vmax.f32 %v12881_v42, 0.0  ;;  %v8577_v9 = vld [vmem:[#allocation5 + $0x3c0] sm:$0xff]   ;;  %v8361_v20 = vunpack.i.h.bf16 %v12800_v49 }
 0x4b2   : > { %7812 = vmatpush3.bf16.msra.mxu0 %v8540_v62  ;;  %v3814_v28 = vsel %vm3792_vm4, %v3747_v0, %v12888_v8  ;;  %v12905_v0 = vadd.f32 %v11620_v61, %v4105_v22 }
 0x4b3   : > { %v12899_v29 = vadd.f32 %v11623_v10, %v4136_v7  ;;  %v4073_v18 = vmul.f32 %v12833_v53, %v3814_v28  ;;  %7813 = vmatprep.subr.bf16.mxu0 %v8543_v1  ;;  %7844 = vmatpush3.bf16.msra.mxu1 %v8550_v55  ;;  %v8351_v53 = vunpack.i.h.bf16 %v12771_v26  ;;  %v12916_v55 = vpop.permute.xlu1 %3275  ;;  %v8392_v22 = vpack.i.bf16 %v14001_v35, %v13990_v4  ;;  %v8551_v7 = vld [vmem:[#allocation5 + $0x260] sm:$0xff]  }
 0x4b4   : > { %7845 = vmatprep.subr.bf16.mxu1 %v8553_v14  ;;  %v8360_v14 = vunpack.i.l.bf16 %v12800_v49 }
 0x4b5   : > { %v13988_v13 = vmax.f32 %v12899_v29, 0.0  ;;  %v4137_v44 = vadd.f32 %v4073_v18, %v3652_v41  ;;  %v8354_v43 = vpop.permute.xlu0 %8353  ;;  %3782 = vrot.lane.b32.xlu0 %v12367_v57, %s8870_s22 }
 0x4b6   : > { %7814 = vmatpush3.bf16.msra.mxu0 %v8544_v34  ;;  %v8356_v62 = vunpack.i.h.bf16 %v8354_v43  ;;  %v8355_v50 = vunpack.i.l.bf16 %v8354_v43  ;;  %v14000_v34 = vmax.f32 %v12905_v0, 0.0  ;;  %v8552_v43 = vld [vmem:[#allocation5 + $0x220] sm:$0xff]  }
 0x4b7   : > { %v12914_v1 = vadd.f32 %v11623_v10, %v4137_v44  ;;  %7815 = vmatprep.subr.bf16.mxu0 %v8547_v16  ;;  %v8397_v57 = vpack.i.bf16 %v13988_v13, %v13989_v32  ;;  %7846 = vmatpush3.bf16.msra.mxu1 %v8554_v40  ;;  %v14592_v32 = vmax.f32 %v12253_v46, 0.0 }
 0x4b8   : > { %v4460_v28 = vsel %vm3792_vm4, %v8351_v53, %v8356_v62  ;;  %v4458_v41 = vsel %vm3792_vm4, %v8356_v62, %v8361_v20  ;;  %v4459_v18 = vsel %vm3792_vm4, %v8350_v58, %v8355_v50  ;;  %v4457_v49 = vsel %vm3792_vm4, %v8355_v50, %v8360_v14  ;;  %7875 = vmatprep.subr.bf16.mxu1 %v8577_v9  ;;  %v8555_v50 = vld [vmem:[#allocation5 + $0x268] sm:$0xff]  }
 0x4b9   : > { %v13991_v60 = vmax.f32 %v12914_v1, 0.0  ;;  %v12939_v16 = vpop.permute.xlu0 %8363  ;;  %8398 = vrot.lane.b32.xlu1 %v8397_v57, %s8870_s22  ;;  %8393 = vrot.lane.b32.xlu0 %v8392_v22, %s8870_s22  ;;  %v14591_v62 = vmax.f32 %v12256_v54, 0.0  ;;  %v4522_v4 = vmax.f32 %v14592_v32, %v4460_v28  ;;  %v14593_v9 = vmax.f32 %v12365_v31, 0.0 }
 0x4ba   : > { %7816 = vmatpush3.bf16.msra.mxu0 %v8548_v19  ;;  %v8366_v40 = vunpack.i.h.bf16 %v12939_v16  ;;  %v8365_v44 = vunpack.i.l.bf16 %v12939_v16  ;;  %v14594_v32 = vmax.f32 %v12372_v56, 0.0  ;;  %v14597_v31 = vmax.f32 %v12268_v2, 0.0  ;;  %v8557_v56 = vld [vmem:[#allocation5 + $0x270] sm:$0xff]  }
 0x4bb   : > { %v4490_v13 = vmax.f32 %v14591_v62, %v4459_v18  ;;  %7817 = vmatprep.subr.bf16.mxu0 %v8551_v7  ;;  %v8402_v57 = vpack.i.bf16 %v13991_v60, %v14000_v34  ;;  %v4523_v46 = vmax.f32 %v14593_v9, %v4458_v41  ;;  %v12967_v7 = vpop.permute.xlu1 %3752  ;;  %v14595_v62 = vld [vmem:[#allocation33_spill] sm:$0xff]  ;;  %v8578_v9 = vld [vmem:[#allocation5 + $0x380] sm:$0xff]  }
 0x4bc   : > { %v4456_v19 = vsel %vm3792_vm4, %v8361_v20, %v8366_v40  ;;  %v4455_v54 = vsel %vm3792_vm4, %v8360_v14, %v8365_v44  ;;  %v4491_v22 = vmax.f32 %v14594_v32, %v4457_v49  ;;  %v8556_v20 = vld [vmem:[#allocation5 + $0x228] sm:$0xff]   ;;  %v14596_v14 = vmax.f32 %v12272_v24, 0.0  ;;  %v8558_v2 = vld [vmem:[#allocation5 + $0x230] sm:$0xff]  }
 0x4bd   : > { %v12969_v28 = vpop.permute.xlu0 %3265  ;;  %v4554_v18 = vpack.c.bf16 %v4522_v4, %v4490_v13  ;;  %3295 = vrot.lane.b32.xlu1 %v14595_v62, %s8869_s15  ;;  %8403 = vrot.lane.b32.xlu0 %v8402_v57, %s8870_s22  ;;  %v4524_v41 = vmax.f32 %v14597_v31, %v4456_v19  ;;  %v14598_v4 = vld [vmem:[#allocation61_spill] sm:$0xff]  ;;  %v3463_v24 = vrot.slane %v12612_v37, %v14438_v38  ;;  %v8579_v57 = vld [vmem:[#allocation5 + $0x3c8] sm:$0xff]   ;;  %v8559_v19 = vld [vmem:[#allocation5 + $0x278] sm:$0xff]  }
 0x4be   : > { %7818 = vmatpush3.bf16.msra.mxu0 %v8552_v43  ;;  %v4492_v60 = vmax.f32 %v14596_v14, %v4455_v54  ;;  %v14599_v13 = vld [vmem:[#allocation105_spill] sm:$0xff]  ;;  %v4555_v43 = vpack.c.bf16 %v4523_v46, %v4491_v22  ;;  %v14600_v54 = vunpack.i.h.bf16 %v12717_v15  ;;  %v14601_v22 = vunpack.i.l.bf16 %v12717_v15  ;;  %v8580_v62 = vld [vmem:[#allocation5 + $0x388] sm:$0xff]   ;;  %v14602_v15 = vld [vmem:[#allocation19_spill] sm:$0xff] }
 0x4bf   : > { %6821 = vmatprep.mubr.bf16.mxu0 %v4554_v18  ;;  %7819 = vmatprep.subr.bf16.mxu0 %v8555_v50  ;;  %v3757_v50 = vpop.permute.xlu1 %3756  ;;  %v14603_v31 = vld [vmem:[#allocation32_spill] sm:$0xff] }
 0x4c0   : > { %v4556_v49 = vpack.c.bf16 %v4524_v41, %v4492_v60  ;;  %v3328_v60 = vsel %vm3307_vm3, %v12693_v59, %v12835_v27  ;;  %v4462_v46 = vsel %vm3792_vm4, %v14600_v54, %v8351_v53  ;;  %v4461_v18 = vsel %vm3792_vm4, %v14601_v22, %v8350_v58  ;;  %v8560_v53 = vld [vmem:[#allocation5 + $0x238] sm:$0xff]   ;;  %v8581_v58 = vld [vmem:[#allocation5 + $0x3d0] sm:$0xff]  }
 0x4c1   : > { %3299 = vrot.lane.b32.xlu1 %v14598_v4, %s8869_s15  ;;  %3297 = vrot.lane.b32.xlu0 %v14599_v13, %s8869_s15  ;;  %v13004_v59 = vrot.slane %v12621_v63, %v14438_v38  ;;  %v3557_v26 = vmul.f32 %v3463_v24, %v3328_v60  ;;  %v14604_v41 = vmax.f32 %v14603_v31, 0.0  ;;  %v3467_v13 = vrot.slane %v12612_v37, %v14454_v3 }
 0x4c2   : > { %v12978_v32 = vpop.permute.xlu0 %3269  ;;  %7820 = vmatpush3.bf16.msra.mxu0 %v8556_v20  ;;  %6862 = vmatprep.mubr.bf16.mxu1 %v4556_v49  ;;  %v3811_v20 = vsel %vm3792_vm4, %v12758_v48, %v12967_v7  ;;  %v14605_v49 = vld [vmem:[#allocation66_spill] sm:$0xff]  ;;  %v8561_v48 = vld [vmem:[#allocation5 + $0x340] sm:$0xff]   ;;  %v3471_v60 = vrot.slane %v12612_v37, %v14446_v11  ;;  %v3324_v37 = vsel %vm3307_vm3, %v12858_v6, %v12886_v5 }
 0x4c3   : > { %6863 = vmatmul.mubr.bf16.vlgmr.msra.gmra.mrb[104].mxu1 %v4555_v43  ;;  %7821 = vmatprep.subr.bf16.mxu0 %v8557_v56  ;;  %v4521_v56 = vmax.f32 %v14604_v41, %v4462_v46  ;;  %v3329_v43 = vsel %vm3307_vm3, %v12775_v12, %v12969_v28  ;;  %v3761_v54 = vpop.permute.xlu1 %3760  ;;  %v14607_v12 = vld [vmem:[#allocation95_spill] sm:$0xff] }
 0x4c4   : > { %7876 = vmatpush3.bf16.msra.mxu1 %v8578_v9  ;;  %v14606_v9 = vmax.f32 %v14605_v49, 0.0  ;;  %v3621_v22 = vadd.f32 %v3557_v26, %v14607_v12  ;;  %v3559_v41 = vmul.f32 %v3471_v60, %v3324_v37  ;;  %v14608_v49 = vld [vmem:[#allocation83_spill] sm:$0xff]  ;;  %v14610_v37 = vld [vmem:[#allocation44_spill] sm:$0xff] }
 0x4c5   : > { %3784 = vrot.lane.b32.xlu1 %v12448_v30, %s8870_s22  ;;  %3301 = vrot.lane.b32.xlu0 %v14602_v15, %s8869_s15  ;;  %v4042_v30 = vmul.f32 %v13004_v59, %v3811_v20  ;;  %v3589_v20 = vmul.f32 %v3463_v24, %v3329_v43  ;;  %v8563_v15 = vld [vmem:[#allocation5 + $0x348] sm:$0xff]   ;;  %v3956_v24 = vrot.slane %v12621_v63, %v14446_v11  ;;  %s8794_s15 = sshll.u32 %s8871_s28, 4  ;;  %s8795_s15 = int_to_ptr.vmem [resolvable:$false] %s8794_s15 }
 0x4c6   : > { %v13010_v14 = vpop.permute.xlu0 %3273  ;;  %7822 = vmatpush3.bf16.msra.mxu0 %v8558_v2  ;;  %7877 = vmatprep.subr.bf16.mxu1 %v8579_v57  ;;  %v4489_v4 = vmax.f32 %v14606_v9, %v4461_v18  ;;  %v8582_v2 = vld [vmem:[#allocation5 + $0x390] sm:$0xff]   ;;  %v3326_v57 = vsel %vm3307_vm3, %v12835_v27, %v12858_v6  ;;  %v3952_v27 = vrot.slane %v12621_v63, %v14454_v3  ;;  %v8562_v18 = vld [vmem:[#allocation5 + $0x300] sm:$0xff]   ;;  %s8796_s20 = scalar_lea.vmem %s8795_s15, 512 }
 0x4c7   : > { %7823 = vmatprep.subr.bf16.mxu0 %v8559_v19  ;;  %v13036_v19 = vld [vmem:[%s13702_s5 + $0x62] ss:$4 sm:$0xff]  ;;  %v3558_v26 = vmul.f32 %v3467_v13, %v3326_v57  ;;  %v4106_v6 = vadd.f32 %v4042_v30, %v3621_v22  ;;  %v13081_v57 = vpop.permute.xlu1 %3764 }
 0x4c8   : > { %7878 = vmatpush3.bf16.msra.mxu1 %v8580_v62  ;;  %v8583_v62 = vld [vmem:[#allocation5 + $0x3d8] sm:$0xff]   ;;  %v13056_v31 = vrot.slane %v13036_v19, %v14451_v36  ;;  %v8585_v9 = vld [vmem:[#allocation5 + $0x3e0] sm:$0xff]   ;;  %v14609_v30 = vld [vmem:[#allocation97_spill] sm:$0xff] }
 0x4c9   : > { %3788 = vrot.lane.b32.xlu1 %v12452_v17, %s8870_s22  ;;  %3786 = vrot.lane.b32.xlu0 %v12456_v51, %s8870_s22  ;;  %v3809_v17 = vsel %vm3792_vm4, %v12967_v7, %v3757_v50  ;;  %v4553_v51 = vpack.c.bf16 %v4521_v56, %v4489_v4  ;;  %v3322_v7 = vsel %vm3307_vm3, %v12886_v5, %v12916_v55  ;;  %v8564_v5 = vld [vmem:[#allocation5 + $0x308] sm:$0xff]   ;;  %v8565_v22 = vld [vmem:[#allocation5 + $0x350] sm:$0xff]  }
 0x4ca   : > { %v13038_v46 = vpop.permute.xlu0 %3277  ;;  %7824 = vmatpush3.bf16.msra.mxu0 %v8560_v53  ;;  %7879 = vmatprep.subr.bf16.mxu1 %v8581_v58  ;;  %v3327_v53 = vsel %vm3307_vm3, %v12969_v28, %v12978_v32  ;;  %v8584_v58 = vld [vmem:[#allocation5 + $0x398] sm:$0xff]   ;;  %v4043_v4 = vmul.f32 %v3952_v27, %v3809_v17  ;;  %v3807_v28 = vsel %vm3792_vm4, %v3757_v50, %v3761_v54 }
 0x4cb   : > { %7853 = vmatprep.subr.bf16.mxu0 %v8561_v48  ;;  %v13075_v48 = vld [vmem:[%s13702_s5 + $0x63] ss:$4 sm:$0xff]  ;;  %v3653_v43 = vadd.f32 %v3589_v20, %v14609_v30  ;;  %v3325_v50 = vsel %vm3307_vm3, %v12978_v32, %v13010_v14  ;;  %v4044_v17 = vmul.f32 %v3956_v24, %v3807_v28 }
 0x4cc   : > { %7880 = vmatpush3.bf16.msra.mxu1 %v8582_v2  ;;  %v3590_v2 = vmul.f32 %v3467_v13, %v3327_v53  ;;  %v3560_v13 = vmul.f32 %v13056_v31, %v3322_v7  ;;  %v3960_v20 = vrot.slane %v13075_v48, %v14451_v36  ;;  %v8587_v32 = vld [vmem:[#allocation5 + $0x3e8] sm:$0xff]   ;;  %v14611_v7 = vld [vmem:[#allocation59_spill] sm:$0xff] }
 0x4cd   : > { %6822 = vmatmul.mubr.bf16.vlgmr.msra.gmra.mrb[104].mxu0 %v4553_v51  ;;  %3790 = vrot.lane.b32.xlu0 %v14608_v49, %s8870_s22  ;;  %v3623_v49 = vadd.f32 %v3559_v41, %v14611_v7  ;;  %v14612_v28 = vld [vmem:[#allocation23_spill] sm:$0xff] }
 0x4ce   : > { %v3755_v56 = vpop.permute.xlu0 %3754  ;;  %7854 = vmatpush3.bf16.msra.mxu0 %v8562_v18  ;;  %7881 = vmatprep.subr.bf16.mxu1 %v8583_v62  ;;  %v3622_v18 = vadd.f32 %v3558_v26, %v14610_v37  ;;  %v8586_v62 = vld [vmem:[#allocation5 + $0x3a0] sm:$0xff]   ;;  %v3591_v26 = vmul.f32 %v3471_v60, %v3325_v50  ;;  %v3323_v60 = vsel %vm3307_vm3, %v13010_v14, %v13038_v46  ;;  %v8589_v50 = vld [vmem:[#allocation5 + $0x3f0] sm:$0xff]   ;;  %v14614_v37 = vld [vmem:[#allocation56_spill] sm:$0xff] }
 0x4cf   : > { %v3812_v63 = vsel %vm3792_vm4, %v12888_v8, %v3755_v56  ;;  %7855 = vmatprep.subr.bf16.mxu0 %v8563_v15  ;;  %v13090_v8 = vadd.f32 %v11620_v61, %v4106_v6  ;;  %v3805_v15 = vsel %vm3792_vm4, %v3761_v54, %v13081_v57  ;;  %v8588_v54 = vld [vmem:[#allocation5 + $0x3a8] sm:$0xff]  }
 0x4d0   : > { %v4074_v12 = vmul.f32 %v13004_v59, %v3812_v63  ;;  %7882 = vmatpush3.bf16.msra.mxu1 %v8584_v58  ;;  %v4107_v59 = vadd.f32 %v4043_v4, %v3622_v18  ;;  %v8566_v58 = vld [vmem:[#allocation5 + $0x310] sm:$0xff]   ;;  %v3654_v63 = vadd.f32 %v3590_v2, %v14612_v28  ;;  %v8567_v4 = vld [vmem:[#allocation5 + $0x358] sm:$0xff]   ;;  %v3655_v18 = vadd.f32 %v3591_v26, %v14614_v37 }
 0x4d1   : > { %7883 = vmatprep.subr.bf16.mxu1 %v8585_v9  ;;  %v13999_v30 = vmax.f32 %v13090_v8, 0.0 }
 0x4d2   : > { %v4138_v51 = vadd.f32 %v4074_v12, %v3653_v43  ;;  %v3759_v53 = vpop.permute.xlu0 %3758  ;;  %7856 = vmatpush3.bf16.msra.mxu0 %v8564_v5  ;;  %v4045_v5 = vmul.f32 %v3960_v20, %v3805_v15 }
 0x4d3   : > { %v3810_v6 = vsel %vm3792_vm4, %v3755_v56, %v3759_v53  ;;  %7857 = vmatprep.subr.bf16.mxu0 %v8565_v22  ;;  %v4108_v56 = vadd.f32 %v4044_v17, %v3623_v49  ;;  %v13113_v22 = vadd.f32 %v11620_v61, %v4107_v59  ;;  %v3592_v17 = vmul.f32 %v13056_v31, %v3323_v60  ;;  %v8590_v59 = vld [vmem:[#allocation5 + $0x3b0] sm:$0xff]  }
 0x4d4   : > { %v13103_v36 = vadd.f32 %v11623_v10, %v4138_v51  ;;  %v4075_v9 = vmul.f32 %v3952_v27, %v3810_v6  ;;  %7884 = vmatpush3.bf16.msra.mxu1 %v8586_v62  ;;  %v14613_v27 = vld [vmem:[#allocation98_spill] sm:$0xff] }
 0x4d5   : > { %7885 = vmatprep.subr.bf16.mxu1 %v8587_v32  ;;  %v3624_v12 = vadd.f32 %v3560_v13, %v14613_v27  ;;  %v8568_v62 = vld [vmem:[#allocation5 + $0x318] sm:$0xff]   ;;  %v8569_v32 = vld [vmem:[#allocation5 + $0x360] sm:$0xff]   ;;  %v13127_v26 = vadd.f32 %v11620_v61, %v4108_v56  ;;  %v13997_v7 = vmax.f32 %v13113_v22, 0.0  ;;  %v8571_v56 = vld [vmem:[#allocation5 + $0x368] sm:$0xff]  }
 0x4d6   : > { %v13998_v41 = vmax.f32 %v13103_v36, 0.0  ;;  %v4139_v43 = vadd.f32 %v4075_v9, %v3654_v63  ;;  %v3763_v2 = vpop.permute.xlu0 %3762  ;;  %7858 = vmatpush3.bf16.msra.mxu0 %v8566_v58  ;;  %v8570_v63 = vld [vmem:[#allocation5 + $0x320] sm:$0xff]   ;;  %v14615_v9 = vld [vmem:[#allocation100_spill] sm:$0xff] }
 0x4d7   : > { %v3808_v14 = vsel %vm3792_vm4, %v3759_v53, %v3763_v2  ;;  %7859 = vmatprep.subr.bf16.mxu0 %v8567_v4  ;;  %v4109_v53 = vadd.f32 %v4045_v5, %v3624_v12  ;;  %v3656_v4 = vadd.f32 %v3592_v17, %v14615_v9  ;;  %v14616_v9 = vld [vmem:[#allocation51_spill] sm:$0xff] }
 0x4d8   : > { %v13120_v51 = vadd.f32 %v11623_v10, %v4139_v43  ;;  %v4076_v15 = vmul.f32 %v3956_v24, %v3808_v14  ;;  %v8407_v13 = vpack.i.bf16 %v13998_v41, %v13999_v30  ;;  %7886 = vmatpush3.bf16.msra.mxu1 %v8588_v54  ;;  %v8591_v24 = vld [vmem:[#allocation5 + $0x3f8] sm:$0xff]  }
 0x4d9   : > { %7887 = vmatprep.subr.bf16.mxu1 %v8589_v50  ;;  %v8369_v49 = vpop.permute.xlu1 %8368  ;;  %v8592_v43 = vld [vmem:[#allocation5 + $0x3b8] sm:$0xff]   ;;  %v13993_v50 = vmax.f32 %v13127_v26, 0.0 }
 0x4da   : > { %v13996_v6 = vmax.f32 %v13120_v51, 0.0  ;;  %v4140_v31 = vadd.f32 %v4076_v15, %v3655_v18  ;;  %v13130_v58 = vpop.permute.xlu0 %3766  ;;  %8408 = vrot.lane.b32.xlu1 %v8407_v13, %s8870_s22  ;;  %7860 = vmatpush3.bf16.msra.mxu0 %v8568_v62  ;;  %v8371_v18 = vunpack.i.h.bf16 %v8369_v49  ;;  %v8370_v14 = vunpack.i.l.bf16 %v8369_v49  ;;  %v8572_v13 = vld [vmem:[#allocation5 + $0x328] sm:$0xff]   ;;  %v14636_v30 = vld [vmem:[#allocation74_spill] sm:$0xff] }
 0x4db   : > { %v3806_v28 = vsel %vm3792_vm4, %v3763_v2, %v13130_v58  ;;  %7861 = vmatprep.subr.bf16.mxu0 %v8569_v32  ;;  %v13147_v2 = vadd.f32 %v11620_v61, %v4109_v53  ;;  %v8573_v53 = vld [vmem:[#allocation5 + $0x370] sm:$0xff]   ;;  %v13174_v49 = vrot.slane %v13036_v19, %v14477_v25 }
 0x4dc   : > { %v13139_v60 = vadd.f32 %v11623_v10, %v4140_v31  ;;  %v4077_v54 = vmul.f32 %v3960_v20, %v3806_v28  ;;  %v8412_v5 = vpack.i.bf16 %v13996_v6, %v13997_v7  ;;  %7888 = vmatpush3.bf16.msra.mxu1 %v8590_v59  ;;  %v8596_v20 = vld [vmem:[#allocation5 + $0x4c0] sm:$0xff]   ;;  %v8602_v7 = vld [vmem:[#allocation5 + $0x488] sm:$0xff]  }
 0x4dd   : > { %7889 = vmatprep.subr.bf16.mxu1 %v8591_v24  ;;  %v13995_v28 = vmax.f32 %v13147_v2, 0.0 }
 0x4de   : > { %v13992_v27 = vmax.f32 %v13139_v60, 0.0  ;;  %v4141_v12 = vadd.f32 %v4077_v54, %v3656_v4  ;;  %v13150_v37 = vpop.permute.xlu0 %8373  ;;  %7862 = vmatpush3.bf16.msra.mxu0 %v8570_v63  ;;  %8413 = vrot.lane.b32.xlu0 %v8412_v5, %s8870_s22  ;;  %v14617_v4 = vmax.f32 %v14616_v9, 0.0  ;;  %v8574_v5 = vld [vmem:[#allocation5 + $0x330] sm:$0xff]  }
 0x4df   : > { %v8376_v17 = vunpack.i.h.bf16 %v13150_v37  ;;  %v8375_v15 = vunpack.i.l.bf16 %v13150_v37  ;;  %7863 = vmatprep.subr.bf16.mxu0 %v8571_v56 }
 0x4e0   : > { %v13158_v32 = vadd.f32 %v11623_v10, %v4141_v12  ;;  %v8417_v59 = vpack.i.bf16 %v13992_v27, %v13993_v50  ;;  %7890 = vmatpush3.bf16.msra.mxu1 %v8592_v43  ;;  %v14618_v12 = vld [vmem:[#allocation21_spill] sm:$0xff] }
 0x4e1   : > { %v13152_v62 = vpop.permute.xlu1 %8378  ;;  %v4452_v31 = vsel %vm3792_vm4, %v8371_v18, %v8376_v17  ;;  %v4451_v24 = vsel %vm3792_vm4, %v8370_v14, %v8375_v15  ;;  %7919 = vmatprep.subr.bf16.mxu1 %v8596_v20  ;;  %v14619_v27 = vmax.f32 %v14618_v12, 0.0  ;;  %v4454_v20 = vsel %vm3792_vm4, %v8366_v40, %v8371_v18  ;;  %v14621_v12 = vld [vmem:[#allocation46_spill] sm:$0xff]  ;;  %v14623_v18 = vld [vmem:[#allocation15_spill] sm:$0xff] }
 0x4e2   : > { %v13994_v63 = vmax.f32 %v13158_v32, 0.0  ;;  %8418 = vrot.lane.b32.xlu1 %v8417_v59, %s8870_s22  ;;  %v4494_v54 = vmax.f32 %v14617_v4, %v4451_v24  ;;  %7864 = vmatpush3.bf16.msra.mxu0 %v8572_v13  ;;  %v8575_v24 = vld [vmem:[#allocation5 + $0x378] sm:$0xff]   ;;  %v14624_v16 = vmax.f32 %v14623_v18, 0.0  ;;  %v8613_v18 = vld [vmem:[#allocation5 + $0x428] sm:$0xff]  }
 0x4e3   : > { %v4526_v50 = vmax.f32 %v14619_v27, %v4452_v31  ;;  %7865 = vmatprep.subr.bf16.mxu0 %v8573_v53  ;;  %v4453_v27 = vsel %vm3792_vm4, %v8365_v44, %v8370_v14  ;;  %v14620_v53 = vld [vmem:[#allocation99_spill] sm:$0xff]  ;;  %v8576_v4 = vld [vmem:[#allocation5 + $0x338] sm:$0xff]  }
 0x4e4   : > { %v8422_v59 = vpack.i.bf16 %v13994_v63, %v13995_v28  ;;  %v14622_v63 = vmax.f32 %v14621_v12, 0.0  ;;  %v4493_v28 = vmax.f32 %v14624_v16, %v4453_v27  ;;  %v8593_v44 = vld [vmem:[#allocation5 + $0x440] sm:$0xff]   ;;  %v8603_v27 = vld [vmem:[#allocation5 + $0x458] sm:$0xff]   ;;  %v8615_v16 = vld [vmem:[#allocation5 + $0x470] sm:$0xff]  }
 0x4e5   : > { %v13181_v56 = vpop.permute.xlu1 %3279  ;;  %v8609_v12 = vld [vmem:[#allocation5 + $0x420] sm:$0xff]  }
 0x4e6   : > { %v3320_v43 = vsel %vm3307_vm3, %v12916_v55, %v13181_v56  ;;  %v4558_v55 = vpack.c.bf16 %v4526_v50, %v4494_v54  ;;  %8423 = vrot.lane.b32.xlu0 %v8422_v59, %s8870_s22  ;;  %7866 = vmatpush3.bf16.msra.mxu0 %v8574_v5  ;;  %v4525_v40 = vmax.f32 %v14622_v63, %v4454_v20  ;;  %v8594_v50 = vld [vmem:[#allocation5 + $0x400] sm:$0xff]   ;;  %v8597_v5 = vld [vmem:[#allocation5 + $0x408] sm:$0xff]   ;;  %v8601_v20 = vld [vmem:[#allocation5 + $0x410] sm:$0xff]  }
 0x4e7   : > { %v3561_v13 = vmul.f32 %v13174_v49, %v3320_v43  ;;  %7867 = vmatprep.subr.bf16.mxu0 %v8575_v24  ;;  %v8595_v43 = vld [vmem:[#allocation5 + $0x448] sm:$0xff]   ;;  %v13216_v63 = vrot.slane %v13075_v48, %v14477_v25  ;;  %v8607_v25 = vld [vmem:[#allocation5 + $0x460] sm:$0xff]  }
 0x4e8   : > { %6903 = vmatprep.mubr.bf16.mxu0 %v4558_v55  ;;  %v4557_v54 = vpack.c.bf16 %v4525_v40, %v4493_v28  ;;  %v8611_v40 = vld [vmem:[#allocation5 + $0x468] sm:$0xff]  }
 0x4e9   : > { %v3625_v31 = vadd.f32 %v3561_v13, %v14620_v53  ;;  %v13204_v9 = vpop.permute.xlu1 %3283  ;;  %v8599_v13 = vld [vmem:[#allocation5 + $0x450] sm:$0xff]  }
 0x4ea   : > { %7868 = vmatpush3.bf16.msra.mxu0 %v8576_v4  ;;  %v8605_v4 = vld [vmem:[#allocation5 + $0x418] sm:$0xff]  }
 0x4eb   : > { %7897 = vmatprep.subr.bf16.mxu0 %v8593_v44  ;;  %v8619_v44 = vld [vmem:[#allocation5 + $0x478] sm:$0xff]  }
 0x4ed   : > { %v13210_v14 = vpop.permute.xlu1 %3287  ;;  %6904 = vmatmul.mubr.bf16.vlgmr.msra.gmra.mrb[108].mxu0 %v4557_v54  ;;  %v8621_v54 = vld [vmem:[#allocation5 + $0x438] sm:$0xff]  }
 0x4ee   : > { %7898 = vmatpush3.bf16.msra.mxu0 %v8594_v50  ;;  %v8381_v50 = vunpack.i.h.bf16 %v13152_v62 }
 0x4ef   : > { %7899 = vmatprep.subr.bf16.mxu0 %v8595_v43 }
 0x4f0   : > { %v4450_v43 = vsel %vm3792_vm4, %v8376_v17, %v8381_v50 }
 0x4f1   : > { %v13212_v59 = vpop.permute.xlu1 %3291 }
 0x4f2   : > { %7900 = vmatpush3.bf16.msra.mxu0 %v8597_v5 }
 0x4f3   : > { %7901 = vmatprep.subr.bf16.mxu0 %v8599_v13 }
 0x4f5   : > { %v13218_v24 = vpop.permute.xlu1 %3768 }
 0x4f6   : > { %v3803_v28 = vsel %vm3792_vm4, %v13081_v57, %v13218_v24  ;;  %7902 = vmatpush3.bf16.msra.mxu0 %v8601_v20  ;;  %v8617_v57 = vld [vmem:[#allocation5 + $0x430] sm:$0xff]   ;;  %v8625_v20 = vld [vmem:[#allocation5 + $0x540] sm:$0xff]  }
 0x4f7   : > { %v4046_v55 = vmul.f32 %v13216_v63, %v3803_v28  ;;  %7903 = vmatprep.subr.bf16.mxu0 %v8603_v27  ;;  %v14625_v27 = vld [vmem:[#allocation42_spill] sm:$0xff] }
 0x4f9   : > { %v13225_v53 = vadd.f32 %v4046_v55, %v3625_v31  ;;  %v8380_v31 = vunpack.i.l.bf16 %v13152_v62  ;;  %v14626_v55 = vmax.f32 %v14625_v27, 0.0 }
 0x4fa   : > { %7904 = vmatpush3.bf16.msra.mxu0 %v8605_v4 }
 0x4fb   : > { %7905 = vmatprep.subr.bf16.mxu0 %v8607_v25  ;;  %v4449_v5 = vsel %vm3792_vm4, %v8375_v15, %v8380_v31  ;;  %v4527_v4 = vmax.f32 %v14626_v55, %v4450_v43  ;;  %v14627_v25 = vld [vmem:[#allocation86_spill] sm:$0xff]  ;;  %v8598_v55 = vld [vmem:[#allocation5 + $0x480] sm:$0xff]  }
 0x4fe   : > { %7906 = vmatpush3.bf16.msra.mxu0 %v8609_v12  ;;  %v14628_v12 = vmax.f32 %v14627_v25, 0.0 }
 0x4ff   : > { %7907 = vmatprep.subr.bf16.mxu0 %v8611_v40 }
 0x500   : > { %v4495_v40 = vmax.f32 %v14628_v12, %v4449_v5  ;;  %v8600_v12 = vld [vmem:[#allocation5 + $0x4c8] sm:$0xff]  }
 0x502   : > { %7908 = vmatpush3.bf16.msra.mxu0 %v8613_v18  ;;  %v14629_v18 = vld [vmem:[#allocation68_spill] sm:$0xff]  ;;  %v4559_v25 = vpack.c.bf16 %v4527_v4, %v4495_v40  ;;  %v8606_v4 = vld [vmem:[#allocation5 + $0x490] sm:$0xff]  }
 0x503   : > { %7909 = vmatprep.subr.bf16.mxu0 %v8615_v16  ;;  %v14630_v16 = vmax.f32 %v14629_v18, 0.0  ;;  %v14633_v18 = vld [vmem:[#allocation12_spill] sm:$0xff] }
 0x504   : > { %v3968_v40 = vrot.slane %v13075_v48, %v14633_v18 }
 0x506   : > { %7910 = vmatpush3.bf16.msra.mxu0 %v8617_v57 }
 0x507   : > { %v13237_v13 = vpop.permute.xlu0 %8383  ;;  %7911 = vmatprep.subr.bf16.mxu0 %v8619_v44  ;;  %v14631_v44 = vld [vmem:[#allocation79_spill] sm:$0xff] }
 0x508   : > { %v8386_v28 = vunpack.i.h.bf16 %v13237_v13  ;;  %v14004_v62 = vunpack.i.l.bf16 %v13237_v13  ;;  %v14632_v43 = vmax.f32 %v14631_v44, 0.0 }
 0x50a   : > { %v4448_v37 = vsel %vm3792_vm4, %v8381_v50, %v8386_v28  ;;  %v4447_v17 = vsel %vm3792_vm4, %v8380_v31, %v14004_v62  ;;  %7912 = vmatpush3.bf16.msra.mxu0 %v8621_v54  ;;  %v3773_v50 = vpop.permute.xlu1 %3772  ;;  %v8604_v31 = vld [vmem:[#allocation5 + $0x4d0] sm:$0xff]   ;;  %v14638_v62 = vld [vmem:[#allocation60_spill] sm:$0xff] }
 0x50b   : > { %v3282_v15 = vpop.permute.xlu0 %3281  ;;  %v4496_v57 = vmax.f32 %v14630_v16, %v4447_v17  ;;  %v4528_v27 = vmax.f32 %v14632_v43, %v4448_v37  ;;  %7941 = vmatprep.subr.bf16.mxu0 %v8625_v20  ;;  %v3483_v17 = vrot.slane %v13036_v19, %v14633_v18  ;;  %v3318_v20 = vsel %vm3307_vm3, %v13181_v56, %v13204_v9  ;;  %v8608_v16 = vld [vmem:[#allocation5 + $0x4d8] sm:$0xff]   ;;  %v14634_v56 = vld [vmem:[#allocation11_spill] sm:$0xff]  ;;  %v14635_v18 = vld [vmem:[#allocation13_spill] sm:$0xff] }
 0x50c   : > { %v3321_v37 = vsel %vm3307_vm3, %v13038_v46, %v3282_v15 }
 0x50d   : > { %v4560_v5 = vpack.c.bf16 %v4528_v27, %v4496_v57  ;;  %v3801_v57 = vsel %vm3792_vm4, %v13218_v24, %v3773_v50  ;;  %v3562_v27 = vmul.f32 %v3483_v17, %v3318_v20  ;;  %v3593_v46 = vmul.f32 %v13174_v49, %v3321_v37 }
 0x50e   : > { %v3777_v44 = vpop.permute.xlu1 %3776  ;;  %v3972_v24 = vrot.slane %v13075_v48, %v14634_v56  ;;  %v3491_v20 = vrot.slane %v13036_v19, %v14635_v18  ;;  %v3314_v37 = vsel %vm3307_vm3, %v13210_v14, %v13212_v59 }
 0x50f   : > { %v3286_v6 = vpop.permute.xlu0 %3285  ;;  %6944 = vmatprep.mubr.bf16.mxu1 %v4560_v5  ;;  %v3316_v5 = vsel %vm3307_vm3, %v13204_v9, %v13210_v14  ;;  %v3799_v41 = vsel %vm3792_vm4, %v3773_v50, %v3777_v44  ;;  %v3626_v49 = vadd.f32 %v3562_v27, %v14636_v30  ;;  %v14637_v50 = vld [vmem:[#allocation101_spill] sm:$0xff]  ;;  %v8614_v27 = vld [vmem:[#allocation5 + $0x4a0] sm:$0xff]   ;;  %v8616_v14 = vld [vmem:[#allocation5 + $0x4e8] sm:$0xff]  }
 0x510   : > { %6945 = vmatmul.mubr.bf16.vlgmr.msra.gmra.mrb[108].mxu1 %v4559_v25  ;;  %v4047_v25 = vmul.f32 %v3968_v40, %v3801_v57  ;;  %v4048_v35 = vmul.f32 %v3972_v24, %v3799_v41 }
 0x511   : > { %7920 = vmatpush3.bf16.msra.mxu1 %v8598_v55  ;;  %v8610_v55 = vld [vmem:[#allocation5 + $0x498] sm:$0xff]  }
 0x512   : > { %7921 = vmatprep.subr.bf16.mxu1 %v8600_v12  ;;  %v3319_v12 = vsel %vm3307_vm3, %v3282_v15, %v3286_v6  ;;  %v13302_v57 = vpop.permute.xlu1 %3780 }
 0x513   : > { %v13257_v54 = vpop.permute.xlu0 %3289  ;;  %v3594_v34 = vmul.f32 %v3483_v17, %v3319_v12  ;;  %v3564_v17 = vmul.f32 %v3491_v20, %v3314_v37  ;;  %v14639_v12 = vld [vmem:[#allocation25_spill] sm:$0xff] }
 0x515   : > { %7922 = vmatpush3.bf16.msra.mxu1 %v8602_v7  ;;  %v3487_v7 = vrot.slane %v13036_v19, %v14634_v56  ;;  %v3657_v56 = vadd.f32 %v3593_v46, %v14637_v50 }
 0x516   : > { %7923 = vmatprep.subr.bf16.mxu1 %v8604_v31  ;;  %v8612_v31 = vld [vmem:[#allocation5 + $0x4e0] sm:$0xff]  }
 0x517   : > { %v13273_v43 = vpop.permute.xlu0 %3293 }
 0x519   : > { %7924 = vmatpush3.bf16.msra.mxu1 %v8606_v4  ;;  %v3563_v4 = vmul.f32 %v3487_v7, %v3316_v5  ;;  %v4111_v5 = vadd.f32 %v4047_v25, %v3626_v49 }
 0x51a   : > { %7925 = vmatprep.subr.bf16.mxu1 %v8608_v16  ;;  %v13300_v16 = vadd.f32 %v11620_v61, %v13225_v53  ;;  %v3317_v53 = vsel %vm3307_vm3, %v3286_v6, %v13257_v54 }
 0x51b   : > { %v3771_v9 = vpop.permute.xlu0 %3770  ;;  %v3627_v46 = vadd.f32 %v3563_v4, %v14638_v62  ;;  %v8618_v62 = vld [vmem:[#allocation5 + $0x4a8] sm:$0xff]   ;;  %v13323_v4 = vadd.f32 %v11620_v61, %v4111_v5 }
 0x51c   : > { %v3804_v15 = vsel %vm3792_vm4, %v13130_v58, %v3771_v9  ;;  %v3976_v58 = vrot.slane %v13075_v48, %v14635_v18  ;;  %v14012_v25 = vmax.f32 %v13300_v16, 0.0 }
 0x51d   : > { %v4078_v30 = vmul.f32 %v13216_v63, %v3804_v15  ;;  %7926 = vmatpush3.bf16.msra.mxu1 %v8610_v55  ;;  %v3797_v63 = vsel %vm3792_vm4, %v3777_v44, %v13302_v57  ;;  %v4112_v37 = vadd.f32 %v4048_v35, %v3627_v46  ;;  %v3595_v44 = vmul.f32 %v3487_v7, %v3317_v53  ;;  %v14640_v35 = vld [vmem:[#allocation107_spill] sm:$0xff] }
 0x51e   : > { %7927 = vmatprep.subr.bf16.mxu1 %v8612_v31  ;;  %v3658_v31 = vadd.f32 %v3594_v34, %v14639_v12  ;;  %v3628_v7 = vadd.f32 %v3564_v17, %v14640_v35  ;;  %v8623_v17 = vld [vmem:[#allocation5 + $0x4f8] sm:$0xff]  }
 0x51f   : > { %v4142_v23 = vadd.f32 %v4078_v30, %v3657_v56  ;;  %v3775_v21 = vpop.permute.xlu0 %3774  ;;  %v4049_v56 = vmul.f32 %v3976_v58, %v3797_v63  ;;  %v8622_v63 = vld [vmem:[#allocation5 + $0x4b0] sm:$0xff]  }
 0x520   : > { %v3802_v41 = vsel %vm3792_vm4, %v3771_v9, %v3775_v21  ;;  %v8620_v9 = vld [vmem:[#allocation5 + $0x4f0] sm:$0xff]  }
 0x521   : > { %v13320_v18 = vadd.f32 %v11623_v10, %v4142_v23  ;;  %v4079_v49 = vmul.f32 %v3968_v40, %v3802_v41  ;;  %7928 = vmatpush3.bf16.msra.mxu1 %v8614_v27  ;;  %v3315_v23 = vsel %vm3307_vm3, %v13257_v54, %v13273_v43 }
 0x522   : > { %7929 = vmatprep.subr.bf16.mxu1 %v8616_v14  ;;  %v3596_v12 = vmul.f32 %v3491_v20, %v3315_v23 }
 0x523   : > { %v7759_v55 = vpop.f32.mrb[96].mxu1  ;;  %v14011_v34 = vmax.f32 %v13320_v18, 0.0  ;;  %v4143_v40 = vadd.f32 %v4079_v49, %v3658_v31  ;;  %v3779_v5 = vpop.permute.xlu0 %3778  ;;  %v13347_v49 = vadd.f32 %v11620_v61, %v4112_v37  ;;  %v8624_v37 = vld [vmem:[#allocation5 + $0x4b8] sm:$0xff]  }
 0x524   : > { %v7760_v6 = vpop.f32.mrb[97].mxu1  ;;  %v8389_v14 = vpop.permute.xlu1 %8388  ;;  %v3800_v46 = vsel %vm3792_vm4, %v3775_v21, %v3779_v5 }
 0x525   : > { %v13325_v15 = vadd.f32 %v7760_v6, %v7759_v55  ;;  %v7762_v50 = vpop.f32.mrb[98].mxu1  ;;  %v13336_v53 = vadd.f32 %v11623_v10, %v4143_v40  ;;  %v8427_v54 = vpack.i.bf16 %v14011_v34, %v14012_v25  ;;  %7930 = vmatpush3.bf16.msra.mxu1 %v8618_v62  ;;  %v14641_v55 = vld [vmem:[#allocation78_spill] sm:$0xff]  ;;  %v4080_v31 = vmul.f32 %v3972_v24, %v3800_v46 }
 0x526   : > { %v7763_v30 = vpop.f32.mrb[99].mxu1  ;;  %v3659_v41 = vadd.f32 %v3595_v44, %v14641_v55  ;;  %7931 = vmatprep.subr.bf16.mxu1 %v8620_v9  ;;  %v14010_v6 = vmax.f32 %v13323_v4, 0.0  ;;  %v8391_v40 = vunpack.i.h.bf16 %v8389_v14  ;;  %v8390_v35 = vunpack.i.l.bf16 %v8389_v14  ;;  %v14642_v44 = vld [vmem:[#allocation109_spill] sm:$0xff] }
 0x527   : > { %v13332_v27 = vadd.f32 %v7763_v30, %v7762_v50  ;;  %v4113_v50 = vadd.f32 %v4049_v56, %v3628_v7  ;;  %v14005_v21 = vmax.f32 %v13336_v53, 0.0  ;;  %8428 = vrot.lane.b32.xlu1 %v8427_v54, %s8870_s22  ;;  %v13351_v62 = vpop.permute.xlu0 %3782  ;;  %v3660_v9 = vadd.f32 %v3596_v12, %v14642_v44  ;;  %v8630_v7 = vld [vmem:[#allocation5 + $0x5c0] sm:$0xff]  }
 0x528   : > { %v4144_v30 = vadd.f32 %v4080_v31, %v3659_v41  ;;  %v3798_v24 = vsel %vm3792_vm4, %v3779_v5, %v13351_v62  ;;  %v14007_v14 = vmax.f32 %v13347_v49, 0.0  ;;  %v4446_v54 = vsel %vm3792_vm4, %v8386_v28, %v8391_v40 }
 0x529   : > { %v8432_v20 = vpack.i.bf16 %v14005_v21, %v14010_v6  ;;  %7932 = vmatpush3.bf16.msra.mxu1 %v8622_v63  ;;  %v4081_v23 = vmul.f32 %v3976_v58, %v3798_v24  ;;  %v13366_v46 = vadd.f32 %v11620_v61, %v4113_v50  ;;  %v14643_v12 = vunpack.i.l.bf16 %v13237_v13  ;;  %v8626_v6 = vld [vmem:[#allocation5 + $0x500] sm:$0xff]  }
 0x52a   : > { %v13362_v56 = vadd.f32 %v11623_v10, %v4144_v30  ;;  %7933 = vmatprep.subr.bf16.mxu1 %v8623_v17 }
 0x52b   : > { %v8399_v5 = vpop.permute.xlu1 %8398  ;;  %8433 = vrot.lane.b32.xlu0 %v8432_v20, %s8870_s22  ;;  %v4145_v55 = vadd.f32 %v4081_v23, %v3660_v9  ;;  %v8394_v58 = vpop.permute.xlu0 %8393  ;;  %v4445_v31 = vsel %vm3792_vm4, %v14643_v12, %v8390_v35  ;;  %v14009_v20 = vmax.f32 %v13366_v46, 0.0  ;;  %v14644_v23 = vld [vmem:[#allocation92_spill] sm:$0xff] }
 0x52c   : > { %v14006_v63 = vmax.f32 %v13362_v56, 0.0  ;;  %v8401_v41 = vunpack.i.h.bf16 %v8399_v5  ;;  %v8400_v17 = vunpack.i.l.bf16 %v8399_v5  ;;  %v8396_v50 = vunpack.i.h.bf16 %v8394_v58 }
 0x52d   : > { %v8395_v30 = vunpack.i.l.bf16 %v8394_v58  ;;  %7934 = vmatpush3.bf16.msra.mxu1 %v8624_v37  ;;  %v13379_v24 = vadd.f32 %v11623_v10, %v4145_v55  ;;  %v3495_v37 = vrot.slane %v13036_v19, %v14438_v38  ;;  %v14645_v5 = vmax.f32 %v14644_v23, 0.0  ;;  %v14646_v58 = vld [vmem:[#allocation85_spill] sm:$0xff] }
 0x52e   : > { %v8437_v28 = vpack.i.bf16 %v14006_v63, %v14007_v14  ;;  %7963 = vmatprep.subr.bf16.mxu1 %v8630_v7  ;;  %v4444_v13 = vsel %vm3792_vm4, %v8391_v40, %v8396_v50  ;;  %v14647_v12 = vmax.f32 %v14646_v58, 0.0  ;;  %v4442_v63 = vsel %vm3792_vm4, %v8396_v50, %v8401_v41 }
 0x52f   : > { %v4443_v44 = vsel %vm3792_vm4, %v8390_v35, %v8395_v30  ;;  %v3296_v9 = vpop.permute.xlu1 %3295  ;;  %v4529_v55 = vmax.f32 %v14645_v5, %v4446_v54  ;;  %v14008_v7 = vmax.f32 %v13379_v24, 0.0  ;;  %v13400_v40 = vpop.permute.xlu0 %8403  ;;  %v4441_v35 = vsel %vm3792_vm4, %v8395_v30, %v8400_v17 }
 0x530   : > { %v4497_v21 = vmax.f32 %v14647_v12, %v4445_v31  ;;  %8438 = vrot.lane.b32.xlu1 %v8437_v28, %s8870_s22  ;;  %v14013_v14 = vunpack.i.h.bf16 %v13400_v40  ;;  %v8405_v23 = vunpack.i.l.bf16 %v13400_v40  ;;  %v14648_v54 = vmax.f32 %v12829_v45, 0.0 }
 0x531   : > { %v3312_v31 = vsel %vm3307_vm3, %v13212_v59, %v3296_v9  ;;  %v8442_v50 = vpack.i.bf16 %v14008_v7, %v14009_v20  ;;  %v14649_v28 = vmax.f32 %v12851_v33, 0.0  ;;  %v3499_v59 = vrot.slane %v13036_v19, %v14454_v3 }
 0x532   : > { %v4498_v5 = vmax.f32 %v14648_v54, %v4443_v44  ;;  %v4440_v30 = vsel %vm3792_vm4, %v8401_v41, %v14013_v14  ;;  %v4439_v45 = vsel %vm3792_vm4, %v8400_v17, %v8405_v23  ;;  %v3980_v12 = vrot.slane %v13075_v48, %v14438_v38 }
 0x533   : > { %v4530_v58 = vmax.f32 %v14649_v28, %v4444_v13  ;;  %v3300_v44 = vpop.permute.xlu1 %3299  ;;  %v14650_v33 = vmax.f32 %v12873_v52, 0.0  ;;  %v14651_v54 = vmax.f32 %v12881_v42, 0.0  ;;  %8443 = vrot.lane.b32.xlu0 %v8442_v50, %s8870_s22  ;;  %v3298_v41 = vpop.permute.xlu0 %3297  ;;  %v14652_v20 = vmax.f32 %v12884_v47, 0.0  ;;  %v8628_v50 = vld [vmem:[#allocation5 + $0x508] sm:$0xff]  }
 0x534   : > { %v3565_v34 = vmul.f32 %v3495_v37, %v3312_v31  ;;  %v3310_v25 = vsel %vm3307_vm3, %v3296_v9, %v3300_v44  ;;  %v4561_v14 = vpack.c.bf16 %v4529_v55, %v4497_v21  ;;  %v14653_v38 = vmax.f32 %v12899_v29, 0.0  ;;  %v8632_v21 = vld [vmem:[#allocation5 + $0x580] sm:$0xff]  }
 0x535   : > { %v4531_v13 = vmax.f32 %v14650_v33, %v4442_v63  ;;  %v4499_v28 = vmax.f32 %v14651_v54, %v4441_v35  ;;  %v4562_v7 = vpack.c.bf16 %v4530_v58, %v4498_v5  ;;  %v4500_v17 = vmax.f32 %v14652_v20, %v4439_v45  ;;  %v8627_v63 = vld [vmem:[#allocation5 + $0x548] sm:$0xff]  }
 0x536   : > { %v4532_v52 = vmax.f32 %v14653_v38, %v4440_v30  ;;  %v3503_v42 = vrot.slane %v13036_v19, %v14446_v11  ;;  %v14654_v35 = vld [vmem:[#allocation104_spill] sm:$0xff]  ;;  %v3313_v47 = vsel %vm3307_vm3, %v13273_v43, %v3298_v41  ;;  %v3566_v55 = vmul.f32 %v3499_v59, %v3310_v25  ;;  %v8629_v25 = vld [vmem:[#allocation5 + $0x550] sm:$0xff]  }
 0x537   : > { %6985 = vmatprep.mubr.bf16.mxu0 %v4562_v7  ;;  %v3308_v5 = vsel %vm3307_vm3, %v3300_v44, %v14654_v35  ;;  %v3785_v20 = vpop.permute.xlu1 %3784  ;;  %v3302_v31 = vpop.permute.xlu0 %3301  ;;  %v4563_v19 = vpack.c.bf16 %v4531_v13, %v4499_v28  ;;  %v3984_v7 = vrot.slane %v13075_v48, %v14454_v3  ;;  %v14655_v58 = vld [vmem:[#allocation108_spill] sm:$0xff]  ;;  %v3988_v43 = vrot.slane %v13075_v48, %v14446_v11  ;;  %v14656_v13 = vld [vmem:[#allocation106_spill] sm:$0xff]  ;;  %v14657_v28 = vld [vmem:[#allocation91_spill] sm:$0xff] }
 0x538   : > { %6986 = vmatmul.mubr.bf16.vlgmr.msra.gmra.mrb[112].mxu0 %v4561_v14  ;;  %v4564_v9 = vpack.c.bf16 %v4532_v52, %v4500_v17  ;;  %v3795_v29 = vsel %vm3792_vm4, %v13302_v57, %v3785_v20  ;;  %v3629_v30 = vadd.f32 %v3565_v34, %v14655_v58  ;;  %v3567_v14 = vmul.f32 %v3503_v42, %v3308_v5  ;;  %v8636_v54 = vld [vmem:[#allocation5 + $0x588] sm:$0xff]   ;;  %v14658_v48 = vld [vmem:[#allocation58_spill] sm:$0xff]  ;;  %v8631_v38 = vld [vmem:[#allocation5 + $0x510] sm:$0xff]  }
 0x539   : > { %7942 = vmatpush3.bf16.msra.mxu0 %v8626_v6  ;;  %v4050_v45 = vmul.f32 %v3980_v12, %v3795_v29  ;;  %v3597_v44 = vmul.f32 %v3495_v37, %v3313_v47  ;;  %v3311_v57 = vsel %vm3307_vm3, %v3298_v41, %v3302_v31  ;;  %v8634_v6 = vld [vmem:[#allocation5 + $0x5c8] sm:$0xff]   ;;  %v3309_v3 = vsel %vm3307_vm3, %v3302_v31, %v14656_v13  ;;  %v8638_v52 = vld [vmem:[#allocation5 + $0x5d0] sm:$0xff]  }
 0x53a   : > { %7026 = vmatprep.mubr.bf16.mxu1 %v4564_v9  ;;  %7943 = vmatprep.subr.bf16.mxu0 %v8627_v63  ;;  %v3630_v17 = vadd.f32 %v3566_v55, %v14657_v28  ;;  %v3598_v63 = vmul.f32 %v3499_v59, %v3311_v57  ;;  %v8633_v9 = vld [vmem:[#allocation5 + $0x558] sm:$0xff]   ;;  %v3599_v31 = vmul.f32 %v3503_v42, %v3309_v3  ;;  %v8640_v59 = vld [vmem:[#allocation5 + $0x590] sm:$0xff]  }
 0x53b   : > { %7027 = vmatmul.mubr.bf16.vlgmr.msra.gmra.mrb[112].mxu1 %v4563_v19  ;;  %v4114_v33 = vadd.f32 %v4050_v45, %v3629_v30  ;;  %v3789_v34 = vpop.permute.xlu1 %3788  ;;  %v3787_v41 = vpop.permute.xlu0 %3786  ;;  %v14661_v13 = vld [vmem:[#allocation37_spill] sm:$0xff] }
 0x53c   : > { %7964 = vmatpush3.bf16.msra.mxu1 %v8632_v21  ;;  %v3793_v11 = vsel %vm3792_vm4, %v3785_v20, %v3789_v34  ;;  %v3855_v37 = vsel %vm3792_vm4, %v3789_v34, %v14658_v48  ;;  %v3796_v47 = vsel %vm3792_vm4, %v13351_v62, %v3787_v41  ;;  %v14659_v21 = vld [vmem:[#allocation36_spill] sm:$0xff]  ;;  %v14660_v20 = vld [vmem:[#allocation110_spill] sm:$0xff] }
 0x53d   : > { %7944 = vmatpush3.bf16.msra.mxu0 %v8628_v50  ;;  %v4051_v35 = vmul.f32 %v3984_v7, %v3793_v11  ;;  %v4052_v5 = vmul.f32 %v3988_v43, %v3855_v37  ;;  %v3631_v55 = vadd.f32 %v3567_v14, %v14659_v21  ;;  %v3661_v29 = vadd.f32 %v3597_v44, %v14660_v20  ;;  %v8635_v62 = vld [vmem:[#allocation5 + $0x518] sm:$0xff]  }
 0x53e   : > { %7945 = vmatprep.subr.bf16.mxu0 %v8629_v25  ;;  %v4082_v19 = vmul.f32 %v3980_v12, %v3796_v47  ;;  %7965 = vmatprep.subr.bf16.mxu1 %v8634_v6  ;;  %v13473_v50 = vadd.f32 %v11620_v61, %v4114_v33  ;;  %v8642_v25 = vld [vmem:[#allocation5 + $0x5d8] sm:$0xff]   ;;  %v3662_v14 = vadd.f32 %v3598_v63, %v14661_v13  ;;  %v14662_v12 = vld [vmem:[#allocation57_spill] sm:$0xff]  ;;  %v8637_v6 = vld [vmem:[#allocation5 + $0x560] sm:$0xff]  }
 0x53f   : > { %v4115_v58 = vadd.f32 %v4051_v35, %v3630_v17  ;;  %v4116_v30 = vadd.f32 %v4052_v5, %v3631_v55  ;;  %v3791_v57 = vpop.permute.xlu0 %3790  ;;  %v14663_v33 = vld [vmem:[#allocation69_spill] sm:$0xff]  ;;  %v8644_v48 = vld [vmem:[#allocation5 + $0x598] sm:$0xff]   ;;  %v8639_v63 = vld [vmem:[#allocation5 + $0x520] sm:$0xff]  }
 0x540   : > { %7966 = vmatpush3.bf16.msra.mxu1 %v8636_v54  ;;  %v4146_v45 = vadd.f32 %v4082_v19, %v3661_v29  ;;  %v3794_v42 = vsel %vm3792_vm4, %v3787_v41, %v3791_v57  ;;  %v3856_v44 = vsel %vm3792_vm4, %v3791_v57, %v14662_v12  ;;  %v3663_v3 = vadd.f32 %v3599_v31, %v14663_v33  ;;  %v8648_v47 = vld [vmem:[#allocation5 + $0x5a0] sm:$0xff]   ;;  %v8650_v29 = vld [vmem:[#allocation5 + $0x5e8] sm:$0xff]   ;;  %v8649_v13 = vld [vmem:[#allocation5 + $0x578] sm:$0xff]  }
 0x541   : > { %7946 = vmatpush3.bf16.msra.mxu0 %v8631_v38  ;;  %7967 = vmatprep.subr.bf16.mxu1 %v8638_v52  ;;  %v4083_v54 = vmul.f32 %v3984_v7, %v3794_v42  ;;  %v4084_v28 = vmul.f32 %v3988_v43, %v3856_v44  ;;  %v4254_v17 = vmax.f32 %v13473_v50, 0.0  ;;  %v13487_v11 = vadd.f32 %v11620_v61, %v4115_v58  ;;  %v8641_v7 = vld [vmem:[#allocation5 + $0x568] sm:$0xff]   ;;  %v8646_v43 = vld [vmem:[#allocation5 + $0x5e0] sm:$0xff]   ;;  %v8645_v58 = vld [vmem:[#allocation5 + $0x570] sm:$0xff]  }
 0x542   : > { %7947 = vmatprep.subr.bf16.mxu0 %v8633_v9  ;;  %v13483_v34 = vadd.f32 %v11623_v10, %v4146_v45  ;;  %v13490_v37 = vadd.f32 %v11620_v61, %v4116_v30  ;;  %v8652_v30 = vld [vmem:[#allocation5 + $0x5a8] sm:$0xff]   ;;  %v14664_v12 = vunpack.i.h.bf16 %v13400_v40  ;;  %v8655_v33 = vld [vmem:[#allocation5 + $0x5f8] sm:$0xff]  }
 0x543   : > { %v4147_v38 = vadd.f32 %v4083_v54, %v3662_v14  ;;  %v4148_v52 = vadd.f32 %v4084_v28, %v3663_v3  ;;  %v4255_v9 = vmax.f32 %v13487_v11, 0.0  ;;  %v8654_v14 = vld [vmem:[#allocation5 + $0x5b0] sm:$0xff]   ;;  %v8651_v28 = vld [vmem:[#allocation5 + $0x538] sm:$0xff]  }
 0x544   : > { %7968 = vmatpush3.bf16.msra.mxu1 %v8640_v59  ;;  %v4286_v41 = vmax.f32 %v13483_v34, 0.0  ;;  %v4256_v21 = vmax.f32 %v13490_v37, 0.0 }
 0x545   : > { %7948 = vmatpush3.bf16.msra.mxu0 %v8635_v62  ;;  %7969 = vmatprep.subr.bf16.mxu1 %v8642_v25  ;;  %v13494_v35 = vadd.f32 %v11623_v10, %v4147_v38  ;;  %v13497_v5 = vadd.f32 %v11623_v10, %v4148_v52  ;;  %v8643_v10 = vld [vmem:[#allocation5 + $0x528] sm:$0xff]   ;;  %v8653_v62 = vld [vmem:[#allocation5 + $0x5f0] sm:$0xff]   ;;  %v14665_v38 = vmax.f32 %v12905_v0, 0.0  ;;  %v14668_v0 = vmax.f32 %v13103_v36, 0.0 }
 0x546   : > { %7949 = vmatprep.subr.bf16.mxu0 %v8637_v6  ;;  %v8447_v61 = vpack.i.bf16 %v4286_v41, %v4254_v17  ;;  %v8647_v25 = vld [vmem:[#allocation5 + $0x530] sm:$0xff]  }
 0x547   : > { %v4287_v55 = vmax.f32 %v13494_v35, 0.0  ;;  %v4288_v20 = vmax.f32 %v13497_v5, 0.0 }
 0x548   : > { %7970 = vmatpush3.bf16.msra.mxu1 %v8644_v48  ;;  %8448 = vrot.lane.b32.xlu1 %v8447_v61, %s8870_s22  ;;  %v8657_v48 = vld [vmem:[#allocation5 + $0x640] sm:$0xff]   ;;  %v8656_v61 = vld [vmem:[#allocation5 + $0x5b8] sm:$0xff]  }
 0x549   : > { %7950 = vmatpush3.bf16.msra.mxu0 %v8639_v63  ;;  %7971 = vmatprep.subr.bf16.mxu1 %v8646_v43  ;;  %v8457_v31 = vpack.i.bf16 %v4288_v20, %v4256_v21  ;;  %v8452_v19 = vpack.i.bf16 %v4287_v55, %v4255_v9  ;;  %v14666_v63 = vmax.f32 %v12914_v1, 0.0  ;;  %v8661_v1 = vld [vmem:[#allocation5 + $0x6c0] sm:$0xff]  }
 0x54a   : > { %7951 = vmatprep.subr.bf16.mxu0 %v8641_v7 }
 0x54b   : > { %8453 = vrot.lane.b32.xlu0 %v8452_v19, %s8870_s22 }
 0x54c   : > { %v8409_v59 = vpop.permute.xlu1 %8408  ;;  %7972 = vmatpush3.bf16.msra.mxu1 %v8648_v47  ;;  %8458 = vrot.lane.b32.xlu1 %v8457_v31, %s8870_s22  ;;  %s7389_s22 = sshll.u32 %s9051_s10, 4 }
 0x54d   : > { %v8411_v45 = vunpack.i.h.bf16 %v8409_v59  ;;  %v8410_v57 = vunpack.i.l.bf16 %v8409_v59  ;;  %7952 = vmatpush3.bf16.msra.mxu0 %v8643_v10  ;;  %7973 = vmatprep.subr.bf16.mxu1 %v8650_v29  ;;  %v14667_v29 = vmax.f32 %v13090_v8, 0.0  ;;  %v8658_v59 = vld [vmem:[#allocation5 + $0x600] sm:$0xff]   ;;  %v8659_v8 = vld [vmem:[#allocation5 + $0x648] sm:$0xff]   ;;  %s309_s17 = scalar_lea.vmem [#allocation7], %s7389_s22 }
 0x54e   : > { %7953 = vmatprep.subr.bf16.mxu0 %v8645_v58  ;;  %s7296_s21 = sshll.u32 %s309_s17, 4  ;;  %s13648_s21 = int_to_ptr.vmem [resolvable:$true] %s7296_s21 }
 0x54f   : > { %v4437_v42 = vsel %vm3792_vm4, %v8405_v23, %v8410_v57  ;;  %v4438_v44 = vsel %vm3792_vm4, %v14664_v12, %v8411_v45  ;;  %s8790_s29 = scalar_lea.vmem %s13648_s21, 256  ;;  %p8797_p10 = scmp.lt.s32.totalorder %s13648_s21, %s8795_s15 }
 0x550   : > { %7974 = vmatpush3.bf16.msra.mxu1 %v8652_v30  ;;  %v8414_v6 = vpop.permute.xlu0 %8413  ;;  %v4501_v52 = vmax.f32 %v14665_v38, %v4437_v42  ;;  %v4533_v23 = vmax.f32 %v14666_v63, %v4438_v44  ;;  %v14670_v42 = vmax.f32 %v13120_v51, 0.0  ;;  %v8662_v51 = vld [vmem:[#allocation5 + $0x650] sm:$0xff]   ;;  %v8663_v38 = vld [vmem:[#allocation5 + $0x680] sm:$0xff]   ;;  %p8791_p4 = scmp.ne.s32.totalorder %s13648_s21, %s8790_s29  ;;  %p8798_p13 = scmp.lt.s32.totalorder %s8796_s20, %s8790_s29 }
 0x551   : > { %7975 = vmatprep.subr.bf16.mxu1 %v8653_v62  ;;  %v8416_v3 = vunpack.i.h.bf16 %v8414_v6  ;;  %v8415_v54 = vunpack.i.l.bf16 %v8414_v6  ;;  %7954 = vmatpush3.bf16.msra.mxu0 %v8647_v25  ;;  %v8664_v63 = vld [vmem:[#allocation5 + $0x610] sm:$0xff]  }
 0x552   : > { %7955 = vmatprep.subr.bf16.mxu0 %v8649_v13  ;;  %v4565_v62 = vpack.c.bf16 %v4533_v23, %v4501_v52  ;;  %v14669_v13 = vmax.f32 %v13113_v22, 0.0  ;;  %v14672_v22 = vmax.f32 %v13139_v60, 0.0  ;;  %v8665_v23 = vld [vmem:[#allocation5 + $0x6c8] sm:$0xff]   ;;  %v8668_v60 = vld [vmem:[#allocation5 + $0x618] sm:$0xff]   ;;  %p8792_p6 = pnand %p8791_p4, %p9006_p12  ;;  %p8799_p3 = por %p8798_p13, %p8797_p10 }
 0x553   : > { %v4436_v40 = vsel %vm3792_vm4, %v8411_v45, %v8416_v3  ;;  %v4435_v7 = vsel %vm3792_vm4, %v8410_v57, %v8415_v54 }
 0x554   : > { %v8419_v43 = vpop.permute.xlu1 %8418  ;;  %7976 = vmatpush3.bf16.msra.mxu1 %v8654_v14  ;;  %v4502_v31 = vmax.f32 %v14667_v29, %v4435_v7  ;;  %v4534_v19 = vmax.f32 %v14668_v0, %v4436_v40  ;;  %v8666_v40 = vld [vmem:[#allocation5 + $0x658] sm:$0xff]   ;;  %p8793_p8 = pneg %p8792_p6 }
 0x555   : > { %v8421_v47 = vunpack.i.h.bf16 %v8419_v43  ;;  %v8420_v10 = vunpack.i.l.bf16 %v8419_v43  ;;  %7977 = vmatprep.subr.bf16.mxu1 %v8655_v33  ;;  %7956 = vmatpush3.bf16.msra.mxu0 %v8651_v28  ;;  %v8660_v33 = vld [vmem:[#allocation5 + $0x608] sm:$0xff]  }
 0x556   : > { %v4566_v58 = vpack.c.bf16 %v4534_v19, %v4502_v31  ;;  %7985 = vmatprep.subr.bf16.mxu0 %v8657_v48  ;;  %v8670_v31 = vld [vmem:[#allocation5 + $0x660] sm:$0xff]   ;;  %p8800_p7 = pnand %p8799_p3, %p8793_p8 }
 0x557   : > { %v4433_v30 = vsel %vm3792_vm4, %v8415_v54, %v8420_v10  ;;  %v4434_v45 = vsel %vm3792_vm4, %v8416_v3, %v8421_v47  ;;  %v14671_v3 = vmax.f32 %v13127_v26, 0.0  ;;  %v8667_v26 = vld [vmem:[#allocation5 + $0x688] sm:$0xff]  }
 0x558   : > { %v13542_v57 = vpop.permute.xlu0 %8423  ;;  %7978 = vmatpush3.bf16.msra.mxu1 %v8656_v61  ;;  %7067 = vmatprep.mubr.bf16.mxu0 %v4566_v58  ;;  %v4503_v14 = vmax.f32 %v14669_v13, %v4433_v30  ;;  %v4535_v12 = vmax.f32 %v14670_v42, %v4434_v45  ;;  %v8673_v30 = vld [vmem:[#allocation5 + $0x6d8] sm:$0xff]   ;;  %v8674_v45 = vld [vmem:[#allocation5 + $0x668] sm:$0xff]   ;;  %v8677_v13 = vld [vmem:[#allocation5 + $0x6e0] sm:$0xff]  }
 0x559   : > { %v8426_v36 = vunpack.i.h.bf16 %v13542_v57  ;;  %v8425_v25 = vunpack.i.l.bf16 %v13542_v57  ;;  %8007 = vmatprep.subr.bf16.mxu1 %v8661_v1  ;;  %7068 = vmatmul.mubr.bf16.vlgmr.msra.gmra.mrb[116].mxu0 %v4565_v62  ;;  %v8671_v1 = vld [vmem:[#allocation5 + $0x690] sm:$0xff]   ;;  %v8675_v62 = vld [vmem:[#allocation5 + $0x698] sm:$0xff]  }
 0x55a   : > { %7986 = vmatpush3.bf16.msra.mxu0 %v8658_v59  ;;  %v4567_v52 = vpack.c.bf16 %v4535_v12, %v4503_v14  ;;  %v8672_v59 = vld [vmem:[#allocation5 + $0x620] sm:$0xff]   ;;  %v8678_v14 = vld [vmem:[#allocation5 + $0x670] sm:$0xff]   ;;  %v8681_v12 = vld [vmem:[#allocation5 + $0x6e8] sm:$0xff]  }
 0x55b   : > { %v4432_v44 = vsel %vm3792_vm4, %v8421_v47, %v8426_v36  ;;  %v4431_v6 = vsel %vm3792_vm4, %v8420_v10, %v8425_v25  ;;  %7987 = vmatprep.subr.bf16.mxu0 %v8659_v8  ;;  %v8669_v10 = vld [vmem:[#allocation5 + $0x6d0] sm:$0xff]   ;;  %v8676_v8 = vld [vmem:[#allocation5 + $0x628] sm:$0xff]  }
 0x55c   : > { %v4504_v54 = vmax.f32 %v14671_v3, %v4431_v6  ;;  %v4536_v28 = vmax.f32 %v14672_v22, %v4432_v44  ;;  %v8682_v6 = vld [vmem:[#allocation5 + $0x678] sm:$0xff]   ;;  %v8683_v22 = vld [vmem:[#allocation5 + $0x6a8] sm:$0xff]  }
 0x55e   : > { %v4568_v48 = vpack.c.bf16 %v4536_v28, %v4504_v54  ;;  %7988 = vmatpush3.bf16.msra.mxu0 %v8660_v33 }
 0x55f   : > { %7989 = vmatprep.subr.bf16.mxu0 %v8662_v51  ;;  %v8684_v51 = vld [vmem:[#allocation5 + $0x638] sm:$0xff]  }
 0x560   : > { %7108 = vmatprep.mubr.bf16.mxu1 %v4568_v48  ;;  %v7737_v7 = vpop.f32.mrb[96].mxu0  ;;  %v8685_v48 = vld [vmem:[#allocation5 + $0x6f0] sm:$0xff]  }
 0x561   : > { %7109 = vmatmul.mubr.bf16.vlgmr.msra.gmra.mrb[116].mxu1 %v4567_v52  ;;  %v7738_v43 = vpop.f32.mrb[97].mxu0  ;;  %v8686_v52 = vld [vmem:[#allocation5 + $0x6b0] sm:$0xff]  }
 0x562   : > { %8008 = vmatpush3.bf16.msra.mxu1 %v8663_v38  ;;  %v7739_v61 = vadd.f32 %v7738_v43, %v7737_v7  ;;  %v7740_v47 = vpop.f32.mrb[98].mxu0  ;;  %7990 = vmatpush3.bf16.msra.mxu0 %v8664_v63  ;;  %v8687_v38 = vld [vmem:[#allocation5 + $0x740] sm:$0xff]   ;;  %v8689_v63 = vld [vmem:[#allocation5 + $0x6f8] sm:$0xff]  }
 0x563   : > { %8009 = vmatprep.subr.bf16.mxu1 %v8665_v23  ;;  %v7741_v29 = vpop.f32.mrb[99].mxu0  ;;  %7991 = vmatprep.subr.bf16.mxu0 %v8666_v40  ;;  %v8690_v23 = vld [vmem:[#allocation5 + $0x6b8] sm:$0xff]   ;;  %v8693_v40 = vld [vmem:[#allocation5 + $0x7c0] sm:$0xff]  }
 0x564   : > { %v6701_v0 = vadd.f32 %v13325_v15, %v7739_v61  ;;  %v7742_v19 = vadd.f32 %v7741_v29, %v7740_v47  ;;  %v8679_v15 = vld [vmem:[#allocation5 + $0x6a0] sm:$0xff]  }
 0x566   : > { %8010 = vmatpush3.bf16.msra.mxu1 %v8667_v26  ;;  %v6704_v58 = vadd.f32 %v13332_v27, %v7742_v19  ;;  %7992 = vmatpush3.bf16.msra.mxu0 %v8668_v60  ;;  %v8680_v27 = vld [vmem:[#allocation5 + $0x630] sm:$0xff]  }
 0x567   : > { %8011 = vmatprep.subr.bf16.mxu1 %v8669_v10  ;;  %7993 = vmatprep.subr.bf16.mxu0 %v8670_v31 }
 0x56a   : > { %8012 = vmatpush3.bf16.msra.mxu1 %v8671_v1  ;;  %7994 = vmatpush3.bf16.msra.mxu0 %v8672_v59 }
 0x56b   : > { %8013 = vmatprep.subr.bf16.mxu1 %v8673_v30  ;;  %7995 = vmatprep.subr.bf16.mxu0 %v8674_v45 }
 0x56d   : > { %v7803_v42 = vpop.f32.mrb[100].mxu1 }
 0x56e   : > { %8014 = vmatpush3.bf16.msra.mxu1 %v8675_v62  ;;  %7996 = vmatpush3.bf16.msra.mxu0 %v8676_v8  ;;  %v7804_v44 = vpop.f32.mrb[101].mxu1 }
 0x56f   : > { %8015 = vmatprep.subr.bf16.mxu1 %v8677_v13  ;;  %7997 = vmatprep.subr.bf16.mxu0 %v8678_v14  ;;  %v7805_v33 = vadd.f32 %v7804_v44, %v7803_v42  ;;  %v7806_v3 = vpop.f32.mrb[102].mxu1  ;;  %v14673_v44 = vmax.f32 %v13147_v2, 0.0 }
 0x570   : > { %v7807_v54 = vpop.f32.mrb[103].mxu1 }
 0x571   : > { %v7808_v28 = vadd.f32 %v7807_v54, %v7806_v3 }
 0x572   : > { %8016 = vmatpush3.bf16.msra.mxu1 %v8679_v15  ;;  %7998 = vmatpush3.bf16.msra.mxu0 %v8680_v27 }
 0x573   : > { %8017 = vmatprep.subr.bf16.mxu1 %v8681_v12  ;;  %7999 = vmatprep.subr.bf16.mxu0 %v8682_v6 }
 0x576   : > { %8018 = vmatpush3.bf16.msra.mxu1 %v8683_v22  ;;  %8000 = vmatpush3.bf16.msra.mxu0 %v8684_v51  ;;  %v14676_v51 = vmax.f32 %v13320_v18, 0.0 }
 0x577   : > { %8019 = vmatprep.subr.bf16.mxu1 %v8685_v48  ;;  %8029 = vmatprep.subr.bf16.mxu0 %v8687_v38 }
 0x57a   : > { %8020 = vmatpush3.bf16.msra.mxu1 %v8686_v52 }
 0x57b   : > { %8021 = vmatprep.subr.bf16.mxu1 %v8689_v63 }
 0x57e   : > { %8022 = vmatpush3.bf16.msra.mxu1 %v8690_v23 }
 0x57f   : > { %8051 = vmatprep.subr.bf16.mxu1 %v8693_v40 }
 0x580   : > { %v7781_v7 = vpop.f32.mrb[100].mxu0 }
 0x581   : > { %v7782_v43 = vpop.f32.mrb[101].mxu0 }
 0x582   : > { %v7783_v26 = vadd.f32 %v7782_v43, %v7781_v7  ;;  %v7784_v61 = vpop.f32.mrb[102].mxu0  ;;  %v8688_v7 = vld [vmem:[#allocation5 + $0x700] sm:$0xff]  }
 0x583   : > { %v7785_v47 = vpop.f32.mrb[103].mxu0 }
 0x584   : > { %v6742_v60 = vadd.f32 %v7783_v26, %v6701_v0  ;;  %v7786_v10 = vadd.f32 %v7785_v47, %v7784_v61  ;;  %v8691_v47 = vld [vmem:[#allocation5 + $0x748] sm:$0xff]  }
 0x586   : > { %v6745_v29 = vadd.f32 %v7786_v10, %v6704_v58  ;;  %v6783_v31 = vadd.f32 %v7805_v33, %v6742_v60  ;;  %v14674_v33 = vmax.f32 %v13158_v32, 0.0 }
 0x588   : > { %v6786_v19 = vadd.f32 %v7808_v28, %v6745_v29  ;;  %v14675_v28 = vmax.f32 %v13300_v16, 0.0 }
 0x596   : > { %v7847_v1 = vpop.f32.mrb[104].mxu1 }
 0x597   : > { %v7848_v59 = vpop.f32.mrb[105].mxu1 }
 0x598   : > { %v7849_v30 = vadd.f32 %v7848_v59, %v7847_v1  ;;  %v7850_v45 = vpop.f32.mrb[106].mxu1  ;;  %v8692_v59 = vld [vmem:[#allocation5 + $0x708] sm:$0xff]  }
 0x599   : > { %v7851_v62 = vpop.f32.mrb[107].mxu1  ;;  %v8429_v8 = vpop.permute.xlu1 %8428 }
 0x59a   : > { %v7852_v13 = vadd.f32 %v7851_v62, %v7850_v45  ;;  %v8431_v14 = vunpack.i.h.bf16 %v8429_v8  ;;  %v8430_v15 = vunpack.i.l.bf16 %v8429_v8  ;;  %v8694_v45 = vld [vmem:[#allocation5 + $0x750] sm:$0xff]   ;;  %v14677_v8 = vmax.f32 %v13323_v4, 0.0  ;;  %v8695_v4 = vld [vmem:[#allocation5 + $0x780] sm:$0xff]  }
 0x59c   : > { %v4429_v42 = vsel %vm3792_vm4, %v8425_v25, %v8430_v15  ;;  %v4430_v0 = vsel %vm3792_vm4, %v8426_v36, %v8431_v14 }
 0x59d   : > { %v8434_v58 = vpop.permute.xlu0 %8433  ;;  %v4505_v6 = vmax.f32 %v14673_v44, %v4429_v42  ;;  %v4537_v3 = vmax.f32 %v14674_v33, %v4430_v0  ;;  %v14679_v0 = vmax.f32 %v13347_v49, 0.0  ;;  %v8697_v33 = vld [vmem:[#allocation5 + $0x7c8] sm:$0xff]   ;;  %v8702_v49 = vld [vmem:[#allocation5 + $0x760] sm:$0xff]  }
 0x59e   : > { %v8436_v27 = vunpack.i.h.bf16 %v8434_v58  ;;  %v8435_v12 = vunpack.i.l.bf16 %v8434_v58 }
 0x59f   : > { %v4569_v61 = vpack.c.bf16 %v4537_v3, %v4505_v6  ;;  %v8698_v6 = vld [vmem:[#allocation5 + $0x758] sm:$0xff]  }
 0x5a0   : > { %v4428_v54 = vsel %vm3792_vm4, %v8431_v14, %v8436_v27  ;;  %v4427_v25 = vsel %vm3792_vm4, %v8430_v15, %v8435_v12  ;;  %v7825_v22 = vpop.f32.mrb[104].mxu0  ;;  %v8700_v3 = vld [vmem:[#allocation5 + $0x718] sm:$0xff]  }
 0x5a1   : > { %v7826_v57 = vpop.f32.mrb[105].mxu0  ;;  %v4506_v36 = vmax.f32 %v14675_v28, %v4427_v25  ;;  %v4538_v48 = vmax.f32 %v14676_v51, %v4428_v54  ;;  %v8699_v54 = vld [vmem:[#allocation5 + $0x788] sm:$0xff]   ;;  %v8701_v25 = vld [vmem:[#allocation5 + $0x7d0] sm:$0xff]   ;;  %v8705_v28 = vld [vmem:[#allocation5 + $0x7d8] sm:$0xff]  }
 0x5a2   : > { %v7827_v38 = vadd.f32 %v7826_v57, %v7825_v22  ;;  %v8439_v2 = vpop.permute.xlu1 %8438  ;;  %v7828_v52 = vpop.f32.mrb[106].mxu0  ;;  %v8703_v22 = vld [vmem:[#allocation5 + $0x790] sm:$0xff]   ;;  %v8706_v57 = vld [vmem:[#allocation5 + $0x768] sm:$0xff]   ;;  %v8707_v51 = vld [vmem:[#allocation5 + $0x798] sm:$0xff]  }
 0x5a3   : > { %v8441_v63 = vunpack.i.h.bf16 %v8439_v2  ;;  %v8440_v32 = vunpack.i.l.bf16 %v8439_v2  ;;  %v7829_v23 = vpop.f32.mrb[107].mxu0  ;;  %v4570_v40 = vpack.c.bf16 %v4538_v48, %v4506_v36  ;;  %v8708_v36 = vld [vmem:[#allocation5 + $0x728] sm:$0xff]   ;;  %v8710_v48 = vld [vmem:[#allocation5 + $0x770] sm:$0xff]  }
 0x5a4   : > { %v6824_v43 = vadd.f32 %v7827_v38, %v6783_v31  ;;  %v7830_v26 = vadd.f32 %v7829_v23, %v7828_v52  ;;  %v8709_v38 = vld [vmem:[#allocation5 + $0x7e0] sm:$0xff]  }
 0x5a5   : > { %7149 = vmatprep.mubr.bf16.mxu0 %v4570_v40  ;;  %v4425_v16 = vsel %vm3792_vm4, %v8435_v12, %v8440_v32  ;;  %v4426_v18 = vsel %vm3792_vm4, %v8436_v27, %v8441_v63  ;;  %v13588_v10 = vpop.permute.xlu0 %8443  ;;  %v14680_v27 = vmax.f32 %v13362_v56, 0.0  ;;  %v8704_v56 = vld [vmem:[#allocation5 + $0x720] sm:$0xff]   ;;  %v8714_v40 = vld [vmem:[#allocation5 + $0x778] sm:$0xff]  }
 0x5a6   : > { %v6827_v60 = vadd.f32 %v7830_v26, %v6786_v19  ;;  %7150 = vmatmul.mubr.bf16.vlgmr.msra.gmra.mrb[120].mxu0 %v4569_v61  ;;  %v13590_v29 = vadd.f32 %v7849_v30, %v6824_v43  ;;  %v8446_v1 = vunpack.i.h.bf16 %v13588_v10  ;;  %v8445_v31 = vunpack.i.l.bf16 %v13588_v10  ;;  %v8711_v23 = vld [vmem:[#allocation5 + $0x7a0] sm:$0xff]  }
 0x5a7   : > { %8030 = vmatpush3.bf16.msra.mxu0 %v8688_v7  ;;  %v4507_v14 = vmax.f32 %v14677_v8, %v4425_v16  ;;  %v14678_v19 = vmax.f32 %v13336_v53, 0.0  ;;  %v8713_v7 = vld [vmem:[#allocation5 + $0x7e8] sm:$0xff]  }
 0x5a8   : > { %8031 = vmatprep.subr.bf16.mxu0 %v8691_v47  ;;  %v13594_v62 = vadd.f32 %v7852_v13, %v6827_v60  ;;  %v4424_v30 = vsel %vm3792_vm4, %v8441_v63, %v8446_v1  ;;  %v4423_v42 = vsel %vm3792_vm4, %v8440_v32, %v8445_v31  ;;  %v8696_v13 = vld [vmem:[#allocation5 + $0x710] sm:$0xff]   ;;  %v8715_v8 = vld [vmem:[#allocation5 + $0x7a8] sm:$0xff]  }
 0x5a9   : > { %v4539_v15 = vmax.f32 %v14678_v19, %v4426_v18  ;;  %v4508_v58 = vmax.f32 %v14679_v0, %v4423_v42  ;;  %v4540_v12 = vmax.f32 %v14680_v27, %v4424_v30  ;;  %v8712_v32 = vld [vmem:[#allocation5 + $0x730] sm:$0xff]  }
 0x5aa   : > { %v8717_v0 = vld [vmem:[#allocation5 + $0x7f0] sm:$0xff]  }
 0x5ab   : > { %8032 = vmatpush3.bf16.msra.mxu0 %v8692_v59  ;;  %v4572_v44 = vpack.c.bf16 %v4540_v12, %v4508_v58  ;;  %v4571_v53 = vpack.c.bf16 %v4539_v15, %v4507_v14  ;;  %v8716_v59 = vld [vmem:[#allocation5 + $0x738] sm:$0xff]   ;;  %v14681_v14 = vld [vmem:[#allocation40_spill] sm:$0xff]  ;;  %v14684_v58 = vmax.f32 %v13366_v46, 0.0  ;;  %v14685_v12 = vmax.f32 %v13379_v24, 0.0 }
 0x5ac   : > { %8033 = vmatprep.subr.bf16.mxu0 %v8694_v45  ;;  %v14682_v19 = vunpack.i.h.bf16 %v14681_v14  ;;  %v14683_v15 = vunpack.i.l.bf16 %v14681_v14 }
 0x5ad   : > { %7190 = vmatprep.mubr.bf16.mxu1 %v4572_v44 }
 0x5ae   : > { %7191 = vmatmul.mubr.bf16.vlgmr.msra.gmra.mrb[120].mxu1 %v4571_v53 }
 0x5af   : > { %8034 = vmatpush3.bf16.msra.mxu0 %v8696_v13  ;;  %8052 = vmatpush3.bf16.msra.mxu1 %v8695_v4 }
 0x5b0   : > { %8035 = vmatprep.subr.bf16.mxu0 %v8698_v6  ;;  %8053 = vmatprep.subr.bf16.mxu1 %v8697_v33 }
 0x5b3   : > { %8036 = vmatpush3.bf16.msra.mxu0 %v8700_v3  ;;  %8054 = vmatpush3.bf16.msra.mxu1 %v8699_v54 }
 0x5b4   : > { %8037 = vmatprep.subr.bf16.mxu0 %v8702_v49  ;;  %8055 = vmatprep.subr.bf16.mxu1 %v8701_v25 }
 0x5b7   : > { %8038 = vmatpush3.bf16.msra.mxu0 %v8704_v56  ;;  %8056 = vmatpush3.bf16.msra.mxu1 %v8703_v22  ;;  %v8718_v56 = vld [vmem:[#allocation5 + $0x7b0] sm:$0xff]  }
 0x5b8   : > { %8039 = vmatprep.subr.bf16.mxu0 %v8706_v57  ;;  %8057 = vmatprep.subr.bf16.mxu1 %v8705_v28  ;;  %v8719_v57 = vld [vmem:[#allocation5 + $0x7f8] sm:$0xff]  }
 0x5ba   : > { %v8449_v2 = vpop.permute.xlu1 %8448 }
 0x5bb   : > { %v8451_v52 = vunpack.i.h.bf16 %v8449_v2  ;;  %v8450_v63 = vunpack.i.l.bf16 %v8449_v2  ;;  %8040 = vmatpush3.bf16.msra.mxu0 %v8708_v36  ;;  %8058 = vmatpush3.bf16.msra.mxu1 %v8707_v51 }
 0x5bc   : > { %8041 = vmatprep.subr.bf16.mxu0 %v8710_v48  ;;  %8059 = vmatprep.subr.bf16.mxu1 %v8709_v38 }
 0x5bd   : > { %v4421_v43 = vsel %vm3792_vm4, %v8445_v31, %v8450_v63  ;;  %v4422_v26 = vsel %vm3792_vm4, %v8446_v1, %v8451_v52  ;;  %v8454_v47 = vpop.permute.xlu0 %8453 }
 0x5be   : > { %v8459_v61 = vpop.permute.xlu1 %8458  ;;  %v8456_v60 = vunpack.i.h.bf16 %v8454_v47  ;;  %v8455_v10 = vunpack.i.l.bf16 %v8454_v47  ;;  %v4509_v27 = vmax.f32 %v14684_v58, %v4421_v43  ;;  %v4541_v13 = vmax.f32 %v14685_v12, %v4422_v26 }
 0x5bf   : > { %v8461_v16 = vunpack.i.h.bf16 %v8459_v61  ;;  %v8460_v18 = vunpack.i.l.bf16 %v8459_v61  ;;  %8042 = vmatpush3.bf16.msra.mxu0 %v8712_v32  ;;  %8060 = vmatpush3.bf16.msra.mxu1 %v8711_v23 }
 0x5c0   : > { %v7869_v45 = vpop.f32.mrb[108].mxu0  ;;  %8043 = vmatprep.subr.bf16.mxu0 %v8714_v40  ;;  %v4420_v30 = vsel %vm3792_vm4, %v8451_v52, %v8456_v60  ;;  %8061 = vmatprep.subr.bf16.mxu1 %v8713_v7  ;;  %v4419_v44 = vsel %vm3792_vm4, %v8450_v63, %v8455_v10 }
 0x5c1   : > { %v4480_v31 = vsel %vm3792_vm4, %v8461_v16, %v14682_v19  ;;  %v4479_v1 = vsel %vm3792_vm4, %v8460_v18, %v14683_v15  ;;  %v7870_v42 = vpop.f32.mrb[109].mxu0  ;;  %v4510_v33 = vmax.f32 %v4254_v17, %v4419_v44  ;;  %v4542_v3 = vmax.f32 %v4286_v41, %v4420_v30  ;;  %v8720_v41 = vld [vmem:[#allocation5 + $0x7b8] sm:$0xff]  }
 0x5c2   : > { %v7871_v4 = vadd.f32 %v7870_v42, %v7869_v45  ;;  %v7872_v6 = vpop.f32.mrb[110].mxu0  ;;  %v4512_v46 = vmax.f32 %v4256_v21, %v4479_v1  ;;  %v4544_v49 = vmax.f32 %v4288_v20, %v4480_v31  ;;  %v4573_v17 = vpack.c.bf16 %v4541_v13, %v4509_v27 }
 0x5c3   : > { %v7873_v53 = vpop.f32.mrb[111].mxu0  ;;  %8044 = vmatpush3.bf16.msra.mxu0 %v8716_v59  ;;  %8062 = vmatpush3.bf16.msra.mxu1 %v8715_v8  ;;  %v4574_v25 = vpack.c.bf16 %v4542_v3, %v4510_v33  ;;  %v4418_v34 = vsel %vm3792_vm4, %v8456_v60, %v8461_v16  ;;  %v4417_v37 = vsel %vm3792_vm4, %v8455_v10, %v8460_v18 }
 0x5c4   : > { %v6906_v54 = vadd.f32 %v7871_v4, %v13590_v29  ;;  %v7874_v24 = vadd.f32 %v7873_v53, %v7872_v6  ;;  %8063 = vmatprep.subr.bf16.mxu1 %v8717_v0  ;;  %v4576_v50 = vpack.c.bf16 %v4544_v49, %v4512_v46  ;;  %v4543_v5 = vmax.f32 %v4287_v55, %v4418_v34 }
 0x5c5   : > { %7231 = vmatprep.mubr.bf16.mxu0 %v4574_v25  ;;  %v4511_v21 = vmax.f32 %v4255_v9, %v4417_v37 }
 0x5c6   : > { %v6909_v22 = vadd.f32 %v7874_v24, %v13594_v62  ;;  %7272 = vmatprep.mubr.bf16.mxu1 %v4576_v50  ;;  %7232 = vmatmul.mubr.bf16.vlgmr.msra.gmra.mrb[124].mxu0 %v4573_v17 }
 0x5c7   : > { %8064 = vmatpush3.bf16.msra.mxu1 %v8718_v56  ;;  %v4575_v20 = vpack.c.bf16 %v4543_v5, %v4511_v21 }
 0x5c8   : > { %8065 = vmatprep.subr.bf16.mxu1 %v8719_v57 }
 0x5cb   : > { %8066 = vmatpush3.bf16.msra.mxu1 %v8720_v41 }
 0x5ce   : > { %7273 = vmatmul.mubr.bf16.vlgmr.msra.gmra.mrb[124].mxu1 %v4575_v20 }
 0x5e3   : > { %v7891_v29 = vpop.f32.mrb[108].mxu1 }
 0x5e4   : > { %v7892_v62 = vpop.f32.mrb[109].mxu1 }
 0x5e5   : > { %v7893_v28 = vadd.f32 %v7892_v62, %v7891_v29  ;;  %v7894_v39 = vpop.f32.mrb[110].mxu1 }
 0x5e6   : > { %v7895_v36 = vpop.f32.mrb[111].mxu1 }
 0x5e7   : > { %v6947_v51 = vadd.f32 %v7893_v28, %v6906_v54  ;;  %v7896_v48 = vadd.f32 %v7895_v36, %v7894_v39 }
 0x5e9   : > { %v6950_v38 = vadd.f32 %v7896_v48, %v6909_v22 }
 0x60b   : > { %v7913_v2 = vpop.f32.mrb[112].mxu0 }
 0x60c   : > { %v7914_v52 = vpop.f32.mrb[113].mxu0 }
 0x60d   : > { %v7915_v63 = vadd.f32 %v7914_v52, %v7913_v2  ;;  %v7916_v35 = vpop.f32.mrb[114].mxu0 }
 0x60e   : > { %v7917_v55 = vpop.f32.mrb[115].mxu0  ;;  %v7935_v32 = vpop.f32.mrb[112].mxu1 }
 0x60f   : > { %v6988_v11 = vadd.f32 %v7915_v63, %v6947_v51  ;;  %v7918_v9 = vadd.f32 %v7917_v55, %v7916_v35  ;;  %v7936_v23 = vpop.f32.mrb[113].mxu1 }
 0x610   : > { %v7937_v40 = vadd.f32 %v7936_v23, %v7935_v32  ;;  %v7938_v7 = vpop.f32.mrb[114].mxu1 }
 0x611   : > { %v6991_v43 = vadd.f32 %v7918_v9, %v6950_v38  ;;  %v7939_v26 = vpop.f32.mrb[115].mxu1 }
 0x612   : > { %v7029_v61 = vadd.f32 %v7937_v40, %v6988_v11  ;;  %v7940_v47 = vadd.f32 %v7939_v26, %v7938_v7 }
 0x614   : > { %v7032_v16 = vadd.f32 %v7940_v47, %v6991_v43 }
 0x62c   : > { %v7957_v18 = vpop.f32.mrb[116].mxu0 }
 0x62d   : > { %v7958_v60 = vpop.f32.mrb[117].mxu0 }
 0x62e   : > { %v7959_v10 = vadd.f32 %v7958_v60, %v7957_v18  ;;  %v7960_v59 = vpop.f32.mrb[118].mxu0 }
 0x62f   : > { %v7961_v45 = vpop.f32.mrb[119].mxu0 }
 0x630   : > { %v7070_v8 = vadd.f32 %v7959_v10, %v7029_v61  ;;  %v7962_v14 = vadd.f32 %v7961_v45, %v7960_v59 }
 0x632   : > { %v7073_v19 = vadd.f32 %v7962_v14, %v7032_v16 }
 0x634   : > { %v7979_v31 = vpop.f32.mrb[116].mxu1 }
 0x635   : > { %v7980_v15 = vpop.f32.mrb[117].mxu1 }
 0x636   : > { %v7981_v1 = vadd.f32 %v7980_v15, %v7979_v31  ;;  %v7982_v30 = vpop.f32.mrb[118].mxu1 }
 0x637   : > { %v7983_v42 = vpop.f32.mrb[119].mxu1 }
 0x638   : > { %v7111_v0 = vadd.f32 %v7981_v1, %v7070_v8  ;;  %v7984_v58 = vadd.f32 %v7983_v42, %v7982_v30 }
 0x63a   : > { %v7114_v27 = vadd.f32 %v7984_v58, %v7073_v19 }
 0x679   : > { %v8001_v12 = vpop.f32.mrb[120].mxu0 }
 0x67a   : > { %v8002_v13 = vpop.f32.mrb[121].mxu0 }
 0x67b   : > { %v8003_v44 = vadd.f32 %v8002_v13, %v8001_v12  ;;  %v8004_v4 = vpop.f32.mrb[122].mxu0 }
 0x67c   : > { %v8005_v6 = vpop.f32.mrb[123].mxu0 }
 0x67d   : > { %v7152_v53 = vadd.f32 %v8003_v44, %v7111_v0  ;;  %v8006_v33 = vadd.f32 %v8005_v6, %v8004_v4 }
 0x67f   : > { %v7155_v3 = vadd.f32 %v8006_v33, %v7114_v27 }
 0x681   : > { %v8023_v46 = vpop.f32.mrb[120].mxu1 }
 0x682   : > { %v8024_v54 = vpop.f32.mrb[121].mxu1 }
 0x683   : > { %v8025_v24 = vadd.f32 %v8024_v54, %v8023_v46  ;;  %v8026_v49 = vpop.f32.mrb[122].mxu1 }
 0x684   : > { %v8027_v25 = vpop.f32.mrb[123].mxu1 }
 0x685   : > { %v7193_v56 = vadd.f32 %v8025_v24, %v7152_v53  ;;  %v8028_v22 = vadd.f32 %v8027_v25, %v8026_v49 }
 0x687   : > { %v7196_v50 = vadd.f32 %v8028_v22, %v7155_v3 }
 0x699   : > { %v8045_v17 = vpop.f32.mrb[124].mxu0 }
 0x69a   : > { %v8046_v57 = vpop.f32.mrb[125].mxu0 }
 0x69b   : > { %v8047_v34 = vadd.f32 %v8046_v57, %v8045_v17  ;;  %v8048_v37 = vpop.f32.mrb[126].mxu0 }
 0x69c   : > { %v8049_v41 = vpop.f32.mrb[127].mxu0 }
 0x69d   : > { %v7234_v5 = vadd.f32 %v8047_v34, %v7193_v56  ;;  %v8050_v21 = vadd.f32 %v8049_v41, %v8048_v37 }
 0x69f   : > { %v7237_v20 = vadd.f32 %v8050_v21, %v7196_v50 }
 0x6a1   : > { %v8067_v29 = vpop.f32.mrb[124].mxu1 }
 0x6a2   : > { %v8068_v62 = vpop.f32.mrb[125].mxu1 }
 0x6a3   : > { %v8069_v28 = vadd.f32 %v8068_v62, %v8067_v29  ;;  %v8070_v39 = vpop.f32.mrb[126].mxu1 }
 0x6a4   : > { %v8071_v36 = vpop.f32.mrb[127].mxu1 }
 0x6a5   : > { %v7275_v51 = vadd.f32 %v8069_v28, %v7234_v5  ;;  %v8072_v48 = vadd.f32 %v8071_v36, %v8070_v39 }
 0x6a7   : > { %7281 = vst [vmem:[%s309_s17] sm:$0xff] %v7275_v51  ;;  %v7278_v38 = vadd.f32 %v8072_v48, %v7237_v20 }
 0x6a9   : > { %7282 = vst [vmem:[%s309_s17 + $0x8] sm:$0xff] %v7278_v38 }
 0x6aa   : > { %8803 = shalt.err (!%p8800_p7)
}
 0x6ab   : > { %s8804_s11 = scalar_lea.hbm %s13653_s9, 256  ;;  %s8808_s17 = scalar_lea.hbm %s13704_s7, 512 }
 0x6ac   : > { %p8805_p9 = scmp.ne.s32.totalorder %s13653_s9, %s8804_s11  ;;  %p8809_p0 = scmp.lt.u32.totalorder %s13653_s9, %s13704_s7 }
 0x6ad   : > { %p8810_p11 = scmp.lt.u32.totalorder %s8808_s17, %s8804_s11  ;;  %p8812_p4 = scmp.lt.u32.totalorder %s8804_s11, %s13653_s9 }
 0x6ae   : > { %p8806_p2 = pnand %p8805_p9, %p9006_p12 }
 0x6af   : > { %p8811_p1 = por %p8810_p11, %p8809_p0 }
 0x6b0   : > { %p8807_p5 = pneg %p8806_p2 }
 0x6b1   : > { %p8813_p6 = por %p8812_p4, %p8811_p1 }
 0x6b3   : > { %p8814_p8 = pnand %p8813_p6, %p8807_p5 }
 0x6b5   : > { %8817 = shalt.err (!%p8814_p8)
}
 0x6b6   : > { %s8872_s16 = smov 128   ;;  %s8873_s29 = smov 256  }
 0x6b7   : > { %s8874_s28 = smov 8  }
 0x6b8   : > { %8079 = dma.vmem_to_hbm [thread:$0]  (%p9006_p12), %s13648_s21, 256, %s13653_s9, %s7284_s14, %s8872_s16, %s8873_s29, %s8874_s28  }
 0x6b9 PF: > { %s7311_s15 = sand.u32 1, %s8848_s24   ;;  %p14686_p10 = scmp.ne.s32.totalorder %s14015_s8, 0 }
 0x6ba   : > { %p14687_p13 = scmp.ge.s32.totalorder %s8860_s27, 2  ;;  %s7312_s20 = scalar_lea.sflag [#allocation4], %s7311_s15 }
 0x6bc   : > { %p8090_p3 = pnand %p14687_p13, %p14686_p10 }
 0x6be   : > { %8843 = dma.done.wait (!%p8090_p3), %s7312_s20, 256  }
 0x6bf   : > { %8845 = vsyncadd (!%p8090_p3), %s7312_s20, 4294967040  ;;  %p21_p7 = scmp.ge.s32.totalorder %s8971_s13, 4   ;;  %s14688_s24 = smov %s8852_s25 }
 0x6c0   : > { %s14689_s25 = smov %s8856_s26  ;;  %s14690_s26 = smov %s9002_s18 }
 0x6c1   : > { %s14691_s27 = smov %s8971_s13  ;;  %23 = sbr.rel (!%p21_p7) target bundleno = 6 (0x6), region = 114 }
 0x6c8   :  { %7317 = vsyncpa [#allocation3], 1 }
 0x6c9   :  { %7319 = vsyncpa [#allocation3 + $0x1], 1 }
 0x6ca   :  { %7320 = vsyncpa [#allocation6], 1 }
 0x6cb   :  { %7321 = vsyncpa [#allocation4], 1 }
 0x6cc   :  { %7323 = vsyncpa [#allocation4 + $0x1], 1 }

</bundles_post_ra>
